<compile_context>
chip_gen: v5e
topology: v5e:2x2
jax: 0.10.0
libtpu: 0.0.40
codegen_flags: <defaults>
</compile_context>

<pallas_src>
import functools
import math

import numpy as np
import jax
import jax.numpy as jnp
from jax.experimental import pallas as pl
from jax.experimental.pallas import tpu as pltpu


CPAD = 128   # lane-dense padded channel count used for every layer
K = 3        # conv kernel size (3x3 everywhere in this model)


def _round_up(x, m):
    return ((x + m - 1) // m) * m


# ----------------------------------------------------------------------------
# Constant 0/1 gather / scatter matrices (numpy, built at trace time).
# Zero rows/columns implement zero padding, stride holes and row padding.
# ----------------------------------------------------------------------------
def _conv_gather(hin, win, hout, wout, stride, pad, min_pad, mout_pad):
    """(9*mout_pad, min_pad): row t*mout_pad + o selects the input row feeding
    output position o at tap t (Conv2d, cross-correlation)."""
    g = np.zeros((K * K * mout_pad, min_pad), np.float32)
    for dy in range(K):
        for dx in range(K):
            t = dy * K + dx
            for ho in range(hout):
                for wo in range(wout):
                    hi = ho * stride + dy - pad
                    wi = wo * stride + dx - pad
                    if 0 <= hi < hin and 0 <= wi < win:
                        g[t * mout_pad + ho * wout + wo, hi * win + wi] = 1.0
    return g


def _convT_scatter(hin, win, hout, wout, stride, pad, min_pad, mout_pad):
    """(mout_pad, 9*min_pad): column t*min_pad + i scatters the tap-t
    channel-mixed input row i to output row o (PyTorch ConvTranspose2d:
    out[ho,wo] += in[(ho+p-dy)/s,(wo+p-dx)/s] * w[:,:,dy,dx] when exact)."""
    g = np.zeros((mout_pad, K * K * min_pad), np.float32)
    for dy in range(K):
        for dx in range(K):
            t = dy * K + dx
            for ho in range(hout):
                for wo in range(wout):
                    a = ho + pad - dy
                    b = wo + pad - dx
                    if a % stride or b % stride:
                        continue
                    hi, wi = a // stride, b // stride
                    if 0 <= hi < hin and 0 <= wi < win:
                        g[ho * wout + wo, t * min_pad + hi * win + wi] = 1.0
    return g


# ----------------------------------------------------------------------------
# Fused Pallas kernel: all 6 layers, activations resident in VMEM.
# refs = (x_ref, w0_ref, b0_ref, [g_ref, w_ref, b_ref] * 5, o_ref)
# Batch is folded into the row (M) dimension everywhere; gather/scatter
# matmuls run per-image via static slices (n is tiny).
# ----------------------------------------------------------------------------
def _fused_autoencoder_kernel(*refs, n, m_pads, kinds, acts):
    x_ref, o_ref = refs[0], refs[-1]
    prm = refs[1:-1]

    # ---- layer 0: im2col was done in XLA -> one matmul ----------------------
    acc = jnp.dot(x_ref[...], prm[0][...], preferred_element_type=jnp.float32)
    a = jnp.maximum(acc + prm[1][...], 0.0).astype(jnp.bfloat16)   # (n*m1, 128)

    idx = 2
    for l in range(1, 6):
        g_ref, w_ref, b_ref = prm[idx], prm[idx + 1], prm[idx + 2]
        idx += 3
        min_p, mout_p = m_pads[l], m_pads[l + 1]

        if kinds[l] == "conv":
            # Gather-first (spatial downsample): per image, gather the 9 taps'
            # input rows (exact 0/1 selection -> bf16 exact), concatenate the
            # taps along lanes, then ONE deep K=9*128 channel-mix matmul over
            # the whole batch-stacked block.
            g = g_ref[...]                                        # (9*mout, min)
            pc = []
            for bi in range(n):
                a_b = a[bi * min_p:(bi + 1) * min_p, :]           # (min, 128)
                p = jnp.dot(g, a_b,
                            preferred_element_type=jnp.float32).astype(jnp.bfloat16)
                pc.append(jnp.concatenate(
                    [p[t * mout_p:(t + 1) * mout_p, :] for t in range(K * K)],
                    axis=1))                                      # (mout, 9*128)
            p_all = jnp.concatenate(pc, axis=0)                   # (n*mout, 9*128)
            acc = jnp.dot(p_all, w_ref[...],
                          preferred_element_type=jnp.float32)     # (n*mout, 128)
        else:
            # Mix-first (ConvT, spatial upsample): channel-mix on the SMALL
            # pre-upsample row count for the whole batch, then one deep
            # K=9*min scatter matmul per image.
            q = jnp.dot(a, w_ref[...],
                        preferred_element_type=jnp.float32)       # (n*min, 9*128)
            q = q.astype(jnp.bfloat16)
            g = g_ref[...]                                        # (mout, 9*min)
            outs = []
            for bi in range(n):
                q_b = q[bi * min_p:(bi + 1) * min_p, :]
                q_v = jnp.concatenate(
                    [q_b[:, t * CPAD:(t + 1) * CPAD] for t in range(K * K)],
                    axis=0)                                       # (9*min, 128)
                outs.append(jnp.dot(g, q_v,
                                    preferred_element_type=jnp.float32))
            acc = jnp.concatenate(outs, axis=0)                   # (n*mout, 128)

        acc = acc + b_ref[...]                                    # (1,128) f32
        if acts[l] == "relu":
            a = jnp.maximum(acc, 0.0).astype(jnp.bfloat16)
        else:                                                     # final sigmoid
            a = jax.nn.sigmoid(acc)                               # stays f32

    o_ref[...] = a.astype(o_ref.dtype)


# ----------------------------------------------------------------------------
# Parameters (deterministic, PyTorch-shaped, kaiming-uniform-style bounds)
# ----------------------------------------------------------------------------
def init_params(key):
    params = {}

    def uniform(key, shape, fan_in):
        bound = 1.0 / math.sqrt(fan_in)
        return jax.random.uniform(
            key, shape, dtype=jnp.float32, minval=-bound, maxval=bound)

    enc_defs = [(3, 16), (16, 32), (32, 64)]
    for i, (cin, cout) in enumerate(enc_defs):
        key, k1, k2 = jax.random.split(key, 3)
        fan_in = cin * 9
        params[f"enc{i}_w"] = uniform(k1, (cout, cin, 3, 3), fan_in)
        params[f"enc{i}_b"] = uniform(k2, (cout,), fan_in)

    dec_defs = [(64, 32), (32, 16), (16, 3)]
    for i, (cin, cout) in enumerate(dec_defs):
        key, k1, k2 = jax.random.split(key, 3)
        fan_in = cout * 9
        params[f"dec{i}_w"] = uniform(k1, (cin, cout, 3, 3), fan_in)
        params[f"dec{i}_b"] = uniform(k2, (cout,), fan_in)

    return params


# ----------------------------------------------------------------------------
# Full forward pass (NCHW in / NCHW out, like the PyTorch module)
# ----------------------------------------------------------------------------
def cnn_autoencoder_forward(params, x_nchw):
    n, c_in, h_in, w_in = x_nchw.shape

    layers = [
        ("conv", params["enc0_w"], params["enc0_b"]),
        ("conv", params["enc1_w"], params["enc1_b"]),
        ("conv", params["enc2_w"], params["enc2_b"]),
        ("convT", params["dec0_w"], params["dec0_b"]),
        ("convT", params["dec1_w"], params["dec1_b"]),
        ("convT", params["dec2_w"], params["dec2_b"]),
    ]
    kinds = tuple(k for k, _, _ in layers)
    acts = ("relu",) * 5 + ("sigmoid",)

    # Spatial sizes at each layer boundary.
    hs, ws = [h_in], [w_in]
    for kind, _, _ in layers:
        if kind == "conv":        # k=3, stride=2, pad=1
            hs.append((hs[-1] + 2 - K) // 2 + 1)
            ws.append((ws[-1] + 2 - K) // 2 + 1)
        else:                     # k=3, stride=2, pad=1, output_padding=1
            hs.append((hs[-1] - 1) * 2 - 2 + K + 1)
            ws.append((ws[-1] - 1) * 2 - 2 + K + 1)

    m_real = [h * w for h, w in zip(hs, ws)]
    # Rows padded to multiples of 16 so bf16 slices stay (16,128)-tile aligned.
    m_pads = tuple(max(16, _round_up(m, 16)) for m in m_real)

    operands, specs = [], []

    def add(arr):
        operands.append(arr)
        specs.append(pl.BlockSpec(arr.shape, lambda i: (0, 0)))

    # ---- layer 0 input: im2col in XLA on the raw input ----------------------
    hout0, wout0 = hs[1], ws[1]
    xp = jnp.pad(x_nchw.astype(jnp.float32), ((0, 0), (0, 0), (1, 1), (1, 1)))
    taps = []
    for dy in range(K):
        for dx in range(K):
            taps.append(xp[:, :, dy::2, dx::2][:, :, :hout0, :wout0])
    patches = jnp.stack(taps, axis=1)                       # (n, 9, Cin, ho, wo)
    patches = jnp.transpose(patches, (0, 3, 4, 1, 2))       # (n, ho, wo, 9, Cin)
    patches = patches.reshape(n, m_real[1], K * K * c_in)
    patches = jnp.pad(
        patches,
        ((0, 0), (0, m_pads[1] - m_real[1]), (0, CPAD - K * K * c_in)))
    x2d = patches.reshape(n * m_pads[1], CPAD).astype(jnp.bfloat16)
    add(x2d)

    # ---- layer 0 weights: (27, Cout) -> (128, 128), row = t*Cin + ci --------
    w0, b0 = params["enc0_w"], params["enc0_b"]              # (16,3,3,3), (16,)
    c0_out = w0.shape[0]
    w0_rows = jnp.transpose(w0, (2, 3, 1, 0)).reshape(K * K * c_in, c0_out)
    w0_pack = jnp.pad(w0_rows,
                      ((0, CPAD - K * K * c_in), (0, CPAD - c0_out))
                      ).astype(jnp.bfloat16)
    add(w0_pack)
    add(jnp.pad(b0, (0, CPAD - c0_out)).astype(jnp.float32)[None, :])

    flops = 2 * n * m_pads[1] * CPAD * CPAD                  # layer 0

    # ---- layers 1..5: (G, W, b) triples --------------------------------------
    for l in range(1, 6):
        kind, w, bias = layers[l]
        hin, win, hout, wout = hs[l], ws[l], hs[l + 1], ws[l + 1]
        min_p, mout_p = m_pads[l], m_pads[l + 1]

        if kind == "conv":
            c_i, c_o = w.shape[1], w.shape[0]
            g_np = _conv_gather(hin, win, hout, wout, 2, 1, min_p, mout_p)
            # tall mix weights: rows = t*128 + ci  (matches lane-concat of taps)
            w_kk = jnp.transpose(w, (2, 3, 1, 0)).reshape(K * K, c_i, c_o)
            w_pad = jnp.pad(w_kk, ((0, 0), (0, CPAD - c_i), (0, CPAD - c_o)))
            w_pack = w_pad.reshape(K * K * CPAD, CPAD).astype(jnp.bfloat16)
            flops += n * (2 * (K * K * mout_p) * min_p * CPAD        # gather
                          + 2 * mout_p * (K * K * CPAD) * CPAD)      # deep mix
        else:
            c_i, c_o = w.shape[0], w.shape[1]
            g_np = _convT_scatter(hin, win, hout, wout, 2, 1, min_p, mout_p)
            # wide mix weights: cols = t*128 + co (mix-first on pre-upsample rows)
            w_kk = jnp.transpose(w, (2, 3, 0, 1)).reshape(K * K, c_i, c_o)
            w_pad = jnp.pad(w_kk, ((0, 0), (0, CPAD - c_i), (0, CPAD - c_o)))
            w_pack = jnp.transpose(w_pad, (1, 0, 2)).reshape(
                CPAD, K * K * CPAD).astype(jnp.bfloat16)
            flops += n * (2 * min_p * CPAD * (K * K * CPAD)          # mix
                          + 2 * mout_p * (K * K * min_p) * CPAD)     # scatter

        add(jnp.asarray(g_np, dtype=jnp.bfloat16))            # 0/1 exact in bf16
        add(w_pack)
        add(jnp.pad(bias, (0, CPAD - c_o)).astype(jnp.float32)[None, :])

    out_rows = n * m_pads[6]
    bytes_accessed = sum(int(np.prod(a.shape)) * a.dtype.itemsize
                         for a in operands) + out_rows * CPAD * 4
    cost = pl.CostEstimate(
        flops=int(flops),
        transcendentals=int(out_rows * CPAD),                 # final sigmoid
        bytes_accessed=int(bytes_accessed),
    )

    kernel = functools.partial(_fused_autoencoder_kernel,
                               n=n, m_pads=m_pads, kinds=kinds, acts=acts)
    out2d = pl.pallas_call(
        kernel,
        out_shape=jax.ShapeDtypeStruct((out_rows, CPAD), jnp.float32),
        grid=(1,),
        in_specs=specs,
        out_specs=pl.BlockSpec((out_rows, CPAD), lambda i: (0, 0)),
        compiler_params=pltpu.CompilerParams(
            dimension_semantics=("arbitrary",),
            vmem_limit_bytes=32 * 1024 * 1024),
        cost_estimate=cost,
    )(*operands)

    out = out2d.reshape(n, m_pads[6], CPAD)[:, :m_real[6], :3]
    out = out.reshape(n, hs[6], ws[6], 3)
    return jnp.transpose(out, (0, 3, 1, 2))                   # NHWC -> NCHW


# ----------------------------------------------------------------------------
# Pure-JAX f32 reference (matches PyTorch semantics) for a tolerance check.
# ----------------------------------------------------------------------------
def reference_forward(params, x):
    dn = ("NCHW", "OIHW", "NCHW")

    def conv(a, w, b):
        y = jax.lax.conv_general_dilated(a, w, (2, 2), ((1, 1), (1, 1)),
                                         dimension_numbers=dn)
        return y + b[None, :, None, None]

    def convT(a, w, b):
        # ConvTranspose2d(k=3, s=2, p=1, output_padding=1) == fractionally
        # strided conv with the (Cin,Cout)-swapped, spatially flipped kernel.
        wk = jnp.flip(jnp.transpose(w, (1, 0, 2, 3)), axis=(2, 3))
        y = jax.lax.conv_general_dilated(a, wk, (1, 1), ((1, 2), (1, 2)),
                                         lhs_dilation=(2, 2),
                                         dimension_numbers=dn)
        return y + b[None, :, None, None]

    a = jax.nn.relu(conv(x, params["enc0_w"], params["enc0_b"]))
    a = jax.nn.relu(conv(a, params["enc1_w"], params["enc1_b"]))
    a = jax.nn.relu(conv(a, params["enc2_w"], params["enc2_b"]))
    a = jax.nn.relu(convT(a, params["dec0_w"], params["dec0_b"]))
    a = jax.nn.relu(convT(a, params["dec1_w"], params["dec1_b"]))
    a = jax.nn.sigmoid(convT(a, params["dec2_w"], params["dec2_b"]))
    return a


if __name__ == "__main__":
    key = jax.random.PRNGKey(0)
    key, pkey, xkey = jax.random.split(key, 3)

    params = init_params(pkey)
    x = jax.random.normal(xkey, (2, 3, 16, 16), dtype=jnp.float32)   # NCHW

    fwd = jax.jit(cnn_autoencoder_forward)
    out = jax.block_until_ready(fwd(params, x))

    assert out.shape == (2, 3, 16, 16), out.shape
    assert bool(jnp.all(jnp.isfinite(out)))
    assert bool(jnp.all((out >= 0.0) & (out <= 1.0)))   # sigmoid output range

    ref = reference_forward(params, x)
    max_err = float(jnp.max(jnp.abs(out - ref)))
    assert max_err < 3e-2, max_err                      # bf16-level tolerance

    print("KERNEL_OK")
</pallas_src>

<mosaic_0001>
module attributes {stable_mosaic.version = 11 : i64} {
  func.func @_fused_autoencoder_kernel(%arg0: i32, %arg1: memref<128x128xbf16, #tpu.memory_space<vmem>>, %arg2: memref<128x128xbf16, #tpu.memory_space<vmem>>, %arg3: memref<1x128xf32, #tpu.memory_space<vmem>>, %arg4: memref<144x64xbf16, #tpu.memory_space<vmem>>, %arg5: memref<1152x128xbf16, #tpu.memory_space<vmem>>, %arg6: memref<1x128xf32, #tpu.memory_space<vmem>>, %arg7: memref<144x16xbf16, #tpu.memory_space<vmem>>, %arg8: memref<1152x128xbf16, #tpu.memory_space<vmem>>, %arg9: memref<1x128xf32, #tpu.memory_space<vmem>>, %arg10: memref<16x144xbf16, #tpu.memory_space<vmem>>, %arg11: memref<128x1152xbf16, #tpu.memory_space<vmem>>, %arg12: memref<1x128xf32, #tpu.memory_space<vmem>>, %arg13: memref<64x144xbf16, #tpu.memory_space<vmem>>, %arg14: memref<128x1152xbf16, #tpu.memory_space<vmem>>, %arg15: memref<1x128xf32, #tpu.memory_space<vmem>>, %arg16: memref<256x576xbf16, #tpu.memory_space<vmem>>, %arg17: memref<128x1152xbf16, #tpu.memory_space<vmem>>, %arg18: memref<1x128xf32, #tpu.memory_space<vmem>>, %arg19: memref<512x128xf32, #tpu.memory_space<vmem>>) attributes {dimension_semantics = [#tpu.dimension_semantics<arbitrary>], iteration_bounds = array<i64: 1>, scalar_prefetch = 0 : i64, scratch_operands = 0 : i64, tpu.core_type = #tpu.core_type<tc>, window_params = [{pipeline_mode = #tpu.pipeline_mode<synchronous>, transform_indices = @transform_0, window_bounds = array<i64: 128, 128>}, {pipeline_mode = #tpu.pipeline_mode<synchronous>, transform_indices = @transform_1, window_bounds = array<i64: 128, 128>}, {pipeline_mode = #tpu.pipeline_mode<synchronous>, transform_indices = @transform_2, window_bounds = array<i64: 1, 128>}, {pipeline_mode = #tpu.pipeline_mode<synchronous>, transform_indices = @transform_3, window_bounds = array<i64: 144, 64>}, {pipeline_mode = #tpu.pipeline_mode<synchronous>, transform_indices = @transform_4, window_bounds = array<i64: 1152, 128>}, {pipeline_mode = #tpu.pipeline_mode<synchronous>, transform_indices = @transform_5, window_bounds = array<i64: 1, 128>}, {pipeline_mode = #tpu.pipeline_mode<synchronous>, transform_indices = @transform_6, window_bounds = array<i64: 144, 16>}, {pipeline_mode = #tpu.pipeline_mode<synchronous>, transform_indices = @transform_7, window_bounds = array<i64: 1152, 128>}, {pipeline_mode = #tpu.pipeline_mode<synchronous>, transform_indices = @transform_8, window_bounds = array<i64: 1, 128>}, {pipeline_mode = #tpu.pipeline_mode<synchronous>, transform_indices = @transform_9, window_bounds = array<i64: 16, 144>}, {pipeline_mode = #tpu.pipeline_mode<synchronous>, transform_indices = @transform_10, window_bounds = array<i64: 128, 1152>}, {pipeline_mode = #tpu.pipeline_mode<synchronous>, transform_indices = @transform_11, window_bounds = array<i64: 1, 128>}, {pipeline_mode = #tpu.pipeline_mode<synchronous>, transform_indices = @transform_12, window_bounds = array<i64: 64, 144>}, {pipeline_mode = #tpu.pipeline_mode<synchronous>, transform_indices = @transform_13, window_bounds = array<i64: 128, 1152>}, {pipeline_mode = #tpu.pipeline_mode<synchronous>, transform_indices = @transform_14, window_bounds = array<i64: 1, 128>}, {pipeline_mode = #tpu.pipeline_mode<synchronous>, transform_indices = @transform_15, window_bounds = array<i64: 256, 576>}, {pipeline_mode = #tpu.pipeline_mode<synchronous>, transform_indices = @transform_16, window_bounds = array<i64: 128, 1152>}, {pipeline_mode = #tpu.pipeline_mode<synchronous>, transform_indices = @transform_17, window_bounds = array<i64: 1, 128>}, {pipeline_mode = #tpu.pipeline_mode<synchronous>, transform_indices = @transform_18, window_bounds = array<i64: 512, 128>}]} {
    %c0 = arith.constant 0 : index
    %c0_0 = arith.constant 0 : index
    %0 = vector.load %arg1[%c0, %c0_0] : memref<128x128xbf16, #tpu.memory_space<vmem>>, vector<128x128xbf16>
    %c0_1 = arith.constant 0 : index
    %c0_2 = arith.constant 0 : index
    %1 = vector.load %arg2[%c0_1, %c0_2] : memref<128x128xbf16, #tpu.memory_space<vmem>>, vector<128x128xbf16>
    %cst = arith.constant dense<0.000000e+00> : vector<128x128xf32>
    %2 = tpu.matmul %0, %1, %cst {dimension_numbers = #tpu.dot_dimension_numbers<[1], [0], [0], [1], [0, 0, 1, 1], [], []>} : vector<128x128xbf16>, vector<128x128xbf16>, vector<128x128xf32> -> vector<128x128xf32>
    %c0_3 = arith.constant 0 : index
    %c0_4 = arith.constant 0 : index
    %3 = vector.load %arg3[%c0_3, %c0_4] : memref<1x128xf32, #tpu.memory_space<vmem>>, vector<1x128xf32>
    %4 = vector.broadcast %3 : vector<1x128xf32> to vector<128x128xf32>
    %5 = arith.addf %2, %4 : vector<128x128xf32>
    %cst_5 = arith.constant 0.000000e+00 : f32
    %6 = vector.broadcast %cst_5 : f32 to vector<128x128xf32>
    %7 = arith.maximumf %5, %6 : vector<128x128xf32>
    %8 = arith.truncf %7 : vector<128x128xf32> to vector<128x128xbf16>
    %c0_6 = arith.constant 0 : index
    %c0_7 = arith.constant 0 : index
    %9 = vector.load %arg4[%c0_6, %c0_7] : memref<144x64xbf16, #tpu.memory_space<vmem>>, vector<144x64xbf16>
    %10 = vector.extract_strided_slice %8 {offsets = [0, 0], sizes = [64, 128], strides = [1, 1]} : vector<128x128xbf16> to vector<64x128xbf16>
    %cst_8 = arith.constant dense<0.000000e+00> : vector<144x128xf32>
    %11 = tpu.matmul %9, %10, %cst_8 {dimension_numbers = #tpu.dot_dimension_numbers<[1], [0], [0], [1], [0, 0, 1, 1], [], []>} : vector<144x64xbf16>, vector<64x128xbf16>, vector<144x128xf32> -> vector<144x128xf32>
    %12 = arith.truncf %11 : vector<144x128xf32> to vector<144x128xbf16>
    %13 = vector.extract_strided_slice %12 {offsets = [0, 0], sizes = [16, 128], strides = [1, 1]} : vector<144x128xbf16> to vector<16x128xbf16>
    %14 = vector.extract_strided_slice %12 {offsets = [16, 0], sizes = [16, 128], strides = [1, 1]} : vector<144x128xbf16> to vector<16x128xbf16>
    %15 = vector.extract_strided_slice %12 {offsets = [32, 0], sizes = [16, 128], strides = [1, 1]} : vector<144x128xbf16> to vector<16x128xbf16>
    %16 = vector.extract_strided_slice %12 {offsets = [48, 0], sizes = [16, 128], strides = [1, 1]} : vector<144x128xbf16> to vector<16x128xbf16>
    %17 = vector.extract_strided_slice %12 {offsets = [64, 0], sizes = [16, 128], strides = [1, 1]} : vector<144x128xbf16> to vector<16x128xbf16>
    %18 = vector.extract_strided_slice %12 {offsets = [80, 0], sizes = [16, 128], strides = [1, 1]} : vector<144x128xbf16> to vector<16x128xbf16>
    %19 = vector.extract_strided_slice %12 {offsets = [96, 0], sizes = [16, 128], strides = [1, 1]} : vector<144x128xbf16> to vector<16x128xbf16>
    %20 = vector.extract_strided_slice %12 {offsets = [112, 0], sizes = [16, 128], strides = [1, 1]} : vector<144x128xbf16> to vector<16x128xbf16>
    %21 = vector.extract_strided_slice %12 {offsets = [128, 0], sizes = [16, 128], strides = [1, 1]} : vector<144x128xbf16> to vector<16x128xbf16>
    %22 = tpu.concatenate %13, %14, %15, %16, %17, %18, %19, %20, %21 in 1 : vector<16x128xbf16>, vector<16x128xbf16>, vector<16x128xbf16>, vector<16x128xbf16>, vector<16x128xbf16>, vector<16x128xbf16>, vector<16x128xbf16>, vector<16x128xbf16>, vector<16x128xbf16> -> vector<16x1152xbf16>
    %23 = vector.extract_strided_slice %8 {offsets = [64, 0], sizes = [64, 128], strides = [1, 1]} : vector<128x128xbf16> to vector<64x128xbf16>
    %cst_9 = arith.constant dense<0.000000e+00> : vector<144x128xf32>
    %24 = tpu.matmul %9, %23, %cst_9 {dimension_numbers = #tpu.dot_dimension_numbers<[1], [0], [0], [1], [0, 0, 1, 1], [], []>} : vector<144x64xbf16>, vector<64x128xbf16>, vector<144x128xf32> -> vector<144x128xf32>
    %25 = arith.truncf %24 : vector<144x128xf32> to vector<144x128xbf16>
    %26 = vector.extract_strided_slice %25 {offsets = [0, 0], sizes = [16, 128], strides = [1, 1]} : vector<144x128xbf16> to vector<16x128xbf16>
    %27 = vector.extract_strided_slice %25 {offsets = [16, 0], sizes = [16, 128], strides = [1, 1]} : vector<144x128xbf16> to vector<16x128xbf16>
    %28 = vector.extract_strided_slice %25 {offsets = [32, 0], sizes = [16, 128], strides = [1, 1]} : vector<144x128xbf16> to vector<16x128xbf16>
    %29 = vector.extract_strided_slice %25 {offsets = [48, 0], sizes = [16, 128], strides = [1, 1]} : vector<144x128xbf16> to vector<16x128xbf16>
    %30 = vector.extract_strided_slice %25 {offsets = [64, 0], sizes = [16, 128], strides = [1, 1]} : vector<144x128xbf16> to vector<16x128xbf16>
    %31 = vector.extract_strided_slice %25 {offsets = [80, 0], sizes = [16, 128], strides = [1, 1]} : vector<144x128xbf16> to vector<16x128xbf16>
    %32 = vector.extract_strided_slice %25 {offsets = [96, 0], sizes = [16, 128], strides = [1, 1]} : vector<144x128xbf16> to vector<16x128xbf16>
    %33 = vector.extract_strided_slice %25 {offsets = [112, 0], sizes = [16, 128], strides = [1, 1]} : vector<144x128xbf16> to vector<16x128xbf16>
    %34 = vector.extract_strided_slice %25 {offsets = [128, 0], sizes = [16, 128], strides = [1, 1]} : vector<144x128xbf16> to vector<16x128xbf16>
    %35 = tpu.concatenate %26, %27, %28, %29, %30, %31, %32, %33, %34 in 1 : vector<16x128xbf16>, vector<16x128xbf16>, vector<16x128xbf16>, vector<16x128xbf16>, vector<16x128xbf16>, vector<16x128xbf16>, vector<16x128xbf16>, vector<16x128xbf16>, vector<16x128xbf16> -> vector<16x1152xbf16>
    %36 = tpu.concatenate %22, %35 in 0 : vector<16x1152xbf16>, vector<16x1152xbf16> -> vector<32x1152xbf16>
    %c0_10 = arith.constant 0 : index
    %c0_11 = arith.constant 0 : index
    %37 = vector.load %arg5[%c0_10, %c0_11] : memref<1152x128xbf16, #tpu.memory_space<vmem>>, vector<1152x128xbf16>
    %cst_12 = arith.constant dense<0.000000e+00> : vector<32x128xf32>
    %38 = tpu.matmul %36, %37, %cst_12 {dimension_numbers = #tpu.dot_dimension_numbers<[1], [0], [0], [1], [0, 0, 1, 1], [], []>} : vector<32x1152xbf16>, vector<1152x128xbf16>, vector<32x128xf32> -> vector<32x128xf32>
    %c0_13 = arith.constant 0 : index
    %c0_14 = arith.constant 0 : index
    %39 = vector.load %arg6[%c0_13, %c0_14] : memref<1x128xf32, #tpu.memory_space<vmem>>, vector<1x128xf32>
    %40 = vector.broadcast %39 : vector<1x128xf32> to vector<32x128xf32>
    %41 = arith.addf %38, %40 : vector<32x128xf32>
    %cst_15 = arith.constant 0.000000e+00 : f32
    %42 = vector.broadcast %cst_15 : f32 to vector<32x128xf32>
    %43 = arith.maximumf %41, %42 : vector<32x128xf32>
    %44 = arith.truncf %43 : vector<32x128xf32> to vector<32x128xbf16>
    %c0_16 = arith.constant 0 : index
    %c0_17 = arith.constant 0 : index
    %45 = vector.load %arg7[%c0_16, %c0_17] : memref<144x16xbf16, #tpu.memory_space<vmem>>, vector<144x16xbf16>
    %46 = vector.extract_strided_slice %44 {offsets = [0, 0], sizes = [16, 128], strides = [1, 1]} : vector<32x128xbf16> to vector<16x128xbf16>
    %cst_18 = arith.constant dense<0.000000e+00> : vector<144x128xf32>
    %47 = tpu.matmul %45, %46, %cst_18 {dimension_numbers = #tpu.dot_dimension_numbers<[1], [0], [0], [1], [0, 0, 1, 1], [], []>} : vector<144x16xbf16>, vector<16x128xbf16>, vector<144x128xf32> -> vector<144x128xf32>
    %48 = arith.truncf %47 : vector<144x128xf32> to vector<144x128xbf16>
    %49 = vector.extract_strided_slice %48 {offsets = [0, 0], sizes = [16, 128], strides = [1, 1]} : vector<144x128xbf16> to vector<16x128xbf16>
    %50 = vector.extract_strided_slice %48 {offsets = [16, 0], sizes = [16, 128], strides = [1, 1]} : vector<144x128xbf16> to vector<16x128xbf16>
    %51 = vector.extract_strided_slice %48 {offsets = [32, 0], sizes = [16, 128], strides = [1, 1]} : vector<144x128xbf16> to vector<16x128xbf16>
    %52 = vector.extract_strided_slice %48 {offsets = [48, 0], sizes = [16, 128], strides = [1, 1]} : vector<144x128xbf16> to vector<16x128xbf16>
    %53 = vector.extract_strided_slice %48 {offsets = [64, 0], sizes = [16, 128], strides = [1, 1]} : vector<144x128xbf16> to vector<16x128xbf16>
    %54 = vector.extract_strided_slice %48 {offsets = [80, 0], sizes = [16, 128], strides = [1, 1]} : vector<144x128xbf16> to vector<16x128xbf16>
    %55 = vector.extract_strided_slice %48 {offsets = [96, 0], sizes = [16, 128], strides = [1, 1]} : vector<144x128xbf16> to vector<16x128xbf16>
    %56 = vector.extract_strided_slice %48 {offsets = [112, 0], sizes = [16, 128], strides = [1, 1]} : vector<144x128xbf16> to vector<16x128xbf16>
    %57 = vector.extract_strided_slice %48 {offsets = [128, 0], sizes = [16, 128], strides = [1, 1]} : vector<144x128xbf16> to vector<16x128xbf16>
    %58 = tpu.concatenate %49, %50, %51, %52, %53, %54, %55, %56, %57 in 1 : vector<16x128xbf16>, vector<16x128xbf16>, vector<16x128xbf16>, vector<16x128xbf16>, vector<16x128xbf16>, vector<16x128xbf16>, vector<16x128xbf16>, vector<16x128xbf16>, vector<16x128xbf16> -> vector<16x1152xbf16>
    %59 = vector.extract_strided_slice %44 {offsets = [16, 0], sizes = [16, 128], strides = [1, 1]} : vector<32x128xbf16> to vector<16x128xbf16>
    %cst_19 = arith.constant dense<0.000000e+00> : vector<144x128xf32>
    %60 = tpu.matmul %45, %59, %cst_19 {dimension_numbers = #tpu.dot_dimension_numbers<[1], [0], [0], [1], [0, 0, 1, 1], [], []>} : vector<144x16xbf16>, vector<16x128xbf16>, vector<144x128xf32> -> vector<144x128xf32>
    %61 = arith.truncf %60 : vector<144x128xf32> to vector<144x128xbf16>
    %62 = vector.extract_strided_slice %61 {offsets = [0, 0], sizes = [16, 128], strides = [1, 1]} : vector<144x128xbf16> to vector<16x128xbf16>
    %63 = vector.extract_strided_slice %61 {offsets = [16, 0], sizes = [16, 128], strides = [1, 1]} : vector<144x128xbf16> to vector<16x128xbf16>
    %64 = vector.extract_strided_slice %61 {offsets = [32, 0], sizes = [16, 128], strides = [1, 1]} : vector<144x128xbf16> to vector<16x128xbf16>
    %65 = vector.extract_strided_slice %61 {offsets = [48, 0], sizes = [16, 128], strides = [1, 1]} : vector<144x128xbf16> to vector<16x128xbf16>
    %66 = vector.extract_strided_slice %61 {offsets = [64, 0], sizes = [16, 128], strides = [1, 1]} : vector<144x128xbf16> to vector<16x128xbf16>
    %67 = vector.extract_strided_slice %61 {offsets = [80, 0], sizes = [16, 128], strides = [1, 1]} : vector<144x128xbf16> to vector<16x128xbf16>
    %68 = vector.extract_strided_slice %61 {offsets = [96, 0], sizes = [16, 128], strides = [1, 1]} : vector<144x128xbf16> to vector<16x128xbf16>
    %69 = vector.extract_strided_slice %61 {offsets = [112, 0], sizes = [16, 128], strides = [1, 1]} : vector<144x128xbf16> to vector<16x128xbf16>
    %70 = vector.extract_strided_slice %61 {offsets = [128, 0], sizes = [16, 128], strides = [1, 1]} : vector<144x128xbf16> to vector<16x128xbf16>
    %71 = tpu.concatenate %62, %63, %64, %65, %66, %67, %68, %69, %70 in 1 : vector<16x128xbf16>, vector<16x128xbf16>, vector<16x128xbf16>, vector<16x128xbf16>, vector<16x128xbf16>, vector<16x128xbf16>, vector<16x128xbf16>, vector<16x128xbf16>, vector<16x128xbf16> -> vector<16x1152xbf16>
    %72 = tpu.concatenate %58, %71 in 0 : vector<16x1152xbf16>, vector<16x1152xbf16> -> vector<32x1152xbf16>
    %c0_20 = arith.constant 0 : index
    %c0_21 = arith.constant 0 : index
    %73 = vector.load %arg8[%c0_20, %c0_21] : memref<1152x128xbf16, #tpu.memory_space<vmem>>, vector<1152x128xbf16>
    %cst_22 = arith.constant dense<0.000000e+00> : vector<32x128xf32>
    %74 = tpu.matmul %72, %73, %cst_22 {dimension_numbers = #tpu.dot_dimension_numbers<[1], [0], [0], [1], [0, 0, 1, 1], [], []>} : vector<32x1152xbf16>, vector<1152x128xbf16>, vector<32x128xf32> -> vector<32x128xf32>
    %c0_23 = arith.constant 0 : index
    %c0_24 = arith.constant 0 : index
    %75 = vector.load %arg9[%c0_23, %c0_24] : memref<1x128xf32, #tpu.memory_space<vmem>>, vector<1x128xf32>
    %76 = vector.broadcast %75 : vector<1x128xf32> to vector<32x128xf32>
    %77 = arith.addf %74, %76 : vector<32x128xf32>
    %cst_25 = arith.constant 0.000000e+00 : f32
    %78 = vector.broadcast %cst_25 : f32 to vector<32x128xf32>
    %79 = arith.maximumf %77, %78 : vector<32x128xf32>
    %80 = arith.truncf %79 : vector<32x128xf32> to vector<32x128xbf16>
    %c0_26 = arith.constant 0 : index
    %c0_27 = arith.constant 0 : index
    %81 = vector.load %arg11[%c0_26, %c0_27] : memref<128x1152xbf16, #tpu.memory_space<vmem>>, vector<128x1152xbf16>
    %cst_28 = arith.constant dense<0.000000e+00> : vector<32x1152xf32>
    %82 = tpu.matmul %80, %81, %cst_28 {dimension_numbers = #tpu.dot_dimension_numbers<[1], [0], [0], [1], [0, 0, 1, 1], [], []>} : vector<32x128xbf16>, vector<128x1152xbf16>, vector<32x1152xf32> -> vector<32x1152xf32>
    %83 = arith.truncf %82 : vector<32x1152xf32> to vector<32x1152xbf16>
    %c0_29 = arith.constant 0 : index
    %c0_30 = arith.constant 0 : index
    %84 = vector.load %arg10[%c0_29, %c0_30] : memref<16x144xbf16, #tpu.memory_space<vmem>>, vector<16x144xbf16>
    %85 = vector.extract_strided_slice %83 {offsets = [0, 0], sizes = [16, 1152], strides = [1, 1]} : vector<32x1152xbf16> to vector<16x1152xbf16>
    %86 = vector.extract_strided_slice %85 {offsets = [0, 0], sizes = [16, 128], strides = [1, 1]} : vector<16x1152xbf16> to vector<16x128xbf16>
    %87 = vector.extract_strided_slice %85 {offsets = [0, 128], sizes = [16, 128], strides = [1, 1]} : vector<16x1152xbf16> to vector<16x128xbf16>
    %88 = vector.extract_strided_slice %85 {offsets = [0, 256], sizes = [16, 128], strides = [1, 1]} : vector<16x1152xbf16> to vector<16x128xbf16>
    %89 = vector.extract_strided_slice %85 {offsets = [0, 384], sizes = [16, 128], strides = [1, 1]} : vector<16x1152xbf16> to vector<16x128xbf16>
    %90 = vector.extract_strided_slice %85 {offsets = [0, 512], sizes = [16, 128], strides = [1, 1]} : vector<16x1152xbf16> to vector<16x128xbf16>
    %91 = vector.extract_strided_slice %85 {offsets = [0, 640], sizes = [16, 128], strides = [1, 1]} : vector<16x1152xbf16> to vector<16x128xbf16>
    %92 = vector.extract_strided_slice %85 {offsets = [0, 768], sizes = [16, 128], strides = [1, 1]} : vector<16x1152xbf16> to vector<16x128xbf16>
    %93 = vector.extract_strided_slice %85 {offsets = [0, 896], sizes = [16, 128], strides = [1, 1]} : vector<16x1152xbf16> to vector<16x128xbf16>
    %94 = vector.extract_strided_slice %85 {offsets = [0, 1024], sizes = [16, 128], strides = [1, 1]} : vector<16x1152xbf16> to vector<16x128xbf16>
    %95 = tpu.concatenate %86, %87, %88, %89, %90, %91, %92, %93, %94 in 0 : vector<16x128xbf16>, vector<16x128xbf16>, vector<16x128xbf16>, vector<16x128xbf16>, vector<16x128xbf16>, vector<16x128xbf16>, vector<16x128xbf16>, vector<16x128xbf16>, vector<16x128xbf16> -> vector<144x128xbf16>
    %cst_31 = arith.constant dense<0.000000e+00> : vector<16x128xf32>
    %96 = tpu.matmul %84, %95, %cst_31 {dimension_numbers = #tpu.dot_dimension_numbers<[1], [0], [0], [1], [0, 0, 1, 1], [], []>} : vector<16x144xbf16>, vector<144x128xbf16>, vector<16x128xf32> -> vector<16x128xf32>
    %97 = vector.extract_strided_slice %83 {offsets = [16, 0], sizes = [16, 1152], strides = [1, 1]} : vector<32x1152xbf16> to vector<16x1152xbf16>
    %98 = vector.extract_strided_slice %97 {offsets = [0, 0], sizes = [16, 128], strides = [1, 1]} : vector<16x1152xbf16> to vector<16x128xbf16>
    %99 = vector.extract_strided_slice %97 {offsets = [0, 128], sizes = [16, 128], strides = [1, 1]} : vector<16x1152xbf16> to vector<16x128xbf16>
    %100 = vector.extract_strided_slice %97 {offsets = [0, 256], sizes = [16, 128], strides = [1, 1]} : vector<16x1152xbf16> to vector<16x128xbf16>
    %101 = vector.extract_strided_slice %97 {offsets = [0, 384], sizes = [16, 128], strides = [1, 1]} : vector<16x1152xbf16> to vector<16x128xbf16>
    %102 = vector.extract_strided_slice %97 {offsets = [0, 512], sizes = [16, 128], strides = [1, 1]} : vector<16x1152xbf16> to vector<16x128xbf16>
    %103 = vector.extract_strided_slice %97 {offsets = [0, 640], sizes = [16, 128], strides = [1, 1]} : vector<16x1152xbf16> to vector<16x128xbf16>
    %104 = vector.extract_strided_slice %97 {offsets = [0, 768], sizes = [16, 128], strides = [1, 1]} : vector<16x1152xbf16> to vector<16x128xbf16>
    %105 = vector.extract_strided_slice %97 {offsets = [0, 896], sizes = [16, 128], strides = [1, 1]} : vector<16x1152xbf16> to vector<16x128xbf16>
    %106 = vector.extract_strided_slice %97 {offsets = [0, 1024], sizes = [16, 128], strides = [1, 1]} : vector<16x1152xbf16> to vector<16x128xbf16>
    %107 = tpu.concatenate %98, %99, %100, %101, %102, %103, %104, %105, %106 in 0 : vector<16x128xbf16>, vector<16x128xbf16>, vector<16x128xbf16>, vector<16x128xbf16>, vector<16x128xbf16>, vector<16x128xbf16>, vector<16x128xbf16>, vector<16x128xbf16>, vector<16x128xbf16> -> vector<144x128xbf16>
    %cst_32 = arith.constant dense<0.000000e+00> : vector<16x128xf32>
    %108 = tpu.matmul %84, %107, %cst_32 {dimension_numbers = #tpu.dot_dimension_numbers<[1], [0], [0], [1], [0, 0, 1, 1], [], []>} : vector<16x144xbf16>, vector<144x128xbf16>, vector<16x128xf32> -> vector<16x128xf32>
    %109 = tpu.concatenate %96, %108 in 0 : vector<16x128xf32>, vector<16x128xf32> -> vector<32x128xf32>
    %c0_33 = arith.constant 0 : index
    %c0_34 = arith.constant 0 : index
    %110 = vector.load %arg12[%c0_33, %c0_34] : memref<1x128xf32, #tpu.memory_space<vmem>>, vector<1x128xf32>
    %111 = vector.broadcast %110 : vector<1x128xf32> to vector<32x128xf32>
    %112 = arith.addf %109, %111 : vector<32x128xf32>
    %cst_35 = arith.constant 0.000000e+00 : f32
    %113 = vector.broadcast %cst_35 : f32 to vector<32x128xf32>
    %114 = arith.maximumf %112, %113 : vector<32x128xf32>
    %115 = arith.truncf %114 : vector<32x128xf32> to vector<32x128xbf16>
    %c0_36 = arith.constant 0 : index
    %c0_37 = arith.constant 0 : index
    %116 = vector.load %arg14[%c0_36, %c0_37] : memref<128x1152xbf16, #tpu.memory_space<vmem>>, vector<128x1152xbf16>
    %cst_38 = arith.constant dense<0.000000e+00> : vector<32x1152xf32>
    %117 = tpu.matmul %115, %116, %cst_38 {dimension_numbers = #tpu.dot_dimension_numbers<[1], [0], [0], [1], [0, 0, 1, 1], [], []>} : vector<32x128xbf16>, vector<128x1152xbf16>, vector<32x1152xf32> -> vector<32x1152xf32>
    %118 = arith.truncf %117 : vector<32x1152xf32> to vector<32x1152xbf16>
    %c0_39 = arith.constant 0 : index
    %c0_40 = arith.constant 0 : index
    %119 = vector.load %arg13[%c0_39, %c0_40] : memref<64x144xbf16, #tpu.memory_space<vmem>>, vector<64x144xbf16>
    %120 = vector.extract_strided_slice %118 {offsets = [0, 0], sizes = [16, 1152], strides = [1, 1]} : vector<32x1152xbf16> to vector<16x1152xbf16>
    %121 = vector.extract_strided_slice %120 {offsets = [0, 0], sizes = [16, 128], strides = [1, 1]} : vector<16x1152xbf16> to vector<16x128xbf16>
    %122 = vector.extract_strided_slice %120 {offsets = [0, 128], sizes = [16, 128], strides = [1, 1]} : vector<16x1152xbf16> to vector<16x128xbf16>
    %123 = vector.extract_strided_slice %120 {offsets = [0, 256], sizes = [16, 128], strides = [1, 1]} : vector<16x1152xbf16> to vector<16x128xbf16>
    %124 = vector.extract_strided_slice %120 {offsets = [0, 384], sizes = [16, 128], strides = [1, 1]} : vector<16x1152xbf16> to vector<16x128xbf16>
    %125 = vector.extract_strided_slice %120 {offsets = [0, 512], sizes = [16, 128], strides = [1, 1]} : vector<16x1152xbf16> to vector<16x128xbf16>
    %126 = vector.extract_strided_slice %120 {offsets = [0, 640], sizes = [16, 128], strides = [1, 1]} : vector<16x1152xbf16> to vector<16x128xbf16>
    %127 = vector.extract_strided_slice %120 {offsets = [0, 768], sizes = [16, 128], strides = [1, 1]} : vector<16x1152xbf16> to vector<16x128xbf16>
    %128 = vector.extract_strided_slice %120 {offsets = [0, 896], sizes = [16, 128], strides = [1, 1]} : vector<16x1152xbf16> to vector<16x128xbf16>
    %129 = vector.extract_strided_slice %120 {offsets = [0, 1024], sizes = [16, 128], strides = [1, 1]} : vector<16x1152xbf16> to vector<16x128xbf16>
    %130 = tpu.concatenate %121, %122, %123, %124, %125, %126, %127, %128, %129 in 0 : vector<16x128xbf16>, vector<16x128xbf16>, vector<16x128xbf16>, vector<16x128xbf16>, vector<16x128xbf16>, vector<16x128xbf16>, vector<16x128xbf16>, vector<16x128xbf16>, vector<16x128xbf16> -> vector<144x128xbf16>
    %cst_41 = arith.constant dense<0.000000e+00> : vector<64x128xf32>
    %131 = tpu.matmul %119, %130, %cst_41 {dimension_numbers = #tpu.dot_dimension_numbers<[1], [0], [0], [1], [0, 0, 1, 1], [], []>} : vector<64x144xbf16>, vector<144x128xbf16>, vector<64x128xf32> -> vector<64x128xf32>
    %132 = vector.extract_strided_slice %118 {offsets = [16, 0], sizes = [16, 1152], strides = [1, 1]} : vector<32x1152xbf16> to vector<16x1152xbf16>
    %133 = vector.extract_strided_slice %132 {offsets = [0, 0], sizes = [16, 128], strides = [1, 1]} : vector<16x1152xbf16> to vector<16x128xbf16>
    %134 = vector.extract_strided_slice %132 {offsets = [0, 128], sizes = [16, 128], strides = [1, 1]} : vector<16x1152xbf16> to vector<16x128xbf16>
    %135 = vector.extract_strided_slice %132 {offsets = [0, 256], sizes = [16, 128], strides = [1, 1]} : vector<16x1152xbf16> to vector<16x128xbf16>
    %136 = vector.extract_strided_slice %132 {offsets = [0, 384], sizes = [16, 128], strides = [1, 1]} : vector<16x1152xbf16> to vector<16x128xbf16>
    %137 = vector.extract_strided_slice %132 {offsets = [0, 512], sizes = [16, 128], strides = [1, 1]} : vector<16x1152xbf16> to vector<16x128xbf16>
    %138 = vector.extract_strided_slice %132 {offsets = [0, 640], sizes = [16, 128], strides = [1, 1]} : vector<16x1152xbf16> to vector<16x128xbf16>
    %139 = vector.extract_strided_slice %132 {offsets = [0, 768], sizes = [16, 128], strides = [1, 1]} : vector<16x1152xbf16> to vector<16x128xbf16>
    %140 = vector.extract_strided_slice %132 {offsets = [0, 896], sizes = [16, 128], strides = [1, 1]} : vector<16x1152xbf16> to vector<16x128xbf16>
    %141 = vector.extract_strided_slice %132 {offsets = [0, 1024], sizes = [16, 128], strides = [1, 1]} : vector<16x1152xbf16> to vector<16x128xbf16>
    %142 = tpu.concatenate %133, %134, %135, %136, %137, %138, %139, %140, %141 in 0 : vector<16x128xbf16>, vector<16x128xbf16>, vector<16x128xbf16>, vector<16x128xbf16>, vector<16x128xbf16>, vector<16x128xbf16>, vector<16x128xbf16>, vector<16x128xbf16>, vector<16x128xbf16> -> vector<144x128xbf16>
    %cst_42 = arith.constant dense<0.000000e+00> : vector<64x128xf32>
    %143 = tpu.matmul %119, %142, %cst_42 {dimension_numbers = #tpu.dot_dimension_numbers<[1], [0], [0], [1], [0, 0, 1, 1], [], []>} : vector<64x144xbf16>, vector<144x128xbf16>, vector<64x128xf32> -> vector<64x128xf32>
    %144 = tpu.concatenate %131, %143 in 0 : vector<64x128xf32>, vector<64x128xf32> -> vector<128x128xf32>
    %c0_43 = arith.constant 0 : index
    %c0_44 = arith.constant 0 : index
    %145 = vector.load %arg15[%c0_43, %c0_44] : memref<1x128xf32, #tpu.memory_space<vmem>>, vector<1x128xf32>
    %146 = vector.broadcast %145 : vector<1x128xf32> to vector<128x128xf32>
    %147 = arith.addf %144, %146 : vector<128x128xf32>
    %cst_45 = arith.constant 0.000000e+00 : f32
    %148 = vector.broadcast %cst_45 : f32 to vector<128x128xf32>
    %149 = arith.maximumf %147, %148 : vector<128x128xf32>
    %150 = arith.truncf %149 : vector<128x128xf32> to vector<128x128xbf16>
    %c0_46 = arith.constant 0 : index
    %c0_47 = arith.constant 0 : index
    %151 = vector.load %arg17[%c0_46, %c0_47] : memref<128x1152xbf16, #tpu.memory_space<vmem>>, vector<128x1152xbf16>
    %cst_48 = arith.constant dense<0.000000e+00> : vector<128x1152xf32>
    %152 = tpu.matmul %150, %151, %cst_48 {dimension_numbers = #tpu.dot_dimension_numbers<[1], [0], [0], [1], [0, 0, 1, 1], [], []>} : vector<128x128xbf16>, vector<128x1152xbf16>, vector<128x1152xf32> -> vector<128x1152xf32>
    %153 = arith.truncf %152 : vector<128x1152xf32> to vector<128x1152xbf16>
    %c0_49 = arith.constant 0 : index
    %c0_50 = arith.constant 0 : index
    %154 = vector.load %arg16[%c0_49, %c0_50] : memref<256x576xbf16, #tpu.memory_space<vmem>>, vector<256x576xbf16>
    %155 = vector.extract_strided_slice %153 {offsets = [0, 0], sizes = [64, 1152], strides = [1, 1]} : vector<128x1152xbf16> to vector<64x1152xbf16>
    %156 = vector.extract_strided_slice %155 {offsets = [0, 0], sizes = [64, 128], strides = [1, 1]} : vector<64x1152xbf16> to vector<64x128xbf16>
    %157 = vector.extract_strided_slice %155 {offsets = [0, 128], sizes = [64, 128], strides = [1, 1]} : vector<64x1152xbf16> to vector<64x128xbf16>
    %158 = vector.extract_strided_slice %155 {offsets = [0, 256], sizes = [64, 128], strides = [1, 1]} : vector<64x1152xbf16> to vector<64x128xbf16>
    %159 = vector.extract_strided_slice %155 {offsets = [0, 384], sizes = [64, 128], strides = [1, 1]} : vector<64x1152xbf16> to vector<64x128xbf16>
    %160 = vector.extract_strided_slice %155 {offsets = [0, 512], sizes = [64, 128], strides = [1, 1]} : vector<64x1152xbf16> to vector<64x128xbf16>
    %161 = vector.extract_strided_slice %155 {offsets = [0, 640], sizes = [64, 128], strides = [1, 1]} : vector<64x1152xbf16> to vector<64x128xbf16>
    %162 = vector.extract_strided_slice %155 {offsets = [0, 768], sizes = [64, 128], strides = [1, 1]} : vector<64x1152xbf16> to vector<64x128xbf16>
    %163 = vector.extract_strided_slice %155 {offsets = [0, 896], sizes = [64, 128], strides = [1, 1]} : vector<64x1152xbf16> to vector<64x128xbf16>
    %164 = vector.extract_strided_slice %155 {offsets = [0, 1024], sizes = [64, 128], strides = [1, 1]} : vector<64x1152xbf16> to vector<64x128xbf16>
    %165 = tpu.concatenate %156, %157, %158, %159, %160, %161, %162, %163, %164 in 0 : vector<64x128xbf16>, vector<64x128xbf16>, vector<64x128xbf16>, vector<64x128xbf16>, vector<64x128xbf16>, vector<64x128xbf16>, vector<64x128xbf16>, vector<64x128xbf16>, vector<64x128xbf16> -> vector<576x128xbf16>
    %cst_51 = arith.constant dense<0.000000e+00> : vector<256x128xf32>
    %166 = tpu.matmul %154, %165, %cst_51 {dimension_numbers = #tpu.dot_dimension_numbers<[1], [0], [0], [1], [0, 0, 1, 1], [], []>} : vector<256x576xbf16>, vector<576x128xbf16>, vector<256x128xf32> -> vector<256x128xf32>
    %167 = vector.extract_strided_slice %153 {offsets = [64, 0], sizes = [64, 1152], strides = [1, 1]} : vector<128x1152xbf16> to vector<64x1152xbf16>
    %168 = vector.extract_strided_slice %167 {offsets = [0, 0], sizes = [64, 128], strides = [1, 1]} : vector<64x1152xbf16> to vector<64x128xbf16>
    %169 = vector.extract_strided_slice %167 {offsets = [0, 128], sizes = [64, 128], strides = [1, 1]} : vector<64x1152xbf16> to vector<64x128xbf16>
    %170 = vector.extract_strided_slice %167 {offsets = [0, 256], sizes = [64, 128], strides = [1, 1]} : vector<64x1152xbf16> to vector<64x128xbf16>
    %171 = vector.extract_strided_slice %167 {offsets = [0, 384], sizes = [64, 128], strides = [1, 1]} : vector<64x1152xbf16> to vector<64x128xbf16>
    %172 = vector.extract_strided_slice %167 {offsets = [0, 512], sizes = [64, 128], strides = [1, 1]} : vector<64x1152xbf16> to vector<64x128xbf16>
    %173 = vector.extract_strided_slice %167 {offsets = [0, 640], sizes = [64, 128], strides = [1, 1]} : vector<64x1152xbf16> to vector<64x128xbf16>
    %174 = vector.extract_strided_slice %167 {offsets = [0, 768], sizes = [64, 128], strides = [1, 1]} : vector<64x1152xbf16> to vector<64x128xbf16>
    %175 = vector.extract_strided_slice %167 {offsets = [0, 896], sizes = [64, 128], strides = [1, 1]} : vector<64x1152xbf16> to vector<64x128xbf16>
    %176 = vector.extract_strided_slice %167 {offsets = [0, 1024], sizes = [64, 128], strides = [1, 1]} : vector<64x1152xbf16> to vector<64x128xbf16>
    %177 = tpu.concatenate %168, %169, %170, %171, %172, %173, %174, %175, %176 in 0 : vector<64x128xbf16>, vector<64x128xbf16>, vector<64x128xbf16>, vector<64x128xbf16>, vector<64x128xbf16>, vector<64x128xbf16>, vector<64x128xbf16>, vector<64x128xbf16>, vector<64x128xbf16> -> vector<576x128xbf16>
    %cst_52 = arith.constant dense<0.000000e+00> : vector<256x128xf32>
    %178 = tpu.matmul %154, %177, %cst_52 {dimension_numbers = #tpu.dot_dimension_numbers<[1], [0], [0], [1], [0, 0, 1, 1], [], []>} : vector<256x576xbf16>, vector<576x128xbf16>, vector<256x128xf32> -> vector<256x128xf32>
    %179 = tpu.concatenate %166, %178 in 0 : vector<256x128xf32>, vector<256x128xf32> -> vector<512x128xf32>
    %c0_53 = arith.constant 0 : index
    %c0_54 = arith.constant 0 : index
    %180 = vector.load %arg18[%c0_53, %c0_54] : memref<1x128xf32, #tpu.memory_space<vmem>>, vector<1x128xf32>
    %181 = vector.broadcast %180 : vector<1x128xf32> to vector<512x128xf32>
    %182 = arith.addf %179, %181 : vector<512x128xf32>
    %183 = arith.negf %182 : vector<512x128xf32>
    %184 = math.exp %183 : vector<512x128xf32>
    %cst_55 = arith.constant 1.000000e+00 : f32
    %185 = vector.broadcast %cst_55 : f32 to vector<512x128xf32>
    %186 = arith.addf %185, %184 : vector<512x128xf32>
    %187 = arith.divf %185, %186 : vector<512x128xf32>
    %c0_56 = arith.constant 0 : index
    %c0_57 = arith.constant 0 : index
    %188 = vector.load %arg19[%c0_56, %c0_57] : memref<512x128xf32, #tpu.memory_space<vmem>>, vector<512x128xf32>
    tpu.vector_store %arg19[%c0_56, %c0_57], %187 {strides = array<i32>} : memref<512x128xf32, #tpu.memory_space<vmem>>, vector<512x128xf32>,
    return
  }
  func.func @transform_0(%arg0: i32) -> (i32, i32) {
    %c0_i32 = arith.constant 0 : i32
    %c0_i32_0 = arith.constant 0 : i32
    %c0_i32_1 = arith.constant 0 : i32
    return %c0_i32, %c0_i32_0 : i32, i32
  }
  func.func @transform_1(%arg0: i32) -> (i32, i32) {
    %c0_i32 = arith.constant 0 : i32
    %c0_i32_0 = arith.constant 0 : i32
    %c0_i32_1 = arith.constant 0 : i32
    return %c0_i32, %c0_i32_0 : i32, i32
  }
  func.func @transform_2(%arg0: i32) -> (i32, i32) {
    %c0_i32 = arith.constant 0 : i32
    %c0_i32_0 = arith.constant 0 : i32
    %c0_i32_1 = arith.constant 0 : i32
    return %c0_i32, %c0_i32_0 : i32, i32
  }
  func.func @transform_3(%arg0: i32) -> (i32, i32) {
    %c0_i32 = arith.constant 0 : i32
    %c0_i32_0 = arith.constant 0 : i32
    %c0_i32_1 = arith.constant 0 : i32
    return %c0_i32, %c0_i32_0 : i32, i32
  }
  func.func @transform_4(%arg0: i32) -> (i32, i32) {
    %c0_i32 = arith.constant 0 : i32
    %c0_i32_0 = arith.constant 0 : i32
    %c0_i32_1 = arith.constant 0 : i32
    return %c0_i32, %c0_i32_0 : i32, i32
  }
  func.func @transform_5(%arg0: i32) -> (i32, i32) {
    %c0_i32 = arith.constant 0 : i32
    %c0_i32_0 = arith.constant 0 : i32
    %c0_i32_1 = arith.constant 0 : i32
    return %c0_i32, %c0_i32_0 : i32, i32
  }
  func.func @transform_6(%arg0: i32) -> (i32, i32) {
    %c0_i32 = arith.constant 0 : i32
    %c0_i32_0 = arith.constant 0 : i32
    %c0_i32_1 = arith.constant 0 : i32
    return %c0_i32, %c0_i32_0 : i32, i32
  }
  func.func @transform_7(%arg0: i32) -> (i32, i32) {
    %c0_i32 = arith.constant 0 : i32
    %c0_i32_0 = arith.constant 0 : i32
    %c0_i32_1 = arith.constant 0 : i32
    return %c0_i32, %c0_i32_0 : i32, i32
  }
  func.func @transform_8(%arg0: i32) -> (i32, i32) {
    %c0_i32 = arith.constant 0 : i32
    %c0_i32_0 = arith.constant 0 : i32
    %c0_i32_1 = arith.constant 0 : i32
    return %c0_i32, %c0_i32_0 : i32, i32
  }
  func.func @transform_9(%arg0: i32) -> (i32, i32) {
    %c0_i32 = arith.constant 0 : i32
    %c0_i32_0 = arith.constant 0 : i32
    %c0_i32_1 = arith.constant 0 : i32
    return %c0_i32, %c0_i32_0 : i32, i32
  }
  func.func @transform_10(%arg0: i32) -> (i32, i32) {
    %c0_i32 = arith.constant 0 : i32
    %c0_i32_0 = arith.constant 0 : i32
    %c0_i32_1 = arith.constant 0 : i32
    return %c0_i32, %c0_i32_0 : i32, i32
  }
  func.func @transform_11(%arg0: i32) -> (i32, i32) {
    %c0_i32 = arith.constant 0 : i32
    %c0_i32_0 = arith.constant 0 : i32
    %c0_i32_1 = arith.constant 0 : i32
    return %c0_i32, %c0_i32_0 : i32, i32
  }
  func.func @transform_12(%arg0: i32) -> (i32, i32) {
    %c0_i32 = arith.constant 0 : i32
    %c0_i32_0 = arith.constant 0 : i32
    %c0_i32_1 = arith.constant 0 : i32
    return %c0_i32, %c0_i32_0 : i32, i32
  }
  func.func @transform_13(%arg0: i32) -> (i32, i32) {
    %c0_i32 = arith.constant 0 : i32
    %c0_i32_0 = arith.constant 0 : i32
    %c0_i32_1 = arith.constant 0 : i32
    return %c0_i32, %c0_i32_0 : i32, i32
  }
  func.func @transform_14(%arg0: i32) -> (i32, i32) {
    %c0_i32 = arith.constant 0 : i32
    %c0_i32_0 = arith.constant 0 : i32
    %c0_i32_1 = arith.constant 0 : i32
    return %c0_i32, %c0_i32_0 : i32, i32
  }
  func.func @transform_15(%arg0: i32) -> (i32, i32) {
    %c0_i32 = arith.constant 0 : i32
    %c0_i32_0 = arith.constant 0 : i32
    %c0_i32_1 = arith.constant 0 : i32
    return %c0_i32, %c0_i32_0 : i32, i32
  }
  func.func @transform_16(%arg0: i32) -> (i32, i32) {
    %c0_i32 = arith.constant 0 : i32
    %c0_i32_0 = arith.constant 0 : i32
    %c0_i32_1 = arith.constant 0 : i32
    return %c0_i32, %c0_i32_0 : i32, i32
  }
  func.func @transform_17(%arg0: i32) -> (i32, i32) {
    %c0_i32 = arith.constant 0 : i32
    %c0_i32_0 = arith.constant 0 : i32
    %c0_i32_1 = arith.constant 0 : i32
    return %c0_i32, %c0_i32_0 : i32, i32
  }
  func.func @transform_18(%arg0: i32) -> (i32, i32) {
    %c0_i32 = arith.constant 0 : i32
    %c0_i32_0 = arith.constant 0 : i32
    %c0_i32_1 = arith.constant 0 : i32
    return %c0_i32, %c0_i32_0 : i32, i32
  }
}

</mosaic_0001>

<bundles_post_ra>
// kernel: cnn_autoencoder_forward.1
= control target key start
LH: loop header
LB: loop body
LE: loop exit
PB: predicated region body
PF: predicated region fallthrough
CT: control target
= control target key end

     0   :  { %vm360_vm0 = vcmask 523264   ;;  %vm1492_vm1 = vcmask 130048   ;;  %s15712_s1 = inlined_call_operand.vmem [shape: bf16[128,128], index: 1, kind: input, shape index: {}]   ;;  %s15713_s2 = inlined_call_operand.vmem [shape: f32[1,128], index: 2, kind: input, shape index: {}]   ;;  %s15714_s0 = inlined_call_operand.vmem [shape: bf16[128,128], index: 0, kind: input, shape index: {}]   ;;  %s15715_s3 = inlined_call_operand.vmem [shape: bf16[144,64], index: 3, kind: input, shape index: {}]   ;;  %s15716_s4 = inlined_call_operand.vmem [shape: bf16[1152,128], index: 4, kind: input, shape index: {}]   ;;  %s15717_s5 = inlined_call_operand.vmem [shape: f32[1,128], index: 5, kind: input, shape index: {}]   ;;  %s15718_s6 = inlined_call_operand.vmem [shape: bf16[144,16], index: 6, kind: input, shape index: {}]   ;;  %s15719_s7 = inlined_call_operand.vmem [shape: bf16[1152,128], index: 7, kind: input, shape index: {}]   ;;  %s15720_s8 = inlined_call_operand.vmem [shape: f32[1,128], index: 8, kind: input, shape index: {}]   ;;  %s15721_s10 = inlined_call_operand.vmem [shape: bf16[128,1152], index: 10, kind: input, shape index: {}]   ;;  %s15722_s13 = inlined_call_operand.vmem [shape: bf16[128,1152], index: 13, kind: input, shape index: {}]   ;;  %s15723_s9 = inlined_call_operand.vmem [shape: bf16[16,144], index: 9, kind: input, shape index: {}]   ;;  %s15724_s11 = inlined_call_operand.vmem [shape: f32[1,128], index: 11, kind: input, shape index: {}]   ;;  %s15725_s12 = inlined_call_operand.vmem [shape: bf16[64,144], index: 12, kind: input, shape index: {}]   ;;  %s15726_s14 = inlined_call_operand.vmem [shape: f32[1,128], index: 14, kind: input, shape index: {}]   ;;  %s15727_s16 = inlined_call_operand.vmem [shape: bf16[128,1152], index: 16, kind: input, shape index: {}]   ;;  %s15728_s15 = inlined_call_operand.vmem [shape: bf16[256,576], index: 15, kind: input, shape index: {}]   ;;  %s15729_s17 = inlined_call_operand.vmem [shape: f32[1,128], index: 17, kind: input, shape index: {}]   ;;  %s15730_s18 = inlined_call_operand.vmem [shape: f32[512,128], index: 18, kind: output, shape index: {}]  }
   0x1   :  { %15780 = sst [smem:[#allocation49_spill]] %s15712_s1  ;;  %v11410_v63 = vld [vmem:[%s15715_s3] sm:$0xff] }
   0x2   :  { %15781 = sst [smem:[#allocation50_spill]] %s15713_s2 }
   0x3   :  { %15782 = sst [smem:[#allocation51_spill]] %s15714_s0 }
   0x4   :  { %s15783_s29 = sld [smem:[#allocation49_spill]] }
   0x5   :  { %s15784_s19 = sld [smem:[#allocation51_spill]] }
   0x6   :  { %s15785_s21 = sld [smem:[#allocation50_spill]] }
   0xa   :  { %v10513_v0 = vld [vmem:[%s15783_s29 + $0x38] sm:$0xff]  ;;  %v10512_v1 = vld [vmem:[%s15783_s29 + $0x30] sm:$0xff]  ;;  %v10511_v2 = vld [vmem:[%s15783_s29 + $0x28] sm:$0xff] }
   0xb   :  { %192 = vmatpush.bf16.msra.mxu0 %v10513_v0  ;;  %v10510_v3 = vld [vmem:[%s15783_s29 + $0x20] sm:$0xff]  ;;  %v10509_v4 = vld [vmem:[%s15783_s29 + $0x18] sm:$0xff]  ;;  %v10508_v5 = vld [vmem:[%s15783_s29 + $0x10] sm:$0xff] }
   0xc   :  { %v10507_v6 = vld [vmem:[%s15783_s29 + $0x8] sm:$0xff]  ;;  %v10506_v7 = vld [vmem:[%s15783_s29] sm:$0xff]  ;;  %v10500_v10 = vld [vmem:[%s15784_s19 + $0x10] sm:$0xff] }
   0xd   :  { %v10498_v8 = vld [vmem:[%s15784_s19] sm:$0xff]  ;;  %v10499_v9 = vld [vmem:[%s15784_s19 + $0x8] sm:$0xff]  ;;  %v10501_v11 = vld [vmem:[%s15784_s19 + $0x18] sm:$0xff] }
   0xe   :  { %v10502_v12 = vld [vmem:[%s15784_s19 + $0x20] sm:$0xff]  ;;  %v10503_v13 = vld [vmem:[%s15784_s19 + $0x28] sm:$0xff]  ;;  %v10504_v14 = vld [vmem:[%s15784_s19 + $0x30] sm:$0xff] }
   0xf   :  { %193 = vmatpush.bf16.msra.mxu0 %v10512_v1  ;;  %v10505_v15 = vld [vmem:[%s15784_s19 + $0x38] sm:$0xff]  ;;  %v11397_v23 = vld [vmem:[%s15785_s21] ss:$0 sm:$0xff] }
  0x13   :  { %194 = vmatpush.bf16.msra.mxu0 %v10511_v2  ;;  %v11417_v2 = vld [vmem:[%s15715_s3 + $0x8] sm:$0xff] }
  0x17   :  { %195 = vmatpush.bf16.msra.mxu0 %v10510_v3 }
  0x1b   :  { %196 = vmatpush.bf16.msra.mxu0 %v10509_v4 }
  0x1f   :  { %197 = vmatpush.bf16.msra.mxu0 %v10508_v5  ;;  %v11424_v5 = vld [vmem:[%s15715_s3 + $0x10] sm:$0xff] }
  0x23   :  { %198 = vmatpush.bf16.msra.mxu0 %v10507_v6 }
  0x27   :  { %199 = vmatpush.bf16.msra.mxu0 %v10506_v7 }
  0x2a   :  { %200 = vmatmul.bf16.vlgmr.msra.gmra.mxu0 %v10498_v8 }
  0x3a   :  { %205 = vmatmul.bf16.gmra.mxu0 %v10499_v9 }
  0x4a   :  { %210 = vmatmul.bf16.gmra.mxu0 %v10500_v10 }
  0x5a   :  { %215 = vmatmul.bf16.gmra.mxu0 %v10501_v11 }
  0x6a   :  { %220 = vmatmul.bf16.gmra.mxu0 %v10502_v12 }
  0x7a   :  { %225 = vmatmul.bf16.gmra.mxu0 %v10503_v13 }
  0x8a   :  { %230 = vmatmul.bf16.gmra.mxu0 %v10504_v14 }
  0x9a   :  { %235 = vmatmul.bf16.gmra.mxu0 %v10505_v15 }
  0xa7   :  { %v201_v16 = vpop.f32.mrf.mxu0 }
  0xa8   :  { %v202_v40 = vadd.f32 %v11397_v23, %v201_v16 }
  0xaa   :  { %v241_v50 = vmax.f32 %v202_v40, 0.0 }
  0xac   :  { %v257_v56 = vpack.c.bf16 %v241_v50, %v241_v50  ;;  %v10522_v50 = vld [vmem:[%s15715_s3 + $0x40] sm:$0xff] }
  0xae   :  { %v344_v61 = vunpack.c.l.b16 %v257_v56  ;;  %v10525_v56 = vld [vmem:[%s15716_s4 + $0x10] sm:$0xff] }
  0xaf   :  { %v203_v17 = vpop.f32.mrf.mxu0 }
  0xb0   :  { %v204_v36 = vadd.f32 %v11397_v23, %v203_v17 }
  0xb2   :  { %v242_v46 = vmax.f32 %v204_v36, 0.0 }
  0xb4   :  { %v258_v53 = vpack.c.bf16 %v242_v46, %v242_v46  ;;  %v10521_v46 = vld [vmem:[%s15715_s3 + $0x38] sm:$0xff] }
  0xb6   :  { %v345_v59 = vunpack.c.l.b16 %v258_v53  ;;  %v10526_v53 = vld [vmem:[%s15716_s4 + $0x18] sm:$0xff] }
  0xb7   :  { %v206_v18 = vpop.f32.mrf.mxu0 }
  0xb8   :  { %v207_v32 = vadd.f32 %v11397_v23, %v206_v18  ;;  %v352_v62 = vpack.c.b16 %v345_v59, %v344_v61  ;;  %v10536_v59 = vld [vmem:[%s15716_s4 + $0x68] sm:$0xff]  ;;  %v10535_v61 = vld [vmem:[%s15716_s4 + $0x60] sm:$0xff] }
  0xba   :  { %v243_v41 = vmax.f32 %v207_v32, 0.0 }
  0xbc   :  { %v259_v51 = vpack.c.bf16 %v243_v41, %v243_v41 }
  0xbe   :  { %v346_v57 = vunpack.c.l.b16 %v259_v51  ;;  %v10528_v51 = vld [vmem:[%s15716_s4 + $0x28] sm:$0xff] }
  0xbf   :  { %v208_v19 = vpop.f32.mrf.mxu0 }
  0xc0   :  { %v209_v29 = vadd.f32 %v11397_v23, %v208_v19 }
  0xc2   :  { %v244_v37 = vmax.f32 %v209_v29, 0.0 }
  0xc4   :  { %v260_v47 = vpack.c.bf16 %v244_v37, %v244_v37 }
  0xc6   :  { %v347_v54 = vunpack.c.l.b16 %v260_v47  ;;  %v10530_v47 = vld [vmem:[%s15716_s4 + $0x38] sm:$0xff] }
  0xc7   :  { %v211_v20 = vpop.f32.mrf.mxu0 }
  0xc8   :  { %v212_v26 = vadd.f32 %v11397_v23, %v211_v20  ;;  %v353_v60 = vpack.c.b16 %v347_v54, %v346_v57  ;;  %v10538_v54 = vld [vmem:[%s15716_s4 + $0x78] sm:$0xff]  ;;  %v10537_v57 = vld [vmem:[%s15716_s4 + $0x70] sm:$0xff] }
  0xc9   :  { %1263 = vmatpush.bf16.msra.mxu3 %v10538_v54 }
  0xca   :  { %v245_v33 = vmax.f32 %v212_v26, 0.0 }
  0xcc   :  { %v261_v42 = vpack.c.bf16 %v245_v33, %v245_v33 }
  0xcd   :  { %1264 = vmatpush.bf16.msra.mxu3 %v10537_v57 }
  0xce   :  { %v348_v52 = vunpack.c.l.b16 %v261_v42 }
  0xcf   :  { %v213_v21 = vpop.f32.mrf.mxu0 }
  0xd0   :  { %v214_v25 = vadd.f32 %v11397_v23, %v213_v21 }
  0xd1   :  { %1265 = vmatpush.bf16.msra.mxu3 %v10536_v59  ;;  %v10575_v59 = vld [vmem:[%s15716_s4 + $0x1a0] sm:$0xff] }
  0xd2   :  { %v246_v30 = vmax.f32 %v214_v25, 0.0 }
  0xd4   :  { %v262_v38 = vpack.c.bf16 %v246_v30, %v246_v30 }
  0xd5   :  { %1266 = vmatpush.bf16.msra.mxu3 %v10535_v61 }
  0xd6   :  { %v349_v48 = vunpack.c.l.b16 %v262_v38 }
  0xd7   :  { %v216_v22 = vpop.f32.mrf.mxu0 }
  0xd8   :  { %v217_v24 = vadd.f32 %v11397_v23, %v216_v22  ;;  %v354_v55 = vpack.c.b16 %v349_v48, %v348_v52  ;;  %v11460_v48 = vld [vmem:[%s15715_s3 + $0x28] sm:$0xff]  ;;  %v10527_v52 = vld [vmem:[%s15716_s4 + $0x20] sm:$0xff] }
  0xda   :  { %v247_v27 = vmax.f32 %v217_v24, 0.0 }
  0xdc   :  { %v263_v34 = vpack.c.bf16 %v247_v27, %v247_v27 }
  0xde   :  { %v350_v43 = vunpack.c.l.b16 %v263_v34 }
  0xdf   :  { %v218_v28 = vpop.f32.mrf.mxu0 }
  0xe0   :  { %v219_v31 = vadd.f32 %v11397_v23, %v218_v28 }
  0xe2   :  { %v248_v35 = vmax.f32 %v219_v31, 0.0  ;;  %v11439_v31 = vld [vmem:[%s15715_s3 + $0x18] sm:$0xff] }
  0xe4   :  { %v264_v39 = vpack.c.bf16 %v248_v35, %v248_v35 }
  0xe6   :  { %v351_v44 = vunpack.c.l.b16 %v264_v39 }
  0xe7   :  { %v221_v45 = vpop.f32.mrf.mxu0 }
  0xe8   :  { %v355_v49 = vpack.c.b16 %v351_v44, %v350_v43  ;;  %v222_v18 = vadd.f32 %v11397_v23, %v221_v45  ;;  %v11446_v45 = vld [vmem:[%s15715_s3 + $0x20] sm:$0xff] }
  0xea   :  { %392 = vmatpush.bf16.msra.mxu1 %v355_v49  ;;  %v249_v28 = vmax.f32 %v222_v18, 0.0  ;;  %v10529_v49 = vld [vmem:[%s15716_s4 + $0x30] sm:$0xff] }
  0xec   :  { %v265_v36 = vpack.c.bf16 %v249_v28, %v249_v28 }
  0xee   :  { %393 = vmatpush.bf16.msra.mxu1 %v354_v55  ;;  %v522_v41 = vunpack.c.l.b16 %v265_v36  ;;  %v11486_v55 = vld [vmem:[%s15715_s3 + $0x30] sm:$0xff]  ;;  %v10559_v36 = vld [vmem:[%s15716_s4 + $0x120] sm:$0xff] }
  0xef   :  { %v223_v58 = vpop.f32.mrf.mxu0 }
  0xf0   :  { %v224_v19 = vadd.f32 %v11397_v23, %v223_v58  ;;  %v10524_v58 = vld [vmem:[%s15716_s4 + $0x8] sm:$0xff] }
  0xf2   :  { %394 = vmatpush.bf16.msra.mxu1 %v353_v60  ;;  %v250_v29 = vmax.f32 %v224_v19, 0.0  ;;  %v10523_v60 = vld [vmem:[%s15716_s4] sm:$0xff] }
  0xf4   :  { %v266_v37 = vpack.c.bf16 %v250_v29, %v250_v29 }
  0xf6   :  { %395 = vmatpush.bf16.msra.mxu1 %v352_v62  ;;  %v523_v42 = vunpack.c.l.b16 %v266_v37  ;;  %v10534_v62 = vld [vmem:[%s15716_s4 + $0x58] sm:$0xff] }
  0xf7   :  { %v226_v0 = vpop.f32.mrf.mxu0  ;;  %1267 = vmatpush.bf16.msra.mxu3 %v10534_v62  ;;  %v10574_v62 = vld [vmem:[%s15716_s4 + $0x198] sm:$0xff] }
  0xf8   :  { %v227_v11 = vadd.f32 %v11397_v23, %v226_v0  ;;  %v530_v44 = vpack.c.b16 %v523_v42, %v522_v41  ;;  %v10533_v0 = vld [vmem:[%s15716_s4 + $0x50] sm:$0xff]  ;;  %v10592_v41 = vld [vmem:[%s15716_s4 + $0x228] sm:$0xff] }
  0xf9   :  { %8520 = vmatmul.msk.bf16.vlgmr.msra.gmra.mxu1 %vm360_vm0, %v11410_v63 }
  0xfa   :  { %v251_v20 = vmax.f32 %v227_v11, 0.0 }
  0xfb   :  { %1268 = vmatpush.bf16.msra.mxu3 %v10533_v0 }
  0xfc   :  { %v267_v30 = vpack.c.bf16 %v251_v20, %v251_v20 }
  0xfe   :  { %v524_v38 = vunpack.c.l.b16 %v267_v30 }
  0xff   :  { %v228_v1 = vpop.f32.mrf.mxu0 }
 0x100   :  { %v229_v12 = vadd.f32 %v11397_v23, %v228_v1  ;;  %v10532_v1 = vld [vmem:[%s15716_s4 + $0x48] sm:$0xff] }
 0x101   :  { %1269 = vmatpush.bf16.msra.mxu3 %v10532_v1 }
 0x102   :  { %v252_v21 = vmax.f32 %v229_v12, 0.0 }
 0x104   :  { %v268_v32 = vpack.c.bf16 %v252_v21, %v252_v21 }
 0x106   :  { %v525_v39 = vunpack.c.l.b16 %v268_v32 }
 0x107   :  { %v231_v3 = vpop.f32.mrf.mxu0 }
 0x108   :  { %v232_v8 = vadd.f32 %v11397_v23, %v231_v3  ;;  %v531_v43 = vpack.c.b16 %v525_v39, %v524_v38  ;;  %v10531_v3 = vld [vmem:[%s15716_s4 + $0x40] sm:$0xff]  ;;  %v10558_v38 = vld [vmem:[%s15716_s4 + $0x118] sm:$0xff]  ;;  %v10593_v39 = vld [vmem:[%s15716_s4 + $0x230] sm:$0xff] }
 0x109   :  { %8521 = vmatmul.msk.bf16.gmra.mxu1 %vm360_vm0, %v11417_v2  ;;  %1270 = vmatpush.bf16.msra.mxu3 %v10531_v3 }
 0x10a   :  { %v253_v13 = vmax.f32 %v232_v8, 0.0 }
 0x10c   :  { %v269_v22 = vpack.c.bf16 %v253_v13, %v253_v13 }
 0x10e   :  { %v526_v33 = vunpack.c.l.b16 %v269_v22 }
 0x10f   :  { %v233_v4 = vpop.f32.mrf.mxu0 }
 0x110   :  { %v234_v9 = vadd.f32 %v11397_v23, %v233_v4 }
 0x112   :  { %v254_v14 = vmax.f32 %v234_v9, 0.0 }
 0x114   :  { %v270_v24 = vpack.c.bf16 %v254_v14, %v254_v14 }
 0x116   :  { %v527_v34 = vunpack.c.l.b16 %v270_v24 }
 0x117   :  { %v236_v6 = vpop.f32.mrf.mxu0 }
 0x118   :  { %v237_v7 = vadd.f32 %v11397_v23, %v236_v6  ;;  %v532_v40 = vpack.c.b16 %v527_v34, %v526_v33  ;;  %v10562_v34 = vld [vmem:[%s15716_s4 + $0x138] sm:$0xff] }
 0x119   :  { %8522 = vmatmul.msk.bf16.gmra.mxu1 %vm360_vm0, %v11424_v5 }
 0x11a   :  { %v255_v10 = vmax.f32 %v237_v7, 0.0 }
 0x11c   :  { %v271_v16 = vpack.c.bf16 %v255_v10, %v255_v10 }
 0x11e   :  { %v528_v26 = vunpack.c.l.b16 %v271_v16 }
 0x11f   :  { %v238_v15 = vpop.f32.mrf.mxu0 }
 0x120   :  { %v239_v17 = vadd.f32 %v11397_v23, %v238_v15 }
 0x122   :  { %v256_v25 = vmax.f32 %v239_v17, 0.0 }
 0x124   :  { %v272_v27 = vpack.c.bf16 %v256_v25, %v256_v25 }
 0x126   :  { %v529_v35 = vunpack.c.l.b16 %v272_v27 }
 0x128   :  { %v533_v23 = vpack.c.b16 %v529_v35, %v528_v26 }
 0x129   :  { %8523 = vmatmul.msk.bf16.gmra.mxu1 %vm360_vm0, %v11439_v31 }
 0x12a   :  { %542 = vmatpush.bf16.msrb.mxu1 %v533_v23  ;;  %10982 = vmatpush.bf16.msra.mxu2 %v533_v23  ;;  %v10560_v23 = vld [vmem:[%s15716_s4 + $0x128] sm:$0xff] }
 0x12e   :  { %543 = vmatpush.bf16.msrb.mxu1 %v532_v40  ;;  %10983 = vmatpush.bf16.msra.mxu2 %v532_v40  ;;  %v10557_v40 = vld [vmem:[%s15716_s4 + $0x110] sm:$0xff] }
 0x132   :  { %544 = vmatpush.bf16.msrb.mxu1 %v531_v43  ;;  %10984 = vmatpush.bf16.msra.mxu2 %v531_v43  ;;  %v10556_v43 = vld [vmem:[%s15716_s4 + $0x108] sm:$0xff] }
 0x136   :  { %545 = vmatpush.bf16.msrb.mxu1 %v530_v44  ;;  %10985 = vmatpush.bf16.msra.mxu2 %v530_v44  ;;  %v10591_v44 = vld [vmem:[%s15716_s4 + $0x220] sm:$0xff] }
 0x139   :  { %8524 = vmatmul.msk.bf16.gmra.mxu1 %vm360_vm0, %v11446_v45  ;;  %8536 = vmatmul.msk.bf16.vlgmr.msra.gmra.mxu2 %vm360_vm0, %v10521_v46 }
 0x13a   :  { %1244 = vmatpush.bf16.msrb.mxu2 %v10530_v47  ;;  %1320 = vmatpush.bf16.msra.mxu1 %v10562_v34  ;;  %v10554_v34 = vld [vmem:[%s15716_s4 + $0xf8] sm:$0xff] }
 0x13e   :  { %1245 = vmatpush.bf16.msrb.mxu2 %v10529_v49  ;;  %v10589_v49 = vld [vmem:[%s15716_s4 + $0x210] sm:$0xff] }
 0x142   :  { %1246 = vmatpush.bf16.msrb.mxu2 %v10528_v51 }
 0x146   :  { %1247 = vmatpush.bf16.msrb.mxu2 %v10527_v52  ;;  %v10587_v52 = vld [vmem:[%s15716_s4 + $0x200] sm:$0xff] }
 0x149   :  { %8525 = vmatmul.msk.bf16.gmra.mxu1 %vm360_vm0, %v11460_v48  ;;  %8537 = vmatmul.msk.bf16.gmra.mxu2 %vm360_vm0, %v10522_v50 }
 0x14a   :  { %1248 = vmatpush.bf16.msrb.mxu2 %v10526_v53  ;;  %v10578_v53 = vld [vmem:[%s15716_s4 + $0x1b8] sm:$0xff] }
 0x14e   :  { %1249 = vmatpush.bf16.msrb.mxu2 %v10525_v56  ;;  %v10576_v56 = vld [vmem:[%s15716_s4 + $0x1a8] sm:$0xff] }
 0x152   :  { %1250 = vmatpush.bf16.msrb.mxu2 %v10524_v58 }
 0x156   :  { %1251 = vmatpush.bf16.msrb.mxu2 %v10523_v60 }
 0x159   :  { %8526 = vmatmul.msk.bf16.gmra.mxu1 %vm360_vm0, %v11486_v55 }
 0x15a   :  { %1358 = vmatpush.bf16.msra.mxu2 %v10578_v53  ;;  %v10549_v53 = vld [vmem:[%s15716_s4 + $0xd0] sm:$0xff] }
 0x169   :  { %8527 = vmatmul.msk.bf16.gmra.mxu1 %vm360_vm0, %v10521_v46  ;;  %v10590_v46 = vld [vmem:[%s15716_s4 + $0x218] sm:$0xff] }
 0x176   :  { %v397_v4 = vpop.f32.mrf.mxu1 }
 0x177   :  { %v442_v6 = vpack.c.bf16 %v397_v4, %v397_v4  ;;  %v10545_v4 = vld [vmem:[%s15716_s4 + $0xb0] sm:$0xff] }
 0x179   :  { %8528 = vmatmul.msk.bf16.gmra.mxu1 %vm360_vm0, %v10522_v50  ;;  %v462_v9 = vunpack.c.l.b16 %v442_v6  ;;  %v10588_v50 = vld [vmem:[%s15716_s4 + $0x208] sm:$0xff]  ;;  %v10573_v6 = vld [vmem:[%s15716_s4 + $0x190] sm:$0xff] }
 0x17e   :  { %v399_v7 = vpop.f32.mrf.mxu1 }
 0x17f   :  { %v443_v8 = vpack.c.bf16 %v399_v7, %v399_v7  ;;  %v10544_v7 = vld [vmem:[%s15716_s4 + $0xa8] sm:$0xff] }
 0x181   :  { %v463_v10 = vunpack.c.l.b16 %v443_v8  ;;  %v10572_v8 = vld [vmem:[%s15716_s4 + $0x188] sm:$0xff] }
 0x183   :  { %v464_v11 = vpack.c.b16 %v463_v10, %v462_v9 }
 0x185   :  { %1252 = vmatmul.bf16.vlgmr.msrb.gmra.mxu2 %v464_v11 }
 0x186   :  { %v402_v12 = vpop.f32.mrf.mxu1 }
 0x187   :  { %v444_v13 = vpack.c.bf16 %v402_v12, %v402_v12  ;;  %v10543_v12 = vld [vmem:[%s15716_s4 + $0xa0] sm:$0xff] }
 0x189   :  { %8529 = vmatmul.msk.bf16.vlgmr.msrb.gmra.mxu1 %vm360_vm0, %v11410_v63  ;;  %v468_v16 = vunpack.c.l.b16 %v444_v13  ;;  %v10571_v13 = vld [vmem:[%s15716_s4 + $0x180] sm:$0xff] }
 0x18e   :  { %v404_v14 = vpop.f32.mrf.mxu1 }
 0x18f   :  { %v445_v15 = vpack.c.bf16 %v404_v14, %v404_v14 }
 0x191   :  { %v469_v17 = vunpack.c.l.b16 %v445_v15 }
 0x193   :  { %v470_v18 = vpack.c.b16 %v469_v17, %v468_v16  ;;  %v10542_v17 = vld [vmem:[%s15716_s4 + $0x98] sm:$0xff] }
 0x195   :  { %1271 = vmatmul.bf16.vlgmr.msra.gmra.mxu3 %v470_v18 }
 0x196   :  { %v407_v19 = vpop.f32.mrf.mxu1 }
 0x197   :  { %v446_v20 = vpack.c.bf16 %v407_v19, %v407_v19  ;;  %v10541_v19 = vld [vmem:[%s15716_s4 + $0x90] sm:$0xff] }
 0x199   :  { %8530 = vmatmul.msk.bf16.gmra.mxu1 %vm360_vm0, %v11417_v2  ;;  %v11526_v24 = vunpack.c.l.b16 %v446_v20  ;;  %v10540_v20 = vld [vmem:[%s15716_s4 + $0x88] sm:$0xff] }
 0x19e   :  { %v409_v21 = vpop.f32.mrf.mxu1 }
 0x19f   :  { %v447_v22 = vpack.c.bf16 %v409_v21, %v409_v21 }
 0x1a1   :  { %v11528_v25 = vunpack.c.l.b16 %v447_v22 }
 0x1a3   :  { %v476_v63 = vpack.c.b16 %v11528_v25, %v11526_v24  ;;  %v10564_v24 = vld [vmem:[%s15716_s4 + $0x148] sm:$0xff] }
 0x1a4   :  { %v10584_v25 = vld [vmem:[%s15716_s4 + $0x1e8] sm:$0xff] }
 0x1a6   :  { %v412_v26 = vpop.f32.mrf.mxu1 }
 0x1a7   :  { %v448_v27 = vpack.c.bf16 %v412_v26, %v412_v26 }
 0x1a9   :  { %8531 = vmatmul.msk.bf16.gmra.mxu1 %vm360_vm0, %v11424_v5  ;;  %v11534_v30 = vunpack.c.l.b16 %v448_v27  ;;  %v10561_v5 = vld [vmem:[%s15716_s4 + $0x130] sm:$0xff]  ;;  %v10539_v27 = vld [vmem:[%s15716_s4 + $0x80] sm:$0xff] }
 0x1aa   :  { %1321 = vmatpush.bf16.msra.mxu1 %v10561_v5 }
 0x1ae   :  { %v414_v28 = vpop.f32.mrf.mxu1  ;;  %1322 = vmatpush.bf16.msra.mxu1 %v10560_v23 }
 0x1af   :  { %v449_v29 = vpack.c.bf16 %v414_v28, %v414_v28 }
 0x1b1   :  { %v11536_v2 = vunpack.c.l.b16 %v449_v29 }
 0x1b2   :  { %1323 = vmatpush.bf16.msra.mxu1 %v10559_v36  ;;  %v10552_v36 = vld [vmem:[%s15716_s4 + $0xe8] sm:$0xff] }
 0x1b3   :  { %v482_v32 = vpack.c.b16 %v11536_v2, %v11534_v30 }
 0x1b6   :  { %v417_v33 = vpop.f32.mrf.mxu1  ;;  %1324 = vmatpush.bf16.msra.mxu1 %v10558_v38 }
 0x1b7   :  { %v450_v60 = vpack.c.bf16 %v417_v33, %v417_v33 }
 0x1b9   :  { %8532 = vmatmul.msk.bf16.gmra.mxu1 %vm360_vm0, %v11439_v31  ;;  %v10594_v31 = vld [vmem:[%s15716_s4 + $0x238] sm:$0xff]  ;;  %v486_v0 = vunpack.c.l.b16 %v450_v60 }
 0x1ba   :  { %1396 = vmatpush.bf16.msrb.mxu0 %v10594_v31  ;;  %1325 = vmatpush.bf16.msra.mxu1 %v10557_v40 }
 0x1bc   :  { %v11690_v60 = vpop.f32.mrf.mxu2 }
 0x1be   :  { %v419_v35 = vpop.f32.mrf.mxu1  ;;  %1397 = vmatpush.bf16.msrb.mxu0 %v10593_v39  ;;  %1326 = vmatpush.bf16.msra.mxu1 %v10556_v43  ;;  %v10551_v43 = vld [vmem:[%s15716_s4 + $0xe0] sm:$0xff] }
 0x1bf   :  { %v451_v58 = vpack.c.bf16 %v419_v35, %v419_v35  ;;  %v10553_v35 = vld [vmem:[%s15716_s4 + $0xf0] sm:$0xff] }
 0x1c1   :  { %v487_v61 = vunpack.c.l.b16 %v451_v58  ;;  %v10568_v58 = vld [vmem:[%s15716_s4 + $0x168] sm:$0xff] }
 0x1c2   :  { %1398 = vmatpush.bf16.msrb.mxu0 %v10592_v41 }
 0x1c3   :  { %v488_v3 = vpack.c.b16 %v487_v61, %v486_v0  ;;  %v10547_v61 = vld [vmem:[%s15716_s4 + $0xc0] sm:$0xff]  ;;  %v10586_v0 = vld [vmem:[%s15716_s4 + $0x1f8] sm:$0xff] }
 0x1c6   :  { %v11557_v37 = vpop.f32.mrf.mxu1  ;;  %1399 = vmatpush.bf16.msrb.mxu0 %v10591_v44 }
 0x1c9   :  { %8533 = vmatmul.msk.bf16.gmra.mxu1 %vm360_vm0, %v11446_v45  ;;  %v10555_v45 = vld [vmem:[%s15716_s4 + $0x100] sm:$0xff] }
 0x1ca   :  { %1327 = vmatpush.bf16.msra.mxu1 %v10555_v45  ;;  %1400 = vmatpush.bf16.msrb.mxu0 %v10590_v46 }
 0x1ce   :  { %v11573_v42 = vpop.f32.mrf.mxu1  ;;  %1401 = vmatpush.bf16.msrb.mxu0 %v10589_v49 }
 0x1d2   :  { %1402 = vmatpush.bf16.msrb.mxu0 %v10588_v50 }
 0x1d6   :  { %v11587_v47 = vpop.f32.mrf.mxu1  ;;  %1403 = vmatpush.bf16.msrb.mxu0 %v10587_v52 }
 0x1d7   :  { %v454_v31 = vpack.c.bf16 %v11587_v47, %v11587_v47  ;;  %v10570_v47 = vld [vmem:[%s15716_s4 + $0x178] sm:$0xff] }
 0x1d8   :  { %1339 = vmatpush.bf16.msrb.mxu1 %v10570_v47 }
 0x1d9   :  { %8534 = vmatmul.msk.bf16.gmra.mxu1 %vm360_vm0, %v11460_v48  ;;  %v10577_v48 = vld [vmem:[%s15716_s4 + $0x1b0] sm:$0xff]  ;;  %v498_v44 = vunpack.c.l.b16 %v454_v31  ;;  %v453_v31 = vpack.c.bf16 %v11573_v42, %v11573_v42 }
 0x1da   :  { %1359 = vmatpush.bf16.msra.mxu2 %v10577_v48  ;;  %v10569_v48 = vld [vmem:[%s15716_s4 + $0x170] sm:$0xff] }
 0x1dc   :  { %1340 = vmatpush.bf16.msrb.mxu1 %v10569_v48 }
 0x1de   :  { %v11597_v51 = vpop.f32.mrf.mxu1  ;;  %1360 = vmatpush.bf16.msra.mxu2 %v10576_v56  ;;  %v10548_v56 = vld [vmem:[%s15716_s4 + $0xc8] sm:$0xff] }
 0x1df   :  { %v455_v23 = vpack.c.bf16 %v11597_v51, %v11597_v51  ;;  %v10550_v51 = vld [vmem:[%s15716_s4 + $0xd8] sm:$0xff] }
 0x1e0   :  { %1341 = vmatpush.bf16.msrb.mxu1 %v10568_v58 }
 0x1e1   :  { %v499_v40 = vunpack.c.l.b16 %v455_v23 }
 0x1e2   :  { %1361 = vmatpush.bf16.msra.mxu2 %v10575_v59 }
 0x1e3   :  { %v500_v49 = vpack.c.b16 %v499_v40, %v498_v44  ;;  %v452_v40 = vpack.c.bf16 %v11557_v37, %v11557_v37 }
 0x1e6   :  { %v11605_v54 = vpop.f32.mrf.mxu1  ;;  %1362 = vmatpush.bf16.msra.mxu2 %v10574_v62  ;;  %v10566_v62 = vld [vmem:[%s15716_s4 + $0x158] sm:$0xff] }
 0x1e7   :  { %v456_v47 = vpack.c.bf16 %v11605_v54, %v11605_v54 }
 0x1e9   :  { %8535 = vmatmul.msk.bf16.gmra.mxu1 %vm360_vm0, %v11486_v55  ;;  %v10546_v55 = vld [vmem:[%s15716_s4 + $0xb8] sm:$0xff] }
 0x1ea   :  { %1282 = vmatpush.bf16.msrb.mxu3 %v10546_v55  ;;  %1363 = vmatpush.bf16.msra.mxu2 %v10573_v6  ;;  %v10567_v55 = vld [vmem:[%s15716_s4 + $0x160] sm:$0xff]  ;;  %v11713_v6 = vpop.f32.mrf.mxu2 }
 0x1eb   :  { %1342 = vmatpush.bf16.msrb.mxu1 %v10567_v55  ;;  %v607_v54 = vpack.c.bf16 %v11713_v6, %v11713_v6 }
 0x1ee   :  { %v11615_v57 = vpop.f32.mrf.mxu1  ;;  %1283 = vmatpush.bf16.msrb.mxu3 %v10545_v4  ;;  %1364 = vmatpush.bf16.msra.mxu2 %v10572_v8  ;;  %v10585_v4 = vld [vmem:[%s15716_s4 + $0x1f0] sm:$0xff] }
 0x1ef   :  { %1343 = vmatpush.bf16.msrb.mxu1 %v10566_v62  ;;  %v457_v42 = vpack.c.bf16 %v11615_v57, %v11615_v57  ;;  %v606_v57 = vpack.c.bf16 %v11690_v60, %v11690_v60 }
 0x1f1   :  { %v505_v58 = vunpack.c.l.b16 %v457_v42 }
 0x1f2   :  { %1284 = vmatpush.bf16.msrb.mxu3 %v10544_v7  ;;  %1365 = vmatpush.bf16.msra.mxu2 %v10571_v13  ;;  %v587_v13 = vpop.f32.mrf.mxu2 }
 0x1f6   :  { %v437_v1 = vpop.f32.mrf.mxu1  ;;  %1285 = vmatpush.bf16.msrb.mxu3 %v10543_v12  ;;  %v10583_v12 = vld [vmem:[%s15716_s4 + $0x1e0] sm:$0xff] }
 0x1f7   :  { %v458_v9 = vpack.c.bf16 %v437_v1, %v437_v1 }
 0x1f9   :  { %1328 = vmatmul.bf16.vlgmr.msra.gmra.mxu1 %v488_v3  ;;  %v510_v14 = vunpack.c.l.b16 %v458_v9  ;;  %v10565_v3 = vld [vmem:[%s15716_s4 + $0x150] sm:$0xff] }
 0x1fa   :  { %1286 = vmatpush.bf16.msrb.mxu3 %v10542_v17  ;;  %1344 = vmatpush.bf16.msrb.mxu1 %v10565_v3  ;;  %v10581_v17 = vld [vmem:[%s15716_s4 + $0x1d0] sm:$0xff]  ;;  %v655_v3 = vunpack.c.l.b16 %v607_v54 }
 0x1fe   :  { %v439_v10 = vpop.f32.mrf.mxu1  ;;  %1287 = vmatpush.bf16.msrb.mxu3 %v10541_v19  ;;  %1345 = vmatpush.bf16.msrb.mxu1 %v10564_v24  ;;  %v10580_v19 = vld [vmem:[%s15716_s4 + $0x1c8] sm:$0xff] }
 0x1ff   :  { %v459_v11 = vpack.c.bf16 %v439_v10, %v439_v10 }
 0x201   :  { %v511_v15 = vunpack.c.l.b16 %v459_v11  ;;  %v10563_v11 = vld [vmem:[%s15716_s4 + $0x140] sm:$0xff] }
 0x202   :  { %1288 = vmatpush.bf16.msrb.mxu3 %v10540_v20  ;;  %1346 = vmatpush.bf16.msrb.mxu1 %v10563_v11  ;;  %v589_v20 = vpop.f32.mrf.mxu2 }
 0x203   :  { %v512_v16 = vpack.c.b16 %v511_v15, %v510_v14  ;;  %v10582_v15 = vld [vmem:[%s15716_s4 + $0x1d8] sm:$0xff] }
 0x205   :  { %1404 = vmatmul.bf16.vlgmr.msrb.gmra.mxu0 %v512_v16 }
 0x206   :  { %v547_v18 = vpop.f32.mrf.mxu1  ;;  %1289 = vmatpush.bf16.msrb.mxu3 %v10539_v27 }
 0x207   :  { %v592_v21 = vpack.c.bf16 %v547_v18, %v547_v18 }
 0x209   :  { %v612_v28 = vunpack.c.l.b16 %v592_v21  ;;  %v608_v21 = vpack.c.bf16 %v587_v13, %v587_v13 }
 0x20a   :  { %1301 = vmatpush.bf16.msra.mxu3 %v10554_v34 }
 0x20b   :  { %v660_v34 = vunpack.c.l.b16 %v608_v21 }
 0x20e   :  { %v549_v22 = vpop.f32.mrf.mxu1  ;;  %1302 = vmatpush.bf16.msra.mxu3 %v10553_v35 }
 0x20f   :  { %v593_v26 = vpack.c.bf16 %v549_v22, %v549_v22  ;;  %v609_v22 = vpack.c.bf16 %v589_v20, %v589_v20 }
 0x211   :  { %v613_v29 = vunpack.c.l.b16 %v593_v26 }
 0x212   :  { %1303 = vmatpush.bf16.msra.mxu3 %v10552_v36 }
 0x213   :  { %v614_v33 = vpack.c.b16 %v613_v29, %v612_v28  ;;  %v10579_v29 = vld [vmem:[%s15716_s4 + $0x1c0] sm:$0xff] }
 0x215   :  { %1257 = vmatmul.bf16.gmra.mxu2 %v614_v33 }
 0x216   :  { %v552_v5 = vpop.f32.mrf.mxu1  ;;  %1304 = vmatpush.bf16.msra.mxu3 %v10551_v43  ;;  %v493_v43 = vunpack.c.l.b16 %v453_v31 }
 0x217   :  { %v594_v38 = vpack.c.bf16 %v552_v5, %v552_v5  ;;  %v661_v5 = vunpack.c.l.b16 %v609_v22 }
 0x219   :  { %v618_v45 = vunpack.c.l.b16 %v594_v38  ;;  %v662_v36 = vpack.c.b16 %v661_v5, %v660_v34 }
 0x21a   :  { %1305 = vmatpush.bf16.msra.mxu3 %v10550_v51 }
 0x21b   :  { %1409 = vmatmul.bf16.gmra.mxu0 %v662_v36 }
 0x21e   :  { %v554_v39 = vpop.f32.mrf.mxu1  ;;  %1306 = vmatpush.bf16.msra.mxu3 %v10549_v53 }
 0x21f   :  { %v595_v41 = vpack.c.bf16 %v554_v39, %v554_v39 }
 0x221   :  { %v619_v46 = vunpack.c.l.b16 %v595_v41 }
 0x222   :  { %1307 = vmatpush.bf16.msra.mxu3 %v10548_v56 }
 0x223   :  { %v620_v50 = vpack.c.b16 %v619_v46, %v618_v45  ;;  %v492_v46 = vunpack.c.l.b16 %v452_v40 }
 0x225   :  { %1276 = vmatmul.bf16.gmra.mxu3 %v620_v50  ;;  %1366 = vmatmul.bf16.vlgmr.msra.gmra.mxu2 %v500_v49  ;;  %v494_v49 = vpack.c.b16 %v493_v43, %v492_v46 }
 0x226   :  { %v557_v52 = vpop.f32.mrf.mxu1  ;;  %1308 = vmatpush.bf16.msra.mxu3 %v10547_v61  ;;  %v504_v61 = vunpack.c.l.b16 %v456_v47 }
 0x227   :  { %v596_v7 = vpack.c.bf16 %v557_v52, %v557_v52 }
 0x229   :  { %v624_v9 = vunpack.c.l.b16 %v596_v7  ;;  %v1272_v7 = vpop.f32.mrf.mxu3 }
 0x22e   :  { %v559_v59 = vpop.f32.mrf.mxu1 }
 0x22f   :  { %v597_v8 = vpack.c.bf16 %v559_v59, %v559_v59 }
 0x231   :  { %v625_v10 = vunpack.c.l.b16 %v597_v8  ;;  %v1274_v8 = vpop.f32.mrf.mxu3 }
 0x233   :  { %v626_v14 = vpack.c.b16 %v625_v10, %v624_v9 }
 0x235   :  { %1290 = vmatmul.bf16.vlgmr.msrb.gmra.mxu3 %v476_v63 }
 0x236   :  { %v562_v1 = vpop.f32.mrf.mxu1  ;;  %1377 = vmatpush.bf16.msrb.mxu3 %v10586_v0  ;;  %v506_v0 = vpack.c.b16 %v505_v58, %v504_v61 }
 0x237   :  { %v598_v38 = vpack.c.bf16 %v562_v1, %v562_v1  ;;  %v654_v1 = vunpack.c.l.b16 %v606_v57 }
 0x239   :  { %v630_v44 = vunpack.c.l.b16 %v598_v38 }
 0x23a   :  { %1378 = vmatpush.bf16.msrb.mxu3 %v10585_v4  ;;  %v656_v4 = vpack.c.b16 %v655_v3, %v654_v1 }
 0x23e   :  { %v564_v63 = vpop.f32.mrf.mxu1  ;;  %1379 = vmatpush.bf16.msrb.mxu3 %v10584_v25 }
 0x23f   :  { %v599_v39 = vpack.c.bf16 %v564_v63, %v564_v63 }
 0x241   :  { %v631_v45 = vunpack.c.l.b16 %v599_v39 }
 0x242   :  { %1380 = vmatpush.bf16.msrb.mxu3 %v10583_v12  ;;  %v1253_v12 = vpop.f32.mrf.mxu2 }
 0x243   :  { %v632_v30 = vpack.c.b16 %v631_v45, %v630_v44 }
 0x245   :  { %1295 = vmatmul.bf16.gmra.mxu3 %v626_v14 }
 0x246   :  { %v567_v16 = vpop.f32.mrf.mxu1  ;;  %1381 = vmatpush.bf16.msrb.mxu3 %v10582_v15 }
 0x247   :  { %v600_v18 = vpack.c.bf16 %v567_v16, %v567_v16 }
 0x249   :  { %v636_v27 = vunpack.c.l.b16 %v600_v18 }
 0x24a   :  { %1382 = vmatpush.bf16.msrb.mxu3 %v10581_v17  ;;  %v1255_v15 = vpop.f32.mrf.mxu2 }
 0x24e   :  { %v569_v26 = vpop.f32.mrf.mxu1  ;;  %1383 = vmatpush.bf16.msrb.mxu3 %v10580_v19  ;;  %v10987_v19 = vld [vmem:[%s15717_s5] ss:$0 sm:$0xff] }
 0x24f   :  { %v601_v28 = vpack.c.bf16 %v569_v26, %v569_v26  ;;  %v1254_v21 = vadd.f32 %v10987_v19, %v1253_v12 }
 0x251   :  { %v637_v33 = vunpack.c.l.b16 %v601_v28  ;;  %v1273_v26 = vadd.f32 %v1272_v7, %v1254_v21 }
 0x252   :  { %1384 = vmatpush.bf16.msrb.mxu3 %v10579_v29 }
 0x253   :  { %v638_v35 = vpack.c.b16 %v637_v33, %v636_v27  ;;  %v1256_v33 = vadd.f32 %v10987_v19, %v1255_v15 }
 0x255   :  { %1309 = vmatmul.bf16.vlgmr.msra.gmra.mxu3 %v482_v32  ;;  %1333 = vmatmul.bf16.gmra.mxu1 %v638_v35  ;;  %v1275_v35 = vadd.f32 %v1274_v8, %v1256_v33  ;;  %v10597_v33 = vld [vmem:[%s15718_s6 + $0x10] sm:$0xff] }
 0x256   :  { %v572_v23 = vpop.f32.mrf.mxu1 }
 0x257   :  { %v602_v32 = vpack.c.bf16 %v572_v23, %v572_v23 }
 0x259   :  { %v642_v52 = vunpack.c.l.b16 %v602_v32 }
 0x25e   :  { %v574_v41 = vpop.f32.mrf.mxu1 }
 0x25f   :  { %v603_v50 = vpack.c.bf16 %v574_v41, %v574_v41 }
 0x261   :  { %v643_v53 = vunpack.c.l.b16 %v603_v50 }
 0x263   :  { %v644_v55 = vpack.c.b16 %v643_v53, %v642_v52 }
 0x265   :  { %1314 = vmatmul.bf16.gmra.mxu3 %v632_v30  ;;  %1347 = vmatmul.bf16.vlgmr.msrb.gmra.mxu1 %v494_v49 }
 0x266   :  { %v577_v2 = vpop.f32.mrf.mxu1 }
 0x267   :  { %v604_v51 = vpack.c.bf16 %v577_v2, %v577_v2 }
 0x269   :  { %v648_v48 = vunpack.c.l.b16 %v604_v51 }
 0x26e   :  { %v579_v37 = vpop.f32.mrf.mxu1 }
 0x26f   :  { %v605_v56 = vpack.c.bf16 %v579_v37, %v579_v37 }
 0x271   :  { %v649_v59 = vunpack.c.l.b16 %v605_v56 }
 0x273   :  { %v650_v62 = vpack.c.b16 %v649_v59, %v648_v48 }
 0x275   :  { %1352 = vmatmul.bf16.gmra.mxu1 %v644_v55  ;;  %1371 = vmatmul.bf16.gmra.mxu2 %v650_v62 }
 0x276   :  { %1385 = vmatmul.bf16.vlgmr.msrb.gmra.mxu3 %v506_v0  ;;  %v1329_v10 = vpop.f32.mrf.mxu1 }
 0x27e   :  { %v1331_v14 = vpop.f32.mrf.mxu1 }
 0x282   :  { %v1405_v38 = vpop.f32.mrf.mxu0 }
 0x286   :  { %1390 = vmatmul.bf16.gmra.mxu3 %v656_v4 }
 0x28a   :  { %v1407_v51 = vpop.f32.mrf.mxu0 }
 0x298   :  { %v1258_v17 = vpop.f32.mrf.mxu2  ;;  %v1410_v7 = vpop.f32.mrf.mxu0 }
 0x299   :  { %v1259_v44 = vadd.f32 %v10987_v19, %v1258_v17 }
 0x2a0   :  { %v1260_v20 = vpop.f32.mrf.mxu2 }
 0x2a1   :  { %v1261_v53 = vadd.f32 %v10987_v19, %v1260_v20  ;;  %v1412_v19 = vpop.f32.mrf.mxu0 }
 0x2a8   :  { %v1277_v24 = vpop.f32.mrf.mxu3  ;;  %v1367_v5 = vpop.f32.mrf.mxu2 }
 0x2a9   :  { %v1278_v30 = vadd.f32 %v1277_v24, %v1259_v44  ;;  %v10618_v44 = vld [vmem:[%s15719_s7 + $0x70] sm:$0xff] }
 0x2b0   :  { %v1279_v25 = vpop.f32.mrf.mxu3  ;;  %v1369_v49 = vpop.f32.mrf.mxu2 }
 0x2b1   :  { %v1280_v59 = vadd.f32 %v1279_v25, %v1261_v53  ;;  %v10595_v25 = vld [vmem:[%s15718_s6] sm:$0xff] }
 0x2b2   :  { %v10603_v53 = vld [vmem:[%s15718_s6 + $0x40] sm:$0xff] }
 0x2b8   :  { %v1291_v63 = vpop.f32.mrf.mxu3 }
 0x2b9   :  { %v1292_v27 = vadd.f32 %v1291_v63, %v1273_v26 }
 0x2c0   :  { %v1293_v9 = vpop.f32.mrf.mxu3 }
 0x2c1   :  { %v1294_v36 = vadd.f32 %v1293_v9, %v1275_v35  ;;  %v10611_v35 = vld [vmem:[%s15719_s7 + $0x38] sm:$0xff] }
 0x2c2   :  { %2358 = vmatpush.bf16.msra.mxu3 %v10611_v35 }
 0x2c8   :  { %v1296_v11 = vpop.f32.mrf.mxu3 }
 0x2c9   :  { %v1297_v32 = vadd.f32 %v1296_v11, %v1278_v30  ;;  %v10616_v30 = vld [vmem:[%s15719_s7 + $0x60] sm:$0xff] }
 0x2d0   :  { %v1298_v13 = vpop.f32.mrf.mxu3 }
 0x2d1   :  { %v1299_v62 = vadd.f32 %v1298_v13, %v1280_v59  ;;  %v10635_v59 = vld [vmem:[%s15719_s7 + $0xf8] sm:$0xff] }
 0x2d2   :  { %v1334_v16 = vpop.f32.mrf.mxu1 }
 0x2d8   :  { %v1310_v60 = vpop.f32.mrf.mxu3 }
 0x2d9   :  { %v1311_v29 = vadd.f32 %v1310_v60, %v1292_v27 }
 0x2da   :  { %v1336_v18 = vpop.f32.mrf.mxu1 }
 0x2db   :  { %v1330_v23 = vadd.f32 %v1329_v10, %v1311_v29  ;;  %v10596_v29 = vld [vmem:[%s15718_s6 + $0x8] sm:$0xff] }
 0x2e0   :  { %v1312_v6 = vpop.f32.mrf.mxu3 }
 0x2e1   :  { %v1313_v39 = vadd.f32 %v1312_v6, %v1294_v36  ;;  %v10610_v36 = vld [vmem:[%s15719_s7 + $0x30] sm:$0xff] }
 0x2e2   :  { %v1348_v28 = vpop.f32.mrf.mxu1  ;;  %2359 = vmatpush.bf16.msra.mxu3 %v10610_v36  ;;  %v10638_v36 = vld [vmem:[%s15719_s7 + $0x110] sm:$0xff] }
 0x2e3   :  { %v1349_v31 = vadd.f32 %v1348_v28, %v1330_v23  ;;  %v1332_v45 = vadd.f32 %v1331_v14, %v1313_v39  ;;  %v10600_v23 = vld [vmem:[%s15718_s6 + $0x28] sm:$0xff]  ;;  %v10607_v39 = vld [vmem:[%s15719_s7 + $0x18] sm:$0xff] }
 0x2e5   :  { %v1368_v41 = vadd.f32 %v1367_v5, %v1349_v31  ;;  %v10599_v5 = vld [vmem:[%s15718_s6 + $0x20] sm:$0xff]  ;;  %v10609_v31 = vld [vmem:[%s15719_s7 + $0x28] sm:$0xff] }
 0x2e6   :  { %2360 = vmatpush.bf16.msra.mxu3 %v10609_v31  ;;  %v10650_v31 = vld [vmem:[%s15719_s7 + $0x170] sm:$0xff] }
 0x2e8   :  { %v1315_v22 = vpop.f32.mrf.mxu3 }
 0x2e9   :  { %v1316_v42 = vadd.f32 %v1315_v22, %v1297_v32  ;;  %v10602_v32 = vld [vmem:[%s15718_s6 + $0x38] sm:$0xff] }
 0x2ea   :  { %v1350_v40 = vpop.f32.mrf.mxu1 }
 0x2eb   :  { %v1351_v2 = vadd.f32 %v1350_v40, %v1332_v45  ;;  %v1335_v61 = vadd.f32 %v1334_v16, %v1316_v42  ;;  %v10619_v40 = vld [vmem:[%s15719_s7 + $0x78] sm:$0xff]  ;;  %v10605_v45 = vld [vmem:[%s15719_s7 + $0x8] sm:$0xff] }
 0x2ec   :  { %2377 = vmatpush.bf16.msra.mxu0 %v10619_v40  ;;  %v10613_v42 = vld [vmem:[%s15719_s7 + $0x48] sm:$0xff] }
 0x2ed   :  { %v1370_v47 = vadd.f32 %v1369_v49, %v1351_v2  ;;  %v10604_v49 = vld [vmem:[%s15719_s7] sm:$0xff]  ;;  %v10615_v2 = vld [vmem:[%s15719_s7 + $0x58] sm:$0xff]  ;;  %v10649_v40 = vld [vmem:[%s15719_s7 + $0x168] sm:$0xff] }
 0x2f0   :  { %v1317_v34 = vpop.f32.mrf.mxu3  ;;  %2378 = vmatpush.bf16.msra.mxu0 %v10618_v44 }
 0x2f1   :  { %v1318_v1 = vadd.f32 %v1317_v34, %v1299_v62  ;;  %v10598_v34 = vld [vmem:[%s15718_s6 + $0x18] sm:$0xff]  ;;  %v10622_v62 = vld [vmem:[%s15719_s7 + $0x90] sm:$0xff] }
 0x2f2   :  { %v1353_v37 = vpop.f32.mrf.mxu1 }
 0x2f3   :  { %v1354_v0 = vadd.f32 %v1353_v37, %v1335_v61  ;;  %v1337_v11 = vadd.f32 %v1336_v18, %v1318_v1  ;;  %v10612_v37 = vld [vmem:[%s15719_s7 + $0x40] sm:$0xff] }
 0x2f8   :  { %v1372_v58 = vpop.f32.mrf.mxu2 }
 0x2f9   :  { %v1386_v43 = vpop.f32.mrf.mxu3  ;;  %v1373_v3 = vadd.f32 %v1372_v58, %v1354_v0  ;;  %v10623_v58 = vld [vmem:[%s15719_s7 + $0x98] sm:$0xff]  ;;  %v10634_v0 = vld [vmem:[%s15719_s7 + $0xf0] sm:$0xff] }
 0x2fa   :  { %v1387_v46 = vadd.f32 %v1386_v43, %v1368_v41  ;;  %v1355_v10 = vpop.f32.mrf.mxu1  ;;  %v10601_v41 = vld [vmem:[%s15718_s6 + $0x30] sm:$0xff] }
 0x2fb   :  { %v1356_v13 = vadd.f32 %v1355_v10, %v1337_v11  ;;  %v10606_v43 = vld [vmem:[%s15719_s7 + $0x10] sm:$0xff]  ;;  %v10643_v10 = vld [vmem:[%s15719_s7 + $0x138] sm:$0xff] }
 0x2fc   :  { %v1406_v50 = vadd.f32 %v1405_v38, %v1387_v46  ;;  %v10608_v38 = vld [vmem:[%s15719_s7 + $0x20] sm:$0xff]  ;;  %v10617_v46 = vld [vmem:[%s15719_s7 + $0x68] sm:$0xff] }
 0x2fd   :  { %2361 = vmatpush.bf16.msra.mxu3 %v10608_v38  ;;  %2379 = vmatpush.bf16.msra.mxu0 %v10617_v46 }
 0x2fe   :  { %v1415_v48 = vmax.f32 %v1406_v50, 0.0  ;;  %v10614_v50 = vld [vmem:[%s15719_s7 + $0x50] sm:$0xff] }
 0x300   :  { %v1419_v57 = vpack.c.bf16 %v1415_v48, %v1415_v48  ;;  %v1374_v14 = vpop.f32.mrf.mxu2 }
 0x301   :  { %v1388_v52 = vpop.f32.mrf.mxu3  ;;  %v1375_v60 = vadd.f32 %v1374_v14, %v1356_v13  ;;  %2362 = vmatpush.bf16.msra.mxu3 %v10607_v39  ;;  %2380 = vmatpush.bf16.msra.mxu0 %v10616_v30  ;;  %v10642_v13 = vld [vmem:[%s15719_s7 + $0x130] sm:$0xff]  ;;  %v10637_v39 = vld [vmem:[%s15719_s7 + $0x108] sm:$0xff]  ;;  %v10636_v30 = vld [vmem:[%s15719_s7 + $0x100] sm:$0xff] }
 0x302   :  { %v1389_v56 = vadd.f32 %v1388_v52, %v1370_v47  ;;  %v1488_v24 = vunpack.c.l.b16 %v1419_v57  ;;  %v10626_v47 = vld [vmem:[%s15719_s7 + $0xb0] sm:$0xff]  ;;  %v10625_v52 = vld [vmem:[%s15719_s7 + $0xa8] sm:$0xff] }
 0x304   :  { %v1408_v55 = vadd.f32 %v1407_v51, %v1389_v56  ;;  %v10627_v51 = vld [vmem:[%s15719_s7 + $0xb8] sm:$0xff]  ;;  %v10624_v56 = vld [vmem:[%s15719_s7 + $0xa0] sm:$0xff] }
 0x305   :  { %2363 = vmatpush.bf16.msra.mxu3 %v10606_v43  ;;  %2381 = vmatpush.bf16.msra.mxu0 %v10615_v2  ;;  %v10648_v2 = vld [vmem:[%s15719_s7 + $0x160] sm:$0xff] }
 0x306   :  { %v1416_v54 = vmax.f32 %v1408_v55, 0.0 }
 0x308   :  { %v1420_v4 = vpack.c.bf16 %v1416_v54, %v1416_v54 }
 0x309   :  { %v1391_v8 = vpop.f32.mrf.mxu3  ;;  %2364 = vmatpush.bf16.msra.mxu3 %v10605_v45  ;;  %2382 = vmatpush.bf16.msra.mxu0 %v10614_v50 }
 0x30a   :  { %v1489_v63 = vunpack.c.l.b16 %v1420_v4  ;;  %v1392_v9 = vadd.f32 %v1391_v8, %v1373_v3  ;;  %v10621_v3 = vld [vmem:[%s15719_s7 + $0x88] sm:$0xff] }
 0x30b   :  { %v10633_v4 = vld [vmem:[%s15719_s7 + $0xe8] sm:$0xff] }
 0x30c   :  { %v1490_v12 = vpack.c.b16 %v1489_v63, %v1488_v24  ;;  %v1411_v15 = vadd.f32 %v1410_v7, %v1392_v9  ;;  %v10620_v24 = vld [vmem:[%s15719_s7 + $0x80] sm:$0xff]  ;;  %v10631_v9 = vld [vmem:[%s15719_s7 + $0xd8] sm:$0xff] }
 0x30d   :  { %2365 = vmatpush.bf16.msra.mxu3 %v10604_v49  ;;  %2383 = vmatpush.bf16.msra.mxu0 %v10613_v42  ;;  %v10632_v63 = vld [vmem:[%s15719_s7 + $0xe0] sm:$0xff] }
 0x30e   :  { %1527 = vmatpush.bf16.msra.mxu1 %v1490_v12  ;;  %v1417_v17 = vmax.f32 %v1411_v15, 0.0 }
 0x310   :  { %v1421_v21 = vpack.c.bf16 %v1417_v17, %v1417_v17  ;;  %v10629_v17 = vld [vmem:[%s15719_s7 + $0xc8] sm:$0xff] }
 0x311   :  { %v1393_v16 = vpop.f32.mrf.mxu3  ;;  %8862 = vmatmul.msk.bf16.vlgmr.msra.gmra.mxu1 %vm1492_vm1, %v10595_v25  ;;  %2396 = vmatpush.bf16.msrb.mxu3 %v10627_v51 }
 0x312   :  { %v1394_v6 = vadd.f32 %v1393_v16, %v1375_v60  ;;  %v1648_v26 = vunpack.c.l.b16 %v1421_v21  ;;  %2384 = vmatpush.bf16.msra.mxu0 %v10612_v37  ;;  %v10647_v37 = vld [vmem:[%s15719_s7 + $0x158] sm:$0xff] }
 0x314   :  { %v1413_v20 = vadd.f32 %v1412_v19, %v1394_v6  ;;  %v10641_v6 = vld [vmem:[%s15719_s7 + $0x128] sm:$0xff] }
 0x315   :  { %2397 = vmatpush.bf16.msrb.mxu3 %v10626_v47 }
 0x316   :  { %v1418_v18 = vmax.f32 %v1413_v20, 0.0  ;;  %2415 = vmatpush.bf16.msrb.mxu0 %v10635_v59 }
 0x318   :  { %v1422_v22 = vpack.c.bf16 %v1418_v18, %v1418_v18 }
 0x319   :  { %2398 = vmatpush.bf16.msrb.mxu3 %v10625_v52  ;;  %v10659_v52 = vld [vmem:[%s15719_s7 + $0x1b8] sm:$0xff] }
 0x31a   :  { %v1649_v27 = vunpack.c.l.b16 %v1422_v22  ;;  %2416 = vmatpush.bf16.msrb.mxu0 %v10634_v0 }
 0x31c   :  { %v1650_v28 = vpack.c.b16 %v1649_v27, %v1648_v26  ;;  %v10628_v26 = vld [vmem:[%s15719_s7 + $0xc0] sm:$0xff] }
 0x31d   :  { %2399 = vmatpush.bf16.msrb.mxu3 %v10624_v56  ;;  %v10640_v27 = vld [vmem:[%s15719_s7 + $0x120] sm:$0xff]  ;;  %v10646_v56 = vld [vmem:[%s15719_s7 + $0x150] sm:$0xff] }
 0x31e   :  { %1659 = vmatpush.bf16.msrb.mxu2 %v1650_v28  ;;  %2417 = vmatpush.bf16.msrb.mxu0 %v10633_v4  ;;  %v10644_v4 = vld [vmem:[%s15719_s7 + $0x140] sm:$0xff] }
 0x321   :  { %8863 = vmatmul.msk.bf16.gmra.mxu1 %vm1492_vm1, %v10596_v29  ;;  %8871 = vmatmul.msk.bf16.vlgmr.msrb.gmra.mxu2 %vm1492_vm1, %v10595_v25  ;;  %v10630_v25 = vld [vmem:[%s15719_s7 + $0xd0] sm:$0xff] }
 0x322   :  { %2400 = vmatpush.bf16.msrb.mxu3 %v10623_v58  ;;  %2418 = vmatpush.bf16.msrb.mxu0 %v10632_v63  ;;  %v10658_v58 = vld [vmem:[%s15719_s7 + $0x1b0] sm:$0xff] }
 0x326   :  { %2401 = vmatpush.bf16.msrb.mxu3 %v10622_v62  ;;  %2419 = vmatpush.bf16.msrb.mxu0 %v10631_v9 }
 0x32a   :  { %2402 = vmatpush.bf16.msrb.mxu3 %v10621_v3  ;;  %2420 = vmatpush.bf16.msrb.mxu0 %v10630_v25 }
 0x32e   :  { %2403 = vmatpush.bf16.msrb.mxu3 %v10620_v24  ;;  %2421 = vmatpush.bf16.msrb.mxu0 %v10629_v17  ;;  %v10665_v17 = vld [vmem:[%s15719_s7 + $0x1e8] sm:$0xff] }
 0x331   :  { %8864 = vmatmul.msk.bf16.gmra.mxu1 %vm1492_vm1, %v10597_v33  ;;  %8872 = vmatmul.msk.bf16.gmra.mxu2 %vm1492_vm1, %v10596_v29 }
 0x332   :  { %2422 = vmatpush.bf16.msrb.mxu0 %v10628_v26  ;;  %v10652_v26 = vld [vmem:[%s15719_s7 + $0x180] sm:$0xff] }
 0x341   :  { %8865 = vmatmul.msk.bf16.gmra.mxu1 %vm1492_vm1, %v10598_v34  ;;  %8873 = vmatmul.msk.bf16.gmra.mxu2 %vm1492_vm1, %v10597_v33 }
 0x351   :  { %8866 = vmatmul.msk.bf16.gmra.mxu1 %vm1492_vm1, %v10599_v5  ;;  %8874 = vmatmul.msk.bf16.gmra.mxu2 %vm1492_vm1, %v10598_v34  ;;  %v10639_v34 = vld [vmem:[%s15719_s7 + $0x118] sm:$0xff] }
 0x361   :  { %8867 = vmatmul.msk.bf16.gmra.mxu1 %vm1492_vm1, %v10600_v23  ;;  %8875 = vmatmul.msk.bf16.gmra.mxu2 %vm1492_vm1, %v10599_v5  ;;  %v10651_v5 = vld [vmem:[%s15719_s7 + $0x178] sm:$0xff] }
 0x371   :  { %8868 = vmatmul.msk.bf16.gmra.mxu1 %vm1492_vm1, %v10601_v41  ;;  %8876 = vmatmul.msk.bf16.gmra.mxu2 %vm1492_vm1, %v10600_v23 }
 0x381   :  { %8869 = vmatmul.msk.bf16.gmra.mxu1 %vm1492_vm1, %v10602_v32  ;;  %8877 = vmatmul.msk.bf16.gmra.mxu2 %vm1492_vm1, %v10601_v41 }
 0x38e   :  { %v1529_v48 = vpop.f32.mrf.mxu1 }
 0x38f   :  { %v1574_v61 = vpack.c.bf16 %v1529_v48, %v1529_v48 }
 0x391   :  { %8870 = vmatmul.msk.bf16.gmra.mxu1 %vm1492_vm1, %v10603_v53  ;;  %8878 = vmatmul.msk.bf16.gmra.mxu2 %vm1492_vm1, %v10602_v32  ;;  %v1594_v54 = vunpack.c.l.b16 %v1574_v61  ;;  %v10645_v61 = vld [vmem:[%s15719_s7 + $0x148] sm:$0xff] }
 0x396   :  { %v1531_v55 = vpop.f32.mrf.mxu1 }
 0x397   :  { %v1575_v57 = vpack.c.bf16 %v1531_v55, %v1531_v55  ;;  %v10657_v55 = vld [vmem:[%s15719_s7 + $0x1a8] sm:$0xff] }
 0x399   :  { %v1595_v1 = vunpack.c.l.b16 %v1575_v57 }
 0x39b   :  { %v1596_v7 = vpack.c.b16 %v1595_v1, %v1594_v54 }
 0x39d   :  { %2366 = vmatmul.bf16.vlgmr.msra.gmra.mxu3 %v1596_v7  ;;  %v10656_v7 = vld [vmem:[%s15719_s7 + $0x1a0] sm:$0xff] }
 0x39e   :  { %v1534_v8 = vpop.f32.mrf.mxu1  ;;  %2434 = vmatpush.bf16.msra.mxu3 %v10643_v10 }
 0x39f   :  { %v1576_v12 = vpack.c.bf16 %v1534_v8, %v1534_v8 }
 0x3a1   :  { %8879 = vmatmul.msk.bf16.gmra.mxu2 %vm1492_vm1, %v10603_v53  ;;  %v1600_v60 = vunpack.c.l.b16 %v1576_v12  ;;  %v10667_v12 = vld [vmem:[%s15719_s7 + $0x1f8] sm:$0xff] }
 0x3a2   :  { %2435 = vmatpush.bf16.msra.mxu3 %v10642_v13  ;;  %v10654_v13 = vld [vmem:[%s15719_s7 + $0x190] sm:$0xff] }
 0x3a4   :  { %v1661_v11 = vpop.f32.mrf.mxu2 }
 0x3a5   :  { %v1706_v19 = vpack.c.bf16 %v1661_v11, %v1661_v11  ;;  %v10655_v11 = vld [vmem:[%s15719_s7 + $0x198] sm:$0xff] }
 0x3a6   :  { %v1536_v14 = vpop.f32.mrf.mxu1  ;;  %2436 = vmatpush.bf16.msra.mxu3 %v10641_v6 }
 0x3a7   :  { %v1577_v15 = vpack.c.bf16 %v1536_v14, %v1536_v14  ;;  %v1726_v28 = vunpack.c.l.b16 %v1706_v19 }
 0x3a9   :  { %v1601_v16 = vunpack.c.l.b16 %v1577_v15  ;;  %v10666_v15 = vld [vmem:[%s15719_s7 + $0x1f0] sm:$0xff] }
 0x3aa   :  { %2437 = vmatpush.bf16.msra.mxu3 %v10640_v27  ;;  %v10664_v27 = vld [vmem:[%s15719_s7 + $0x1e0] sm:$0xff] }
 0x3ab   :  { %v1602_v20 = vpack.c.b16 %v1601_v16, %v1600_v60  ;;  %v10653_v16 = vld [vmem:[%s15719_s7 + $0x188] sm:$0xff] }
 0x3ac   :  { %v1663_v21 = vpop.f32.mrf.mxu2 }
 0x3ad   :  { %v1707_v18 = vpack.c.bf16 %v1663_v21, %v1663_v21  ;;  %2385 = vmatmul.bf16.vlgmr.msra.gmra.mxu0 %v1602_v20 }
 0x3ae   :  { %v1539_v22 = vpop.f32.mrf.mxu1  ;;  %2438 = vmatpush.bf16.msra.mxu3 %v10639_v34  ;;  %2453 = vmatpush.bf16.msra.mxu0 %v10651_v5 }
 0x3af   :  { %v1727_v29 = vunpack.c.l.b16 %v1707_v18  ;;  %v1578_v41 = vpack.c.bf16 %v1539_v22, %v1539_v22 }
 0x3b1   :  { %v1728_v33 = vpack.c.b16 %v1727_v29, %v1726_v28  ;;  %v1606_v32 = vunpack.c.l.b16 %v1578_v41  ;;  %v10661_v41 = vld [vmem:[%s15719_s7 + $0x1c8] sm:$0xff] }
 0x3b2   :  { %2439 = vmatpush.bf16.msra.mxu3 %v10638_v36  ;;  %2454 = vmatpush.bf16.msra.mxu0 %v10650_v31 }
 0x3b3   :  { %2371 = vmatmul.bf16.gmra.mxu3 %v1728_v33 }
 0x3b4   :  { %v1666_v35 = vpop.f32.mrf.mxu2 }
 0x3b5   :  { %v1708_v43 = vpack.c.bf16 %v1666_v35, %v1666_v35  ;;  %v10663_v35 = vld [vmem:[%s15719_s7 + $0x1d8] sm:$0xff] }
 0x3b6   :  { %v1541_v23 = vpop.f32.mrf.mxu1  ;;  %2440 = vmatpush.bf16.msra.mxu3 %v10637_v39  ;;  %2455 = vmatpush.bf16.msra.mxu0 %v10649_v40  ;;  %v10674_v39 = vld [vmem:[%s15719_s7 + $0x230] sm:$0xff] }
 0x3b7   :  { %v1579_v38 = vpack.c.bf16 %v1541_v23, %v1541_v23  ;;  %v1732_v50 = vunpack.c.l.b16 %v1708_v43  ;;  %v10675_v23 = vld [vmem:[%s15719_s7 + $0x238] sm:$0xff]  ;;  %v10673_v43 = vld [vmem:[%s15719_s7 + $0x228] sm:$0xff] }
 0x3b9   :  { %v1607_v45 = vunpack.c.l.b16 %v1579_v38  ;;  %v10662_v38 = vld [vmem:[%s15719_s7 + $0x1d0] sm:$0xff] }
 0x3ba   :  { %2441 = vmatpush.bf16.msra.mxu3 %v10636_v30  ;;  %2456 = vmatpush.bf16.msra.mxu0 %v10648_v2 }
 0x3bb   :  { %v1608_v42 = vpack.c.b16 %v1607_v45, %v1606_v32  ;;  %v10660_v32 = vld [vmem:[%s15719_s7 + $0x1c0] sm:$0xff] }
 0x3bc   :  { %v1668_v44 = vpop.f32.mrf.mxu2 }
 0x3bd   :  { %v1709_v46 = vpack.c.bf16 %v1668_v44, %v1668_v44 }
 0x3be   :  { %v1544_v49 = vpop.f32.mrf.mxu1  ;;  %2457 = vmatpush.bf16.msra.mxu0 %v10647_v37 }
 0x3bf   :  { %v1733_v51 = vunpack.c.l.b16 %v1709_v46  ;;  %v1580_v62 = vpack.c.bf16 %v1544_v49, %v1544_v49 }
 0x3c1   :  { %v1734_v47 = vpack.c.b16 %v1733_v51, %v1732_v50  ;;  %v1612_v8 = vunpack.c.l.b16 %v1580_v62  ;;  %v10672_v50 = vld [vmem:[%s15719_s7 + $0x220] sm:$0xff] }
 0x3c2   :  { %2458 = vmatpush.bf16.msra.mxu0 %v10646_v56 }
 0x3c3   :  { %2390 = vmatmul.bf16.gmra.mxu0 %v1734_v47  ;;  %2404 = vmatmul.bf16.vlgmr.msrb.gmra.mxu3 %v1608_v42 }
 0x3c4   :  { %v1671_v53 = vpop.f32.mrf.mxu2  ;;  %2472 = vmatpush.bf16.msrb.mxu3 %v10659_v52 }
 0x3c5   :  { %v1710_v0 = vpack.c.bf16 %v1671_v53, %v1671_v53  ;;  %v10671_v53 = vld [vmem:[%s15719_s7 + $0x218] sm:$0xff] }
 0x3c6   :  { %v1546_v48 = vpop.f32.mrf.mxu1  ;;  %2459 = vmatpush.bf16.msra.mxu0 %v10645_v61  ;;  %v10669_v61 = vld [vmem:[%s15719_s7 + $0x208] sm:$0xff] }
 0x3c7   :  { %v1581_v59 = vpack.c.bf16 %v1546_v48, %v1546_v48  ;;  %v1738_v24 = vunpack.c.l.b16 %v1710_v0 }
 0x3c8   :  { %2473 = vmatpush.bf16.msrb.mxu3 %v10658_v58  ;;  %v10670_v58 = vld [vmem:[%s15719_s7 + $0x210] sm:$0xff] }
 0x3c9   :  { %v1613_v54 = vunpack.c.l.b16 %v1581_v59 }
 0x3ca   :  { %2460 = vmatpush.bf16.msra.mxu0 %v10644_v4 }
 0x3cb   :  { %v1614_v9 = vpack.c.b16 %v1613_v54, %v1612_v8 }
 0x3cc   :  { %v1673_v57 = vpop.f32.mrf.mxu2  ;;  %2474 = vmatpush.bf16.msrb.mxu3 %v10657_v55 }
 0x3cd   :  { %v1711_v1 = vpack.c.bf16 %v1673_v57, %v1673_v57 }
 0x3ce   :  { %v1549_v3 = vpop.f32.mrf.mxu1 }
 0x3cf   :  { %v1739_v63 = vunpack.c.l.b16 %v1711_v1  ;;  %v1582_v6 = vpack.c.bf16 %v1549_v3, %v1549_v3  ;;  %v10668_v3 = vld [vmem:[%s15719_s7 + $0x200] sm:$0xff] }
 0x3d0   :  { %2475 = vmatpush.bf16.msrb.mxu3 %v10656_v7 }
 0x3d1   :  { %v1740_v10 = vpack.c.b16 %v1739_v63, %v1738_v24  ;;  %v1618_v28 = vunpack.c.l.b16 %v1582_v6 }
 0x3d3   :  { %2409 = vmatmul.bf16.gmra.mxu3 %v1740_v10  ;;  %2423 = vmatmul.bf16.vlgmr.msrb.gmra.mxu0 %v1614_v9 }
 0x3d4   :  { %v1676_v14 = vpop.f32.mrf.mxu2  ;;  %2476 = vmatpush.bf16.msrb.mxu3 %v10655_v11  ;;  %2491 = vmatpush.bf16.msrb.mxu0 %v10667_v12 }
 0x3d5   :  { %v1712_v19 = vpack.c.bf16 %v1676_v14, %v1676_v14 }
 0x3d6   :  { %v1551_v25 = vpop.f32.mrf.mxu1 }
 0x3d7   :  { %v1583_v60 = vpack.c.bf16 %v1551_v25, %v1551_v25  ;;  %v1744_v29 = vunpack.c.l.b16 %v1712_v19 }
 0x3d8   :  { %2477 = vmatpush.bf16.msrb.mxu3 %v10654_v13  ;;  %2492 = vmatpush.bf16.msrb.mxu0 %v10666_v15 }
 0x3d9   :  { %v1619_v21 = vunpack.c.l.b16 %v1583_v60 }
 0x3db   :  { %v1620_v34 = vpack.c.b16 %v1619_v21, %v1618_v28 }
 0x3dc   :  { %v1678_v20 = vpop.f32.mrf.mxu2  ;;  %2478 = vmatpush.bf16.msrb.mxu3 %v10653_v16  ;;  %2493 = vmatpush.bf16.msrb.mxu0 %v10665_v17 }
 0x3dd   :  { %v1713_v18 = vpack.c.bf16 %v1678_v20, %v1678_v20 }
 0x3de   :  { %v1554_v22 = vpop.f32.mrf.mxu1 }
 0x3df   :  { %v1745_v33 = vunpack.c.l.b16 %v1713_v18  ;;  %v1584_v44 = vpack.c.bf16 %v1554_v22, %v1554_v22 }
 0x3e0   :  { %2479 = vmatpush.bf16.msrb.mxu3 %v10652_v26  ;;  %2494 = vmatpush.bf16.msrb.mxu0 %v10664_v27 }
 0x3e1   :  { %v1746_v5 = vpack.c.b16 %v1745_v33, %v1744_v29  ;;  %v1624_v51 = vunpack.c.l.b16 %v1584_v44 }
 0x3e3   :  { %2428 = vmatmul.bf16.gmra.mxu0 %v1746_v5  ;;  %2442 = vmatmul.bf16.vlgmr.msra.gmra.mxu3 %v1620_v34 }
 0x3e4   :  { %v1681_v36 = vpop.f32.mrf.mxu2  ;;  %2495 = vmatpush.bf16.msrb.mxu0 %v10663_v35  ;;  %2510 = vmatpush.bf16.msra.mxu3 %v10675_v23 }
 0x3e5   :  { %v1714_v45 = vpack.c.bf16 %v1681_v36, %v1681_v36 }
 0x3e6   :  { %v1556_v31 = vpop.f32.mrf.mxu1 }
 0x3e7   :  { %v1585_v40 = vpack.c.bf16 %v1556_v31, %v1556_v31  ;;  %v1750_v42 = vunpack.c.l.b16 %v1714_v45 }
 0x3e8   :  { %2496 = vmatpush.bf16.msrb.mxu0 %v10662_v38  ;;  %2511 = vmatpush.bf16.msra.mxu3 %v10674_v39  ;;  %v12021_v39 = vld [vmem:[%s15720_s8] ss:$0 sm:$0xff] }
 0x3e9   :  { %v1625_v49 = vunpack.c.l.b16 %v1585_v40 }
 0x3eb   :  { %v1626_v37 = vpack.c.b16 %v1625_v49, %v1624_v51 }
 0x3ec   :  { %v1683_v46 = vpop.f32.mrf.mxu2  ;;  %2497 = vmatpush.bf16.msrb.mxu0 %v10661_v41  ;;  %2512 = vmatpush.bf16.msra.mxu3 %v10673_v43 }
 0x3ed   :  { %v1715_v30 = vpack.c.bf16 %v1683_v46, %v1683_v46 }
 0x3ee   :  { %v1559_v2 = vpop.f32.mrf.mxu1 }
 0x3ef   :  { %v1751_v47 = vunpack.c.l.b16 %v1715_v30  ;;  %v1586_v55 = vpack.c.bf16 %v1559_v2, %v1559_v2 }
 0x3f0   :  { %2498 = vmatpush.bf16.msrb.mxu0 %v10660_v32  ;;  %2513 = vmatpush.bf16.msra.mxu3 %v10672_v50 }
 0x3f1   :  { %v1752_v52 = vpack.c.b16 %v1751_v47, %v1750_v42  ;;  %v1630_v4 = vunpack.c.l.b16 %v1586_v55 }
 0x3f3   :  { %2447 = vmatmul.bf16.gmra.mxu3 %v1752_v52  ;;  %2461 = vmatmul.bf16.vlgmr.msra.gmra.mxu0 %v1626_v37 }
 0x3f4   :  { %v1686_v48 = vpop.f32.mrf.mxu2  ;;  %2514 = vmatpush.bf16.msra.mxu3 %v10671_v53 }
 0x3f5   :  { %v1716_v62 = vpack.c.bf16 %v1686_v48, %v1686_v48 }
 0x3f6   :  { %v1561_v56 = vpop.f32.mrf.mxu1 }
 0x3f7   :  { %v1587_v59 = vpack.c.bf16 %v1561_v56, %v1561_v56  ;;  %v1756_v7 = vunpack.c.l.b16 %v1716_v62 }
 0x3f8   :  { %2515 = vmatpush.bf16.msra.mxu3 %v10670_v58 }
 0x3f9   :  { %v1631_v57 = vunpack.c.l.b16 %v1587_v59 }
 0x3fb   :  { %v1632_v24 = vpack.c.b16 %v1631_v57, %v1630_v4 }
 0x3fc   :  { %v1688_v0 = vpop.f32.mrf.mxu2  ;;  %2516 = vmatpush.bf16.msra.mxu3 %v10669_v61 }
 0x3fd   :  { %v1717_v54 = vpack.c.bf16 %v1688_v0, %v1688_v0 }
 0x3fe   :  { %v1564_v1 = vpop.f32.mrf.mxu1 }
 0x3ff   :  { %v1757_v8 = vunpack.c.l.b16 %v1717_v54  ;;  %v1588_v12 = vpack.c.bf16 %v1564_v1, %v1564_v1 }
 0x400   :  { %2517 = vmatpush.bf16.msra.mxu3 %v10668_v3 }
 0x401   :  { %v1758_v63 = vpack.c.b16 %v1757_v8, %v1756_v7  ;;  %v1636_v16 = vunpack.c.l.b16 %v1588_v12  ;;  %v9424_v12 = vld [vmem:[%s15721_s10 + $0x21c] sm:$0xf0] }
 0x403   :  { %2466 = vmatmul.bf16.gmra.mxu0 %v1758_v63  ;;  %2480 = vmatmul.bf16.vlgmr.msrb.gmra.mxu3 %v1632_v24  ;;  %v9422_v24 = vld [vmem:[%s15721_s10 + $0x1f8] sm:$0xf]  ;;  %v10743_v63 = vld [vmem:[%s15721_s10 + $0x218] sm:$0xf0] }
 0x404   :  { %v1691_v9 = vpop.f32.mrf.mxu2 }
 0x405   :  { %v1718_v14 = vpack.c.bf16 %v1691_v9, %v1691_v9  ;;  %v10739_v9 = vld [vmem:[%s15721_s10 + $0x1fc] sm:$0xf] }
 0x406   :  { %v1566_v10 = vpop.f32.mrf.mxu1 }
 0x407   :  { %v1589_v11 = vpack.c.bf16 %v1566_v10, %v1566_v10  ;;  %v1762_v17 = vunpack.c.l.b16 %v1718_v14  ;;  %v9430_v14 = vld [vmem:[%s15721_s10 + $0x200] sm:$0xf] }
 0x409   :  { %v1637_v13 = vunpack.c.l.b16 %v1589_v11  ;;  %v9423_v11 = vor.u32 %v10743_v63, %v9422_v24  ;;  %v9278_v24 = vld [vmem:[%s15721_s10 + $0xd8] sm:$0xf]  ;;  %v10707_v63 = vld [vmem:[%s15721_s10 + $0xf8] sm:$0xf0] }
 0x40b   :  { %v1638_v19 = vpack.c.b16 %v1637_v13, %v1636_v16  ;;  %v9427_v13 = vor.u32 %v10739_v9, %v9424_v12  ;;  %v9432_v16 = vld [vmem:[%s15721_s10 + $0x224] sm:$0xf0]  ;;  %2983 = vmatpush.bf16.msrb.mxu1 %v9423_v11  ;;  %v10703_v9 = vld [vmem:[%s15721_s10 + $0xdc] sm:$0xf]  ;;  %v9279_v11 = vor.u32 %v10707_v63, %v9278_v24  ;;  %v9280_v12 = vld [vmem:[%s15721_s10 + $0xfc] sm:$0xf0] }
 0x40c   :  { %v1693_v25 = vpop.f32.mrf.mxu2  ;;  %v9180_v24 = vld [vmem:[%s15721_s10 + $0x2c] sm:$0xf0] }
 0x40d   :  { %v1719_v15 = vpack.c.bf16 %v1693_v25, %v1693_v25  ;;  %v10744_v25 = vld [vmem:[%s15721_s10 + $0x220] sm:$0xf0]  ;;  %3002 = vmatpush.bf16.msra.mxu2 %v9427_v13  ;;  %v9283_v13 = vor.u32 %v10703_v9, %v9280_v12  ;;  %v10745_v12 = vld [vmem:[%s15721_s10 + $0x228] sm:$0xf0] }
 0x40e   :  { %v1569_v60 = vpop.f32.mrf.mxu1 }
 0x40f   :  { %v1763_v6 = vunpack.c.l.b16 %v1719_v15  ;;  %v1590_v26 = vpack.c.bf16 %v1569_v60, %v1569_v60  ;;  %v9431_v15 = vor.u32 %v10744_v25, %v9430_v14  ;;  %v10740_v60 = vld [vmem:[%s15721_s10 + $0x204] sm:$0xf]  ;;  %v9286_v14 = vld [vmem:[%s15721_s10 + $0xe0] sm:$0xf] }
 0x410   :  { %v10708_v25 = vld [vmem:[%s15721_s10 + $0x100] sm:$0xf0] }
 0x411   :  { %v1764_v20 = vpack.c.b16 %v1763_v6, %v1762_v17  ;;  %v1642_v34 = vunpack.c.l.b16 %v1590_v26  ;;  %v9435_v6 = vor.u32 %v10740_v60, %v9432_v16  ;;  %3021 = vmatpush.bf16.msra.mxu0 %v9431_v15  ;;  %v9388_v26 = vld [vmem:[%s15721_s10 + $0x1d4] sm:$0xf0]  ;;  %v9287_v15 = vor.u32 %v10708_v25, %v9286_v14  ;;  %v10704_v60 = vld [vmem:[%s15721_s10 + $0xe4] sm:$0xf]  ;;  %v9288_v16 = vld [vmem:[%s15721_s10 + $0x104] sm:$0xf0] }
 0x412   :  { %v10741_v14 = vld [vmem:[%s15721_s10 + $0x20c] sm:$0xf] }
 0x413   :  { %2485 = vmatmul.bf16.gmra.mxu3 %v1764_v20  ;;  %2499 = vmatmul.bf16.vlgmr.msrb.gmra.mxu0 %v1638_v19  ;;  %v9386_v20 = vld [vmem:[%s15721_s10 + $0x1b0] sm:$0xf] }
 0x414   :  { %v1696_v21 = vpop.f32.mrf.mxu2  ;;  %3040 = vmatpush.bf16.msrb.mxu3 %v9435_v6  ;;  %v9291_v6 = vor.u32 %v10704_v60, %v9288_v16  ;;  %v10746_v60 = vld [vmem:[%s15721_s10 + $0x230] sm:$0xf0] }
 0x415   :  { %v1720_v27 = vpack.c.bf16 %v1696_v21, %v1696_v21  ;;  %v10734_v21 = vld [vmem:[%s15721_s10 + $0x1d0] sm:$0xf0] }
 0x416   :  { %v1571_v18 = vpop.f32.mrf.mxu1 }
 0x417   :  { %v1591_v22 = vpack.c.bf16 %v1571_v18, %v1571_v18  ;;  %v1768_v5 = vunpack.c.l.b16 %v1720_v27  ;;  %v10730_v18 = vld [vmem:[%s15721_s10 + $0x1b4] sm:$0xf]  ;;  %v9394_v27 = vld [vmem:[%s15721_s10 + $0x1b8] sm:$0xf] }
 0x419   :  { %v1643_v29 = vunpack.c.l.b16 %v1591_v22  ;;  %v9387_v22 = vor.u32 %v10734_v21, %v9386_v20  ;;  %v9242_v20 = vld [vmem:[%s15721_s10 + $0x90] sm:$0xf]  ;;  %v10698_v21 = vld [vmem:[%s15721_s10 + $0xb0] sm:$0xf0] }
 0x41b   :  { %v1644_v23 = vpack.c.b16 %v1643_v29, %v1642_v34  ;;  %v9391_v29 = vor.u32 %v10730_v18, %v9388_v26  ;;  %v10731_v34 = vld [vmem:[%s15721_s10 + $0x1bc] sm:$0xf]  ;;  %2984 = vmatpush.bf16.msrb.mxu1 %v9387_v22  ;;  %v10694_v18 = vld [vmem:[%s15721_s10 + $0x94] sm:$0xf]  ;;  %v9243_v26 = vor.u32 %v10698_v21, %v9242_v20 }
 0x41c   :  { %v1698_v28 = vpop.f32.mrf.mxu2  ;;  %v10742_v21 = vld [vmem:[%s15721_s10 + $0x214] sm:$0xf] }
 0x41d   :  { %v1721_v33 = vpack.c.bf16 %v1698_v28, %v1698_v28  ;;  %v10735_v28 = vld [vmem:[%s15721_s10 + $0x1d8] sm:$0xf0]  ;;  %3003 = vmatpush.bf16.msra.mxu2 %v9391_v29 }
 0x41e   :  { %v10699_v29 = vld [vmem:[%s15721_s10 + $0xb8] sm:$0xf0] }
 0x41f   :  { %v1769_v35 = vunpack.c.l.b16 %v1721_v33  ;;  %v9395_v33 = vor.u32 %v10735_v28, %v9394_v27  ;;  %v9244_v27 = vld [vmem:[%s15721_s10 + $0xb4] sm:$0xf0] }
 0x420   :  { %v2367_v31 = vpop.f32.mrf.mxu3  ;;  %v9250_v28 = vld [vmem:[%s15721_s10 + $0x98] sm:$0xf] }
 0x421   :  { %v1770_v36 = vpack.c.b16 %v1769_v35, %v1768_v5  ;;  %v2368_v40 = vadd.f32 %v12021_v39, %v2367_v31  ;;  %v9396_v5 = vld [vmem:[%s15721_s10 + $0x1dc] sm:$0xf0]  ;;  %3022 = vmatpush.bf16.msra.mxu0 %v9395_v33  ;;  %v10721_v31 = vld [vmem:[%s15721_s10 + $0x16c] sm:$0xf]  ;;  %v9247_v33 = vor.u32 %v10694_v18, %v9244_v27  ;;  %v9448_v18 = vld [vmem:[%s15721_s10 + $0x234] sm:$0xf0] }
 0x422   :  { %v9399_v35 = vor.u32 %v10731_v34, %v9396_v5  ;;  %v9251_v34 = vor.u32 %v10699_v29, %v9250_v28  ;;  %v10695_v5 = vld [vmem:[%s15721_s10 + $0x9c] sm:$0xf]  ;;  %v9402_v27 = vld [vmem:[%s15721_s10 + $0x1c0] sm:$0xf]  ;;  %v10736_v28 = vld [vmem:[%s15721_s10 + $0x1e0] sm:$0xf0] }
 0x423   :  { %2504 = vmatmul.bf16.gmra.mxu0 %v1770_v36  ;;  %2518 = vmatmul.bf16.vlgmr.msra.gmra.mxu3 %v1644_v23  ;;  %v9350_v23 = vld [vmem:[%s15721_s10 + $0x168] sm:$0xf]  ;;  %v10725_v36 = vld [vmem:[%s15721_s10 + $0x188] sm:$0xf0]  ;;  %v10732_v29 = vld [vmem:[%s15721_s10 + $0x1c4] sm:$0xf] }
 0x424   :  { %v1701_v38 = vpop.f32.mrf.mxu2  ;;  %3041 = vmatpush.bf16.msrb.mxu3 %v9399_v35  ;;  %v9252_v35 = vld [vmem:[%s15721_s10 + $0xbc] sm:$0xf0] }
 0x425   :  { %v1722_v43 = vpack.c.bf16 %v1701_v38, %v1701_v38  ;;  %v9351_v38 = vor.u32 %v10725_v36, %v9350_v23  ;;  %v9255_v23 = vor.u32 %v10695_v5, %v9252_v35  ;;  %v9206_v36 = vld [vmem:[%s15721_s10 + $0x48] sm:$0xf]  ;;  %v10737_v35 = vld [vmem:[%s15721_s10 + $0x1e8] sm:$0xf0] }
 0x426   :  { %v9410_v5 = vld [vmem:[%s15721_s10 + $0x1c8] sm:$0xf] }
 0x427   :  { %v1774_v30 = vunpack.c.l.b16 %v1722_v43  ;;  %v10726_v43 = vld [vmem:[%s15721_s10 + $0x190] sm:$0xf0]  ;;  %2985 = vmatpush.bf16.msrb.mxu1 %v9351_v38  ;;  %v10685_v38 = vld [vmem:[%s15721_s10 + $0x4c] sm:$0xf] }
 0x428   :  { %v12024_v49 = vpop.f32.mrf.mxu3 }
 0x42a   :  { %v2386_v41 = vpop.f32.mrf.mxu0 }
 0x42b   :  { %v2387_v44 = vadd.f32 %v2386_v41, %v2368_v40  ;;  %v9352_v40 = vld [vmem:[%s15721_s10 + $0x18c] sm:$0xf0] }
 0x42c   :  { %v1703_v45 = vpop.f32.mrf.mxu2  ;;  %v9358_v41 = vld [vmem:[%s15721_s10 + $0x170] sm:$0xf] }
 0x42d   :  { %v1723_v46 = vpack.c.bf16 %v1703_v45, %v1703_v45  ;;  %v9359_v45 = vor.u32 %v10726_v43, %v9358_v41  ;;  %v9208_v41 = vld [vmem:[%s15721_s10 + $0x6c] sm:$0xf0] }
 0x42e   :  { %v9214_v43 = vld [vmem:[%s15721_s10 + $0x50] sm:$0xf] }
 0x42f   :  { %v1775_v2 = vunpack.c.l.b16 %v1723_v46  ;;  %v10722_v46 = vld [vmem:[%s15721_s10 + $0x174] sm:$0xf]  ;;  %3023 = vmatpush.bf16.msra.mxu0 %v9359_v45  ;;  %v9211_v45 = vor.u32 %v10685_v38, %v9208_v41  ;;  %v9412_v38 = vld [vmem:[%s15721_s10 + $0x1ec] sm:$0xf0] }
 0x431   :  { %v1776_v32 = vpack.c.b16 %v1775_v2, %v1774_v30  ;;  %v9360_v30 = vld [vmem:[%s15721_s10 + $0x194] sm:$0xf0] }
 0x432   :  { %v12026_v51 = vpop.f32.mrf.mxu0 }
 0x433   :  { %2523 = vmatmul.bf16.gmra.mxu3 %v1776_v32 }
 0x436   :  { %v2372_v50 = vpop.f32.mrf.mxu3 }
 0x437   :  { %v2373_v47 = vadd.f32 %v12021_v39, %v2372_v50  ;;  %v9363_v50 = vor.u32 %v10722_v46, %v9360_v30  ;;  %v10686_v30 = vld [vmem:[%s15721_s10 + $0x54] sm:$0xf] }
 0x439   :  { %3042 = vmatpush.bf16.msrb.mxu3 %v9363_v50  ;;  %v9216_v50 = vld [vmem:[%s15721_s10 + $0x74] sm:$0xf0] }
 0x43e   :  { %v12028_v42 = vpop.f32.mrf.mxu3 }
 0x440   :  { %v2391_v37 = vpop.f32.mrf.mxu0 }
 0x441   :  { %v2392_v52 = vadd.f32 %v2391_v37, %v2373_v47  ;;  %v9314_v47 = vld [vmem:[%s15721_s10 + $0x120] sm:$0xf]  ;;  %v10716_v37 = vld [vmem:[%s15721_s10 + $0x140] sm:$0xf0] }
 0x446   :  { %v2405_v53 = vpop.f32.mrf.mxu3 }
 0x447   :  { %v2406_v48 = vadd.f32 %v2405_v53, %v2387_v44  ;;  %v9355_v44 = vor.u32 %v10721_v31, %v9352_v40  ;;  %v9315_v53 = vor.u32 %v10716_v37, %v9314_v47  ;;  %v10689_v31 = vld [vmem:[%s15721_s10 + $0x68] sm:$0xf0]  ;;  %v9219_v37 = vor.u32 %v10686_v30, %v9216_v50  ;;  %v9368_v30 = vld [vmem:[%s15721_s10 + $0x19c] sm:$0xf0] }
 0x448   :  { %v12031_v56 = vpop.f32.mrf.mxu0  ;;  %v9207_v40 = vor.u32 %v10689_v31, %v9206_v36  ;;  %v9411_v36 = vor.u32 %v10737_v35, %v9410_v5  ;;  %v10733_v31 = vld [vmem:[%s15721_s10 + $0x1cc] sm:$0xf]  ;;  %v9374_v50 = vld [vmem:[%s15721_s10 + $0x180] sm:$0xf]  ;;  %v9304_v35 = vld [vmem:[%s15721_s10 + $0x114] sm:$0xf0] }
 0x449   :  { %3004 = vmatpush.bf16.msra.mxu2 %v9355_v44  ;;  %2986 = vmatpush.bf16.msrb.mxu1 %v9315_v53  ;;  %v10690_v44 = vld [vmem:[%s15721_s10 + $0x70] sm:$0xf0]  ;;  %v10680_v53 = vld [vmem:[%s15721_s10 + $0x20] sm:$0xf0] }
 0x44a   :  { %v9215_v46 = vor.u32 %v10690_v44, %v9214_v43  ;;  %v9366_v43 = vld [vmem:[%s15721_s10 + $0x178] sm:$0xf]  ;;  %v10727_v44 = vld [vmem:[%s15721_s10 + $0x198] sm:$0xf0] }
 0x44d   :  { %2987 = vmatpush.bf16.msrb.mxu1 %v9279_v11  ;;  %v9438_v11 = vld [vmem:[%s15721_s10 + $0x208] sm:$0xf] }
 0x44e   :  { %v12033_v58 = vpop.f32.mrf.mxu3  ;;  %v9439_v25 = vor.u32 %v10745_v12, %v9438_v11  ;;  %v9338_v11 = vld [vmem:[%s15721_s10 + $0x138] sm:$0xf]  ;;  %v10719_v12 = vld [vmem:[%s15721_s10 + $0x158] sm:$0xf0] }
 0x450   :  { %v2424_v59 = vpop.f32.mrf.mxu0 }
 0x451   :  { %v2425_v61 = vadd.f32 %v2424_v59, %v2406_v48  ;;  %v9316_v48 = vld [vmem:[%s15721_s10 + $0x144] sm:$0xf0]  ;;  %2988 = vmatpush.bf16.msrb.mxu1 %v9243_v26  ;;  %v9451_v26 = vor.u32 %v10742_v21, %v9448_v18  ;;  %v10705_v21 = vld [vmem:[%s15721_s10 + $0xec] sm:$0xf] }
 0x452   :  { %v9322_v59 = vld [vmem:[%s15721_s10 + $0x128] sm:$0xf] }
 0x455   :  { %2989 = vmatpush.bf16.msrb.mxu1 %v9207_v40  ;;  %v9415_v40 = vor.u32 %v10733_v31, %v9412_v38 }
 0x456   :  { %v2410_v55 = vpop.f32.mrf.mxu3 }
 0x457   :  { %v2411_v62 = vadd.f32 %v2410_v55, %v2392_v52  ;;  %v10712_v52 = vld [vmem:[%s15721_s10 + $0x124] sm:$0xf] }
 0x458   :  { %v12035_v0 = vpop.f32.mrf.mxu0  ;;  %v9319_v55 = vor.u32 %v10712_v52, %v9316_v48  ;;  %v9170_v52 = vld [vmem:[%s15721_s10] sm:$0xf]  ;;  %v10676_v48 = vld [vmem:[%s15721_s10 + $0x4] sm:$0xf] }
 0x45a   :  { %3005 = vmatpush.bf16.msra.mxu2 %v9319_v55  ;;  %v9178_v55 = vld [vmem:[%s15721_s10 + $0x8] sm:$0xf] }
 0x45e   :  { %v12037_v57 = vpop.f32.mrf.mxu3  ;;  %3006 = vmatpush.bf16.msra.mxu2 %v9283_v13  ;;  %v9440_v13 = vld [vmem:[%s15721_s10 + $0x22c] sm:$0xf0] }
 0x460   :  { %v2429_v54 = vpop.f32.mrf.mxu0 }
 0x461   :  { %v2430_v1 = vadd.f32 %v2429_v54, %v2411_v62  ;;  %v10713_v54 = vld [vmem:[%s15721_s10 + $0x12c] sm:$0xf] }
 0x462   :  { %3007 = vmatpush.bf16.msra.mxu2 %v9247_v33  ;;  %v9403_v33 = vor.u32 %v10736_v28, %v9402_v27  ;;  %v9302_v27 = vld [vmem:[%s15721_s10 + $0xf0] sm:$0xf]  ;;  %v10710_v28 = vld [vmem:[%s15721_s10 + $0x110] sm:$0xf0] }
 0x463   :  { %v9303_v5 = vor.u32 %v10710_v28, %v9302_v27  ;;  %v10679_v28 = vld [vmem:[%s15721_s10 + $0x1c] sm:$0xf] }
 0x466   :  { %v2443_v3 = vpop.f32.mrf.mxu3  ;;  %3008 = vmatpush.bf16.msra.mxu2 %v9211_v45  ;;  %v10723_v45 = vld [vmem:[%s15721_s10 + $0x17c] sm:$0xf] }
 0x467   :  { %v12039_v4 = vadd.f32 %v2443_v3, %v2425_v61  ;;  %v10717_v61 = vld [vmem:[%s15721_s10 + $0x148] sm:$0xf0] }
 0x468   :  { %v12041_v7 = vpop.f32.mrf.mxu0  ;;  %v9323_v62 = vor.u32 %v10717_v61, %v9322_v59  ;;  %v9171_v59 = vor.u32 %v10680_v53, %v9170_v52  ;;  %v9172_v61 = vld [vmem:[%s15721_s10 + $0x24] sm:$0xf0]  ;;  %v9371_v53 = vor.u32 %v10723_v45, %v9368_v30 }
 0x46a   :  { %3024 = vmatpush.bf16.msra.mxu0 %v9323_v62  ;;  %v10681_v62 = vld [vmem:[%s15721_s10 + $0x28] sm:$0xf0]  ;;  %2990 = vmatpush.bf16.msrb.mxu1 %v9171_v59  ;;  %v10724_v59 = vld [vmem:[%s15721_s10 + $0x184] sm:$0xf] }
 0x46e   :  { %v12043_v8 = vpop.f32.mrf.mxu3  ;;  %3025 = vmatpush.bf16.msra.mxu0 %v9287_v15  ;;  %v9446_v15 = vld [vmem:[%s15721_s10 + $0x210] sm:$0xf]  ;;  %3059 = vmatpush.bf16.msra.mxu1 %v9439_v25  ;;  %v9339_v25 = vor.u32 %v10719_v12, %v9338_v11  ;;  %v10682_v11 = vld [vmem:[%s15721_s10 + $0x30] sm:$0xf0] }
 0x46f   :  { %v9447_v20 = vor.u32 %v10746_v60, %v9446_v15 }
 0x470   :  { %v12054_v10 = vpop.f32.mrf.mxu0 }
 0x471   :  { %v2463_v31 = vadd.f32 %v12054_v10, %v12039_v4  ;;  %v9266_v4 = vld [vmem:[%s15721_s10 + $0xa8] sm:$0xf]  ;;  %v10701_v10 = vld [vmem:[%s15721_s10 + $0xc8] sm:$0xf0] }
 0x472   :  { %3026 = vmatpush.bf16.msra.mxu0 %v9251_v34  ;;  %v9404_v34 = vld [vmem:[%s15721_s10 + $0x1e4] sm:$0xf0]  ;;  %3060 = vmatpush.bf16.msra.mxu1 %v9403_v33 }
 0x476   :  { %v2448_v17 = vpop.f32.mrf.mxu3  ;;  %3027 = vmatpush.bf16.msra.mxu0 %v9215_v46  ;;  %v9367_v46 = vor.u32 %v10727_v44, %v9366_v43  ;;  %v10696_v43 = vld [vmem:[%s15721_s10 + $0xa4] sm:$0xf]  ;;  %v9260_v44 = vld [vmem:[%s15721_s10 + $0xc4] sm:$0xf0] }
 0x477   :  { %v12071_v19 = vadd.f32 %v2448_v17, %v2430_v1  ;;  %v9324_v1 = vld [vmem:[%s15721_s10 + $0x14c] sm:$0xf0]  ;;  %v9263_v45 = vor.u32 %v10696_v43, %v9260_v44  ;;  %v9382_v44 = vld [vmem:[%s15721_s10 + $0x188] sm:$0xf] }
 0x478   :  { %v12121_v2 = vpop.f32.mrf.mxu0  ;;  %v9327_v3 = vor.u32 %v10713_v54, %v9324_v1  ;;  %v9175_v54 = vor.u32 %v10676_v48, %v9172_v61  ;;  %v9179_v1 = vor.u32 %v10681_v62, %v9178_v55  ;;  %v9376_v61 = vld [vmem:[%s15721_s10 + $0x1a4] sm:$0xf0]  ;;  %v2370_v55 = vadd.f32 %v12021_v39, %v12024_v49  ;;  %3061 = vmatpush.bf16.msra.mxu1 %v9367_v46  ;;  %v10697_v46 = vld [vmem:[%s15721_s10 + $0xac] sm:$0xf] }
 0x479   :  { %v9379_v62 = vor.u32 %v10724_v59, %v9376_v61  ;;  %v10691_v61 = vld [vmem:[%s15721_s10 + $0x78] sm:$0xf0] }
 0x47a   :  { %3043 = vmatpush.bf16.msrb.mxu3 %v9327_v3  ;;  %v10677_v3 = vld [vmem:[%s15721_s10 + $0xc] sm:$0xf]  ;;  %3009 = vmatpush.bf16.msra.mxu2 %v9175_v54  ;;  %v9330_v54 = vld [vmem:[%s15721_s10 + $0x130] sm:$0xf] }
 0x47b   :  { %v9183_v9 = vor.u32 %v10677_v3, %v9180_v24  ;;  %3028 = vmatpush.bf16.msra.mxu0 %v9179_v1  ;;  %v10718_v1 = vld [vmem:[%s15721_s10 + $0x150] sm:$0xf0]  ;;  %v2389_v24 = vadd.f32 %v12026_v51, %v2370_v55  ;;  %v10715_v51 = vld [vmem:[%s15721_s10 + $0x13c] sm:$0xf] }
 0x47c   :  { %v10714_v3 = vld [vmem:[%s15721_s10 + $0x134] sm:$0xf]  ;;  %v9331_v49 = vor.u32 %v10718_v1, %v9330_v54  ;;  %v9230_v1 = vld [vmem:[%s15721_s10 + $0x60] sm:$0xf] }
 0x47d   :  { %v2408_v15 = vadd.f32 %v12033_v58, %v2389_v24  ;;  %v10688_v24 = vld [vmem:[%s15721_s10 + $0x64] sm:$0xf] }
 0x47e   :  { %v12123_v32 = vpop.f32.mrf.mxu3  ;;  %3044 = vmatpush.bf16.msrb.mxu3 %v9291_v6  ;;  %v9443_v6 = vor.u32 %v10741_v14, %v9440_v13  ;;  %v9340_v13 = vld [vmem:[%s15721_s10 + $0x15c] sm:$0xf0]  ;;  %3062 = vmatpush.bf16.msra.mxu1 %v9331_v49 }
 0x47f   :  { %3097 = vmatpush.bf16.msrb.mxu0 %v9447_v20  ;;  %v9343_v60 = vor.u32 %v10715_v51, %v9340_v13  ;;  %v10709_v20 = vld [vmem:[%s15721_s10 + $0x108] sm:$0xf0]  ;;  %v2427_v18 = vadd.f32 %v12035_v0, %v2408_v15  ;;  %v10706_v0 = vld [vmem:[%s15721_s10 + $0xf4] sm:$0xf]  ;;  %v9188_v13 = vld [vmem:[%s15721_s10 + $0x34] sm:$0xf0] }
 0x480   :  { %v12184_v22 = vpop.f32.mrf.mxu0  ;;  %3078 = vmatpush.bf16.msrb.mxu2 %v9443_v6  ;;  %v9294_v6 = vld [vmem:[%s15721_s10 + $0xe8] sm:$0xf]  ;;  %v9307_v38 = vor.u32 %v10706_v0, %v9304_v35  ;;  %v10678_v51 = vld [vmem:[%s15721_s10 + $0x14] sm:$0xf]  ;;  %v9194_v15 = vld [vmem:[%s15721_s10 + $0x18] sm:$0xf] }
 0x481   :  { %v9295_v58 = vor.u32 %v10709_v20, %v9294_v6  ;;  %v10683_v6 = vld [vmem:[%s15721_s10 + $0x38] sm:$0xf0]  ;;  %v2375_v20 = vadd.f32 %v12021_v39, %v12028_v42  ;;  %v9454_v35 = vld [vmem:[%s15721_s10 + $0x218] sm:$0xf] }
 0x482   :  { %3045 = vmatpush.bf16.msrb.mxu3 %v9255_v23  ;;  %v9407_v23 = vor.u32 %v10732_v29, %v9404_v34  ;;  %v9195_v27 = vor.u32 %v10683_v6, %v9194_v15 }
 0x483   :  { %3098 = vmatpush.bf16.msrb.mxu0 %v9411_v36  ;;  %v2446_v36 = vadd.f32 %v12043_v8, %v2427_v18  ;;  %3063 = vmatpush.bf16.msra.mxu1 %v9295_v58 }
 0x484   :  { %3079 = vmatpush.bf16.msrb.mxu2 %v9407_v23  ;;  %v9258_v23 = vld [vmem:[%s15721_s10 + $0xa0] sm:$0xf] }
 0x485   :  { %v2465_v30 = vadd.f32 %v12121_v2, %v2446_v36  ;;  %v10687_v2 = vld [vmem:[%s15721_s10 + $0x5c] sm:$0xf] }
 0x486   :  { %v12173_v17 = vpop.f32.mrf.mxu3  ;;  %3046 = vmatpush.bf16.msrb.mxu3 %v9219_v37  ;;  %v10728_v37 = vld [vmem:[%s15721_s10 + $0x1a0] sm:$0xf0] }
 0x487   :  { %v9375_v48 = vor.u32 %v10728_v37, %v9374_v50  ;;  %v2482_v50 = vadd.f32 %v12173_v17, %v2463_v31  ;;  %v9267_v37 = vor.u32 %v10701_v10, %v9266_v4  ;;  %v9224_v17 = vld [vmem:[%s15721_s10 + $0x7c] sm:$0xf0]  ;;  %v9418_v31 = vld [vmem:[%s15721_s10 + $0x1d0] sm:$0xf] }
 0x488   :  { %v12251_v63 = vpop.f32.mrf.mxu0  ;;  %3080 = vmatpush.bf16.msrb.mxu2 %v9371_v53  ;;  %v9268_v53 = vld [vmem:[%s15721_s10 + $0xcc] sm:$0xf0]  ;;  %v9227_v49 = vor.u32 %v10687_v2, %v9224_v17  ;;  %v10711_v2 = vld [vmem:[%s15721_s10 + $0x118] sm:$0xf0] }
 0x489   :  { %3099 = vmatpush.bf16.msrb.mxu0 %v9375_v48  ;;  %v9222_v48 = vld [vmem:[%s15721_s10 + $0x58] sm:$0xf]  ;;  %v9271_v59 = vor.u32 %v10697_v46, %v9268_v53 }
 0x48a   :  { %3047 = vmatpush.bf16.msrb.mxu3 %v9183_v9  ;;  %v9332_v9 = vld [vmem:[%s15721_s10 + $0x154] sm:$0xf0]  ;;  %v9223_v54 = vor.u32 %v10691_v61, %v9222_v48 }
 0x48b   :  { %v9335_v14 = vor.u32 %v10714_v3, %v9332_v9  ;;  %v10692_v3 = vld [vmem:[%s15721_s10 + $0x80] sm:$0xf0]  ;;  %v9186_v9 = vld [vmem:[%s15721_s10 + $0x10] sm:$0xf]  ;;  %v9310_v61 = vld [vmem:[%s15721_s10 + $0xf8] sm:$0xf] }
 0x48c   :  { %v9187_v18 = vor.u32 %v10682_v11, %v9186_v9  ;;  %v9311_v17 = vor.u32 %v10711_v2, %v9310_v61 }
 0x48d   :  { %3081 = vmatpush.bf16.msrb.mxu2 %v9335_v14  ;;  %3100 = vmatpush.bf16.msrb.mxu0 %v9339_v25 }
 0x48e   :  { %v12225_v47 = vpop.f32.mrf.mxu3  ;;  %3116 = vmatpush.bf16.msra.mxu3 %v9451_v26  ;;  %v9296_v26 = vld [vmem:[%s15721_s10 + $0x10c] sm:$0xf0] }
 0x48f   :  { %v9299_v34 = vor.u32 %v10705_v21, %v9296_v26  ;;  %v2484_v55 = vadd.f32 %v12225_v47, %v2465_v30  ;;  %v9231_v47 = vor.u32 %v10692_v3, %v9230_v1  ;;  %v9191_v26 = vor.u32 %v10678_v51, %v9188_v13  ;;  %v10720_v30 = vld [vmem:[%s15721_s10 + $0x160] sm:$0xf0]  ;;  %v9238_v1 = vld [vmem:[%s15721_s10 + $0x68] sm:$0xf]  ;;  %v10693_v3 = vld [vmem:[%s15721_s10 + $0x88] sm:$0xf0] }
 0x490   :  { %v12303_v41 = vpop.f32.mrf.mxu0 }
 0x491   :  { %3082 = vmatpush.bf16.msrb.mxu2 %v9299_v34  ;;  %3101 = vmatpush.bf16.msrb.mxu0 %v9303_v5 }
 0x492   :  { %3117 = vmatpush.bf16.msra.mxu3 %v9415_v40  ;;  %v10700_v40 = vld [vmem:[%s15721_s10 + $0xc0] sm:$0xf0] }
 0x493   :  { %v9259_v8 = vor.u32 %v10700_v40, %v9258_v23  ;;  %v10747_v23 = vld [vmem:[%s15721_s10 + $0x238] sm:$0xf0]  ;;  %v2468_v40 = vadd.f32 %v12184_v22, %v12071_v19  ;;  %v9346_v22 = vld [vmem:[%s15721_s10 + $0x140] sm:$0xf] }
 0x495   :  { %3064 = vmatpush.bf16.msra.mxu1 %v9259_v8  ;;  %3083 = vmatpush.bf16.msrb.mxu2 %v9263_v45  ;;  %v10729_v8 = vld [vmem:[%s15721_s10 + $0x1a8] sm:$0xf0] }
 0x496   :  { %v12271_v16 = vpop.f32.mrf.mxu3  ;;  %3118 = vmatpush.bf16.msra.mxu3 %v9379_v62  ;;  %v2501_v62 = vadd.f32 %v12303_v41, %v2482_v50  ;;  %3102 = vmatpush.bf16.msrb.mxu0 %v9267_v37  ;;  %v9232_v41 = vld [vmem:[%s15721_s10 + $0x84] sm:$0xf0]  ;;  %v9383_v19 = vor.u32 %v10729_v8, %v9382_v44 }
 0x497   :  { %v9235_v25 = vor.u32 %v10688_v24, %v9232_v41  ;;  %v2487_v4 = vadd.f32 %v12271_v16, %v2468_v40  ;;  %v9347_v16 = vor.u32 %v10720_v30, %v9346_v22  ;;  %v9239_v24 = vor.u32 %v10693_v3, %v9238_v1 }
 0x498   :  { %v2502_v29 = vpop.f32.mrf.mxu0 }
 0x499   :  { %v2503_v12 = vadd.f32 %v2502_v29, %v2484_v55  ;;  %3065 = vmatpush.bf16.msra.mxu1 %v9223_v54  ;;  %3084 = vmatpush.bf16.msrb.mxu2 %v9227_v49  ;;  %v9196_v29 = vld [vmem:[%s15721_s10 + $0x3c] sm:$0xf0]  ;;  %v9274_v55 = vld [vmem:[%s15721_s10 + $0xb0] sm:$0xf] }
 0x49a   :  { %3119 = vmatpush.bf16.msra.mxu3 %v9343_v60  ;;  %3103 = vmatpush.bf16.msrb.mxu0 %v9231_v47  ;;  %v9199_v0 = vor.u32 %v10679_v28, %v9196_v29  ;;  %v9202_v49 = vld [vmem:[%s15721_s10 + $0x20] sm:$0xf]  ;;  %v10684_v47 = vld [vmem:[%s15721_s10 + $0x40] sm:$0xf0] }
 0x49b   :  { %v9203_v41 = vor.u32 %v10684_v47, %v9202_v49 }
 0x49d   :  { %3066 = vmatpush.bf16.msra.mxu1 %v9187_v18  ;;  %3085 = vmatpush.bf16.msrb.mxu2 %v9191_v26 }
 0x49e   :  { %v12323_v52 = vpop.f32.mrf.mxu3  ;;  %3120 = vmatpush.bf16.msra.mxu3 %v9307_v38  ;;  %3104 = vmatpush.bf16.msrb.mxu0 %v9195_v27  ;;  %v10738_v38 = vld [vmem:[%s15721_s10 + $0x1f0] sm:$0xf0] }
 0x49f   :  { %v9419_v43 = vor.u32 %v10738_v38, %v9418_v31 }
 0x4a0   :  { %v2505_v58 = vpop.f32.mrf.mxu0 }
 0x4a1   :  { %v2506_v46 = vadd.f32 %v2505_v58, %v2487_v4 }
 0x4a2   :  { %3121 = vmatpush.bf16.msra.mxu3 %v9271_v59 }
 0x4a6   :  { %v2519_v33 = vpop.f32.mrf.mxu3  ;;  %3122 = vmatpush.bf16.msra.mxu3 %v9235_v25 }
 0x4a7   :  { %v2520_v14 = vadd.f32 %v2519_v33, %v2501_v62  ;;  %v2394_v33 = vadd.f32 %v12031_v56, %v2375_v20  ;;  %v10702_v62 = vld [vmem:[%s15721_s10 + $0xd0] sm:$0xf0] }
 0x4a8   :  { %v2507_v10 = vpop.f32.mrf.mxu0  ;;  %v9275_v54 = vor.u32 %v10702_v62, %v9274_v55 }
 0x4a9   :  { %v2529_v34 = vmax.f32 %v2520_v14, 0.0  ;;  %v2413_v42 = vadd.f32 %v12037_v57, %v2394_v33  ;;  %v9455_v57 = vor.u32 %v10747_v23, %v9454_v35 }
 0x4aa   :  { %3123 = vmatpush.bf16.msra.mxu3 %v9199_v0 }
 0x4ab   :  { %v2432_v56 = vadd.f32 %v12041_v7, %v2413_v42 }
 0x4ad   :  { %v2451_v7 = vadd.f32 %v12123_v32, %v2432_v56 }
 0x4ae   :  { %v2521_v60 = vpop.f32.mrf.mxu3 }
 0x4af   :  { %v2522_v21 = vadd.f32 %v2521_v60, %v2503_v12  ;;  %v2470_v45 = vadd.f32 %v12251_v63, %v2451_v7 }
 0x4b1   :  { %v2530_v39 = vmax.f32 %v2522_v21, 0.0  ;;  %v2489_v32 = vadd.f32 %v12323_v52, %v2470_v45 }
 0x4b3   :  { %v12467_v5 = vpack.c.bf16 %v2530_v39, %v2529_v34  ;;  %v2508_v50 = vadd.f32 %v2507_v10, %v2489_v32 }
 0x4b5   :  { %2991 = vmatmul.bf16.vlgmr.msrb.gmra.mxu1 %v12467_v5  ;;  %3010 = vmatmul.bf16.vlgmr.msra.gmra.mxu2 %v12467_v5 }
 0x4b6   :  { %3029 = vmatmul.bf16.vlgmr.msra.gmra.mxu0 %v12467_v5  ;;  %3048 = vmatmul.bf16.vlgmr.msrb.gmra.mxu3 %v12467_v5  ;;  %v2524_v36 = vpop.f32.mrf.mxu3 }
 0x4b7   :  { %3135 = vmatpush.bf16.msrb.mxu1 %v9455_v57  ;;  %v2525_v37 = vadd.f32 %v2524_v36, %v2506_v46 }
 0x4b9   :  { %v2531_v48 = vmax.f32 %v2525_v37, 0.0 }
 0x4bb   :  { %3136 = vmatpush.bf16.msrb.mxu1 %v9419_v43 }
 0x4be   :  { %v2526_v53 = vpop.f32.mrf.mxu3 }
 0x4bf   :  { %v2527_v63 = vadd.f32 %v2526_v53, %v2508_v50  ;;  %3137 = vmatpush.bf16.msrb.mxu1 %v9383_v19 }
 0x4c1   :  { %v2532_v59 = vmax.f32 %v2527_v63, 0.0 }
 0x4c3   :  { %v2534_v52 = vpack.c.bf16 %v2532_v59, %v2531_v48  ;;  %3138 = vmatpush.bf16.msrb.mxu1 %v9347_v16 }
 0x4c5   :  { %2996 = vmatmul.bf16.gmra.mxu1 %v2534_v52  ;;  %3015 = vmatmul.bf16.gmra.mxu2 %v2534_v52 }
 0x4c6   :  { %3034 = vmatmul.bf16.gmra.mxu0 %v2534_v52  ;;  %3053 = vmatmul.bf16.gmra.mxu3 %v2534_v52 }
 0x4c7   :  { %3139 = vmatpush.bf16.msrb.mxu1 %v9311_v17 }
 0x4cb   :  { %3140 = vmatpush.bf16.msrb.mxu1 %v9275_v54 }
 0x4cf   :  { %3141 = vmatpush.bf16.msrb.mxu1 %v9239_v24 }
 0x4d3   :  { %3142 = vmatpush.bf16.msrb.mxu1 %v9203_v41 }
 0x4d5   :  { %3067 = vmatmul.bf16.vlgmr.msra.gmra.mxu1 %v12467_v5  ;;  %3086 = vmatmul.bf16.vlgmr.msrb.gmra.mxu2 %v12467_v5 }
 0x4d6   :  { %3105 = vmatmul.bf16.vlgmr.msrb.gmra.mxu0 %v12467_v5  ;;  %3124 = vmatmul.bf16.vlgmr.msra.gmra.mxu3 %v12467_v5 }
 0x4e5   :  { %3072 = vmatmul.bf16.gmra.mxu1 %v2534_v52  ;;  %3091 = vmatmul.bf16.gmra.mxu2 %v2534_v52 }
 0x4e6   :  { %3110 = vmatmul.bf16.gmra.mxu0 %v2534_v52  ;;  %3129 = vmatmul.bf16.gmra.mxu3 %v2534_v52 }
 0x4f5   :  { %3143 = vmatmul.bf16.vlgmr.msrb.gmra.mxu1 %v12467_v5 }
 0x505   :  { %3148 = vmatmul.bf16.gmra.mxu1 %v2534_v52 }
 0x532   :  { %v12533_v9 = vpop.f32.mrf.mxu1 }
 0x533   :  { %v3030_v11 = vpop.f32.mrf.mxu0 }
 0x538   :  { %v12535_v12 = vpop.f32.mrf.mxu2 }
 0x539   :  { %v3049_v14 = vpop.f32.mrf.mxu3  ;;  %v3154_v41 = vpack.c.bf16 %v12535_v12, %v12533_v9  ;;  %v9684_v9 = vld [vmem:[%s15722_s13 + $0x1b0] sm:$0xf] }
 0x53a   :  { %v2994_v25 = vpop.f32.mrf.mxu1  ;;  %v3155_v50 = vpack.c.bf16 %v3049_v14, %v3030_v11  ;;  %v9720_v11 = vld [vmem:[%s15722_s13 + $0x1f8] sm:$0xf]  ;;  %v10817_v14 = vld [vmem:[%s15722_s13 + $0x218] sm:$0xf0] }
 0x53b   :  { %v3032_v51 = vpop.f32.mrf.mxu0 }
 0x53c   :  { %v3192_v17 = vunpack.c.h.b16 %v3155_v50 }
 0x540   :  { %v3013_v13 = vpop.f32.mrf.mxu2 }
 0x541   :  { %v3051_v15 = vpop.f32.mrf.mxu3  ;;  %v3159_v54 = vpack.c.bf16 %v3013_v13, %v2994_v25  ;;  %v9721_v25 = vor.u32 %v10817_v14, %v9720_v11  ;;  %v10814_v11 = vld [vmem:[%s15722_s13 + $0x204] sm:$0xf]  ;;  %v9730_v14 = vld [vmem:[%s15722_s13 + $0x224] sm:$0xf0] }
 0x542   :  { %v12537_v60 = vpop.f32.mrf.mxu1  ;;  %v3160_v19 = vpack.c.bf16 %v3051_v15, %v3032_v51  ;;  %v3188_v51 = vunpack.c.l.b16 %v3155_v50 }
 0x543   :  { %v12539_v6 = vpop.f32.mrf.mxu0  ;;  %v3183_v13 = vunpack.c.h.b16 %v3159_v54  ;;  %3798 = vmatpush.bf16.msra.mxu1 %v9721_v25 }
 0x544   :  { %v3193_v48 = vunpack.c.h.b16 %v3160_v19  ;;  %v3189_v1 = vunpack.c.l.b16 %v3160_v19 }
 0x546   :  { %v3194_v47 = vpack.c.b16 %v3193_v48, %v3192_v17 }
 0x548   :  { %v12541_v20 = vpop.f32.mrf.mxu2 }
 0x549   :  { %v12543_v21 = vpop.f32.mrf.mxu3 }
 0x54a   :  { %v12545_v18 = vpop.f32.mrf.mxu1 }
 0x54b   :  { %v12547_v58 = vpop.f32.mrf.mxu0 }
 0x550   :  { %v12549_v26 = vpop.f32.mrf.mxu2 }
 0x551   :  { %v12551_v27 = vpop.f32.mrf.mxu3 }
 0x552   :  { %v3068_v28 = vpop.f32.mrf.mxu1 }
 0x553   :  { %v3106_v29 = vpop.f32.mrf.mxu0 }
 0x558   :  { %v3087_v33 = vpop.f32.mrf.mxu2 }
 0x559   :  { %v3125_v34 = vpop.f32.mrf.mxu3  ;;  %v3156_v43 = vpack.c.bf16 %v3087_v33, %v3068_v28 }
 0x55a   :  { %v3070_v39 = vpop.f32.mrf.mxu1  ;;  %v3157_v5 = vpack.c.bf16 %v3125_v34, %v3106_v29  ;;  %v3190_v34 = vpack.c.b16 %v3189_v1, %v3188_v51 }
 0x55b   :  { %v3108_v42 = vpop.f32.mrf.mxu0  ;;  %v3202_v46 = vunpack.c.h.b16 %v3156_v43  ;;  %v3198_v37 = vunpack.c.l.b16 %v3156_v43 }
 0x55c   :  { %v3212_v57 = vunpack.c.h.b16 %v3157_v5  ;;  %v3208_v44 = vunpack.c.l.b16 %v3157_v5  ;;  %v3182_v5 = vunpack.c.h.b16 %v3154_v41 }
 0x560   :  { %v3089_v0 = vpop.f32.mrf.mxu2 }
 0x561   :  { %v3127_v35 = vpop.f32.mrf.mxu3  ;;  %v3161_v31 = vpack.c.bf16 %v3089_v0, %v3070_v39 }
 0x562   :  { %v3162_v23 = vpack.c.bf16 %v3127_v35, %v3108_v42  ;;  %v3073_v56 = vpop.f32.mrf.mxu1  ;;  %v10808_v42 = vld [vmem:[%s15722_s13 + $0x1d0] sm:$0xf0]  ;;  %v10813_v35 = vld [vmem:[%s15722_s13 + $0x1fc] sm:$0xf] }
 0x563   :  { %v3111_v40 = vpop.f32.mrf.mxu0  ;;  %v3203_v4 = vunpack.c.h.b16 %v3161_v31  ;;  %v3199_v22 = vunpack.c.l.b16 %v3161_v31 }
 0x564   :  { %v3213_v36 = vunpack.c.h.b16 %v3162_v23  ;;  %v3209_v38 = vunpack.c.l.b16 %v3162_v23  ;;  %v9722_v23 = vld [vmem:[%s15722_s13 + $0x21c] sm:$0xf0] }
 0x565   :  { %v3204_v30 = vpack.c.b16 %v3203_v4, %v3202_v46  ;;  %v3200_v61 = vpack.c.b16 %v3199_v22, %v3198_v37  ;;  %v9725_v4 = vor.u32 %v10813_v35, %v9722_v23  ;;  %v3165_v46 = vpack.c.bf16 %v12543_v21, %v12539_v6  ;;  %v9458_v22 = vld [vmem:[%s15723_s9] sm:$0xf]  ;;  %v9650_v35 = vld [vmem:[%s15722_s13 + $0x18c] sm:$0xf0] }
 0x566   :  { %v3214_v7 = vpack.c.b16 %v3213_v36, %v3212_v57  ;;  %v3210_v32 = vpack.c.b16 %v3209_v38, %v3208_v44  ;;  %v3179_v36 = vunpack.c.l.b16 %v3159_v54  ;;  %v9656_v23 = vld [vmem:[%s15722_s13 + $0x170] sm:$0xf] }
 0x567   :  { %v3278_v21 = vunpack.c.h.b16 %v3165_v46  ;;  %v3274_v17 = vunpack.c.l.b16 %v3165_v46  ;;  %v9622_v46 = vld [vmem:[%s15722_s13 + $0x14c] sm:$0xf0] }
 0x568   :  { %3234 = vmatpush.bf16.msra.mxu2 %v3214_v7  ;;  %v3092_v8 = vpop.f32.mrf.mxu2  ;;  %v3184_v7 = vpack.c.b16 %v3183_v13, %v3182_v5  ;;  %v9733_v13 = vor.u32 %v10814_v11, %v9730_v14  ;;  %v10795_v5 = vld [vmem:[%s15722_s13 + $0x16c] sm:$0xf]  ;;  %v9506_v11 = vld [vmem:[%s15722_s13 + $0x6c] sm:$0xf0] }
 0x569   :  { %v3130_v45 = vpop.f32.mrf.mxu3  ;;  %v3166_v15 = vpack.c.bf16 %v3092_v8, %v3073_v56  ;;  %v9685_v56 = vor.u32 %v10808_v42, %v9684_v9  ;;  %v10748_v8 = vld [vmem:[%s15723_s9 + $0x4] sm:$0xf]  ;;  %v10799_v42 = vld [vmem:[%s15722_s13 + $0x188] sm:$0xf0]  ;;  %v9512_v14 = vld [vmem:[%s15722_s13 + $0x50] sm:$0xf] }
 0x56a   :  { %v3075_v10 = vpop.f32.mrf.mxu1  ;;  %v3167_v53 = vpack.c.bf16 %v3130_v45, %v3111_v40  ;;  %v3170_v40 = vpack.c.bf16 %v12551_v27, %v12547_v58  ;;  %v9460_v45 = vld [vmem:[%s15723_s9 + $0x8] sm:$0xf0]  ;;  %v9686_v58 = vld [vmem:[%s15722_s13 + $0x1d4] sm:$0xf0]  ;;  %v3178_v27 = vunpack.c.l.b16 %v3154_v41 }
 0x56b   :  { %v3113_v63 = vpop.f32.mrf.mxu0  ;;  %v3288_v57 = vunpack.c.h.b16 %v3166_v15  ;;  %3799 = vmatpush.bf16.msra.mxu1 %v9685_v56  ;;  %v3284_v19 = vunpack.c.l.b16 %v3166_v15  ;;  %v9463_v50 = vor.u32 %v10748_v8, %v9460_v45  ;;  %v9692_v15 = vld [vmem:[%s15722_s13 + $0x1b8] sm:$0xf]  ;;  %v10800_v56 = vld [vmem:[%s15722_s13 + $0x190] sm:$0xf0]  ;;  %v9614_v8 = vld [vmem:[%s15722_s13 + $0x144] sm:$0xf0] }
 0x56c   :  { %3235 = vmatpush.bf16.msra.mxu2 %v3210_v32  ;;  %v3298_v55 = vunpack.c.h.b16 %v3167_v53  ;;  %v3294_v28 = vunpack.c.l.b16 %v3167_v53  ;;  %v10804_v32 = vld [vmem:[%s15722_s13 + $0x1b4] sm:$0xf]  ;;  %v3279_v37 = vunpack.c.h.b16 %v3170_v40 }
 0x56d   :  { %v9689_v48 = vor.u32 %v10804_v32, %v9686_v58  ;;  %v10791_v32 = vld [vmem:[%s15722_s13 + $0x148] sm:$0xf0] }
 0x56e   :  { %v10787_v58 = vld [vmem:[%s15722_s13 + $0x12c] sm:$0xf] }
 0x570   :  { %3236 = vmatpush.bf16.msra.mxu2 %v3204_v30  ;;  %v3094_v2 = vpop.f32.mrf.mxu2  ;;  %v10749_v30 = vld [vmem:[%s15723_s9 + $0x4] sm:$0xf0] }
 0x571   :  { %v3132_v16 = vpop.f32.mrf.mxu3  ;;  %v3171_v3 = vpack.c.bf16 %v3094_v2, %v3075_v10  ;;  %v9459_v6 = vor.u32 %v10749_v30, %v9458_v22  ;;  %v3164_v2 = vpack.c.bf16 %v12541_v20, %v12537_v60  ;;  %v9576_v22 = vld [vmem:[%s15722_s13 + $0xd8] sm:$0xf]  ;;  %v10781_v30 = vld [vmem:[%s15722_s13 + $0xf8] sm:$0xf0] }
 0x572   :  { %v3172_v59 = vpack.c.bf16 %v3132_v16, %v3113_v63  ;;  %v3144_v52 = vpop.f32.mrf.mxu1  ;;  %v3180_v63 = vpack.c.b16 %v3179_v36, %v3178_v27  ;;  %v9657_v36 = vor.u32 %v10800_v56, %v9656_v23  ;;  %v10751_v23 = vld [vmem:[%s15722_s13 + $0xc] sm:$0xf]  ;;  %v9478_v56 = vld [vmem:[%s15722_s13 + $0x2c] sm:$0xf0] }
 0x573   :  { %v3158_v29 = vpack.c.bf16 %v3144_v52, %v3144_v52  ;;  %v3289_v12 = vunpack.c.h.b16 %v3171_v3  ;;  %v3285_v43 = vunpack.c.l.b16 %v3171_v3  ;;  %v3275_v52 = vunpack.c.l.b16 %v3170_v40 }
 0x574   :  { %v3299_v62 = vunpack.c.h.b16 %v3172_v59  ;;  %3237 = vmatpush.bf16.msra.mxu2 %v3200_v61  ;;  %v3295_v24 = vunpack.c.l.b16 %v3172_v59  ;;  %v3169_v59 = vpack.c.bf16 %v12549_v26, %v12545_v18  ;;  %v3280_v61 = vpack.c.b16 %v3279_v37, %v3278_v21  ;;  %v10818_v18 = vld [vmem:[%s15722_s13 + $0x220] sm:$0xf0] }
 0x575   :  { %v3218_v31 = vunpack.c.l.b16 %v3158_v29  ;;  %v3290_v44 = vpack.c.b16 %v3289_v12, %v3288_v57  ;;  %v3286_v16 = vpack.c.b16 %v3285_v43, %v3284_v19  ;;  %v3276_v1 = vpack.c.b16 %v3275_v52, %v3274_v17  ;;  %v10805_v12 = vld [vmem:[%s15722_s13 + $0x1bc] sm:$0xf]  ;;  %v10790_v43 = vld [vmem:[%s15722_s13 + $0x140] sm:$0xf0]  ;;  %v10768_v17 = vld [vmem:[%s15722_s13 + $0x94] sm:$0xf] }
 0x576   :  { %v3300_v49 = vpack.c.b16 %v3299_v62, %v3298_v55  ;;  %v3296_v39 = vpack.c.b16 %v3295_v24, %v3294_v28  ;;  %v3269_v62 = vunpack.c.h.b16 %v3169_v59  ;;  %v9728_v24 = vld [vmem:[%s15722_s13 + $0x200] sm:$0xf]  ;;  %v3268_v26 = vunpack.c.h.b16 %v3164_v2  ;;  %v10809_v28 = vld [vmem:[%s15722_s13 + $0x1d8] sm:$0xf0]  ;;  %v10778_v21 = vld [vmem:[%s15722_s13 + $0xe4] sm:$0xf] }
 0x577   :  { %v3265_v60 = vunpack.c.l.b16 %v3169_v59  ;;  %v9729_v41 = vor.u32 %v10818_v18, %v9728_v24  ;;  %v3264_v25 = vunpack.c.l.b16 %v3164_v2  ;;  %v9693_v9 = vor.u32 %v10809_v28, %v9692_v15  ;;  %v9586_v59 = vld [vmem:[%s15722_s13 + $0x104] sm:$0xf0]  ;;  %v10772_v2 = vld [vmem:[%s15722_s13 + $0xb0] sm:$0xf0]  ;;  %v10769_v18 = vld [vmem:[%s15722_s13 + $0x9c] sm:$0xf] }
 0x578   :  { %3238 = vmatpush.bf16.msra.mxu2 %v3194_v47  ;;  %3308 = vmatpush.bf16.msrb.mxu3 %v3300_v49  ;;  %v3270_v20 = vpack.c.b16 %v3269_v62, %v3268_v26  ;;  %v9653_v57 = vor.u32 %v10795_v5, %v9650_v35  ;;  %v9625_v19 = vor.u32 %v10787_v58, %v9622_v46  ;;  %v9542_v62 = vld [vmem:[%s15722_s13 + $0xb4] sm:$0xf0]  ;;  %v9550_v26 = vld [vmem:[%s15722_s13 + $0xbc] sm:$0xf0]  ;;  %v10755_v5 = vld [vmem:[%s15722_s13 + $0x28] sm:$0xf0] }
 0x579   :  { %v3266_v29 = vpack.c.b16 %v3265_v60, %v3264_v25  ;;  %v9577_v37 = vor.u32 %v10781_v30, %v9576_v22  ;;  %v9589_v52 = vor.u32 %v10778_v21, %v9586_v59  ;;  %v10763_v60 = vld [vmem:[%s15722_s13 + $0x68] sm:$0xf0]  ;;  %v10760_v25 = vld [vmem:[%s15722_s13 + $0x54] sm:$0xf]  ;;  %v9700_v58 = vld [vmem:[%s15722_s13 + $0x1c0] sm:$0xf] }
 0x57a   :  { %v3146_v33 = vpop.f32.mrf.mxu1  ;;  %v10806_v46 = vld [vmem:[%s15722_s13 + $0x1c4] sm:$0xf]  ;;  %v9702_v22 = vld [vmem:[%s15722_s13 + $0x1e4] sm:$0xf0]  ;;  %v10801_v21 = vld [vmem:[%s15722_s13 + $0x198] sm:$0xf0] }
 0x57b   :  { %v3163_v0 = vpack.c.bf16 %v3146_v33, %v3146_v33  ;;  %v9694_v33 = vld [vmem:[%s15722_s13 + $0x1dc] sm:$0xf0]  ;;  %v9708_v30 = vld [vmem:[%s15722_s13 + $0x1c8] sm:$0xf]  ;;  %v10797_v59 = vld [vmem:[%s15722_s13 + $0x17c] sm:$0xf] }
 0x57c   :  { %3239 = vmatpush.bf16.msra.mxu2 %v3190_v34  ;;  %3309 = vmatpush.bf16.msrb.mxu3 %v3296_v39  ;;  %v9697_v34 = vor.u32 %v10805_v12, %v9694_v33  ;;  %v9648_v39 = vld [vmem:[%s15722_s13 + $0x168] sm:$0xf]  ;;  %v10754_v12 = vld [vmem:[%s15722_s13 + $0x20] sm:$0xf0] }
 0x57d   :  { %v3219_v38 = vunpack.c.l.b16 %v3163_v0  ;;  %v9649_v0 = vor.u32 %v10799_v42, %v9648_v39  ;;  %v10750_v33 = vld [vmem:[%s15722_s13 + $0x4] sm:$0xf]  ;;  %v9470_v39 = vld [vmem:[%s15722_s13 + $0x24] sm:$0xf0] }
 0x57e   :  { %v9476_v42 = vld [vmem:[%s15722_s13 + $0x8] sm:$0xf] }
 0x57f   :  { %v3220_v10 = vpack.c.b16 %v3219_v38, %v3218_v31  ;;  %v10796_v31 = vld [vmem:[%s15722_s13 + $0x174] sm:$0xf]  ;;  %v9658_v38 = vld [vmem:[%s15722_s13 + $0x194] sm:$0xf0]  ;;  %3800 = vmatpush.bf16.msra.mxu1 %v9649_v0  ;;  %v9473_v0 = vor.u32 %v10750_v33, %v9470_v39  ;;  %v9477_v35 = vor.u32 %v10755_v5, %v9476_v42  ;;  %v9594_v33 = vld [vmem:[%s15722_s13 + $0x10c] sm:$0xf0] }
 0x580   :  { %3240 = vmatpush.bf16.msra.mxu2 %v3184_v7  ;;  %3310 = vmatpush.bf16.msrb.mxu3 %v3290_v44  ;;  %v9612_v7 = vld [vmem:[%s15722_s13 + $0x120] sm:$0xf]  ;;  %v9661_v40 = vor.u32 %v10796_v31, %v9658_v38  ;;  %v10786_v44 = vld [vmem:[%s15722_s13 + $0x124] sm:$0xf]  ;;  %v10819_v31 = vld [vmem:[%s15722_s13 + $0x228] sm:$0xf0] }
 0x581   :  { %3255 = vmatpush.bf16.msra.mxu0 %v3220_v10  ;;  %v9613_v45 = vor.u32 %v10790_v43, %v9612_v7  ;;  %v9620_v10 = vld [vmem:[%s15722_s13 + $0x128] sm:$0xf]  ;;  %v10815_v38 = vld [vmem:[%s15722_s13 + $0x20c] sm:$0xf]  ;;  %v9744_v43 = vld [vmem:[%s15722_s13 + $0x210] sm:$0xf] }
 0x582   :  { %v3149_v53 = vpop.f32.mrf.mxu1  ;;  %v9621_v27 = vor.u32 %v10791_v32, %v9620_v10  ;;  %v9746_v10 = vld [vmem:[%s15722_s13 + $0x234] sm:$0xf0]  ;;  %v10784_v39 = vld [vmem:[%s15722_s13 + $0x110] sm:$0xf0] }
 0x583   :  { %v3168_v55 = vpack.c.bf16 %v3149_v53, %v3149_v53  ;;  %3801 = vmatpush.bf16.msra.mxu1 %v9613_v45  ;;  %v9578_v53 = vld [vmem:[%s15722_s13 + $0xfc] sm:$0xf0] }
 0x584   :  { %3241 = vmatpush.bf16.msra.mxu2 %v3180_v63  ;;  %3311 = vmatpush.bf16.msrb.mxu3 %v3286_v16  ;;  %v9584_v63 = vld [vmem:[%s15722_s13 + $0xe0] sm:$0xf]  ;;  %v10782_v16 = vld [vmem:[%s15722_s13 + $0x100] sm:$0xf0] }
 0x585   :  { %3817 = vmatpush.bf16.msrb.mxu0 %v9725_v4  ;;  %v3304_v49 = vunpack.c.l.b16 %v3168_v55  ;;  %v9617_v4 = vor.u32 %v10786_v44, %v9614_v8  ;;  %v10820_v44 = vld [vmem:[%s15722_s13 + $0x230] sm:$0xf0] }
 0x586   :  { %9464 = vmatmul.msk.bf16.vlgmr.msra.gmra.mxu0 %vm1492_vm1, %v9463_v50  ;;  %v9745_v45 = vor.u32 %v10820_v44, %v9744_v43  ;;  %v10775_v43 = vld [vmem:[%s15722_s13 + $0xc8] sm:$0xf0] }
 0x587   :  { %3242 = vmatmul.bf16.vlgmr.msra.gmra.mxu2 %v9459_v6  ;;  %3802 = vmatpush.bf16.msra.mxu1 %v9577_v37  ;;  %v9705_v37 = vor.u32 %v10806_v46, %v9702_v22  ;;  %v10771_v44 = vld [vmem:[%s15722_s13 + $0xac] sm:$0xf]  ;;  %v10761_v46 = vld [vmem:[%s15722_s13 + $0x5c] sm:$0xf] }
 0x588   :  { %3312 = vmatpush.bf16.msrb.mxu3 %v3280_v61  ;;  %v9540_v61 = vld [vmem:[%s15722_s13 + $0x90] sm:$0xf] }
 0x589   :  { %3818 = vmatpush.bf16.msrb.mxu0 %v9689_v48  ;;  %v9541_v55 = vor.u32 %v10772_v2, %v9540_v61  ;;  %v9666_v61 = vld [vmem:[%s15722_s13 + $0x19c] sm:$0xf0] }
 0x58a   :  { %v3151_v54 = vpop.f32.mrf.mxu1  ;;  %v9672_v2 = vld [vmem:[%s15722_s13 + $0x180] sm:$0xf] }
 0x58b   :  { %v3173_v3 = vpack.c.bf16 %v3151_v54, %v3151_v54  ;;  %v9548_v54 = vld [vmem:[%s15722_s13 + $0x98] sm:$0xf]  ;;  %3803 = vmatpush.bf16.msra.mxu1 %v9541_v55  ;;  %v9669_v55 = vor.u32 %v10797_v59, %v9666_v61  ;;  %v10756_v59 = vld [vmem:[%s15722_s13 + $0x30] sm:$0xf0] }
 0x58c   :  { %3313 = vmatpush.bf16.msrb.mxu3 %v3276_v1  ;;  %v10773_v1 = vld [vmem:[%s15722_s13 + $0xb8] sm:$0xf0] }
 0x58d   :  { %v3305_v47 = vunpack.c.l.b16 %v3173_v3  ;;  %3819 = vmatpush.bf16.msrb.mxu0 %v9653_v57  ;;  %v9545_v3 = vor.u32 %v10768_v17, %v9542_v62  ;;  %v9549_v24 = vor.u32 %v10773_v1, %v9548_v54  ;;  %v9481_v57 = vor.u32 %v10751_v23, %v9478_v56  ;;  %v10802_v17 = vld [vmem:[%s15722_s13 + $0x1a0] sm:$0xf0]  ;;  %v9674_v1 = vld [vmem:[%s15722_s13 + $0x1a4] sm:$0xf0]  ;;  %v9556_v23 = vld [vmem:[%s15722_s13 + $0xa0] sm:$0xf] }
 0x58e   :  { %v9673_v62 = vor.u32 %v10802_v17, %v9672_v2  ;;  %v10798_v54 = vld [vmem:[%s15722_s13 + $0x184] sm:$0xf]  ;;  %v10752_v17 = vld [vmem:[%s15722_s13 + $0x14] sm:$0xf] }
 0x58f   :  { %v3306_v51 = vpack.c.b16 %v3305_v47, %v3304_v49  ;;  %v9553_v49 = vor.u32 %v10769_v18, %v9550_v26  ;;  %v9504_v47 = vld [vmem:[%s15722_s13 + $0x48] sm:$0xf]  ;;  %v10792_v18 = vld [vmem:[%s15722_s13 + $0x150] sm:$0xf0] }
 0x590   :  { %3314 = vmatpush.bf16.msrb.mxu3 %v3270_v20  ;;  %v10759_v20 = vld [vmem:[%s15722_s13 + $0x4c] sm:$0xf]  ;;  %v10788_v26 = vld [vmem:[%s15722_s13 + $0x134] sm:$0xf] }
 0x591   :  { %3329 = vmatpush.bf16.msrb.mxu2 %v3306_v51  ;;  %3820 = vmatpush.bf16.msrb.mxu0 %v9617_v4  ;;  %v10764_v51 = vld [vmem:[%s15722_s13 + $0x70] sm:$0xf0]  ;;  %v9509_v15 = vor.u32 %v10759_v20, %v9506_v11  ;;  %v10793_v20 = vld [vmem:[%s15722_s13 + $0x158] sm:$0xf0] }
 0x592   :  { %v9513_v28 = vor.u32 %v10764_v51, %v9512_v14  ;;  %v10816_v4 = vld [vmem:[%s15722_s13 + $0x214] sm:$0xf]  ;;  %v10789_v51 = vld [vmem:[%s15722_s13 + $0x13c] sm:$0xf] }
 0x593   :  { %v9749_v32 = vor.u32 %v10816_v4, %v9746_v10  ;;  %v9566_v10 = vld [vmem:[%s15722_s13 + $0xcc] sm:$0xf0] }
 0x594   :  { %3315 = vmatpush.bf16.msrb.mxu3 %v3266_v29 }
 0x595   :  { %3836 = vmatpush.bf16.msra.mxu2 %v9729_v41  ;;  %v9505_v41 = vor.u32 %v10763_v60, %v9504_v47  ;;  %v9630_v47 = vld [vmem:[%s15722_s13 + $0x154] sm:$0xf0] }
 0x596   :  { %v9636_v60 = vld [vmem:[%s15722_s13 + $0x138] sm:$0xf]  ;;  %v9633_v11 = vor.u32 %v10788_v26, %v9630_v47  ;;  %v10753_v26 = vld [vmem:[%s15722_s13 + $0x1c] sm:$0xf] }
 0x597   :  { %3316 = vmatmul.bf16.vlgmr.msrb.gmra.mxu3 %v9459_v6  ;;  %9465 = vmatmul.msk.bf16.vlgmr.msrb.gmra.mxu2 %vm1492_vm1, %v9463_v50  ;;  %v10777_v50 = vld [vmem:[%s15722_s13 + $0xdc] sm:$0xf]  ;;  %v9585_v6 = vor.u32 %v10782_v16, %v9584_v63  ;;  %v10807_v63 = vld [vmem:[%s15722_s13 + $0x1cc] sm:$0xf]  ;;  %v9710_v16 = vld [vmem:[%s15722_s13 + $0x1ec] sm:$0xf0]  ;;  %v9637_v14 = vor.u32 %v10793_v20, %v9636_v60 }
 0x598   :  { %3855 = vmatpush.bf16.msra.mxu3 %v9733_v13  ;;  %v9581_v48 = vor.u32 %v10777_v50, %v9578_v53  ;;  %v9514_v13 = vld [vmem:[%s15722_s13 + $0x74] sm:$0xf0]  ;;  %3804 = vmatpush.bf16.msra.mxu1 %v9505_v41  ;;  %v10811_v50 = vld [vmem:[%s15722_s13 + $0x1e8] sm:$0xf0] }
 0x599   :  { %3837 = vmatpush.bf16.msra.mxu2 %v9693_v9  ;;  %v9517_v29 = vor.u32 %v10760_v25, %v9514_v13  ;;  %v9468_v9 = vld [vmem:[%s15722_s13] sm:$0xf]  ;;  %v9709_v53 = vor.u32 %v10811_v50, %v9708_v30  ;;  %v9592_v13 = vld [vmem:[%s15722_s13 + $0xe8] sm:$0xf]  ;;  %v10766_v50 = vld [vmem:[%s15722_s13 + $0x80] sm:$0xf0] }
 0x59a   :  { %3821 = vmatpush.bf16.msrb.mxu0 %v9581_v48  ;;  %v9713_v48 = vor.u32 %v10807_v63, %v9710_v16  ;;  %v9528_v30 = vld [vmem:[%s15722_s13 + $0x60] sm:$0xf] }
 0x59c   :  { %3856 = vmatpush.bf16.msra.mxu3 %v9697_v34  ;;  %v9469_v34 = vor.u32 %v10754_v12, %v9468_v9  ;;  %v10779_v9 = vld [vmem:[%s15722_s13 + $0xec] sm:$0xf] }
 0x59d   :  { %3838 = vmatpush.bf16.msra.mxu2 %v9657_v36  ;;  %v9736_v36 = vld [vmem:[%s15722_s13 + $0x208] sm:$0xf]  ;;  %v9597_v42 = vor.u32 %v10779_v9, %v9594_v33 }
 0x59e   :  { %3822 = vmatpush.bf16.msrb.mxu0 %v9545_v3  ;;  %3805 = vmatpush.bf16.msra.mxu1 %v9469_v34  ;;  %v9737_v7 = vor.u32 %v10819_v31, %v9736_v36  ;;  %v9677_v3 = vor.u32 %v10798_v54, %v9674_v1  ;;  %v9600_v34 = vld [vmem:[%s15722_s13 + $0xf0] sm:$0xf]  ;;  %v10770_v36 = vld [vmem:[%s15722_s13 + $0xa4] sm:$0xf]  ;;  %v9558_v31 = vld [vmem:[%s15722_s13 + $0xc4] sm:$0xf0] }
 0x59f   :  { %v9601_v5 = vor.u32 %v10784_v39, %v9600_v34  ;;  %v10757_v54 = vld [vmem:[%s15722_s13 + $0x38] sm:$0xf0]  ;;  %v9680_v9 = vld [vmem:[%s15722_s13 + $0x188] sm:$0xf] }
 0x5a0   :  { %3857 = vmatpush.bf16.msra.mxu3 %v9661_v40  ;;  %v9738_v40 = vld [vmem:[%s15722_s13 + $0x22c] sm:$0xf0] }
 0x5a1   :  { %3839 = vmatpush.bf16.msra.mxu2 %v9621_v27  ;;  %v9741_v8 = vor.u32 %v10815_v38, %v9738_v40  ;;  %v10810_v27 = vld [vmem:[%s15722_s13 + $0x1e0] sm:$0xf0]  ;;  %v9564_v40 = vld [vmem:[%s15722_s13 + $0xa8] sm:$0xf] }
 0x5a2   :  { %3823 = vmatpush.bf16.msrb.mxu0 %v9509_v15  ;;  %3874 = vmatpush.bf16.msrb.mxu1 %v9737_v7  ;;  %v9638_v15 = vld [vmem:[%s15722_s13 + $0x15c] sm:$0xf0]  ;;  %v9561_v7 = vor.u32 %v10770_v36, %v9558_v31  ;;  %v9565_v4 = vor.u32 %v10775_v43, %v9564_v40  ;;  %v10785_v40 = vld [vmem:[%s15722_s13 + $0x118] sm:$0xf0] }
 0x5a4   :  { %3858 = vmatpush.bf16.msra.mxu3 %v9625_v19  ;;  %v9701_v19 = vor.u32 %v10810_v27, %v9700_v58  ;;  %v9569_v58 = vor.u32 %v10771_v44, %v9566_v10  ;;  %v10765_v27 = vld [vmem:[%s15722_s13 + $0x78] sm:$0xf0]  ;;  %v9572_v44 = vld [vmem:[%s15722_s13 + $0xb0] sm:$0xf]  ;;  %v10767_v10 = vld [vmem:[%s15722_s13 + $0x88] sm:$0xf0] }
 0x5a5   :  { %3840 = vmatpush.bf16.msra.mxu2 %v9585_v6  ;;  %v9664_v6 = vld [vmem:[%s15722_s13 + $0x178] sm:$0xf] }
 0x5a6   :  { %3824 = vmatpush.bf16.msrb.mxu0 %v9473_v0  ;;  %3875 = vmatpush.bf16.msrb.mxu1 %v9701_v19  ;;  %v10780_v0 = vld [vmem:[%s15722_s13 + $0xf4] sm:$0xf]  ;;  %v9522_v19 = vld [vmem:[%s15722_s13 + $0x7c] sm:$0xf0] }
 0x5a7   :  { %v9525_v16 = vor.u32 %v10761_v46, %v9522_v19 }
 0x5a8   :  { %3859 = vmatpush.bf16.msra.mxu3 %v9589_v52  ;;  %v9665_v52 = vor.u32 %v10801_v21, %v9664_v6  ;;  %v9530_v6 = vld [vmem:[%s15722_s13 + $0x84] sm:$0xf0]  ;;  %v9484_v21 = vld [vmem:[%s15722_s13 + $0x10] sm:$0xf] }
 0x5a9   :  { %3841 = vmatpush.bf16.msra.mxu2 %v9549_v24  ;;  %v9628_v24 = vld [vmem:[%s15722_s13 + $0x130] sm:$0xf] }
 0x5aa   :  { %3893 = vmatpush.bf16.msra.mxu0 %v9741_v8  ;;  %3876 = vmatpush.bf16.msrb.mxu1 %v9665_v52 }
 0x5ac   :  { %3860 = vmatpush.bf16.msra.mxu3 %v9553_v49  ;;  %v9629_v49 = vor.u32 %v10792_v18, %v9628_v24 }
 0x5ad   :  { %3842 = vmatpush.bf16.msra.mxu2 %v9513_v28  ;;  %v9641_v28 = vor.u32 %v10789_v51, %v9638_v15  ;;  %v9752_v51 = vld [vmem:[%s15722_s13 + $0x218] sm:$0xf]  ;;  %v10821_v15 = vld [vmem:[%s15722_s13 + $0x238] sm:$0xf0] }
 0x5ae   :  { %3894 = vmatpush.bf16.msra.mxu0 %v9705_v37  ;;  %3877 = vmatpush.bf16.msrb.mxu1 %v9629_v49  ;;  %v10762_v37 = vld [vmem:[%s15722_s13 + $0x64] sm:$0xf]  ;;  %v9494_v49 = vld [vmem:[%s15722_s13 + $0x3c] sm:$0xf0] }
 0x5af   :  { %v9533_v2 = vor.u32 %v10762_v37, %v9530_v6 }
 0x5b0   :  { %3861 = vmatpush.bf16.msra.mxu3 %v9517_v29  ;;  %v10783_v29 = vld [vmem:[%s15722_s13 + $0x108] sm:$0xf0] }
 0x5b1   :  { %3843 = vmatpush.bf16.msra.mxu2 %v9477_v35  ;;  %v9593_v12 = vor.u32 %v10783_v29, %v9592_v13  ;;  %v9602_v35 = vld [vmem:[%s15722_s13 + $0x114] sm:$0xf0]  ;;  %v10812_v13 = vld [vmem:[%s15722_s13 + $0x1f0] sm:$0xf0] }
 0x5b2   :  { %3895 = vmatpush.bf16.msra.mxu0 %v9669_v55  ;;  %v9605_v56 = vor.u32 %v10780_v0, %v9602_v35  ;;  %v9486_v55 = vld [vmem:[%s15722_s13 + $0x34] sm:$0xf0]  ;;  %v10794_v0 = vld [vmem:[%s15722_s13 + $0x160] sm:$0xf0] }
 0x5b3   :  { %3878 = vmatpush.bf16.msrb.mxu1 %v9593_v12  ;;  %v9489_v24 = vor.u32 %v10752_v17, %v9486_v55  ;;  %v10803_v12 = vld [vmem:[%s15722_s13 + $0x1a8] sm:$0xf0] }
 0x5b4   :  { %3862 = vmatpush.bf16.msra.mxu3 %v9481_v57  ;;  %v10774_v57 = vld [vmem:[%s15722_s13 + $0xc0] sm:$0xf0]  ;;  %v9681_v34 = vor.u32 %v10803_v12, %v9680_v9 }
 0x5b5   :  { %3912 = vmatpush.bf16.msrb.mxu2 %v9745_v45  ;;  %v9557_v38 = vor.u32 %v10774_v57, %v9556_v23  ;;  %v12913_v45 = vld [vmem:[%s15724_s11] ss:$0 sm:$0xff] }
 0x5b6   :  { %3896 = vmatpush.bf16.msra.mxu0 %v9633_v11 }
 0x5b7   :  { %3879 = vmatpush.bf16.msrb.mxu1 %v9557_v38 }
 0x5b8   :  { %3931 = vmatpush.bf16.msrb.mxu3 %v9749_v32  ;;  %v9520_v32 = vld [vmem:[%s15722_s13 + $0x58] sm:$0xf] }
 0x5b9   :  { %3913 = vmatpush.bf16.msrb.mxu2 %v9709_v53  ;;  %v9521_v22 = vor.u32 %v10765_v27, %v9520_v32  ;;  %v10758_v27 = vld [vmem:[%s15722_s13 + $0x40] sm:$0xf0] }
 0x5ba   :  { %3897 = vmatpush.bf16.msra.mxu0 %v9597_v42 }
 0x5bb   :  { %3880 = vmatpush.bf16.msrb.mxu1 %v9521_v22 }
 0x5bc   :  { %3932 = vmatpush.bf16.msrb.mxu3 %v9713_v48  ;;  %v9529_v48 = vor.u32 %v10766_v50, %v9528_v30 }
 0x5bd   :  { %3914 = vmatpush.bf16.msrb.mxu2 %v9673_v62  ;;  %v9492_v62 = vld [vmem:[%s15722_s13 + $0x18] sm:$0xf] }
 0x5be   :  { %3898 = vmatpush.bf16.msra.mxu0 %v9561_v7  ;;  %v9493_v18 = vor.u32 %v10757_v54, %v9492_v62  ;;  %v9608_v7 = vld [vmem:[%s15722_s13 + $0xf8] sm:$0xf] }
 0x5bf   :  { %v9609_v43 = vor.u32 %v10785_v40, %v9608_v7 }
 0x5c0   :  { %3933 = vmatpush.bf16.msrb.mxu3 %v9677_v3  ;;  %v9485_v3 = vor.u32 %v10756_v59, %v9484_v21 }
 0x5c1   :  { %3915 = vmatpush.bf16.msrb.mxu2 %v9637_v14 }
 0x5c2   :  { %3899 = vmatpush.bf16.msra.mxu0 %v9525_v16  ;;  %3881 = vmatpush.bf16.msrb.mxu1 %v9485_v3 }
 0x5c4   :  { %3934 = vmatpush.bf16.msrb.mxu3 %v9641_v28  ;;  %v9753_v28 = vor.u32 %v10821_v15, %v9752_v51 }
 0x5c5   :  { %3916 = vmatpush.bf16.msrb.mxu2 %v9601_v5  ;;  %v9644_v5 = vld [vmem:[%s15722_s13 + $0x140] sm:$0xf] }
 0x5c6   :  { %3900 = vmatpush.bf16.msra.mxu0 %v9489_v24  ;;  %v9645_v57 = vor.u32 %v10794_v0, %v9644_v5 }
 0x5c8   :  { %3935 = vmatpush.bf16.msrb.mxu3 %v9605_v56 }
 0x5c9   :  { %3917 = vmatpush.bf16.msrb.mxu2 %v9565_v4  ;;  %v9536_v4 = vld [vmem:[%s15722_s13 + $0x68] sm:$0xf] }
 0x5ca   :  { %v9537_v32 = vor.u32 %v10767_v10, %v9536_v4 }
 0x5cc   :  { %3936 = vmatpush.bf16.msrb.mxu3 %v9569_v58  ;;  %v9500_v58 = vld [vmem:[%s15722_s13 + $0x20] sm:$0xf] }
 0x5cd   :  { %3918 = vmatpush.bf16.msrb.mxu2 %v9529_v48  ;;  %v9501_v46 = vor.u32 %v10758_v27, %v9500_v58 }
 0x5d0   :  { %3937 = vmatpush.bf16.msrb.mxu3 %v9533_v2 }
 0x5d1   :  { %3919 = vmatpush.bf16.msrb.mxu2 %v9493_v18 }
 0x603   :  { %v3257_v41 = vpop.f32.mrf.mxu0 }
 0x60a   :  { %v3243_v25 = vpop.f32.mrf.mxu2 }
 0x60b   :  { %v3258_v8 = vadd.f32 %v3257_v41, %v3243_v25  ;;  %v3259_v53 = vpop.f32.mrf.mxu0  ;;  %v9497_v41 = vor.u32 %v10753_v26, %v9494_v49  ;;  %v9716_v25 = vld [vmem:[%s15722_s13 + $0x1d0] sm:$0xf] }
 0x60c   :  { %v9717_v29 = vor.u32 %v10812_v13, %v9716_v25 }
 0x60d   :  { %v3340_v52 = vadd.f32 %v12913_v45, %v3258_v8  ;;  %3938 = vmatpush.bf16.msrb.mxu3 %v9497_v41  ;;  %v10776_v8 = vld [vmem:[%s15722_s13 + $0xd0] sm:$0xf0] }
 0x60f   :  { %v3344_v47 = vmax.f32 %v3340_v52, 0.0 }
 0x612   :  { %v3245_v63 = vpop.f32.mrf.mxu2 }
 0x613   :  { %v3260_v61 = vadd.f32 %v3259_v53, %v3245_v63 }
 0x615   :  { %v3341_v1 = vadd.f32 %v12913_v45, %v3260_v61 }
 0x617   :  { %v3345_v60 = vmax.f32 %v3341_v1, 0.0 }
 0x619   :  { %v12968_v20 = vpack.c.bf16 %v3345_v60, %v3344_v47 }
 0x61a   :  { %v3317_v11 = vpop.f32.mrf.mxu3  ;;  %v3331_v14 = vpop.f32.mrf.mxu2 }
 0x61b   :  { %3806 = vmatmul.bf16.vlgmr.msra.gmra.mxu1 %v12968_v20  ;;  %3825 = vmatmul.bf16.vlgmr.msrb.gmra.mxu0 %v12968_v20  ;;  %v3332_v33 = vadd.f32 %v3331_v14, %v3317_v11 }
 0x61c   :  { %3844 = vmatmul.bf16.vlgmr.msra.gmra.mxu2 %v12968_v20  ;;  %3863 = vmatmul.bf16.vlgmr.msra.gmra.mxu3 %v12968_v20 }
 0x61d   :  { %3950 = vmatpush.bf16.msra.mxu1 %v9753_v28  ;;  %v3342_v35 = vadd.f32 %v12913_v45, %v3332_v33 }
 0x61f   :  { %v3346_v36 = vmax.f32 %v3342_v35, 0.0 }
 0x621   :  { %3951 = vmatpush.bf16.msra.mxu1 %v9717_v29 }
 0x622   :  { %v3319_v39 = vpop.f32.mrf.mxu3  ;;  %v3333_v42 = vpop.f32.mrf.mxu2 }
 0x623   :  { %v3334_v23 = vadd.f32 %v3333_v42, %v3319_v39 }
 0x625   :  { %v3343_v56 = vadd.f32 %v12913_v45, %v3334_v23  ;;  %3952 = vmatpush.bf16.msra.mxu1 %v9681_v34  ;;  %v9573_v45 = vor.u32 %v10776_v8, %v9572_v44 }
 0x627   :  { %v3347_v31 = vmax.f32 %v3343_v56, 0.0 }
 0x629   :  { %v3349_v38 = vpack.c.bf16 %v3347_v31, %v3346_v36  ;;  %3953 = vmatpush.bf16.msra.mxu1 %v9645_v57 }
 0x62b   :  { %3811 = vmatmul.bf16.gmra.mxu1 %v3349_v38  ;;  %3830 = vmatmul.bf16.gmra.mxu0 %v3349_v38 }
 0x62c   :  { %3849 = vmatmul.bf16.gmra.mxu2 %v3349_v38  ;;  %3868 = vmatmul.bf16.gmra.mxu3 %v3349_v38 }
 0x62d   :  { %3954 = vmatpush.bf16.msra.mxu1 %v9609_v43 }
 0x631   :  { %3955 = vmatpush.bf16.msra.mxu1 %v9573_v45 }
 0x635   :  { %3956 = vmatpush.bf16.msra.mxu1 %v9537_v32 }
 0x639   :  { %3957 = vmatpush.bf16.msra.mxu1 %v9501_v46 }
 0x63b   :  { %3882 = vmatmul.bf16.vlgmr.msrb.gmra.mxu1 %v12968_v20  ;;  %3901 = vmatmul.bf16.vlgmr.msra.gmra.mxu0 %v12968_v20 }
 0x63c   :  { %3920 = vmatmul.bf16.vlgmr.msrb.gmra.mxu2 %v12968_v20  ;;  %3939 = vmatmul.bf16.vlgmr.msrb.gmra.mxu3 %v12968_v20 }
 0x64b   :  { %3887 = vmatmul.bf16.gmra.mxu1 %v3349_v38  ;;  %3906 = vmatmul.bf16.gmra.mxu0 %v3349_v38 }
 0x64c   :  { %3925 = vmatmul.bf16.gmra.mxu2 %v3349_v38  ;;  %3944 = vmatmul.bf16.gmra.mxu3 %v3349_v38 }
 0x65b   :  { %3958 = vmatmul.bf16.vlgmr.msra.gmra.mxu1 %v12968_v20 }
 0x66b   :  { %3963 = vmatmul.bf16.gmra.mxu1 %v3349_v38 }
 0x698   :  { %v3807_v19 = vpop.f32.mrf.mxu1  ;;  %v3826_v22 = vpop.f32.mrf.mxu0 }
 0x699   :  { %v3969_v44 = vpack.c.bf16 %v3826_v22, %v3807_v19  ;;  %v9758_v19 = vld [vmem:[%s15725_s12 + $0x8] sm:$0xf0] }
 0x69f   :  { %v3845_v30 = vpop.f32.mrf.mxu2  ;;  %v3864_v50 = vpop.f32.mrf.mxu3 }
 0x6a0   :  { %v3809_v37 = vpop.f32.mrf.mxu1  ;;  %v3828_v53 = vpop.f32.mrf.mxu0  ;;  %v3970_v35 = vpack.c.bf16 %v3864_v50, %v3845_v30  ;;  %v4003_v50 = vunpack.c.h.b16 %v3969_v44 }
 0x6a1   :  { %v3974_v38 = vpack.c.bf16 %v3828_v53, %v3809_v37  ;;  %v10822_v37 = vld [vmem:[%s15725_s12 + $0x4] sm:$0xf] }
 0x6a2   :  { %v4013_v31 = vunpack.c.h.b16 %v3970_v35  ;;  %v4009_v8 = vunpack.c.l.b16 %v3970_v35 }
 0x6a3   :  { %v4004_v32 = vunpack.c.h.b16 %v3974_v38  ;;  %v4000_v22 = vunpack.c.l.b16 %v3974_v38 }
 0x6a5   :  { %v4005_v53 = vpack.c.b16 %v4004_v32, %v4003_v50  ;;  %v9782_v50 = vld [vmem:[%s15725_s12 + $0x38] sm:$0xf0] }
 0x6a7   :  { %v3847_v63 = vpop.f32.mrf.mxu2  ;;  %v3866_v16 = vpop.f32.mrf.mxu3 }
 0x6a8   :  { %v3812_v48 = vpop.f32.mrf.mxu1  ;;  %v3831_v6 = vpop.f32.mrf.mxu0  ;;  %v3975_v34 = vpack.c.bf16 %v3866_v16, %v3847_v63 }
 0x6a9   :  { %v13029_v21 = vpack.c.bf16 %v3831_v6, %v3812_v48 }
 0x6aa   :  { %v4014_v56 = vunpack.c.h.b16 %v3975_v34  ;;  %v4010_v7 = vunpack.c.l.b16 %v3975_v34 }
 0x6ac   :  { %v4015_v43 = vpack.c.b16 %v4014_v56, %v4013_v31  ;;  %v4011_v27 = vpack.c.b16 %v4010_v7, %v4009_v8 }
 0x6af   :  { %v3850_v59 = vpop.f32.mrf.mxu2  ;;  %v3869_v52 = vpop.f32.mrf.mxu3 }
 0x6b0   :  { %v13031_v61 = vpack.c.bf16 %v3869_v52, %v3850_v59  ;;  %v13033_v2 = vpop.f32.mrf.mxu1  ;;  %v13035_v17 = vpop.f32.mrf.mxu0  ;;  %v3999_v52 = vunpack.c.l.b16 %v3969_v44 }
 0x6b1   :  { %v3984_v31 = vpack.c.bf16 %v13035_v17, %v13033_v2  ;;  %v4151_v2 = vunpack.c.l.b16 %v13029_v21  ;;  %v10826_v17 = vld [vmem:[%s15725_s12 + $0x24] sm:$0xf] }
 0x6b3   :  { %v4156_v44 = vunpack.c.h.b16 %v3984_v31 }
 0x6b7   :  { %v13037_v55 = vpop.f32.mrf.mxu2  ;;  %v13039_v62 = vpop.f32.mrf.mxu3 }
 0x6b8   :  { %v3883_v54 = vpop.f32.mrf.mxu1  ;;  %v3902_v1 = vpop.f32.mrf.mxu0 }
 0x6b9   :  { %v3971_v25 = vpack.c.bf16 %v3902_v1, %v3883_v54  ;;  %v9761_v1 = vor.u32 %v10822_v37, %v9758_v19  ;;  %v10048_v19 = vld [vmem:[%s15727_s16 + $0x1f8] sm:$0xf] }
 0x6bb   :  { %v4023_v33 = vunpack.c.h.b16 %v3971_v25  ;;  %v4019_v23 = vunpack.c.l.b16 %v3971_v25 }
 0x6bf   :  { %v3921_v3 = vpop.f32.mrf.mxu2  ;;  %v3940_v24 = vpop.f32.mrf.mxu3 }
 0x6c0   :  { %v3885_v18 = vpop.f32.mrf.mxu1  ;;  %v3972_v26 = vpack.c.bf16 %v3940_v24, %v3921_v3  ;;  %v3904_v41 = vpop.f32.mrf.mxu0  ;;  %v9756_v3 = vld [vmem:[%s15725_s12] sm:$0xf]  ;;  %v10823_v24 = vld [vmem:[%s15725_s12 + $0x4] sm:$0xf0] }
 0x6c1   :  { %v3976_v51 = vpack.c.bf16 %v3904_v41, %v3885_v18 }
 0x6c2   :  { %v4033_v11 = vunpack.c.h.b16 %v3972_v26  ;;  %v4029_v13 = vunpack.c.l.b16 %v3972_v26 }
 0x6c3   :  { %v4024_v29 = vunpack.c.h.b16 %v3976_v51  ;;  %v4020_v39 = vunpack.c.l.b16 %v3976_v51 }
 0x6c5   :  { %v4025_v0 = vpack.c.b16 %v4024_v29, %v4023_v33  ;;  %v4021_v36 = vpack.c.b16 %v4020_v39, %v4019_v23 }
 0x6c7   :  { %v3923_v49 = vpop.f32.mrf.mxu2  ;;  %v3942_v47 = vpop.f32.mrf.mxu3 }
 0x6c8   :  { %v3977_v60 = vpack.c.bf16 %v3942_v47, %v3923_v49  ;;  %v13041_v20 = vpop.f32.mrf.mxu1  ;;  %v3907_v40 = vpop.f32.mrf.mxu0  ;;  %v4001_v49 = vpack.c.b16 %v4000_v22, %v3999_v52  ;;  %v10897_v22 = vld [vmem:[%s15727_s16 + $0x218] sm:$0xf0]  ;;  %v10056_v52 = vld [vmem:[%s15727_s16 + $0x200] sm:$0xf] }
 0x6ca   :  { %v4034_v14 = vunpack.c.h.b16 %v3977_v60  ;;  %v4030_v15 = vunpack.c.l.b16 %v3977_v60 }
 0x6cc   :  { %v4035_v28 = vpack.c.b16 %v4034_v14, %v4033_v11  ;;  %v4031_v12 = vpack.c.b16 %v4030_v15, %v4029_v13  ;;  %v13055_v11 = vor.u32 %v10823_v24, %v9756_v3  ;;  %v3981_v14 = vpack.c.bf16 %v3907_v40, %v13041_v20  ;;  %v10824_v20 = vld [vmem:[%s15725_s12 + $0x14] sm:$0xf]  ;;  %v10894_v24 = vld [vmem:[%s15727_s16 + $0x204] sm:$0xf] }
 0x6ce   :  { %4091 = vmatpush.bf16.msrb.mxu0 %v4035_v28  ;;  %v4175_v25 = vunpack.c.h.b16 %v3981_v14  ;;  %v4171_v39 = vunpack.c.l.b16 %v3981_v14 }
 0x6cf   :  { %v3926_v42 = vpop.f32.mrf.mxu2  ;;  %v3945_v5 = vpop.f32.mrf.mxu3 }
 0x6d0   :  { %v3890_v9 = vpop.f32.mrf.mxu1  ;;  %v3982_v63 = vpack.c.bf16 %v3945_v5, %v3926_v42  ;;  %v3909_v54 = vpop.f32.mrf.mxu0 }
 0x6d1   :  { %v3986_v47 = vpack.c.bf16 %v3909_v54, %v3890_v9  ;;  %v3985_v9 = vpack.c.bf16 %v13039_v62, %v13037_v55  ;;  %v9764_v55 = vld [vmem:[%s15725_s12 + $0x10] sm:$0xf]  ;;  %v10825_v62 = vld [vmem:[%s15725_s12 + $0x14] sm:$0xf0]  ;;  %v10898_v54 = vld [vmem:[%s15727_s16 + $0x220] sm:$0xf0] }
 0x6d2   :  { %4092 = vmatpush.bf16.msrb.mxu0 %v4031_v12  ;;  %v4185_v18 = vunpack.c.h.b16 %v3982_v63  ;;  %v4181_v51 = vunpack.c.l.b16 %v3982_v63  ;;  %v9765_v40 = vor.u32 %v10825_v62, %v9764_v55  ;;  %v10057_v3 = vor.u32 %v10898_v54, %v10056_v52  ;;  %v10870_v55 = vld [vmem:[%s15727_s16 + $0x140] sm:$0xf0]  ;;  %v10849_v54 = vld [vmem:[%s15727_s16 + $0x9c] sm:$0xf] }
 0x6d3   :  { %v4176_v15 = vunpack.c.h.b16 %v3986_v47  ;;  %v4172_v12 = vunpack.c.l.b16 %v3986_v47  ;;  %v4166_v35 = vunpack.c.h.b16 %v3985_v9  ;;  %v4162_v38 = vunpack.c.l.b16 %v3985_v9  ;;  %v10888_v47 = vld [vmem:[%s15727_s16 + $0x1d0] sm:$0xf0]  ;;  %v10879_v9 = vld [vmem:[%s15727_s16 + $0x188] sm:$0xf0]  ;;  %v10866_v62 = vld [vmem:[%s15727_s16 + $0x124] sm:$0xf] }
 0x6d4   :  { %4843 = vmatpush.bf16.msra.mxu3 %v10057_v3 }
 0x6d5   :  { %v4177_v34 = vpack.c.b16 %v4176_v15, %v4175_v25  ;;  %v4173_v56 = vpack.c.b16 %v4172_v12, %v4171_v39  ;;  %v10889_v15 = vld [vmem:[%s15727_s16 + $0x1d8] sm:$0xf0]  ;;  %v9984_v39 = vld [vmem:[%s15727_s16 + $0x170] sm:$0xf] }
 0x6d6   :  { %4093 = vmatpush.bf16.msrb.mxu0 %v4025_v0  ;;  %v9766_v0 = vld [vmem:[%s15725_s12 + $0x18] sm:$0xf0] }
 0x6d7   :  { %v3928_v45 = vpop.f32.mrf.mxu2  ;;  %v3947_v4 = vpop.f32.mrf.mxu3 }
 0x6d8   :  { %v3959_v57 = vpop.f32.mrf.mxu1  ;;  %v3987_v46 = vpack.c.bf16 %v3947_v4, %v3928_v45  ;;  %v4155_v45 = vunpack.c.h.b16 %v13029_v21  ;;  %v4152_v4 = vunpack.c.l.b16 %v3984_v31  ;;  %v9942_v31 = vld [vmem:[%s15727_s16 + $0x144] sm:$0xf0] }
 0x6d9   :  { %v3973_v10 = vpack.c.bf16 %v3959_v57, %v3959_v57  ;;  %v9769_v57 = vor.u32 %v10824_v20, %v9766_v0  ;;  %v10876_v20 = vld [vmem:[%s15727_s16 + $0x174] sm:$0xf]  ;;  %v9986_v0 = vld [vmem:[%s15727_s16 + $0x194] sm:$0xf0] }
 0x6da   :  { %4094 = vmatpush.bf16.msrb.mxu0 %v4021_v36  ;;  %v4186_v6 = vunpack.c.h.b16 %v3987_v46  ;;  %v4182_v60 = vunpack.c.l.b16 %v3987_v46  ;;  %v4165_v36 = vunpack.c.h.b16 %v13031_v61  ;;  %v4153_v32 = vpack.c.b16 %v4152_v4, %v4151_v2  ;;  %v10827_v46 = vld [vmem:[%s15725_s12 + $0x24] sm:$0xf0]  ;;  %v9904_v4 = vld [vmem:[%s15727_s16 + $0xd8] sm:$0xf]  ;;  %v10857_v2 = vld [vmem:[%s15727_s16 + $0xdc] sm:$0xf] }
 0x6db   :  { %v4039_v16 = vunpack.c.l.b16 %v3973_v10  ;;  %v4157_v10 = vpack.c.b16 %v4156_v44, %v4155_v45  ;;  %v10867_v44 = vld [vmem:[%s15727_s16 + $0x12c] sm:$0xf] }
 0x6dc   :  { %v4187_v41 = vpack.c.b16 %v4186_v6, %v4185_v18  ;;  %v4183_v28 = vpack.c.b16 %v4182_v60, %v4181_v51  ;;  %v4167_v7 = vpack.c.b16 %v4166_v35, %v4165_v36  ;;  %v10049_v6 = vor.u32 %v10897_v22, %v10048_v19  ;;  %v10058_v18 = vld [vmem:[%s15727_s16 + $0x224] sm:$0xf0]  ;;  %v10884_v60 = vld [vmem:[%s15727_s16 + $0x1b4] sm:$0xf]  ;;  %v10020_v51 = vld [vmem:[%s15727_s16 + $0x1b8] sm:$0xf] }
 0x6dd   :  { %v10021_v25 = vor.u32 %v10889_v15, %v10020_v51  ;;  %v9870_v22 = vld [vmem:[%s15727_s16 + $0xb4] sm:$0xf0]  ;;  %v10840_v51 = vld [vmem:[%s15727_s16 + $0x54] sm:$0xf] }
 0x6de   :  { %4095 = vmatpush.bf16.msrb.mxu0 %v4015_v43  ;;  %v4161_v43 = vunpack.c.l.b16 %v13031_v61  ;;  %v9774_v61 = vld [vmem:[%s15725_s12 + $0x28] sm:$0xf0]  ;;  %v9842_v15 = vld [vmem:[%s15727_s16 + $0x74] sm:$0xf0] }
 0x6df   :  { %4844 = vmatpush.bf16.msra.mxu3 %v10021_v25  ;;  %v9796_v25 = vld [vmem:[%s15727_s16] sm:$0xf] }
 0x6e0   :  { %v3961_v58 = vpop.f32.mrf.mxu1  ;;  %v4163_v8 = vpack.c.b16 %v4162_v38, %v4161_v43  ;;  %v9948_v38 = vld [vmem:[%s15727_s16 + $0x128] sm:$0xf] }
 0x6e1   :  { %v3978_v30 = vpack.c.bf16 %v3961_v58, %v3961_v58  ;;  %v9777_v58 = vor.u32 %v10826_v17, %v9774_v61  ;;  %v9906_v61 = vld [vmem:[%s15727_s16 + $0xfc] sm:$0xf0] }
 0x6e2   :  { %4096 = vmatpush.bf16.msrb.mxu0 %v4011_v27  ;;  %v9772_v27 = vld [vmem:[%s15725_s12 + $0x20] sm:$0xf] }
 0x6e3   :  { %v4040_v48 = vunpack.c.l.b16 %v3978_v30  ;;  %v13094_v21 = vor.u32 %v10827_v46, %v9772_v27  ;;  %v10828_v30 = vld [vmem:[%s15725_s12 + $0x34] sm:$0xf]  ;;  %v10862_v27 = vld [vmem:[%s15727_s16 + $0x100] sm:$0xf0] }
 0x6e4   :  { %v9785_v63 = vor.u32 %v10828_v30, %v9782_v50  ;;  %v10858_v46 = vld [vmem:[%s15727_s16 + $0xe4] sm:$0xf] }
 0x6e5   :  { %v4041_v59 = vpack.c.b16 %v4040_v48, %v4039_v16  ;;  %v9780_v16 = vld [vmem:[%s15725_s12 + $0x30] sm:$0xf]  ;;  %v10829_v48 = vld [vmem:[%s15725_s12 + $0x34] sm:$0xf0] }
 0x6e6   :  { %4097 = vmatpush.bf16.msrb.mxu0 %v4005_v53  ;;  %v13111_v37 = vor.u32 %v10829_v48, %v9780_v16  ;;  %v10893_v53 = vld [vmem:[%s15727_s16 + $0x1fc] sm:$0xf]  ;;  %v10852_v16 = vld [vmem:[%s15727_s16 + $0xb0] sm:$0xf0] }
 0x6e7   :  { %4127 = vmatpush.bf16.msra.mxu2 %v4041_v59  ;;  %v10050_v59 = vld [vmem:[%s15727_s16 + $0x21c] sm:$0xf0]  ;;  %v10848_v48 = vld [vmem:[%s15727_s16 + $0x94] sm:$0xf] }
 0x6e8   :  { %v3964_v26 = vpop.f32.mrf.mxu1 }
 0x6e9   :  { %v3983_v13 = vpack.c.bf16 %v3964_v26, %v3964_v26  ;;  %v10012_v26 = vld [vmem:[%s15727_s16 + $0x1b0] sm:$0xf] }
 0x6ea   :  { %4098 = vmatpush.bf16.msrb.mxu0 %v4001_v49  ;;  %9786 = vmatmul.msk.bf16.vlgmr.msra.gmra.mxu2 %vm1492_vm1, %v9761_v1  ;;  %v10061_v49 = vor.u32 %v10894_v24, %v10058_v18  ;;  %v9832_v24 = vld [vmem:[%s15727_s16 + $0x48] sm:$0xf]  ;;  %v10843_v18 = vld [vmem:[%s15727_s16 + $0x68] sm:$0xf0] }
 0x6eb   :  { %v4191_v42 = vunpack.c.l.b16 %v3983_v13  ;;  %v10022_v13 = vld [vmem:[%s15727_s16 + $0x1dc] sm:$0xf0] }
 0x6ed   :  { %4099 = vmatmul.bf16.vlgmr.msrb.gmra.mxu0 %v13055_v11 }
 0x6ee   :  { %4195 = vmatpush.bf16.msra.mxu0 %v4187_v41  ;;  %v10014_v41 = vld [vmem:[%s15727_s16 + $0x1d4] sm:$0xf0] }
 0x6ef   :  { %v10017_v14 = vor.u32 %v10884_v60, %v10014_v41  ;;  %v9840_v60 = vld [vmem:[%s15727_s16 + $0x50] sm:$0xf]  ;;  %v10844_v41 = vld [vmem:[%s15727_s16 + $0x70] sm:$0xf0] }
 0x6f0   :  { %v3966_v29 = vpop.f32.mrf.mxu1 }
 0x6f1   :  { %v3988_v33 = vpack.c.bf16 %v3966_v29, %v3966_v29  ;;  %v9976_v29 = vld [vmem:[%s15727_s16 + $0x168] sm:$0xf] }
 0x6f2   :  { %4196 = vmatpush.bf16.msra.mxu0 %v4183_v28  ;;  %v10885_v28 = vld [vmem:[%s15727_s16 + $0x1bc] sm:$0xf] }
 0x6f3   :  { %v4192_v5 = vunpack.c.l.b16 %v3988_v33  ;;  %v10025_v12 = vor.u32 %v10885_v28, %v10022_v13  ;;  %v10875_v33 = vld [vmem:[%s15727_s16 + $0x16c] sm:$0xf]  ;;  %v9845_v28 = vor.u32 %v10840_v51, %v9842_v15  ;;  %v10834_v13 = vld [vmem:[%s15727_s16 + $0x20] sm:$0xf0] }
 0x6f5   :  { %v4193_v23 = vpack.c.b16 %v4192_v5, %v4191_v42  ;;  %v9977_v42 = vor.u32 %v10879_v9, %v9976_v29  ;;  %v10880_v5 = vld [vmem:[%s15727_s16 + $0x190] sm:$0xf0]  ;;  %v10830_v29 = vld [vmem:[%s15727_s16 + $0x4] sm:$0xf]  ;;  %v9797_v9 = vor.u32 %v10834_v13, %v9796_v25 }
 0x6f6   :  { %4197 = vmatpush.bf16.msra.mxu0 %v4177_v34  ;;  %v9978_v34 = vld [vmem:[%s15727_s16 + $0x18c] sm:$0xf0] }
 0x6f7   :  { %4231 = vmatpush.bf16.msrb.mxu1 %v4193_v23  ;;  %v9981_v35 = vor.u32 %v10875_v33, %v9978_v34  ;;  %v9985_v23 = vor.u32 %v10880_v5, %v9984_v39  ;;  %v9804_v33 = vld [vmem:[%s15727_s16 + $0x8] sm:$0xf]  ;;  %v10835_v34 = vld [vmem:[%s15727_s16 + $0x28] sm:$0xf0] }
 0x6f8   :  { %v10831_v5 = vld [vmem:[%s15727_s16 + $0xc] sm:$0xf] }
 0x6f9   :  { %4845 = vmatpush.bf16.msra.mxu3 %v9985_v23 }
 0x6fa   :  { %4198 = vmatpush.bf16.msra.mxu0 %v4173_v56  ;;  %9787 = vmatmul.msk.bf16.gmra.mxu2 %vm1492_vm1, %v9769_v57  ;;  %v9989_v56 = vor.u32 %v10876_v20, %v9986_v0  ;;  %v9806_v20 = vld [vmem:[%s15727_s16 + $0x2c] sm:$0xf0] }
 0x6fb   :  { %9790 = vmatmul.msk.bf16.vlgmr.msrb.gmra.mxu1 %vm1492_vm1, %v9761_v1  ;;  %v10053_v1 = vor.u32 %v10893_v53, %v10050_v59  ;;  %v9876_v53 = vld [vmem:[%s15727_s16 + $0x98] sm:$0xf]  ;;  %v9873_v59 = vor.u32 %v10848_v48, %v9870_v22  ;;  %v9809_v0 = vor.u32 %v10831_v5, %v9806_v20  ;;  %v10895_v5 = vld [vmem:[%s15727_s16 + $0x20c] sm:$0xf] }
 0x6fc   :  { %4892 = vmatpush.bf16.msra.mxu1 %v10061_v49  ;;  %v9833_v49 = vor.u32 %v10843_v18, %v9832_v24 }
 0x6fd   :  { %4104 = vmatmul.bf16.gmra.mxu0 %v9765_v40  ;;  %4794 = vmatpush.bf16.msrb.mxu2 %v10053_v1  ;;  %v9878_v1 = vld [vmem:[%s15727_s16 + $0xbc] sm:$0xf0] }
 0x6fe   :  { %4199 = vmatpush.bf16.msra.mxu0 %v4167_v7  ;;  %v10871_v7 = vld [vmem:[%s15727_s16 + $0x148] sm:$0xf0]  ;;  %v9881_v3 = vor.u32 %v10849_v54, %v9878_v1 }
 0x6ff   :  { %v9949_v43 = vor.u32 %v10871_v7, %v9948_v38 }
 0x700   :  { %4893 = vmatpush.bf16.msra.mxu1 %v10025_v12  ;;  %v9798_v12 = vld [vmem:[%s15727_s16 + $0x24] sm:$0xf0] }
 0x701   :  { %4795 = vmatpush.bf16.msrb.mxu2 %v10017_v14  ;;  %4846 = vmatpush.bf16.msra.mxu3 %v9949_v43  ;;  %v9841_v14 = vor.u32 %v10844_v41, %v9840_v60  ;;  %v9801_v39 = vor.u32 %v10830_v29, %v9798_v12 }
 0x702   :  { %4200 = vmatpush.bf16.msra.mxu0 %v4163_v8  ;;  %v9950_v8 = vld [vmem:[%s15727_s16 + $0x14c] sm:$0xf0] }
 0x703   :  { %v9953_v45 = vor.u32 %v10867_v44, %v9950_v8 }
 0x704   :  { %4894 = vmatpush.bf16.msra.mxu1 %v9989_v56 }
 0x705   :  { %4796 = vmatpush.bf16.msrb.mxu2 %v9981_v35 }
 0x706   :  { %4201 = vmatpush.bf16.msra.mxu0 %v4157_v10  ;;  %v10861_v10 = vld [vmem:[%s15727_s16 + $0xf8] sm:$0xf0] }
 0x707   :  { %v9905_v17 = vor.u32 %v10861_v10, %v9904_v4 }
 0x708   :  { %4895 = vmatpush.bf16.msra.mxu1 %v9953_v45 }
 0x70a   :  { %4202 = vmatpush.bf16.msra.mxu0 %v4153_v32  ;;  %9788 = vmatmul.msk.bf16.gmra.mxu2 %vm1492_vm1, %v9777_v58  ;;  %v9912_v32 = vld [vmem:[%s15727_s16 + $0xe0] sm:$0xf] }
 0x70b   :  { %9791 = vmatmul.msk.bf16.gmra.mxu1 %vm1492_vm1, %v9769_v57  ;;  %v9940_v57 = vld [vmem:[%s15727_s16 + $0x120] sm:$0xf]  ;;  %v9913_v30 = vor.u32 %v10862_v27, %v9912_v32 }
 0x70c   :  { %v9941_v36 = vor.u32 %v10870_v55, %v9940_v57  ;;  %v13315_v57 = vld [vmem:[%s15726_s14] ss:$0 sm:$0xff] }
 0x70d   :  { %4109 = vmatmul.bf16.gmra.mxu0 %v13094_v21  ;;  %4847 = vmatpush.bf16.msra.mxu3 %v9913_v30 }
 0x70e   :  { %4745 = vmatpush.bf16.msrb.mxu0 %v10049_v6  ;;  %v10853_v6 = vld [vmem:[%s15727_s16 + $0xb8] sm:$0xf0] }
 0x70f   :  { %v9877_v52 = vor.u32 %v10853_v6, %v9876_v53 }
 0x711   :  { %4848 = vmatpush.bf16.msra.mxu3 %v9877_v52 }
 0x715   :  { %4849 = vmatpush.bf16.msra.mxu3 %v9841_v14 }
 0x71a   :  { %9789 = vmatmul.msk.bf16.gmra.mxu2 %vm1492_vm1, %v9785_v63 }
 0x71b   :  { %9792 = vmatmul.msk.bf16.gmra.mxu1 %vm1492_vm1, %v9777_v58  ;;  %v9909_v58 = vor.u32 %v10857_v2, %v9906_v61 }
 0x71d   :  { %4114 = vmatmul.bf16.gmra.mxu0 %v13111_v37 }
 0x72b   :  { %9793 = vmatmul.msk.bf16.gmra.mxu1 %vm1492_vm1, %v9785_v63  ;;  %v9868_v63 = vld [vmem:[%s15727_s16 + $0x90] sm:$0xf] }
 0x72c   :  { %v9869_v19 = vor.u32 %v10852_v16, %v9868_v63 }
 0x72d   :  { %4203 = vmatmul.bf16.vlgmr.msra.gmra.mxu0 %v13055_v11  ;;  %v10013_v11 = vor.u32 %v10888_v47, %v10012_v26  ;;  %v10839_v26 = vld [vmem:[%s15727_s16 + $0x4c] sm:$0xf]  ;;  %v9834_v47 = vld [vmem:[%s15727_s16 + $0x6c] sm:$0xf0] }
 0x72f   :  { %4746 = vmatpush.bf16.msrb.mxu0 %v10013_v11  ;;  %v9837_v11 = vor.u32 %v10839_v26, %v9834_v47 }
 0x733   :  { %4747 = vmatpush.bf16.msrb.mxu0 %v9977_v42  ;;  %v9805_v42 = vor.u32 %v10835_v34, %v9804_v33 }
 0x735   :  { %4850 = vmatpush.bf16.msra.mxu3 %v9805_v42  ;;  %v10899_v42 = vld [vmem:[%s15727_s16 + $0x228] sm:$0xf0] }
 0x737   :  { %4748 = vmatpush.bf16.msrb.mxu0 %v9941_v36 }
 0x73b   :  { %4749 = vmatpush.bf16.msrb.mxu0 %v9905_v17 }
 0x73d   :  { %4208 = vmatmul.bf16.gmra.mxu0 %v9765_v40  ;;  %v9945_v40 = vor.u32 %v10866_v62, %v9942_v31 }
 0x73f   :  { %4797 = vmatpush.bf16.msrb.mxu2 %v9945_v40  ;;  %4750 = vmatpush.bf16.msrb.mxu0 %v9869_v19 }
 0x743   :  { %4798 = vmatpush.bf16.msrb.mxu2 %v9909_v58  ;;  %4751 = vmatpush.bf16.msrb.mxu0 %v9833_v49 }
 0x747   :  { %4799 = vmatpush.bf16.msrb.mxu2 %v9873_v59  ;;  %4752 = vmatpush.bf16.msrb.mxu0 %v9797_v9 }
 0x74b   :  { %4800 = vmatpush.bf16.msrb.mxu2 %v9837_v11 }
 0x74d   :  { %4213 = vmatmul.bf16.gmra.mxu0 %v13094_v21  ;;  %v9914_v21 = vld [vmem:[%s15727_s16 + $0x104] sm:$0xf0] }
 0x74e   :  { %v9917_v50 = vor.u32 %v10858_v46, %v9914_v21 }
 0x74f   :  { %4801 = vmatpush.bf16.msrb.mxu2 %v9801_v39  ;;  %v10064_v39 = vld [vmem:[%s15727_s16 + $0x208] sm:$0xf] }
 0x750   :  { %4896 = vmatpush.bf16.msra.mxu1 %v9917_v50  ;;  %v10065_v20 = vor.u32 %v10899_v42, %v10064_v39  ;;  %v9920_v39 = vld [vmem:[%s15727_s16 + $0xe8] sm:$0xf]  ;;  %v10863_v42 = vld [vmem:[%s15727_s16 + $0x108] sm:$0xf0] }
 0x752   :  { %4941 = vmatpush.bf16.msra.mxu0 %v10065_v20 }
 0x754   :  { %4897 = vmatpush.bf16.msra.mxu1 %v9881_v3 }
 0x758   :  { %4898 = vmatpush.bf16.msra.mxu1 %v9845_v28 }
 0x75c   :  { %4899 = vmatpush.bf16.msra.mxu1 %v9809_v0  ;;  %v10066_v0 = vld [vmem:[%s15727_s16 + $0x22c] sm:$0xf0] }
 0x75d   :  { %4218 = vmatmul.bf16.gmra.mxu0 %v13111_v37 }
 0x76a   :  { %v4100_v35 = vpop.f32.mrf.mxu0 }
 0x76d   :  { %v4129_v23 = vpop.f32.mrf.mxu2 }
 0x76e   :  { %v4130_v56 = vadd.f32 %v4129_v23, %v4100_v35  ;;  %v10072_v35 = vld [vmem:[%s15727_s16 + $0x210] sm:$0xf]  ;;  %v10900_v23 = vld [vmem:[%s15727_s16 + $0x230] sm:$0xf0] }
 0x770   :  { %v4257_v36 = vadd.f32 %v13315_v57, %v4130_v56  ;;  %v10069_v56 = vor.u32 %v10895_v5, %v10066_v0  ;;  %v10859_v5 = vld [vmem:[%s15727_s16 + $0xec] sm:$0xf]  ;;  %v9921_v0 = vor.u32 %v10863_v42, %v9920_v39 }
 0x772   :  { %v4102_v55 = vpop.f32.mrf.mxu0  ;;  %v4273_v7 = vmax.f32 %v4257_v36, 0.0  ;;  %v10074_v36 = vld [vmem:[%s15727_s16 + $0x234] sm:$0xf0]  ;;  %4990 = vmatpush.bf16.msra.mxu2 %v10069_v56  ;;  %v10864_v56 = vld [vmem:[%s15727_s16 + $0x110] sm:$0xf0] }
 0x775   :  { %v4131_v62 = vpop.f32.mrf.mxu2 }
 0x776   :  { %v4132_v31 = vadd.f32 %v4131_v62, %v4102_v55  ;;  %v10073_v55 = vor.u32 %v10900_v23, %v10072_v35  ;;  %v10896_v62 = vld [vmem:[%s15727_s16 + $0x214] sm:$0xf]  ;;  %v9922_v35 = vld [vmem:[%s15727_s16 + $0x10c] sm:$0xf0] }
 0x777   :  { %v9928_v23 = vld [vmem:[%s15727_s16 + $0xf0] sm:$0xf] }
 0x778   :  { %v4258_v38 = vadd.f32 %v13315_v57, %v4132_v31  ;;  %v4233_v59 = vpop.f32.mrf.mxu1  ;;  %5039 = vmatpush.bf16.msrb.mxu3 %v10073_v55  ;;  %v9925_v55 = vor.u32 %v10859_v5, %v9922_v35 }
 0x77a   :  { %v4274_v37 = vmax.f32 %v4258_v38, 0.0  ;;  %v4105_v40 = vpop.f32.mrf.mxu0  ;;  %v10077_v38 = vor.u32 %v10896_v62, %v10074_v36  ;;  %v9929_v62 = vor.u32 %v10864_v56, %v9928_v23  ;;  %v10860_v36 = vld [vmem:[%s15727_s16 + $0xf4] sm:$0xf] }
 0x77c   :  { %v13319_v43 = vpack.c.bf16 %v4274_v37, %v4273_v7  ;;  %v10028_v7 = vld [vmem:[%s15727_s16 + $0x1c0] sm:$0xf]  ;;  %v10890_v37 = vld [vmem:[%s15727_s16 + $0x1e0] sm:$0xf0]  ;;  %5088 = vmatpush.bf16.msrb.mxu1 %v10077_v38 }
 0x77d   :  { %v4134_v44 = vpop.f32.mrf.mxu2 }
 0x77e   :  { %4753 = vmatmul.bf16.vlgmr.msrb.gmra.mxu0 %v13319_v43  ;;  %4802 = vmatmul.bf16.vlgmr.msrb.gmra.mxu2 %v13319_v43  ;;  %v4135_v8 = vadd.f32 %v4134_v44, %v4105_v40  ;;  %v10886_v40 = vld [vmem:[%s15727_s16 + $0x1c4] sm:$0xf] }
 0x77f   :  { %4851 = vmatmul.bf16.vlgmr.msra.gmra.mxu3 %v13319_v43  ;;  %4900 = vmatmul.bf16.vlgmr.msra.gmra.mxu1 %v13319_v43 }
 0x780   :  { %v4259_v10 = vadd.f32 %v13315_v57, %v4135_v8  ;;  %v4235_v26 = vpop.f32.mrf.mxu1  ;;  %v10029_v8 = vor.u32 %v10890_v37, %v10028_v7  ;;  %v9884_v37 = vld [vmem:[%s15727_s16 + $0xa0] sm:$0xf] }
 0x782   :  { %v4107_v45 = vpop.f32.mrf.mxu0  ;;  %v4275_v61 = vmax.f32 %v4259_v10, 0.0  ;;  %v10891_v10 = vld [vmem:[%s15727_s16 + $0x1e8] sm:$0xf0]  ;;  %4942 = vmatpush.bf16.msra.mxu0 %v10029_v8 }
 0x785   :  { %v4136_v4 = vpop.f32.mrf.mxu2 }
 0x786   :  { %v4137_v2 = vadd.f32 %v4136_v4, %v4107_v45  ;;  %v10030_v45 = vld [vmem:[%s15727_s16 + $0x1e4] sm:$0xf0] }
 0x787   :  { %v10036_v4 = vld [vmem:[%s15727_s16 + $0x1c8] sm:$0xf] }
 0x788   :  { %v4260_v17 = vadd.f32 %v13315_v57, %v4137_v2  ;;  %v4238_v14 = vpop.f32.mrf.mxu1 }
 0x78a   :  { %v4276_v32 = vmax.f32 %v4260_v17, 0.0  ;;  %v4110_v58 = vpop.f32.mrf.mxu0  ;;  %v10033_v17 = vor.u32 %v10886_v40, %v10030_v45  ;;  %v10854_v40 = vld [vmem:[%s15727_s16 + $0xc0] sm:$0xf0]  ;;  %v9886_v45 = vld [vmem:[%s15727_s16 + $0xc4] sm:$0xf0] }
 0x78b   :  { %v9885_v8 = vor.u32 %v10854_v40, %v9884_v37 }
 0x78c   :  { %v13327_v27 = vpack.c.bf16 %v4276_v32, %v4275_v61  ;;  %v10037_v61 = vor.u32 %v10891_v10, %v10036_v4  ;;  %v10887_v32 = vld [vmem:[%s15727_s16 + $0x1cc] sm:$0xf]  ;;  %4991 = vmatpush.bf16.msra.mxu2 %v10033_v17  ;;  %v9892_v4 = vld [vmem:[%s15727_s16 + $0xa8] sm:$0xf] }
 0x78d   :  { %v4139_v46 = vpop.f32.mrf.mxu2  ;;  %v10855_v10 = vld [vmem:[%s15727_s16 + $0xc8] sm:$0xf0] }
 0x78e   :  { %4758 = vmatmul.bf16.gmra.mxu0 %v13327_v27  ;;  %4807 = vmatmul.bf16.gmra.mxu2 %v13327_v27  ;;  %v4140_v21 = vadd.f32 %v4139_v46, %v4110_v58  ;;  %v10038_v58 = vld [vmem:[%s15727_s16 + $0x1ec] sm:$0xf0] }
 0x78f   :  { %4856 = vmatmul.bf16.gmra.mxu3 %v13327_v27  ;;  %4905 = vmatmul.bf16.gmra.mxu1 %v13327_v27 }
 0x790   :  { %v4261_v63 = vadd.f32 %v13315_v57, %v4140_v21  ;;  %v4240_v33 = vpop.f32.mrf.mxu1  ;;  %5040 = vmatpush.bf16.msrb.mxu3 %v10037_v61  ;;  %v9893_v61 = vor.u32 %v10855_v10, %v9892_v4 }
 0x792   :  { %v4112_v30 = vpop.f32.mrf.mxu0  ;;  %v4277_v19 = vmax.f32 %v4261_v63, 0.0  ;;  %v9992_v63 = vld [vmem:[%s15727_s16 + $0x178] sm:$0xf] }
 0x795   :  { %v4141_v50 = vpop.f32.mrf.mxu2 }
 0x796   :  { %v4142_v16 = vadd.f32 %v4141_v50, %v4112_v30  ;;  %v10041_v30 = vor.u32 %v10887_v32, %v10038_v58  ;;  %v10851_v32 = vld [vmem:[%s15727_s16 + $0xac] sm:$0xf]  ;;  %v9894_v58 = vld [vmem:[%s15727_s16 + $0xcc] sm:$0xf0] }
 0x798   :  { %v4262_v48 = vadd.f32 %v13315_v57, %v4142_v16  ;;  %v4243_v21 = vpop.f32.mrf.mxu1  ;;  %v10881_v16 = vld [vmem:[%s15727_s16 + $0x198] sm:$0xf0]  ;;  %5089 = vmatpush.bf16.msrb.mxu1 %v10041_v30 }
 0x799   :  { %v10845_v30 = vld [vmem:[%s15727_s16 + $0x78] sm:$0xf0] }
 0x79a   :  { %v4278_v22 = vmax.f32 %v4262_v48, 0.0  ;;  %v4115_v53 = vpop.f32.mrf.mxu0  ;;  %v10877_v48 = vld [vmem:[%s15727_s16 + $0x17c] sm:$0xf] }
 0x79c   :  { %v13335_v6 = vpack.c.bf16 %v4278_v22, %v4277_v19  ;;  %v9993_v19 = vor.u32 %v10881_v16, %v9992_v63  ;;  %v9994_v22 = vld [vmem:[%s15727_s16 + $0x19c] sm:$0xf0] }
 0x79d   :  { %v4144_v52 = vpop.f32.mrf.mxu2  ;;  %v9850_v63 = vld [vmem:[%s15727_s16 + $0x7c] sm:$0xf0] }
 0x79e   :  { %4763 = vmatmul.bf16.gmra.mxu0 %v13335_v6  ;;  %4812 = vmatmul.bf16.gmra.mxu2 %v13335_v6  ;;  %v4145_v54 = vadd.f32 %v4144_v52, %v4115_v53  ;;  %v10000_v53 = vld [vmem:[%s15727_s16 + $0x180] sm:$0xf]  ;;  %v9997_v52 = vor.u32 %v10877_v48, %v9994_v22  ;;  %v9897_v48 = vor.u32 %v10851_v32, %v9894_v58 }
 0x79f   :  { %4861 = vmatmul.bf16.gmra.mxu3 %v13335_v6  ;;  %4910 = vmatmul.bf16.gmra.mxu1 %v13335_v6  ;;  %v9856_v22 = vld [vmem:[%s15727_s16 + $0x60] sm:$0xf] }
 0x7a0   :  { %v4263_v24 = vadd.f32 %v13315_v57, %v4145_v54  ;;  %4943 = vmatpush.bf16.msra.mxu0 %v9993_v19  ;;  %4992 = vmatpush.bf16.msra.mxu2 %v9997_v52  ;;  %v4245_v20 = vpop.f32.mrf.mxu1 }
 0x7a2   :  { %v4117_v1 = vpop.f32.mrf.mxu0  ;;  %v4279_v47 = vmax.f32 %v4263_v24, 0.0 }
 0x7a5   :  { %v4146_v3 = vpop.f32.mrf.mxu2 }
 0x7a6   :  { %v4147_v18 = vadd.f32 %v4146_v3, %v4117_v1  ;;  %v10878_v1 = vld [vmem:[%s15727_s16 + $0x184] sm:$0xf]  ;;  %v10002_v3 = vld [vmem:[%s15727_s16 + $0x1a4] sm:$0xf0] }
 0x7a8   :  { %v4264_v49 = vadd.f32 %v13315_v57, %v4147_v18 }
 0x7aa   :  { %v4280_v60 = vmax.f32 %v4264_v49, 0.0  ;;  %v4204_v41 = vpop.f32.mrf.mxu0  ;;  %v9956_v49 = vld [vmem:[%s15727_s16 + $0x130] sm:$0xf] }
 0x7ab   :  { %v4234_v51 = vadd.f32 %v4233_v59, %v4204_v41  ;;  %v10882_v59 = vld [vmem:[%s15727_s16 + $0x1a0] sm:$0xf0] }
 0x7ac   :  { %v13343_v11 = vpack.c.bf16 %v4280_v60, %v4279_v47  ;;  %v10001_v54 = vor.u32 %v10882_v59, %v10000_v53  ;;  %v10872_v47 = vld [vmem:[%s15727_s16 + $0x150] sm:$0xf0]  ;;  %v10846_v53 = vld [vmem:[%s15727_s16 + $0x80] sm:$0xf0] }
 0x7ad   :  { %v4265_v13 = vadd.f32 %v13315_v57, %v4234_v51  ;;  %v10868_v60 = vld [vmem:[%s15727_s16 + $0x134] sm:$0xf]  ;;  %v9958_v51 = vld [vmem:[%s15727_s16 + $0x154] sm:$0xf0] }
 0x7ae   :  { %4768 = vmatmul.bf16.gmra.mxu0 %v13343_v11  ;;  %4817 = vmatmul.bf16.gmra.mxu2 %v13343_v11 }
 0x7af   :  { %4866 = vmatmul.bf16.gmra.mxu3 %v13343_v11  ;;  %4915 = vmatmul.bf16.gmra.mxu1 %v13343_v11  ;;  %v4281_v9 = vmax.f32 %v4265_v13, 0.0 }
 0x7b0   :  { %5041 = vmatpush.bf16.msrb.mxu3 %v10001_v54  ;;  %v9857_v54 = vor.u32 %v10846_v53, %v9856_v22 }
 0x7b2   :  { %v4206_v15 = vpop.f32.mrf.mxu0 }
 0x7b3   :  { %v4236_v28 = vadd.f32 %v4235_v26, %v4206_v15  ;;  %v10005_v26 = vor.u32 %v10878_v1, %v10002_v3  ;;  %v9964_v15 = vld [vmem:[%s15727_s16 + $0x138] sm:$0xf]  ;;  %v10842_v1 = vld [vmem:[%s15727_s16 + $0x64] sm:$0xf]  ;;  %v9858_v3 = vld [vmem:[%s15727_s16 + $0x84] sm:$0xf0] }
 0x7b5   :  { %v4266_v25 = vadd.f32 %v13315_v57, %v4236_v28  ;;  %5090 = vmatpush.bf16.msrb.mxu1 %v10005_v26  ;;  %v10873_v28 = vld [vmem:[%s15727_s16 + $0x158] sm:$0xf0]  ;;  %v4248_v26 = vpop.f32.mrf.mxu1 }
 0x7b6   :  { %v9965_v13 = vor.u32 %v10873_v28, %v9964_v15  ;;  %v9814_v15 = vld [vmem:[%s15727_s16 + $0x34] sm:$0xf0] }
 0x7b7   :  { %v4282_v29 = vmax.f32 %v4266_v25, 0.0  ;;  %v9961_v25 = vor.u32 %v10868_v60, %v9958_v51  ;;  %v10836_v60 = vld [vmem:[%s15727_s16 + $0x30] sm:$0xf0]  ;;  %v9820_v28 = vld [vmem:[%s15727_s16 + $0x18] sm:$0xf] }
 0x7b8   :  { %5042 = vmatpush.bf16.msrb.mxu3 %v9965_v13 }
 0x7b9   :  { %v13351_v34 = vpack.c.bf16 %v4282_v29, %v4281_v9  ;;  %v10869_v29 = vld [vmem:[%s15727_s16 + $0x13c] sm:$0xf]  ;;  %v9966_v9 = vld [vmem:[%s15727_s16 + $0x15c] sm:$0xf0]  ;;  %4993 = vmatpush.bf16.msra.mxu2 %v9961_v25 }
 0x7ba   :  { %v4209_v12 = vpop.f32.mrf.mxu0  ;;  %v10837_v25 = vld [vmem:[%s15727_s16 + $0x38] sm:$0xf0] }
 0x7bb   :  { %v4239_v31 = vadd.f32 %v4238_v14, %v4209_v12  ;;  %v9957_v14 = vor.u32 %v10872_v47, %v9956_v49  ;;  %v9861_v49 = vor.u32 %v10842_v1, %v9858_v3  ;;  %v9812_v47 = vld [vmem:[%s15727_s16 + $0x10] sm:$0xf] }
 0x7bc   :  { %5043 = vmatpush.bf16.msrb.mxu3 %v9929_v62  ;;  %v9813_v51 = vor.u32 %v10836_v60, %v9812_v47 }
 0x7bd   :  { %v4267_v46 = vadd.f32 %v13315_v57, %v4239_v31  ;;  %4944 = vmatpush.bf16.msra.mxu0 %v9957_v14  ;;  %v9930_v31 = vld [vmem:[%s15727_s16 + $0x114] sm:$0xf0]  ;;  %4994 = vmatpush.bf16.msra.mxu2 %v9925_v55 }
 0x7be   :  { %4773 = vmatmul.bf16.gmra.mxu0 %v13351_v34  ;;  %4822 = vmatmul.bf16.gmra.mxu2 %v13351_v34  ;;  %v9933_v7 = vor.u32 %v10860_v36, %v9930_v31 }
 0x7bf   :  { %4871 = vmatmul.bf16.gmra.mxu3 %v13351_v34  ;;  %4920 = vmatmul.bf16.gmra.mxu1 %v13351_v34  ;;  %v4283_v24 = vmax.f32 %v4267_v46, 0.0  ;;  %v9848_v46 = vld [vmem:[%s15727_s16 + $0x58] sm:$0xf] }
 0x7c0   :  { %v9849_v19 = vor.u32 %v10845_v30, %v9848_v46  ;;  %5044 = vmatpush.bf16.msrb.mxu3 %v9893_v61 }
 0x7c1   :  { %4945 = vmatpush.bf16.msra.mxu0 %v9921_v0 }
 0x7c2   :  { %v4211_v44 = vpop.f32.mrf.mxu0 }
 0x7c3   :  { %v4241_v2 = vadd.f32 %v4240_v33, %v4211_v44  ;;  %v9969_v33 = vor.u32 %v10869_v29, %v9966_v9  ;;  %v10850_v44 = vld [vmem:[%s15727_s16 + $0xa4] sm:$0xf]  ;;  %v9821_v29 = vor.u32 %v10837_v25, %v9820_v28  ;;  %v10833_v9 = vld [vmem:[%s15727_s16 + $0x1c] sm:$0xf] }
 0x7c4   :  { %v9889_v17 = vor.u32 %v10850_v44, %v9886_v45  ;;  %5045 = vmatpush.bf16.msrb.mxu3 %v9857_v54 }
 0x7c5   :  { %v4268_v50 = vadd.f32 %v13315_v57, %v4241_v2  ;;  %5091 = vmatpush.bf16.msrb.mxu1 %v9969_v33  ;;  %4946 = vmatpush.bf16.msra.mxu0 %v9885_v8  ;;  %v9822_v33 = vld [vmem:[%s15727_s16 + $0x3c] sm:$0xf0] }
 0x7c6   :  { %4995 = vmatpush.bf16.msra.mxu2 %v9889_v17  ;;  %v9825_v42 = vor.u32 %v10833_v9, %v9822_v33 }
 0x7c7   :  { %v4284_v18 = vmax.f32 %v4268_v50, 0.0  ;;  %v10841_v50 = vld [vmem:[%s15727_s16 + $0x5c] sm:$0xf] }
 0x7c8   :  { %v9853_v52 = vor.u32 %v10841_v50, %v9850_v63  ;;  %5046 = vmatpush.bf16.msrb.mxu3 %v9821_v29 }
 0x7c9   :  { %v13455_v12 = vpack.c.bf16 %v4284_v18, %v4283_v24  ;;  %5092 = vmatpush.bf16.msrb.mxu1 %v9933_v7  ;;  %4947 = vmatpush.bf16.msra.mxu0 %v9849_v19 }
 0x7ca   :  { %v4214_v41 = vpop.f32.mrf.mxu0  ;;  %4996 = vmatpush.bf16.msra.mxu2 %v9853_v52 }
 0x7cb   :  { %v4244_v38 = vadd.f32 %v4243_v21, %v4214_v41  ;;  %v10832_v41 = vld [vmem:[%s15727_s16 + $0x14] sm:$0xf] }
 0x7cc   :  { %v9817_v13 = vor.u32 %v10832_v41, %v9814_v15 }
 0x7cd   :  { %v4269_v16 = vadd.f32 %v13315_v57, %v4244_v38  ;;  %5093 = vmatpush.bf16.msrb.mxu1 %v9897_v48  ;;  %4948 = vmatpush.bf16.msra.mxu0 %v9813_v51 }
 0x7ce   :  { %4778 = vmatmul.bf16.gmra.mxu0 %v13455_v12  ;;  %4827 = vmatmul.bf16.gmra.mxu2 %v13455_v12 }
 0x7cf   :  { %4876 = vmatmul.bf16.gmra.mxu3 %v13455_v12  ;;  %4925 = vmatmul.bf16.gmra.mxu1 %v13455_v12  ;;  %v4285_v24 = vmax.f32 %v4269_v16, 0.0 }
 0x7d0   :  { %4997 = vmatpush.bf16.msra.mxu2 %v9817_v13 }
 0x7d1   :  { %5094 = vmatpush.bf16.msrb.mxu1 %v9861_v49 }
 0x7d2   :  { %v4216_v2 = vpop.f32.mrf.mxu0 }
 0x7d3   :  { %v4246_v21 = vadd.f32 %v4245_v20, %v4216_v2  ;;  %v4250_v20 = vpop.f32.mrf.mxu1 }
 0x7d5   :  { %v4270_v59 = vadd.f32 %v13315_v57, %v4246_v21  ;;  %5095 = vmatpush.bf16.msrb.mxu1 %v9825_v42 }
 0x7d7   :  { %v4286_v18 = vmax.f32 %v4270_v59, 0.0 }
 0x7d9   :  { %v13559_v39 = vpack.c.bf16 %v4286_v18, %v4285_v24 }
 0x7da   :  { %v4219_v14 = vpop.f32.mrf.mxu0 }
 0x7db   :  { %v4249_v5 = vadd.f32 %v4248_v26, %v4219_v14 }
 0x7dd   :  { %v4271_v56 = vadd.f32 %v13315_v57, %v4249_v5 }
 0x7de   :  { %4783 = vmatmul.bf16.gmra.mxu0 %v13559_v39  ;;  %4832 = vmatmul.bf16.gmra.mxu2 %v13559_v39 }
 0x7df   :  { %4881 = vmatmul.bf16.gmra.mxu3 %v13559_v39  ;;  %4930 = vmatmul.bf16.gmra.mxu1 %v13559_v39  ;;  %v4287_v62 = vmax.f32 %v4271_v56, 0.0 }
 0x7e2   :  { %v4221_v0 = vpop.f32.mrf.mxu0 }
 0x7e3   :  { %v4251_v35 = vadd.f32 %v4250_v20, %v4221_v0 }
 0x7e5   :  { %v4272_v23 = vadd.f32 %v13315_v57, %v4251_v35 }
 0x7e7   :  { %v4288_v55 = vmax.f32 %v4272_v23, 0.0 }
 0x7e9   :  { %v13567_v36 = vpack.c.bf16 %v4288_v55, %v4287_v62  ;;  %v10080_v62 = vld [vmem:[%s15727_s16 + $0x218] sm:$0xf] }
 0x7ee   :  { %4788 = vmatmul.bf16.gmra.mxu0 %v13567_v36  ;;  %4837 = vmatmul.bf16.gmra.mxu2 %v13567_v36 }
 0x7ef   :  { %4886 = vmatmul.bf16.gmra.mxu3 %v13567_v36  ;;  %4935 = vmatmul.bf16.gmra.mxu1 %v13567_v36 }
 0x7fb   :  { %v4754_v31 = vpop.f32.mrf.mxu0 }
 0x7fc   :  { %v4901_v38 = vpop.f32.mrf.mxu1 }
 0x7fe   :  { %4949 = vmatmul.bf16.vlgmr.msra.gmra.mxu0 %v13319_v43  ;;  %4998 = vmatmul.bf16.vlgmr.msra.gmra.mxu2 %v13319_v43 }
 0x7ff   :  { %5047 = vmatmul.bf16.vlgmr.msrb.gmra.mxu3 %v13319_v43  ;;  %5096 = vmatmul.bf16.vlgmr.msrb.gmra.mxu1 %v13319_v43 }
 0x801   :  { %v4803_v57 = vpop.f32.mrf.mxu2 }
 0x802   :  { %v5186_v7 = vpack.c.bf16 %v4803_v57, %v4754_v31  ;;  %v4852_v37 = vpop.f32.mrf.mxu3  ;;  %v10901_v31 = vld [vmem:[%s15727_s16 + $0x238] sm:$0xf0] }
 0x803   :  { %v13577_v40 = vpack.c.bf16 %v4901_v38, %v4852_v37  ;;  %v4756_v44 = vpop.f32.mrf.mxu0  ;;  %v10081_v37 = vor.u32 %v10901_v31, %v10080_v62 }
 0x804   :  { %v13579_v8 = vpop.f32.mrf.mxu1  ;;  %v5370_v17 = vunpack.c.l.b16 %v5186_v7  ;;  %v5386_v61 = vunpack.c.h.b16 %v5186_v7 }
 0x805   :  { %5137 = vmatpush.bf16.msrb.mxu0 %v10081_v37 }
 0x809   :  { %v4805_v45 = vpop.f32.mrf.mxu2 }
 0x80a   :  { %v5191_v4 = vpack.c.bf16 %v4805_v45, %v4756_v44  ;;  %v13581_v10 = vpop.f32.mrf.mxu3 }
 0x80b   :  { %v13583_v2 = vpop.f32.mrf.mxu0 }
 0x80c   :  { %v5371_v32 = vunpack.c.l.b16 %v5191_v4  ;;  %v5387_v58 = vunpack.c.h.b16 %v5191_v4  ;;  %v13585_v46 = vpop.f32.mrf.mxu1 }
 0x80e   :  { %4954 = vmatmul.bf16.gmra.mxu0 %v13327_v27  ;;  %5003 = vmatmul.bf16.gmra.mxu2 %v13327_v27  ;;  %v13589_v21 = vpack.c.b16 %v5387_v58, %v5386_v61  ;;  %v13591_v30 = vpack.c.b16 %v5371_v32, %v5370_v17  ;;  %v13645_v32 = vpack.c.bf16 %v13579_v8, %v13581_v10 }
 0x80f   :  { %5052 = vmatmul.bf16.gmra.mxu3 %v13327_v27  ;;  %5101 = vmatmul.bf16.gmra.mxu1 %v13327_v27 }
 0x811   :  { %v4808_v50 = vpop.f32.mrf.mxu2 }
 0x812   :  { %v4857_v63 = vpop.f32.mrf.mxu3  ;;  %v13640_v17 = vpack.c.bf16 %v4808_v50, %v13583_v2  ;;  %v10044_v2 = vld [vmem:[%s15727_s16 + $0x1d0] sm:$0xf]  ;;  %v10892_v50 = vld [vmem:[%s15727_s16 + $0x1f0] sm:$0xf0] }
 0x813   :  { %v4761_v16 = vpop.f32.mrf.mxu0  ;;  %v13648_v58 = vpack.c.bf16 %v13585_v46, %v4857_v63 }
 0x814   :  { %v4908_v48 = vpop.f32.mrf.mxu1 }
 0x819   :  { %v4810_v19 = vpop.f32.mrf.mxu2 }
 0x81a   :  { %v4859_v22 = vpop.f32.mrf.mxu3  ;;  %v13629_v38 = vpack.c.bf16 %v4810_v19, %v4761_v16 }
 0x81b   :  { %v4764_v53 = vpop.f32.mrf.mxu0  ;;  %v13634_v44 = vpack.c.bf16 %v4908_v48, %v4859_v22 }
 0x81c   :  { %v4911_v59 = vpop.f32.mrf.mxu1  ;;  %v5389_v19 = vunpack.c.h.b16 %v13629_v38 }
 0x81d   :  { %v5429_v46 = vunpack.c.h.b16 %v13634_v44 }
 0x81e   :  { %4959 = vmatmul.bf16.gmra.mxu0 %v13335_v6  ;;  %5008 = vmatmul.bf16.gmra.mxu2 %v13335_v6 }
 0x81f   :  { %5057 = vmatmul.bf16.gmra.mxu3 %v13335_v6  ;;  %5106 = vmatmul.bf16.gmra.mxu1 %v13335_v6 }
 0x821   :  { %v4813_v52 = vpop.f32.mrf.mxu2 }
 0x822   :  { %v4862_v54 = vpop.f32.mrf.mxu3  ;;  %v13615_v5 = vpack.c.bf16 %v4813_v52, %v4764_v53  ;;  %v10045_v53 = vor.u32 %v10892_v50, %v10044_v2 }
 0x823   :  { %v4766_v1 = vpop.f32.mrf.mxu0  ;;  %v13619_v23 = vpack.c.bf16 %v4911_v59, %v4862_v54  ;;  %v5388_v54 = vunpack.c.h.b16 %v13640_v17 }
 0x824   :  { %v4913_v3 = vpop.f32.mrf.mxu1  ;;  %v5390_v61 = vunpack.c.h.b16 %v13615_v5  ;;  %5138 = vmatpush.bf16.msrb.mxu0 %v10045_v53 }
 0x825   :  { %v5430_v16 = vunpack.c.h.b16 %v13619_v23 }
 0x829   :  { %v4815_v24 = vpop.f32.mrf.mxu2 }
 0x82a   :  { %v4864_v18 = vpop.f32.mrf.mxu3  ;;  %v13607_v25 = vpack.c.bf16 %v4815_v24, %v4766_v1  ;;  %v10008_v24 = vld [vmem:[%s15727_s16 + $0x188] sm:$0xf] }
 0x82b   :  { %v4769_v26 = vpop.f32.mrf.mxu0  ;;  %v13611_v9 = vpack.c.bf16 %v4913_v3, %v4864_v18  ;;  %v5428_v3 = vunpack.c.h.b16 %v13648_v58  ;;  %v10883_v18 = vld [vmem:[%s15727_s16 + $0x1a8] sm:$0xf0] }
 0x82c   :  { %v4916_v49 = vpop.f32.mrf.mxu1  ;;  %v5391_v57 = vunpack.c.h.b16 %v13607_v25 }
 0x82d   :  { %v5431_v45 = vunpack.c.h.b16 %v13611_v9 }
 0x82e   :  { %4964 = vmatmul.bf16.gmra.mxu0 %v13343_v11  ;;  %5013 = vmatmul.bf16.gmra.mxu2 %v13343_v11  ;;  %v5396_v10 = vpack.c.b16 %v5391_v57, %v5390_v61 }
 0x82f   :  { %5062 = vmatmul.bf16.gmra.mxu3 %v13343_v11  ;;  %5111 = vmatmul.bf16.gmra.mxu1 %v13343_v11  ;;  %v5436_v52 = vpack.c.b16 %v5431_v45, %v5430_v16 }
 0x831   :  { %v4818_v47 = vpop.f32.mrf.mxu2 }
 0x832   :  { %v4867_v60 = vpop.f32.mrf.mxu3  ;;  %v13603_v51 = vpack.c.bf16 %v4818_v47, %v4769_v26  ;;  %v5427_v26 = vunpack.c.h.b16 %v13645_v32  ;;  %v10009_v47 = vor.u32 %v10883_v18, %v10008_v24  ;;  %v5413_v18 = vunpack.c.l.b16 %v13634_v44  ;;  %v10847_v44 = vld [vmem:[%s15727_s16 + $0x88] sm:$0xf0] }
 0x833   :  { %v4771_v41 = vpop.f32.mrf.mxu0  ;;  %v13605_v15 = vpack.c.bf16 %v4916_v49, %v4867_v60  ;;  %v5395_v49 = vpack.c.b16 %v5389_v19, %v5388_v54  ;;  %v5375_v19 = vunpack.c.l.b16 %v13607_v25  ;;  %v5374_v25 = vunpack.c.l.b16 %v13615_v5  ;;  %v10856_v54 = vld [vmem:[%s15727_s16 + $0xd0] sm:$0xf0] }
 0x834   :  { %v4918_v14 = vpop.f32.mrf.mxu1  ;;  %v5392_v20 = vunpack.c.h.b16 %v13603_v51  ;;  %5139 = vmatpush.bf16.msrb.mxu0 %v10009_v47  ;;  %v5372_v47 = vunpack.c.l.b16 %v13640_v17  ;;  %v5410_v17 = vunpack.c.l.b16 %v13577_v40 }
 0x835   :  { %v5432_v56 = vunpack.c.h.b16 %v13605_v15  ;;  %v5380_v24 = vpack.c.b16 %v5375_v19, %v5374_v25 }
 0x839   :  { %v4820_v28 = vpop.f32.mrf.mxu2 }
 0x83a   :  { %v13609_v13 = vpack.c.bf16 %v4820_v28, %v4771_v41  ;;  %v4869_v29 = vpop.f32.mrf.mxu3  ;;  %v5435_v41 = vpack.c.b16 %v5429_v46, %v5428_v3  ;;  %v5376_v28 = vunpack.c.l.b16 %v13603_v51 }
 0x83b   :  { %v13613_v33 = vpack.c.bf16 %v4918_v14, %v4869_v29  ;;  %v4774_v42 = vpop.f32.mrf.mxu0  ;;  %v5426_v14 = vunpack.c.h.b16 %v13577_v40 }
 0x83c   :  { %v5393_v0 = vunpack.c.h.b16 %v13609_v13  ;;  %v4921_v35 = vpop.f32.mrf.mxu1  ;;  %v5377_v60 = vunpack.c.l.b16 %v13609_v13 }
 0x83d   :  { %v5433_v55 = vunpack.c.h.b16 %v13613_v33  ;;  %v5434_v13 = vpack.c.b16 %v5427_v26, %v5426_v14  ;;  %v5417_v62 = vunpack.c.l.b16 %v13613_v33  ;;  %v10865_v33 = vld [vmem:[%s15727_s16 + $0x118] sm:$0xf0] }
 0x83e   :  { %v5397_v7 = vpack.c.b16 %v5393_v0, %v5392_v20  ;;  %4969 = vmatmul.bf16.gmra.mxu0 %v13351_v34  ;;  %5018 = vmatmul.bf16.gmra.mxu2 %v13351_v34  ;;  %v10874_v20 = vld [vmem:[%s15727_s16 + $0x160] sm:$0xf0]  ;;  %v5381_v57 = vpack.c.b16 %v5377_v60, %v5376_v28 }
 0x83f   :  { %v5437_v4 = vpack.c.b16 %v5433_v55, %v5432_v56  ;;  %5067 = vmatmul.bf16.gmra.mxu3 %v13351_v34  ;;  %5116 = vmatmul.bf16.gmra.mxu1 %v13351_v34  ;;  %v5416_v55 = vunpack.c.l.b16 %v13605_v15  ;;  %v9936_v15 = vld [vmem:[%s15727_s16 + $0xf8] sm:$0xf] }
 0x840   :  { %5994 = vmatpush.bf16.msrb.mxu2 %v5397_v7 }
 0x841   :  { %6083 = vmatpush.bf16.msra.mxu3 %v5437_v4  ;;  %v4823_v48 = vpop.f32.mrf.mxu2  ;;  %v5421_v53 = vpack.c.b16 %v5417_v62, %v5416_v55 }
 0x842   :  { %v5226_v22 = vpack.c.bf16 %v4823_v48, %v4774_v42  ;;  %v4872_v8 = vpop.f32.mrf.mxu3  ;;  %v9972_v42 = vld [vmem:[%s15727_s16 + $0x140] sm:$0xf] }
 0x843   :  { %v5227_v63 = vpack.c.bf16 %v4921_v35, %v4872_v8  ;;  %v4776_v59 = vpop.f32.mrf.mxu0  ;;  %v9973_v56 = vor.u32 %v10874_v20, %v9972_v42  ;;  %v9828_v20 = vld [vmem:[%s15727_s16 + $0x20] sm:$0xf] }
 0x844   :  { %v4923_v1 = vpop.f32.mrf.mxu1  ;;  %5995 = vmatpush.bf16.msrb.mxu2 %v5396_v10  ;;  %v6447_v7 = vunpack.c.l.b16 %v5226_v22  ;;  %v6463_v37 = vunpack.c.h.b16 %v5226_v22  ;;  %v5415_v10 = vunpack.c.l.b16 %v13611_v9  ;;  %v9900_v9 = vld [vmem:[%s15727_s16 + $0xb0] sm:$0xf] }
 0x845   :  { %6084 = vmatpush.bf16.msra.mxu3 %v5436_v52  ;;  %5140 = vmatpush.bf16.msrb.mxu0 %v9973_v56  ;;  %v6487_v16 = vunpack.c.l.b16 %v5227_v63  ;;  %v6503_v48 = vunpack.c.h.b16 %v5227_v63  ;;  %v9901_v5 = vor.u32 %v10856_v54, %v9900_v9 }
 0x848   :  { %5996 = vmatpush.bf16.msrb.mxu2 %v5395_v49 }
 0x849   :  { %6085 = vmatpush.bf16.msra.mxu3 %v5435_v41  ;;  %v4825_v29 = vpop.f32.mrf.mxu2  ;;  %v5412_v41 = vunpack.c.l.b16 %v13648_v58 }
 0x84a   :  { %v5231_v0 = vpack.c.bf16 %v4825_v29, %v4776_v59  ;;  %v4874_v35 = vpop.f32.mrf.mxu3  ;;  %v5414_v59 = vunpack.c.l.b16 %v13619_v23  ;;  %v5411_v29 = vunpack.c.l.b16 %v13645_v32 }
 0x84b   :  { %v5232_v31 = vpack.c.bf16 %v4923_v1, %v4874_v35  ;;  %v13679_v51 = vpop.f32.mrf.mxu0  ;;  %v5373_v1 = vunpack.c.l.b16 %v13629_v38  ;;  %v9864_v38 = vld [vmem:[%s15727_s16 + $0x68] sm:$0xf]  ;;  %v5419_v42 = vpack.c.b16 %v5413_v18, %v5412_v41  ;;  %v10084_v18 = vld [vmem:[%s15728_s15] sm:$0xf] }
 0x84c   :  { %v6448_v45 = vunpack.c.l.b16 %v5231_v0  ;;  %v6464_v4 = vunpack.c.h.b16 %v5231_v0  ;;  %v4926_v61 = vpop.f32.mrf.mxu1  ;;  %5997 = vmatpush.bf16.msrb.mxu2 %v13589_v21  ;;  %v9937_v21 = vor.u32 %v10865_v33, %v9936_v15  ;;  %v5420_v49 = vpack.c.b16 %v5415_v10, %v5414_v59  ;;  %v10838_v0 = vld [vmem:[%s15727_s16 + $0x40] sm:$0xf0] }
 0x84d   :  { %v6488_v2 = vunpack.c.l.b16 %v5232_v31  ;;  %v6504_v50 = vunpack.c.h.b16 %v5232_v31  ;;  %6086 = vmatpush.bf16.msra.mxu3 %v5434_v13  ;;  %v5379_v14 = vpack.c.b16 %v5373_v1, %v5372_v47  ;;  %v9865_v28 = vor.u32 %v10847_v44, %v9864_v38  ;;  %v10902_v47 = vld [vmem:[%s15728_s15 + $0x4] sm:$0xf] }
 0x84e   :  { %4974 = vmatmul.bf16.gmra.mxu0 %v13455_v12  ;;  %5023 = vmatmul.bf16.gmra.mxu2 %v13455_v12  ;;  %v13691_v22 = vpack.c.b16 %v6464_v4, %v6463_v37  ;;  %v13693_v8 = vpack.c.b16 %v6448_v45, %v6447_v7  ;;  %v9829_v13 = vor.u32 %v10838_v0, %v9828_v20 }
 0x84f   :  { %5072 = vmatmul.bf16.gmra.mxu3 %v13455_v12  ;;  %5121 = vmatmul.bf16.gmra.mxu1 %v13455_v12  ;;  %v13698_v46 = vpack.c.b16 %v6504_v50, %v6503_v48  ;;  %v13700_v63 = vpack.c.b16 %v6488_v2, %v6487_v16  ;;  %v5418_v55 = vpack.c.b16 %v5411_v29, %v5410_v17 }
 0x850   :  { %5998 = vmatpush.bf16.msrb.mxu2 %v5381_v57  ;;  %5141 = vmatpush.bf16.msrb.mxu0 %v9937_v21 }
 0x851   :  { %6087 = vmatpush.bf16.msra.mxu3 %v5421_v53  ;;  %v13704_v52 = vpop.f32.mrf.mxu2 }
 0x852   :  { %v4877_v3 = vpop.f32.mrf.mxu3 }
 0x853   :  { %v5237_v26 = vpack.c.bf16 %v4926_v61, %v4877_v3  ;;  %v13714_v23 = vpop.f32.mrf.mxu0 }
 0x854   :  { %v4928_v60 = vpop.f32.mrf.mxu1  ;;  %5999 = vmatpush.bf16.msrb.mxu2 %v5380_v24  ;;  %5142 = vmatpush.bf16.msrb.mxu0 %v9901_v5 }
 0x855   :  { %6088 = vmatpush.bf16.msra.mxu3 %v5420_v49  ;;  %v6489_v40 = vunpack.c.l.b16 %v5237_v26  ;;  %v6505_v31 = vunpack.c.h.b16 %v5237_v26  ;;  %v10904_v26 = vld [vmem:[%s15728_s15 + $0x10] sm:$0xf0] }
 0x858   :  { %6000 = vmatpush.bf16.msrb.mxu2 %v5379_v14  ;;  %5143 = vmatpush.bf16.msrb.mxu0 %v9865_v28  ;;  %v13767_v28 = vor.u32 %v10904_v26, %v10084_v18 }
 0x859   :  { %6089 = vmatpush.bf16.msra.mxu3 %v5419_v42  ;;  %v13726_v58 = vpop.f32.mrf.mxu2 }
 0x85a   :  { %v4879_v35 = vpop.f32.mrf.mxu3 }
 0x85b   :  { %v5242_v56 = vpack.c.bf16 %v4928_v60, %v4879_v35  ;;  %v4784_v32 = vpop.f32.mrf.mxu0  ;;  %v10086_v60 = vld [vmem:[%s15728_s15 + $0x14] sm:$0xf0] }
 0x85c   :  { %v4931_v62 = vpop.f32.mrf.mxu1  ;;  %6001 = vmatpush.bf16.msrb.mxu2 %v13591_v30  ;;  %5144 = vmatpush.bf16.msrb.mxu0 %v9829_v13  ;;  %v13769_v17 = vor.u32 %v10902_v47, %v10086_v60 }
 0x85d   :  { %v6490_v57 = vunpack.c.l.b16 %v5242_v56  ;;  %v6506_v7 = vunpack.c.h.b16 %v5242_v56  ;;  %6090 = vmatpush.bf16.msra.mxu3 %v5418_v55 }
 0x85e   :  { %4979 = vmatmul.bf16.gmra.mxu0 %v13559_v39  ;;  %5028 = vmatmul.bf16.gmra.mxu2 %v13559_v39 }
 0x85f   :  { %5077 = vmatmul.bf16.gmra.mxu3 %v13559_v39  ;;  %5126 = vmatmul.bf16.gmra.mxu1 %v13559_v39  ;;  %v13739_v37 = vpack.c.b16 %v6506_v7, %v6505_v31  ;;  %v13741_v45 = vpack.c.b16 %v6490_v57, %v6489_v40  ;;  %v5241_v31 = vpack.c.bf16 %v13726_v58, %v13714_v23 }
 0x861   :  { %v4833_v4 = vpop.f32.mrf.mxu2  ;;  %v6466_v23 = vunpack.c.h.b16 %v5241_v31 }
 0x862   :  { %v4882_v30 = vpop.f32.mrf.mxu3  ;;  %v5246_v20 = vpack.c.bf16 %v4833_v4, %v4784_v32  ;;  %v5236_v4 = vpack.c.bf16 %v13704_v52, %v13679_v51  ;;  %v10909_v51 = vld [vmem:[%s15728_s15 + $0x38] sm:$0xf0]  ;;  %v10907_v52 = vld [vmem:[%s15728_s15 + $0x2c] sm:$0xf] }
 0x863   :  { %v5247_v61 = vpack.c.bf16 %v4931_v62, %v4882_v30  ;;  %v4786_v16 = vpop.f32.mrf.mxu0 }
 0x864   :  { %v4933_v48 = vpop.f32.mrf.mxu1 }
 0x865   :  { %v6491_v21 = vunpack.c.l.b16 %v5247_v61  ;;  %v6507_v10 = vunpack.c.h.b16 %v5247_v61  ;;  %v6467_v61 = vunpack.c.h.b16 %v5246_v20 }
 0x869   :  { %v4835_v2 = vpop.f32.mrf.mxu2 }
 0x86a   :  { %v4884_v50 = vpop.f32.mrf.mxu3  ;;  %v13765_v38 = vpack.c.bf16 %v4835_v2, %v4786_v16 }
 0x86b   :  { %v5252_v15 = vpack.c.bf16 %v4933_v48, %v4884_v50  ;;  %v4789_v33 = vpop.f32.mrf.mxu0 }
 0x86c   :  { %v4936_v19 = vpop.f32.mrf.mxu1  ;;  %v6468_v57 = vunpack.c.h.b16 %v13765_v38 }
 0x86d   :  { %v6492_v53 = vunpack.c.l.b16 %v5252_v15  ;;  %v6508_v25 = vunpack.c.h.b16 %v5252_v15  ;;  %v6465_v15 = vunpack.c.h.b16 %v5236_v4 }
 0x86e   :  { %4984 = vmatmul.bf16.gmra.mxu0 %v13567_v36  ;;  %5033 = vmatmul.bf16.gmra.mxu2 %v13567_v36  ;;  %v6473_v2 = vpack.c.b16 %v6468_v57, %v6467_v61  ;;  %v10126_v57 = vld [vmem:[%s15728_s15 + $0x64] sm:$0xf0] }
 0x86f   :  { %5082 = vmatmul.bf16.gmra.mxu3 %v13567_v36  ;;  %5131 = vmatmul.bf16.gmra.mxu1 %v13567_v36  ;;  %v13747_v59 = vpack.c.b16 %v6508_v25, %v6507_v10  ;;  %v13749_v9 = vpack.c.b16 %v6492_v53, %v6491_v21  ;;  %v10104_v21 = vld [vmem:[%s15728_s15 + $0x28] sm:$0xf]  ;;  %v10106_v10 = vld [vmem:[%s15728_s15 + $0x3c] sm:$0xf0] }
 0x870   :  { %v13807_v18 = vor.u32 %v10907_v52, %v10106_v10 }
 0x871   :  { %v4838_v54 = vpop.f32.mrf.mxu2 }
 0x872   :  { %v4887_v1 = vpop.f32.mrf.mxu3  ;;  %v13757_v49 = vpack.c.bf16 %v4838_v54, %v4789_v33 }
 0x873   :  { %v5257_v3 = vpack.c.bf16 %v4936_v19, %v4887_v1  ;;  %v4791_v24 = vpop.f32.mrf.mxu0  ;;  %v6472_v19 = vpack.c.b16 %v6466_v23, %v6465_v15 }
 0x874   :  { %v4938_v5 = vpop.f32.mrf.mxu1  ;;  %v6469_v0 = vunpack.c.h.b16 %v13757_v49 }
 0x875   :  { %v6493_v56 = vunpack.c.l.b16 %v5257_v3  ;;  %v6509_v55 = vunpack.c.h.b16 %v5257_v3  ;;  %v13802_v3 = vor.u32 %v10909_v51, %v10104_v21  ;;  %v10919_v21 = vld [vmem:[%s15728_s15 + $0x88] sm:$0xf0] }
 0x879   :  { %v4840_v41 = vpop.f32.mrf.mxu2 }
 0x87a   :  { %v5261_v44 = vpack.c.bf16 %v4840_v41, %v4791_v24  ;;  %v4889_v14 = vpop.f32.mrf.mxu3  ;;  %v6453_v24 = vunpack.c.l.b16 %v13757_v49 }
 0x87b   :  { %v5262_v29 = vpack.c.bf16 %v4938_v5, %v4889_v14  ;;  %v4950_v42 = vpop.f32.mrf.mxu0 }
 0x87c   :  { %v6470_v35 = vunpack.c.h.b16 %v5261_v44  ;;  %v5097_v13 = vpop.f32.mrf.mxu1  ;;  %v6454_v25 = vunpack.c.l.b16 %v5261_v44  ;;  %v6452_v44 = vunpack.c.l.b16 %v13765_v38 }
 0x87d   :  { %v6494_v62 = vunpack.c.l.b16 %v5262_v29  ;;  %v6510_v40 = vunpack.c.h.b16 %v5262_v29 }
 0x87e   :  { %v6474_v7 = vpack.c.b16 %v6470_v35, %v6469_v0  ;;  %5145 = vmatmul.bf16.vlgmr.msrb.gmra.mxu0 %v13319_v43  ;;  %6002 = vmatmul.bf16.vlgmr.msrb.gmra.mxu2 %v13767_v28  ;;  %v6458_v29 = vpack.c.b16 %v6454_v25, %v6453_v24  ;;  %v6451_v0 = vunpack.c.l.b16 %v5246_v20  ;;  %v10914_v20 = vld [vmem:[%s15728_s15 + $0x60] sm:$0xf0] }
 0x87f   :  { %v13777_v30 = vpack.c.b16 %v6510_v40, %v6509_v55  ;;  %6091 = vmatmul.bf16.vlgmr.msra.gmra.mxu3 %v13769_v17  ;;  %v13780_v32 = vpack.c.b16 %v6494_v62, %v6493_v56  ;;  %v10124_v40 = vld [vmem:[%s15728_s15 + $0x50] sm:$0xf] }
 0x880   :  { %6623 = vmatpush.bf16.msrb.mxu3 %v6474_v7  ;;  %v13840_v61 = vor.u32 %v10914_v20, %v10124_v40 }
 0x881   :  { %v4999_v16 = vpop.f32.mrf.mxu2 }
 0x882   :  { %v5188_v58 = vpack.c.bf16 %v4999_v16, %v4950_v42  ;;  %v5048_v48 = vpop.f32.mrf.mxu3 }
 0x883   :  { %v13784_v50 = vpack.c.bf16 %v5097_v13, %v5048_v48  ;;  %v4952_v43 = vpop.f32.mrf.mxu0  ;;  %v6450_v13 = vunpack.c.l.b16 %v5241_v31  ;;  %v10912_v31 = vld [vmem:[%s15728_s15 + $0x54] sm:$0xf] }
 0x884   :  { %v13786_v33 = vpop.f32.mrf.mxu1  ;;  %6624 = vmatpush.bf16.msrb.mxu3 %v6473_v2  ;;  %v5450_v26 = vunpack.c.l.b16 %v5188_v58  ;;  %v5466_v47 = vunpack.c.h.b16 %v5188_v58  ;;  %v13842_v23 = vor.u32 %v10912_v31, %v10126_v57 }
 0x888   :  { %6625 = vmatpush.bf16.msrb.mxu3 %v6472_v19  ;;  %v10144_v19 = vld [vmem:[%s15728_s15 + $0x78] sm:$0xf] }
 0x889   :  { %v5001_v53 = vpop.f32.mrf.mxu2  ;;  %v13860_v10 = vor.u32 %v10919_v21, %v10144_v19 }
 0x88a   :  { %v5193_v54 = vpack.c.bf16 %v5001_v53, %v4952_v43  ;;  %v13800_v1 = vpop.f32.mrf.mxu3 }
 0x88b   :  { %v13805_v5 = vpop.f32.mrf.mxu0 }
 0x88c   :  { %v5451_v60 = vunpack.c.l.b16 %v5193_v54  ;;  %v5467_v41 = vunpack.c.h.b16 %v5193_v54  ;;  %v13809_v14 = vpop.f32.mrf.mxu1  ;;  %6626 = vmatpush.bf16.msrb.mxu3 %v13691_v22  ;;  %v6457_v22 = vpack.c.b16 %v6452_v44, %v6451_v0  ;;  %v10924_v44 = vld [vmem:[%s15728_s15 + $0xb0] sm:$0xf0]  ;;  %v10166_v0 = vld [vmem:[%s15728_s15 + $0xb4] sm:$0xf0] }
 0x88e   :  { %5150 = vmatmul.bf16.gmra.mxu0 %v13327_v27  ;;  %6007 = vmatmul.bf16.gmra.mxu2 %v13802_v3  ;;  %v13815_v49 = vpack.c.b16 %v5467_v41, %v5466_v47  ;;  %v13817_v42 = vpack.c.b16 %v5451_v60, %v5450_v26  ;;  %v6449_v27 = vunpack.c.l.b16 %v5236_v4  ;;  %v10164_v41 = vld [vmem:[%s15728_s15 + $0xa0] sm:$0xf] }
 0x88f   :  { %6096 = vmatmul.bf16.gmra.mxu3 %v13807_v18  ;;  %v13887_v20 = vor.u32 %v10924_v44, %v10164_v41 }
 0x890   :  { %6627 = vmatpush.bf16.msrb.mxu3 %v6458_v29  ;;  %v6456_v62 = vpack.c.b16 %v6450_v13, %v6449_v27 }
 0x891   :  { %v13820_v35 = vpop.f32.mrf.mxu2 }
 0x892   :  { %v13822_v56 = vpop.f32.mrf.mxu3 }
 0x893   :  { %v13824_v38 = vpop.f32.mrf.mxu0 }
 0x894   :  { %v13826_v55 = vpop.f32.mrf.mxu1  ;;  %6628 = vmatpush.bf16.msrb.mxu3 %v6457_v22 }
 0x898   :  { %6629 = vmatpush.bf16.msrb.mxu3 %v6456_v62 }
 0x899   :  { %v5006_v7 = vpop.f32.mrf.mxu2 }
 0x89a   :  { %v5055_v4 = vpop.f32.mrf.mxu3 }
 0x89b   :  { %v4960_v16 = vpop.f32.mrf.mxu0 }
 0x89c   :  { %v5107_v58 = vpop.f32.mrf.mxu1  ;;  %6630 = vmatpush.bf16.msrb.mxu3 %v13693_v8  ;;  %v10146_v8 = vld [vmem:[%s15728_s15 + $0x8c] sm:$0xf0] }
 0x89e   :  { %5155 = vmatmul.bf16.gmra.mxu0 %v13335_v6  ;;  %6012 = vmatmul.bf16.gmra.mxu2 %v13840_v61  ;;  %v10917_v6 = vld [vmem:[%s15728_s15 + $0x7c] sm:$0xf] }
 0x89f   :  { %6101 = vmatmul.bf16.gmra.mxu3 %v13842_v23  ;;  %v13862_v25 = vor.u32 %v10917_v6, %v10146_v8 }
 0x8a1   :  { %v5009_v48 = vpop.f32.mrf.mxu2 }
 0x8a2   :  { %v5058_v2 = vpop.f32.mrf.mxu3  ;;  %v13895_v6 = vpack.c.bf16 %v5009_v48, %v4960_v16  ;;  %v13910_v16 = vpack.c.bf16 %v13826_v55, %v5055_v4  ;;  %v13925_v55 = vpack.c.bf16 %v13809_v14, %v13822_v56 }
 0x8a3   :  { %v4962_v43 = vpop.f32.mrf.mxu0 }
 0x8a4   :  { %v5109_v15 = vpop.f32.mrf.mxu1  ;;  %v5509_v41 = vunpack.c.h.b16 %v13910_v16  ;;  %v5508_v56 = vunpack.c.h.b16 %v13925_v55 }
 0x8a9   :  { %v5011_v51 = vpop.f32.mrf.mxu2 }
 0x8aa   :  { %v5060_v52 = vpop.f32.mrf.mxu3  ;;  %v13883_v27 = vpack.c.bf16 %v5011_v51, %v4962_v43  ;;  %v13899_v51 = vpack.c.bf16 %v5107_v58, %v5058_v2  ;;  %v13916_v2 = vpack.c.bf16 %v13820_v35, %v13805_v5 }
 0x8ab   :  { %v4965_v53 = vpop.f32.mrf.mxu0  ;;  %v13889_v31 = vpack.c.bf16 %v5109_v15, %v5060_v52  ;;  %v13904_v15 = vpack.c.bf16 %v5006_v7, %v13824_v38  ;;  %v5470_v38 = vunpack.c.h.b16 %v13895_v6 }
 0x8ac   :  { %v5112_v54 = vpop.f32.mrf.mxu1  ;;  %v5471_v52 = vunpack.c.h.b16 %v13883_v27  ;;  %v5510_v7 = vunpack.c.h.b16 %v13899_v51 }
 0x8ad   :  { %v5511_v58 = vunpack.c.h.b16 %v13889_v31 }
 0x8ae   :  { %5160 = vmatmul.bf16.gmra.mxu0 %v13343_v11  ;;  %6017 = vmatmul.bf16.gmra.mxu2 %v13860_v10  ;;  %v10922_v11 = vld [vmem:[%s15728_s15 + $0xa4] sm:$0xf]  ;;  %v5476_v35 = vpack.c.b16 %v5471_v52, %v5470_v38 }
 0x8af   :  { %6106 = vmatmul.bf16.gmra.mxu3 %v13862_v25  ;;  %v13893_v21 = vor.u32 %v10922_v11, %v10166_v0  ;;  %v5516_v0 = vpack.c.b16 %v5511_v58, %v5510_v7 }
 0x8b1   :  { %v5014_v24 = vpop.f32.mrf.mxu2 }
 0x8b2   :  { %v5063_v26 = vpop.f32.mrf.mxu3  ;;  %v13873_v29 = vpack.c.bf16 %v5014_v24, %v4965_v53 }
 0x8b3   :  { %v4967_v47 = vpop.f32.mrf.mxu0  ;;  %v13881_v13 = vpack.c.bf16 %v5112_v54, %v5063_v26 }
 0x8b4   :  { %v5114_v60 = vpop.f32.mrf.mxu1  ;;  %v5472_v8 = vunpack.c.h.b16 %v13873_v29 }
 0x8b5   :  { %v5512_v54 = vunpack.c.h.b16 %v13881_v13 }
 0x8b9   :  { %v5016_v22 = vpop.f32.mrf.mxu2 }
 0x8ba   :  { %v13885_v62 = vpack.c.bf16 %v5016_v22, %v4967_v47  ;;  %v5065_v40 = vpop.f32.mrf.mxu3  ;;  %v5469_v47 = vunpack.c.h.b16 %v13904_v15 }
 0x8bb   :  { %v13891_v57 = vpack.c.bf16 %v5114_v60, %v5065_v40  ;;  %v4970_v19 = vpop.f32.mrf.mxu0  ;;  %v10184_v40 = vld [vmem:[%s15728_s15 + $0xc8] sm:$0xf] }
 0x8bc   :  { %v5473_v53 = vunpack.c.h.b16 %v13885_v62  ;;  %v5117_v43 = vpop.f32.mrf.mxu1 }
 0x8bd   :  { %v5513_v24 = vunpack.c.h.b16 %v13891_v57 }
 0x8be   :  { %v5477_v26 = vpack.c.b16 %v5473_v53, %v5472_v8  ;;  %5165 = vmatmul.bf16.gmra.mxu0 %v13351_v34  ;;  %6022 = vmatmul.bf16.gmra.mxu2 %v13887_v20  ;;  %v13921_v34 = vpack.c.bf16 %v13786_v33, %v13800_v1  ;;  %v5468_v33 = vunpack.c.h.b16 %v13916_v2  ;;  %v5515_v8 = vpack.c.b16 %v5509_v41, %v5508_v56  ;;  %v10929_v53 = vld [vmem:[%s15728_s15 + $0xd8] sm:$0xf0] }
 0x8bf   :  { %v5517_v48 = vpack.c.b16 %v5513_v24, %v5512_v54  ;;  %6111 = vmatmul.bf16.gmra.mxu3 %v13893_v21  ;;  %v10186_v54 = vld [vmem:[%s15728_s15 + $0xdc] sm:$0xf0]  ;;  %v13947_v38 = vor.u32 %v10929_v53, %v10184_v40 }
 0x8c0   :  { %6172 = vmatpush.bf16.msra.mxu1 %v5477_v26  ;;  %v5507_v14 = vunpack.c.h.b16 %v13921_v34  ;;  %v5475_v22 = vpack.c.b16 %v5469_v47, %v5468_v33  ;;  %v5457_v26 = vunpack.c.l.b16 %v13885_v62  ;;  %v5496_v47 = vunpack.c.l.b16 %v13881_v13 }
 0x8c1   :  { %6261 = vmatpush.bf16.msra.mxu0 %v5517_v48  ;;  %v5019_v4 = vpop.f32.mrf.mxu2 }
 0x8c2   :  { %v5228_v60 = vpack.c.bf16 %v5019_v4, %v4970_v19  ;;  %v5068_v5 = vpop.f32.mrf.mxu3  ;;  %v5506_v19 = vunpack.c.h.b16 %v13784_v50  ;;  %v5456_v4 = vunpack.c.l.b16 %v13873_v29  ;;  %v5455_v29 = vunpack.c.l.b16 %v13883_v27 }
 0x8c3   :  { %v5229_v44 = vpack.c.bf16 %v5117_v43, %v5068_v5  ;;  %v4972_v11 = vpop.f32.mrf.mxu0  ;;  %v10927_v43 = vld [vmem:[%s15728_s15 + $0xcc] sm:$0xf]  ;;  %v5497_v5 = vunpack.c.l.b16 %v13891_v57  ;;  %v5454_v27 = vunpack.c.l.b16 %v13895_v6  ;;  %v5492_v6 = vunpack.c.l.b16 %v13925_v55  ;;  %v10206_v55 = vld [vmem:[%s15728_s15 + $0x104] sm:$0xf0] }
 0x8c4   :  { %v5119_v1 = vpop.f32.mrf.mxu1  ;;  %6173 = vmatpush.bf16.msra.mxu1 %v5476_v35  ;;  %v5514_v52 = vpack.c.b16 %v5507_v14, %v5506_v19  ;;  %v13949_v7 = vor.u32 %v10927_v43, %v10186_v54  ;;  %v6543_v33 = vunpack.c.h.b16 %v5228_v60  ;;  %v5461_v13 = vpack.c.b16 %v5457_v26, %v5456_v4 }
 0x8c5   :  { %6262 = vmatpush.bf16.msra.mxu0 %v5516_v0  ;;  %v6527_v0 = vunpack.c.l.b16 %v5228_v60  ;;  %v5453_v43 = vunpack.c.l.b16 %v13904_v15  ;;  %v5491_v4 = vunpack.c.l.b16 %v13921_v34  ;;  %v10204_v15 = vld [vmem:[%s15728_s15 + $0xf0] sm:$0xf]  ;;  %v10092_v34 = vld [vmem:[%s15728_s15 + $0x8] sm:$0xf] }
 0x8c8   :  { %6174 = vmatpush.bf16.msra.mxu1 %v5475_v22  ;;  %v6583_v22 = vunpack.c.h.b16 %v5229_v44 }
 0x8c9   :  { %6263 = vmatpush.bf16.msra.mxu0 %v5515_v8  ;;  %v5021_v24 = vpop.f32.mrf.mxu2 }
 0x8ca   :  { %v5233_v58 = vpack.c.bf16 %v5021_v24, %v4972_v11  ;;  %v5070_v48 = vpop.f32.mrf.mxu3  ;;  %v6567_v11 = vunpack.c.l.b16 %v5229_v44  ;;  %v5460_v24 = vpack.c.b16 %v5455_v29, %v5454_v27 }
 0x8cb   :  { %v5234_v35 = vpack.c.bf16 %v5119_v1, %v5070_v48  ;;  %v13954_v41 = vpop.f32.mrf.mxu0  ;;  %v5495_v1 = vunpack.c.l.b16 %v13889_v31  ;;  %v5493_v31 = vunpack.c.l.b16 %v13910_v16  ;;  %v10934_v16 = vld [vmem:[%s15728_s15 + $0x100] sm:$0xf0] }
 0x8cc   :  { %v6528_v14 = vunpack.c.l.b16 %v5233_v58  ;;  %v6544_v56 = vunpack.c.h.b16 %v5233_v58  ;;  %v5122_v62 = vpop.f32.mrf.mxu1  ;;  %6175 = vmatpush.bf16.msra.mxu1 %v13815_v49  ;;  %v5501_v49 = vpack.c.b16 %v5497_v5, %v5496_v47  ;;  %v5452_v58 = vunpack.c.l.b16 %v13916_v2  ;;  %v10932_v2 = vld [vmem:[%s15728_s15 + $0xf4] sm:$0xf]  ;;  %v10905_v5 = vld [vmem:[%s15728_s15 + $0x18] sm:$0xf0] }
 0x8cd   :  { %v6568_v40 = vunpack.c.l.b16 %v5234_v35  ;;  %v6584_v19 = vunpack.c.h.b16 %v5234_v35  ;;  %6264 = vmatpush.bf16.msra.mxu0 %v5514_v52  ;;  %v5499_v47 = vpack.c.b16 %v5493_v31, %v5492_v6  ;;  %v5490_v35 = vunpack.c.l.b16 %v13784_v50  ;;  %v10937_v31 = vld [vmem:[%s15728_s15 + $0x11c] sm:$0xf] }
 0x8ce   :  { %5170 = vmatmul.bf16.gmra.mxu0 %v13455_v12  ;;  %6027 = vmatmul.bf16.gmra.mxu2 %v13947_v38  ;;  %v13960_v57 = vpack.c.b16 %v6544_v56, %v6543_v33  ;;  %v13962_v60 = vpack.c.b16 %v6528_v14, %v6527_v0  ;;  %v5494_v12 = vunpack.c.l.b16 %v13899_v51  ;;  %v5459_v51 = vpack.c.b16 %v5453_v43, %v5452_v58 }
 0x8cf   :  { %6116 = vmatmul.bf16.gmra.mxu3 %v13949_v7  ;;  %v13966_v44 = vpack.c.b16 %v6584_v19, %v6583_v22  ;;  %v13968_v8 = vpack.c.b16 %v6568_v40, %v6567_v11  ;;  %v14002_v56 = vor.u32 %v10934_v16, %v10204_v15  ;;  %v5498_v40 = vpack.c.b16 %v5491_v4, %v5490_v35 }
 0x8d0   :  { %6176 = vmatpush.bf16.msra.mxu1 %v5461_v13  ;;  %v5500_v26 = vpack.c.b16 %v5495_v1, %v5494_v12  ;;  %v14006_v19 = vor.u32 %v10932_v2, %v10206_v55  ;;  %v14008_v29 = vor.u32 %v10905_v5, %v10092_v34 }
 0x8d1   :  { %6265 = vmatpush.bf16.msra.mxu0 %v5501_v49  ;;  %v13972_v53 = vpop.f32.mrf.mxu2 }
 0x8d2   :  { %v5073_v54 = vpop.f32.mrf.mxu3  ;;  %15786 = vst [vmem:[#allocation2_spill] sm:$0xff] %v14006_v19 }
 0x8d3   :  { %v13976_v52 = vpop.f32.mrf.mxu0  ;;  %v5239_v0 = vpack.c.bf16 %v5122_v62, %v5073_v54 }
 0x8d4   :  { %v5124_v48 = vpop.f32.mrf.mxu1  ;;  %6177 = vmatpush.bf16.msra.mxu1 %v5460_v24  ;;  %v10939_v24 = vld [vmem:[%s15728_s15 + $0x128] sm:$0xf0] }
 0x8d5   :  { %6266 = vmatpush.bf16.msra.mxu0 %v5500_v26  ;;  %v6585_v1 = vunpack.c.h.b16 %v5239_v0  ;;  %v6569_v49 = vunpack.c.l.b16 %v5239_v0  ;;  %v10910_v26 = vld [vmem:[%s15728_s15 + $0x40] sm:$0xf0] }
 0x8d8   :  { %6178 = vmatpush.bf16.msra.mxu1 %v5459_v51 }
 0x8d9   :  { %6267 = vmatpush.bf16.msra.mxu0 %v5499_v47  ;;  %v14000_v33 = vpop.f32.mrf.mxu2 }
 0x8da   :  { %v5075_v14 = vpop.f32.mrf.mxu3 }
 0x8db   :  { %v5244_v11 = vpack.c.bf16 %v5124_v48, %v5075_v14  ;;  %v14004_v22 = vpop.f32.mrf.mxu0 }
 0x8dc   :  { %v5127_v13 = vpop.f32.mrf.mxu1  ;;  %6179 = vmatpush.bf16.msra.mxu1 %v13817_v42 }
 0x8dd   :  { %v6570_v50 = vunpack.c.l.b16 %v5244_v11  ;;  %v6586_v62 = vunpack.c.h.b16 %v5244_v11  ;;  %6268 = vmatpush.bf16.msra.mxu0 %v5498_v40 }
 0x8de   :  { %5175 = vmatmul.bf16.gmra.mxu0 %v13559_v39  ;;  %6032 = vmatmul.bf16.gmra.mxu2 %v14002_v56  ;;  %v10224_v39 = vld [vmem:[%s15728_s15 + $0x118] sm:$0xf] }
 0x8df   :  { %6121 = vmatmul.bf16.gmra.mxu3 %v14006_v19  ;;  %6180 = vmatmul.bf16.vlgmr.msra.gmra.mxu1 %v14008_v29  ;;  %v14016_v27 = vpack.c.b16 %v6586_v62, %v6585_v1  ;;  %v14018_v12 = vpack.c.b16 %v6570_v50, %v6569_v49  ;;  %v14041_v51 = vor.u32 %v10939_v24, %v10224_v39  ;;  %v10246_v50 = vld [vmem:[%s15728_s15 + $0x154] sm:$0xf0]  ;;  %v10915_v49 = vld [vmem:[%s15728_s15 + $0x68] sm:$0xf0] }
 0x8e0   :  { %6712 = vmatpush.bf16.msrb.mxu1 %v13777_v30  ;;  %v10132_v62 = vld [vmem:[%s15728_s15 + $0x58] sm:$0xf] }
 0x8e1   :  { %v5029_v42 = vpop.f32.mrf.mxu2 }
 0x8e2   :  { %v5078_v43 = vpop.f32.mrf.mxu3 }
 0x8e3   :  { %v4982_v54 = vpop.f32.mrf.mxu0  ;;  %v5249_v58 = vpack.c.bf16 %v5127_v13, %v5078_v43  ;;  %v10942_v13 = vld [vmem:[%s15728_s15 + $0x144] sm:$0xf] }
 0x8e4   :  { %6713 = vmatpush.bf16.msrb.mxu1 %v13747_v59  ;;  %v5129_v30 = vpop.f32.mrf.mxu1  ;;  %v10226_v59 = vld [vmem:[%s15728_s15 + $0x12c] sm:$0xf0] }
 0x8e5   :  { %v14043_v15 = vor.u32 %v10937_v31, %v10226_v59  ;;  %v6571_v2 = vunpack.c.l.b16 %v5249_v58  ;;  %v6587_v55 = vunpack.c.h.b16 %v5249_v58 }
 0x8e7   :  { %15787 = vst [vmem:[#allocation3_spill] sm:$0xff] %v14043_v15 }
 0x8e8   :  { %6714 = vmatpush.bf16.msrb.mxu1 %v13739_v37  ;;  %v10112_v37 = vld [vmem:[%s15728_s15 + $0x30] sm:$0xf] }
 0x8e9   :  { %v5031_v48 = vpop.f32.mrf.mxu2  ;;  %v14045_v16 = vor.u32 %v10910_v26, %v10112_v37 }
 0x8ea   :  { %v5080_v6 = vpop.f32.mrf.mxu3  ;;  %v14085_v39 = vpack.c.bf16 %v5031_v48, %v4982_v54 }
 0x8eb   :  { %v5254_v4 = vpack.c.bf16 %v5129_v30, %v5080_v6  ;;  %v4985_v47 = vpop.f32.mrf.mxu0 }
 0x8ec   :  { %6715 = vmatpush.bf16.msrb.mxu1 %v13698_v46  ;;  %v5132_v0 = vpop.f32.mrf.mxu1 }
 0x8ed   :  { %v6572_v34 = vunpack.c.l.b16 %v5254_v4  ;;  %v6588_v5 = vunpack.c.h.b16 %v5254_v4  ;;  %v14093_v4 = vor.u32 %v10942_v13, %v10246_v50 }
 0x8ee   :  { %5180 = vmatmul.bf16.gmra.mxu0 %v13567_v36  ;;  %6037 = vmatmul.bf16.gmra.mxu2 %v14041_v51  ;;  %v10244_v36 = vld [vmem:[%s15728_s15 + $0x140] sm:$0xf] }
 0x8ef   :  { %6126 = vmatmul.bf16.gmra.mxu3 %v14043_v15  ;;  %6185 = vmatmul.bf16.gmra.mxu1 %v14045_v16  ;;  %v14052_v46 = vpack.c.b16 %v6588_v5, %v6587_v55  ;;  %v14054_v35 = vpack.c.b16 %v6572_v34, %v6571_v2  ;;  %15789 = vst [vmem:[#allocation5_spill] sm:$0xff] %v14093_v4 }
 0x8f0   :  { %6716 = vmatpush.bf16.msrb.mxu1 %v13780_v32  ;;  %v10944_v32 = vld [vmem:[%s15728_s15 + $0x150] sm:$0xf0]  ;;  %v5248_v2 = vpack.c.bf16 %v5029_v42, %v14004_v22  ;;  %v5238_v42 = vpack.c.bf16 %v13972_v53, %v13954_v41  ;;  %v10949_v41 = vld [vmem:[%s15728_s15 + $0x178] sm:$0xf0]  ;;  %v10947_v53 = vld [vmem:[%s15728_s15 + $0x16c] sm:$0xf] }
 0x8f1   :  { %v5034_v14 = vpop.f32.mrf.mxu2  ;;  %v14087_v37 = vor.u32 %v10944_v32, %v10244_v36 }
 0x8f2   :  { %v5083_v11 = vpop.f32.mrf.mxu3  ;;  %v14073_v1 = vpack.c.bf16 %v5034_v14, %v4985_v47  ;;  %v14095_v47 = vor.u32 %v10915_v49, %v10132_v62  ;;  %v6548_v14 = vunpack.c.h.b16 %v14085_v39  ;;  %v6547_v36 = vunpack.c.h.b16 %v5248_v2  ;;  %v10264_v49 = vld [vmem:[%s15728_s15 + $0x168] sm:$0xf] }
 0x8f3   :  { %v4987_v40 = vpop.f32.mrf.mxu0  ;;  %v5259_v43 = vpack.c.bf16 %v5132_v0, %v5083_v11  ;;  %v5243_v0 = vpack.c.bf16 %v14000_v33, %v13976_v52  ;;  %v6545_v50 = vunpack.c.h.b16 %v5238_v42 }
 0x8f4   :  { %6717 = vmatpush.bf16.msrb.mxu1 %v13749_v9  ;;  %v10903_v9 = vld [vmem:[%s15728_s15 + $0xc] sm:$0xf]  ;;  %v5134_v24 = vpop.f32.mrf.mxu1  ;;  %v6553_v13 = vpack.c.b16 %v6548_v14, %v6547_v36 }
 0x8f5   :  { %v6573_v48 = vunpack.c.l.b16 %v5259_v43  ;;  %v6589_v55 = vunpack.c.h.b16 %v5259_v43  ;;  %v6546_v33 = vunpack.c.h.b16 %v5243_v0  ;;  %v10908_v43 = vld [vmem:[%s15728_s15 + $0x34] sm:$0xf] }
 0x8f7   :  { %v6552_v62 = vpack.c.b16 %v6546_v33, %v6545_v50  ;;  %v6532_v33 = vunpack.c.l.b16 %v14085_v39  ;;  %v6530_v50 = vunpack.c.l.b16 %v5243_v0  ;;  %v6529_v39 = vunpack.c.l.b16 %v5238_v42  ;;  %v10952_v0 = vld [vmem:[%s15728_s15 + $0x194] sm:$0xf]  ;;  %v10134_v42 = vld [vmem:[%s15728_s15 + $0x6c] sm:$0xf0] }
 0x8f8   :  { %6718 = vmatpush.bf16.msrb.mxu1 %v13741_v45  ;;  %v10094_v45 = vld [vmem:[%s15728_s15 + $0x1c] sm:$0xf0] }
 0x8f9   :  { %v5036_v30 = vpop.f32.mrf.mxu2  ;;  %v14089_v26 = vor.u32 %v10903_v9, %v10094_v45 }
 0x8fa   :  { %v5263_v31 = vpack.c.bf16 %v5036_v30, %v4987_v40  ;;  %v5085_v59 = vpop.f32.mrf.mxu3  ;;  %v10114_v30 = vld [vmem:[%s15728_s15 + $0x44] sm:$0xf0] }
 0x8fb   :  { %15788 = vst [vmem:[#allocation4_spill] sm:$0xff] %v14089_v26  ;;  %v5264_v58 = vpack.c.bf16 %v5134_v24, %v5085_v59  ;;  %v14091_v6 = vpop.f32.mrf.mxu0  ;;  %v10266_v24 = vld [vmem:[%s15728_s15 + $0x17c] sm:$0xf0] }
 0x8fc   :  { %6719 = vmatpush.bf16.msrb.mxu1 %v13700_v63  ;;  %v6549_v63 = vunpack.c.h.b16 %v14073_v1  ;;  %v6550_v54 = vunpack.c.h.b16 %v5263_v31  ;;  %v10152_v59 = vld [vmem:[%s15728_s15 + $0x80] sm:$0xf] }
 0x8fd   :  { %v6574_v34 = vunpack.c.l.b16 %v5264_v58  ;;  %v6590_v5 = vunpack.c.h.b16 %v5264_v58  ;;  %v10920_v58 = vld [vmem:[%s15728_s15 + $0x90] sm:$0xf0] }
 0x8fe   :  { %v6554_v11 = vpack.c.b16 %v6550_v54, %v6549_v63  ;;  %6042 = vmatmul.bf16.gmra.mxu2 %v14087_v37  ;;  %6269 = vmatmul.bf16.vlgmr.msra.gmra.mxu0 %v14089_v26  ;;  %v6534_v54 = vunpack.c.l.b16 %v5263_v31  ;;  %v14150_v36 = vor.u32 %v10920_v58, %v10152_v59  ;;  %v10925_v59 = vld [vmem:[%s15728_s15 + $0xb8] sm:$0xf0] }
 0x8ff   :  { %v14104_v40 = vpack.c.b16 %v6590_v5, %v6589_v55  ;;  %6131 = vmatmul.bf16.gmra.mxu3 %v14093_v4  ;;  %v14107_v22 = vpack.c.b16 %v6574_v34, %v6573_v48  ;;  %6190 = vmatmul.bf16.gmra.mxu1 %v14095_v47  ;;  %v14140_v55 = vor.u32 %v10949_v41, %v10264_v49 }
 0x900   :  { %6801 = vmatpush.bf16.msrb.mxu0 %v6554_v11  ;;  %v14142_v34 = vor.u32 %v10908_v43, %v10114_v30  ;;  %v14148_v11 = vor.u32 %v10947_v53, %v10266_v24  ;;  %v6536_v41 = vpack.c.b16 %v6530_v50, %v6529_v39  ;;  %v10284_v53 = vld [vmem:[%s15728_s15 + $0x190] sm:$0xf]  ;;  %v10913_v43 = vld [vmem:[%s15728_s15 + $0x5c] sm:$0xf]  ;;  %v10286_v30 = vld [vmem:[%s15728_s15 + $0x1a4] sm:$0xf0] }
 0x901   :  { %v6003_v52 = vpop.f32.mrf.mxu2  ;;  %v10172_v24 = vld [vmem:[%s15728_s15 + $0xa8] sm:$0xf]  ;;  %v10304_v39 = vld [vmem:[%s15728_s15 + $0x1b8] sm:$0xf] }
 0x902   :  { %v6092_v32 = vpop.f32.mrf.mxu3  ;;  %15790 = vst [vmem:[#allocation6_spill] sm:$0xff] %v14142_v34 }
 0x903   :  { %v14112_v9 = vpop.f32.mrf.mxu0  ;;  %v14114_v45 = vadd.f32 %v6092_v32, %v6003_v52  ;;  %15791 = vst [vmem:[#allocation7_spill] sm:$0xff] %v14148_v11  ;;  %v6533_v52 = vunpack.c.l.b16 %v14073_v1  ;;  %v6531_v32 = vunpack.c.l.b16 %v5248_v2  ;;  %v10954_v2 = vld [vmem:[%s15728_s15 + $0x1a0] sm:$0xf0] }
 0x904   :  { %6802 = vmatpush.bf16.msrb.mxu0 %v6553_v13 }
 0x905   :  { %v6538_v31 = vpack.c.b16 %v6534_v54, %v6533_v52  ;;  %v6537_v49 = vpack.c.b16 %v6532_v33, %v6531_v32  ;;  %v14187_v54 = vor.u32 %v10954_v2, %v10284_v53  ;;  %v14195_v32 = vor.u32 %v10925_v59, %v10172_v24  ;;  %v10918_v53 = vld [vmem:[%s15728_s15 + $0x84] sm:$0xf]  ;;  %v10154_v2 = vld [vmem:[%s15728_s15 + $0x94] sm:$0xf0] }
 0x907   :  { %15794 = vst [vmem:[#allocation10_spill] sm:$0xff] %v14195_v32 }
 0x908   :  { %6803 = vmatpush.bf16.msrb.mxu0 %v6552_v62 }
 0x909   :  { %v6005_v63 = vpop.f32.mrf.mxu2 }
 0x90a   :  { %v6094_v48 = vpop.f32.mrf.mxu3 }
 0x90b   :  { %v14144_v5 = vpop.f32.mrf.mxu0  ;;  %v14146_v14 = vadd.f32 %v6094_v48, %v6005_v63  ;;  %v14189_v48 = vor.u32 %v10913_v43, %v10134_v42  ;;  %v10192_v43 = vld [vmem:[%s15728_s15 + $0xd0] sm:$0xf]  ;;  %v10930_v42 = vld [vmem:[%s15728_s15 + $0xe0] sm:$0xf0] }
 0x90c   :  { %6804 = vmatpush.bf16.msrb.mxu0 %v13960_v57 }
 0x90d   :  { %15792 = vst [vmem:[#allocation8_spill] sm:$0xff] %v14189_v48 }
 0x90e   :  { %6047 = vmatmul.bf16.gmra.mxu2 %v14140_v55  ;;  %6274 = vmatmul.bf16.gmra.mxu0 %v14142_v34 }
 0x90f   :  { %6136 = vmatmul.bf16.gmra.mxu3 %v14148_v11  ;;  %6195 = vmatmul.bf16.gmra.mxu1 %v14150_v36  ;;  %v5200_v11 = vpack.c.bf16 %v14144_v5, %v14144_v5  ;;  %v5190_v5 = vpack.c.bf16 %v14091_v6, %v14091_v6  ;;  %v10344_v6 = vld [vmem:[%s15728_s15 + $0x208] sm:$0xf] }
 0x910   :  { %6805 = vmatpush.bf16.msrb.mxu0 %v6538_v31  ;;  %v14193_v31 = vor.u32 %v10952_v0, %v10286_v30  ;;  %v10306_v0 = vld [vmem:[%s15728_s15 + $0x1cc] sm:$0xf0] }
 0x911   :  { %v6008_v13 = vpop.f32.mrf.mxu2 }
 0x912   :  { %v6097_v62 = vpop.f32.mrf.mxu3  ;;  %15793 = vst [vmem:[#allocation9_spill] sm:$0xff] %v14193_v31 }
 0x913   :  { %v14159_v1 = vpop.f32.mrf.mxu0  ;;  %v14161_v57 = vadd.f32 %v6097_v62, %v6008_v13 }
 0x914   :  { %6806 = vmatpush.bf16.msrb.mxu0 %v6537_v49 }
 0x918   :  { %6807 = vmatpush.bf16.msrb.mxu0 %v6536_v41  ;;  %v10957_v41 = vld [vmem:[%s15728_s15 + $0x1bc] sm:$0xf] }
 0x919   :  { %v6010_v58 = vpop.f32.mrf.mxu2 }
 0x91a   :  { %v6099_v63 = vpop.f32.mrf.mxu3 }
 0x91b   :  { %v5156_v52 = vpop.f32.mrf.mxu0  ;;  %v14191_v33 = vadd.f32 %v6099_v63, %v6010_v58  ;;  %v14230_v58 = vor.u32 %v10918_v53, %v10154_v2 }
 0x91c   :  { %6808 = vmatpush.bf16.msrb.mxu0 %v13962_v60  ;;  %v10959_v60 = vld [vmem:[%s15728_s15 + $0x1c8] sm:$0xf0] }
 0x91d   :  { %v14228_v59 = vor.u32 %v10959_v60, %v10304_v39  ;;  %15795 = vst [vmem:[#allocation11_spill] sm:$0xff] %v14230_v58 }
 0x91e   :  { %6052 = vmatmul.bf16.gmra.mxu2 %v14187_v54  ;;  %6279 = vmatmul.bf16.gmra.mxu0 %v14189_v48  ;;  %v14236_v48 = vor.u32 %v10930_v42, %v10192_v43  ;;  %v10324_v43 = vld [vmem:[%s15728_s15 + $0x1e0] sm:$0xf]  ;;  %v5210_v42 = vpack.c.bf16 %v5156_v52, %v5156_v52  ;;  %v10326_v52 = vld [vmem:[%s15728_s15 + $0x1f4] sm:$0xf0] }
 0x91f   :  { %6141 = vmatmul.bf16.gmra.mxu3 %v14193_v31  ;;  %6200 = vmatmul.bf16.gmra.mxu1 %v14195_v32 }
 0x920   :  { %15797 = vst [vmem:[#allocation13_spill] sm:$0xff] %v14236_v48 }
 0x921   :  { %v6013_v13 = vpop.f32.mrf.mxu2 }
 0x922   :  { %v6102_v50 = vpop.f32.mrf.mxu3 }
 0x923   :  { %v5158_v62 = vpop.f32.mrf.mxu0  ;;  %v14202_v49 = vadd.f32 %v6102_v50, %v6013_v13  ;;  %v14234_v50 = vor.u32 %v10957_v41, %v10306_v0 }
 0x925   :  { %15796 = vst [vmem:[#allocation12_spill] sm:$0xff] %v14234_v50 }
 0x929   :  { %v6015_v30 = vpop.f32.mrf.mxu2 }
 0x92a   :  { %v6104_v24 = vpop.f32.mrf.mxu3 }
 0x92b   :  { %v5161_v63 = vpop.f32.mrf.mxu0  ;;  %v14232_v13 = vadd.f32 %v6104_v24, %v6015_v30  ;;  %v5215_v24 = vpack.c.bf16 %v5158_v62, %v5158_v62 }
 0x92c   :  { %v5220_v39 = vpack.c.bf16 %v5161_v63, %v5161_v63  ;;  %v10923_v63 = vld [vmem:[%s15728_s15 + $0xac] sm:$0xf] }
 0x92e   :  { %6057 = vmatmul.bf16.gmra.mxu2 %v14228_v59  ;;  %6284 = vmatmul.bf16.gmra.mxu0 %v14230_v58  ;;  %v5536_v41 = vunpack.c.l.b16 %v5220_v39  ;;  %v10964_v58 = vld [vmem:[%s15728_s15 + $0x1f0] sm:$0xf0]  ;;  %v10962_v39 = vld [vmem:[%s15728_s15 + $0x1e4] sm:$0xf] }
 0x92f   :  { %6146 = vmatmul.bf16.gmra.mxu3 %v14234_v50  ;;  %6205 = vmatmul.bf16.gmra.mxu1 %v14236_v48  ;;  %v10212_v50 = vld [vmem:[%s15728_s15 + $0xf8] sm:$0xf]  ;;  %v14270_v31 = vor.u32 %v10964_v58, %v10324_v43  ;;  %v14280_v15 = vor.u32 %v10962_v39, %v10326_v52  ;;  %v5532_v43 = vunpack.c.l.b16 %v5200_v11  ;;  %v10969_v11 = vld [vmem:[%s15728_s15 + $0x218] sm:$0xf0] }
 0x931   :  { %v6018_v34 = vpop.f32.mrf.mxu2  ;;  %15799 = vst [vmem:[#allocation15_spill] sm:$0xff] %v14280_v15 }
 0x932   :  { %v6107_v60 = vpop.f32.mrf.mxu3 }
 0x933   :  { %v5163_v53 = vpop.f32.mrf.mxu0  ;;  %v14242_v2 = vadd.f32 %v6107_v60, %v6018_v34  ;;  %v10174_v34 = vld [vmem:[%s15728_s15 + $0xbc] sm:$0xf0]  ;;  %v5205_v60 = vpack.c.bf16 %v14159_v1, %v14159_v1  ;;  %v5534_v1 = vunpack.c.l.b16 %v5210_v42 }
 0x934   :  { %v5225_v30 = vpack.c.bf16 %v5163_v53, %v5163_v53  ;;  %v5535_v53 = vunpack.c.l.b16 %v5215_v24  ;;  %v14272_v26 = vor.u32 %v10923_v63, %v10174_v34 }
 0x935   :  { %v5533_v19 = vunpack.c.l.b16 %v5205_v60 }
 0x936   :  { %v5537_v0 = vunpack.c.l.b16 %v5225_v30  ;;  %15798 = vst [vmem:[#allocation14_spill] sm:$0xff] %v14272_v26  ;;  %v5540_v58 = vpack.c.b16 %v5535_v53, %v5534_v1  ;;  %v10194_v53 = vld [vmem:[%s15728_s15 + $0xe4] sm:$0xf0]  ;;  %v10232_v1 = vld [vmem:[%s15728_s15 + $0x120] sm:$0xf] }
 0x937   :  { %v5539_v63 = vpack.c.b16 %v5533_v19, %v5532_v43  ;;  %v10928_v19 = vld [vmem:[%s15728_s15 + $0xd4] sm:$0xf] }
 0x938   :  { %v5541_v62 = vpack.c.b16 %v5537_v0, %v5536_v41  ;;  %v10935_v41 = vld [vmem:[%s15728_s15 + $0x108] sm:$0xf0] }
 0x939   :  { %v6020_v30 = vpop.f32.mrf.mxu2  ;;  %v14282_v48 = vor.u32 %v10935_v41, %v10212_v50  ;;  %v10346_v41 = vld [vmem:[%s15728_s15 + $0x21c] sm:$0xf0] }
 0x93a   :  { %6354 = vmatpush.bf16.msra.mxu2 %v5541_v62  ;;  %v6109_v0 = vpop.f32.mrf.mxu3  ;;  %v5195_v62 = vpack.c.bf16 %v14112_v9, %v14112_v9  ;;  %v5530_v9 = vunpack.c.l.b16 %v5190_v5  ;;  %v14321_v5 = vor.u32 %v10969_v11, %v10344_v6  ;;  %v10974_v11 = vld [vmem:[%s15728_s15 + $0x240] sm:$0xf0] }
 0x93b   :  { %v14276_v24 = vpop.f32.mrf.mxu0  ;;  %v14278_v4 = vadd.f32 %v6109_v0, %v6020_v30  ;;  %15800 = vst [vmem:[#allocation16_spill] sm:$0xff] %v14282_v48  ;;  %v10967_v30 = vld [vmem:[%s15728_s15 + $0x20c] sm:$0xf] }
 0x93c   :  { %v5531_v50 = vunpack.c.l.b16 %v5195_v62  ;;  %v10940_v62 = vld [vmem:[%s15728_s15 + $0x130] sm:$0xf0]  ;;  %15801 = vst [vmem:[#allocation17_spill] sm:$0xff] %v14321_v5 }
 0x93e   :  { %6062 = vmatmul.bf16.gmra.mxu2 %v14270_v31  ;;  %6289 = vmatmul.bf16.gmra.mxu0 %v14272_v26  ;;  %v5538_v60 = vpack.c.b16 %v5531_v50, %v5530_v9 }
 0x93f   :  { %6355 = vmatpush.bf16.msra.mxu2 %v5540_v58  ;;  %6151 = vmatmul.bf16.gmra.mxu3 %v14280_v15 }
 0x940   :  { %6210 = vmatmul.bf16.gmra.mxu1 %v14282_v48 }
 0x941   :  { %v6023_v42 = vpop.f32.mrf.mxu2 }
 0x942   :  { %v6112_v34 = vpop.f32.mrf.mxu3 }
 0x943   :  { %6356 = vmatpush.bf16.msra.mxu2 %v5539_v63  ;;  %v14292_v39 = vpop.f32.mrf.mxu0  ;;  %v14294_v52 = vadd.f32 %v6112_v34, %v6023_v42  ;;  %v14329_v42 = vor.u32 %v10967_v30, %v10346_v41  ;;  %v14332_v63 = vor.u32 %v10940_v62, %v10232_v1  ;;  %v10252_v41 = vld [vmem:[%s15728_s15 + $0x148] sm:$0xf] }
 0x945   :  { %15803 = vst [vmem:[#allocation19_spill] sm:$0xff] %v14329_v42 }
 0x946   :  { %15804 = vst [vmem:[#allocation20_spill] sm:$0xff] %v14332_v63 }
 0x947   :  { %6357 = vmatpush.bf16.msra.mxu2 %v5538_v60 }
 0x949   :  { %v6025_v0 = vpop.f32.mrf.mxu2 }
 0x94a   :  { %v6114_v58 = vpop.f32.mrf.mxu3 }
 0x94b   :  { %6890 = vmatpush.bf16.msrb.mxu2 %v14104_v40  ;;  %v14323_v40 = vor.u32 %v10928_v19, %v10194_v53  ;;  %v14325_v43 = vpop.f32.mrf.mxu0  ;;  %v14327_v50 = vadd.f32 %v6114_v58, %v6025_v0  ;;  %v10214_v19 = vld [vmem:[%s15728_s15 + $0x10c] sm:$0xf0]  ;;  %v10366_v53 = vld [vmem:[%s15728_s15 + $0x244] sm:$0xf0]  ;;  %v10945_v0 = vld [vmem:[%s15728_s15 + $0x158] sm:$0xf0] }
 0x94c   :  { %v14380_v26 = vor.u32 %v10945_v0, %v10252_v41  ;;  %v10272_v41 = vld [vmem:[%s15728_s15 + $0x170] sm:$0xf]  ;;  %v10950_v0 = vld [vmem:[%s15728_s15 + $0x180] sm:$0xf0] }
 0x94d   :  { %15802 = vst [vmem:[#allocation18_spill] sm:$0xff] %v14323_v40 }
 0x94e   :  { %6067 = vmatmul.bf16.gmra.mxu2 %v14321_v5  ;;  %6294 = vmatmul.bf16.gmra.mxu0 %v14323_v40  ;;  %15808 = vst [vmem:[#allocation24_spill] sm:$0xff] %v14380_v26 }
 0x94f   :  { %6891 = vmatpush.bf16.msrb.mxu2 %v14052_v46  ;;  %6156 = vmatmul.bf16.gmra.mxu3 %v14329_v42  ;;  %v10364_v46 = vld [vmem:[%s15728_s15 + $0x230] sm:$0xf] }
 0x950   :  { %6215 = vmatmul.bf16.gmra.mxu1 %v14332_v63  ;;  %v14369_v62 = vor.u32 %v10974_v11, %v10364_v46 }
 0x951   :  { %v6028_v34 = vpop.f32.mrf.mxu2 }
 0x952   :  { %v6117_v9 = vpop.f32.mrf.mxu3  ;;  %15805 = vst [vmem:[#allocation21_spill] sm:$0xff] %v14369_v62 }
 0x953   :  { %6892 = vmatpush.bf16.msrb.mxu2 %v14016_v27  ;;  %v14339_v60 = vpop.f32.mrf.mxu0  ;;  %v14341_v6 = vadd.f32 %v6117_v9, %v6028_v34  ;;  %v10933_v27 = vld [vmem:[%s15728_s15 + $0xfc] sm:$0xf] }
 0x957   :  { %6893 = vmatpush.bf16.msrb.mxu2 %v13966_v44  ;;  %v10972_v44 = vld [vmem:[%s15728_s15 + $0x234] sm:$0xf] }
 0x958   :  { %v14377_v9 = vor.u32 %v10972_v44, %v10366_v53  ;;  %v10938_v44 = vld [vmem:[%s15728_s15 + $0x124] sm:$0xf]  ;;  %v10386_v53 = vld [vmem:[%s15728_s15 + $0x26c] sm:$0xf0] }
 0x959   :  { %v6030_v30 = vpop.f32.mrf.mxu2 }
 0x95a   :  { %v6119_v1 = vpop.f32.mrf.mxu3  ;;  %15807 = vst [vmem:[#allocation23_spill] sm:$0xff] %v14377_v9 }
 0x95b   :  { %6894 = vmatpush.bf16.msrb.mxu2 %v14107_v22  ;;  %v14371_v22 = vor.u32 %v10933_v27, %v10214_v19  ;;  %v14373_v58 = vpop.f32.mrf.mxu0  ;;  %v14375_v34 = vadd.f32 %v6119_v1, %v6030_v30 }
 0x95c   :  { %v6181_v40 = vpop.f32.mrf.mxu1 }
 0x95d   :  { %15806 = vst [vmem:[#allocation22_spill] sm:$0xff] %v14371_v22  ;;  %v14383_v42 = vadd.f32 %v6181_v40, %v14114_v45  ;;  %v10384_v40 = vld [vmem:[%s15728_s15 + $0x258] sm:$0xf] }
 0x95e   :  { %6072 = vmatmul.bf16.gmra.mxu2 %v14369_v62  ;;  %6299 = vmatmul.bf16.gmra.mxu0 %v14371_v22 }
 0x95f   :  { %6895 = vmatpush.bf16.msrb.mxu2 %v14054_v35  ;;  %6161 = vmatmul.bf16.gmra.mxu3 %v14377_v9 }
 0x960   :  { %6220 = vmatmul.bf16.gmra.mxu1 %v14380_v26  ;;  %v14428_v26 = vor.u32 %v10950_v0, %v10272_v41 }
 0x961   :  { %v6033_v46 = vpop.f32.mrf.mxu2 }
 0x962   :  { %v6122_v11 = vpop.f32.mrf.mxu3  ;;  %15812 = vst [vmem:[#allocation28_spill] sm:$0xff] %v14428_v26 }
 0x963   :  { %6896 = vmatpush.bf16.msrb.mxu2 %v14018_v12  ;;  %v5178_v27 = vpop.f32.mrf.mxu0  ;;  %v14390_v35 = vadd.f32 %v6122_v11, %v6033_v46  ;;  %v10979_v12 = vld [vmem:[%s15728_s15 + $0x268] sm:$0xf0] }
 0x964   :  { %v6183_v19 = vpop.f32.mrf.mxu1  ;;  %v14420_v46 = vor.u32 %v10979_v12, %v10384_v40 }
 0x965   :  { %v14394_v45 = vadd.f32 %v6183_v19, %v14146_v14  ;;  %v10977_v14 = vld [vmem:[%s15728_s15 + $0x25c] sm:$0xf] }
 0x966   :  { %15809 = vst [vmem:[#allocation25_spill] sm:$0xff] %v14420_v46  ;;  %v14426_v9 = vor.u32 %v10977_v14, %v10386_v53  ;;  %v5255_v53 = vpack.c.bf16 %v5178_v27, %v5178_v27  ;;  %v5245_v27 = vpack.c.bf16 %v14339_v60, %v14339_v60  ;;  %v5240_v60 = vpack.c.bf16 %v14325_v43, %v14325_v43 }
 0x967   :  { %6897 = vmatpush.bf16.msrb.mxu2 %v13968_v8  ;;  %v10234_v8 = vld [vmem:[%s15728_s15 + $0x134] sm:$0xf0] }
 0x968   :  { %v14422_v11 = vor.u32 %v10938_v44, %v10234_v8  ;;  %15811 = vst [vmem:[#allocation27_spill] sm:$0xff] %v14426_v9  ;;  %v6610_v48 = vunpack.c.l.b16 %v5245_v27 }
 0x969   :  { %v6035_v30 = vpop.f32.mrf.mxu2 }
 0x96a   :  { %v6124_v1 = vpop.f32.mrf.mxu3  ;;  %15810 = vst [vmem:[#allocation26_spill] sm:$0xff] %v14422_v11 }
 0x96b   :  { %v5181_v19 = vpop.f32.mrf.mxu0  ;;  %v14424_v22 = vadd.f32 %v6124_v1, %v6035_v30 }
 0x96c   :  { %v6186_v15 = vpop.f32.mrf.mxu1  ;;  %v5260_v12 = vpack.c.bf16 %v5181_v19, %v5181_v19  ;;  %v10906_v19 = vld [vmem:[%s15728_s15 + $0x20] sm:$0xf0] }
 0x96d   :  { %v14431_v63 = vadd.f32 %v6186_v15, %v14161_v57  ;;  %v5250_v57 = vpack.c.bf16 %v14373_v58, %v14373_v58  ;;  %v10254_v58 = vld [vmem:[%s15728_s15 + $0x15c] sm:$0xf0] }
 0x96e   :  { %6077 = vmatmul.bf16.gmra.mxu2 %v14420_v46  ;;  %6304 = vmatmul.bf16.gmra.mxu0 %v14422_v11  ;;  %v6613_v0 = vunpack.c.l.b16 %v5260_v12  ;;  %v10100_v11 = vld [vmem:[%s15728_s15 + $0x10] sm:$0xf] }
 0x96f   :  { %6166 = vmatmul.bf16.gmra.mxu3 %v14426_v9 }
 0x970   :  { %6225 = vmatmul.bf16.gmra.mxu1 %v14428_v26 }
 0x971   :  { %v6038_v40 = vpop.f32.mrf.mxu2 }
 0x972   :  { %v6127_v44 = vpop.f32.mrf.mxu3 }
 0x973   :  { %v5183_v8 = vpop.f32.mrf.mxu0  ;;  %v14437_v14 = vadd.f32 %v6127_v44, %v6038_v40  ;;  %v6612_v40 = vunpack.c.l.b16 %v5255_v53  ;;  %v6611_v53 = vunpack.c.l.b16 %v5250_v57 }
 0x974   :  { %v5265_v30 = vpack.c.bf16 %v5183_v8, %v5183_v8  ;;  %v6188_v41 = vpop.f32.mrf.mxu1  ;;  %v10292_v8 = vld [vmem:[%s15728_s15 + $0x198] sm:$0xf] }
 0x975   :  { %v14440_v15 = vadd.f32 %v6188_v41, %v14191_v33  ;;  %v10943_v33 = vld [vmem:[%s15728_s15 + $0x14c] sm:$0xf]  ;;  %v6617_v62 = vpack.c.b16 %v6612_v40, %v6611_v53 }
 0x976   :  { %v6614_v1 = vunpack.c.l.b16 %v5265_v30  ;;  %v10955_v30 = vld [vmem:[%s15728_s15 + $0x1a8] sm:$0xf0]  ;;  %v14472_v46 = vor.u32 %v10943_v33, %v10254_v58  ;;  %v10948_v58 = vld [vmem:[%s15728_s15 + $0x174] sm:$0xf] }
 0x977   :  { %v14477_v43 = vor.u32 %v10955_v30, %v10292_v8  ;;  %v10911_v33 = vld [vmem:[%s15728_s15 + $0x48] sm:$0xf0]  ;;  %v10960_v8 = vld [vmem:[%s15728_s15 + $0x1d0] sm:$0xf0] }
 0x978   :  { %v6618_v44 = vpack.c.b16 %v6614_v1, %v6613_v0  ;;  %v14466_v0 = vor.u32 %v10906_v19, %v10100_v11  ;;  %v5235_v1 = vpack.c.bf16 %v14292_v39, %v14292_v39  ;;  %15813 = vst [vmem:[#allocation29_spill] sm:$0xff] %v14472_v46  ;;  %v5230_v11 = vpack.c.bf16 %v14276_v24, %v14276_v24 }
 0x979   :  { %v6040_v12 = vpop.f32.mrf.mxu2  ;;  %v6609_v19 = vunpack.c.l.b16 %v5240_v60 }
 0x97a   :  { %6983 = vmatpush.bf16.msra.mxu3 %v6618_v44  ;;  %v6129_v41 = vpop.f32.mrf.mxu3  ;;  %v6608_v39 = vunpack.c.l.b16 %v5235_v1  ;;  %v6607_v27 = vunpack.c.l.b16 %v5230_v11 }
 0x97b   :  { %v14470_v9 = vadd.f32 %v6129_v41, %v6040_v12  ;;  %v6270_v26 = vpop.f32.mrf.mxu0 }
 0x97c   :  { %v14475_v5 = vadd.f32 %v6270_v26, %v14383_v42  ;;  %v6191_v32 = vpop.f32.mrf.mxu1  ;;  %v6616_v26 = vpack.c.b16 %v6610_v48, %v6609_v19  ;;  %v6615_v40 = vpack.c.b16 %v6608_v39, %v6607_v27  ;;  %v10120_v48 = vld [vmem:[%s15728_s15 + $0x38] sm:$0xf] }
 0x97d   :  { %v6192_v57 = vadd.f32 %v6191_v32, %v14202_v49  ;;  %v14511_v60 = vor.u32 %v10911_v33, %v10120_v48  ;;  %v10953_v48 = vld [vmem:[%s15728_s15 + $0x19c] sm:$0xf] }
 0x97e   :  { %10402 = vmatmul.msk.bf16.vlgmr.msra.gmra.mxu2 %vm360_vm0, %v14466_v0  ;;  %6984 = vmatpush.bf16.msra.mxu3 %v6617_v62 }
 0x97f   :  { %6631 = vmatmul.bf16.vlgmr.msrb.gmra.mxu3 %v13767_v28  ;;  %6309 = vmatmul.bf16.gmra.mxu0 %v14472_v46 }
 0x980   :  { %6230 = vmatmul.bf16.gmra.mxu1 %v14477_v43 }
 0x981   :  { %v6043_v42 = vpop.f32.mrf.mxu2 }
 0x982   :  { %6985 = vmatpush.bf16.msra.mxu3 %v6616_v26  ;;  %v6132_v32 = vpop.f32.mrf.mxu3 }
 0x983   :  { %v14487_v49 = vadd.f32 %v6132_v32, %v6043_v42  ;;  %v6272_v24 = vpop.f32.mrf.mxu0 }
 0x984   :  { %v14490_v44 = vadd.f32 %v6272_v24, %v14394_v45  ;;  %v6193_v62 = vpop.f32.mrf.mxu1  ;;  %v10274_v45 = vld [vmem:[%s15728_s15 + $0x184] sm:$0xf0] }
 0x985   :  { %v6194_v28 = vadd.f32 %v6193_v62, %v14232_v13  ;;  %v10312_v13 = vld [vmem:[%s15728_s15 + $0x1c0] sm:$0xf]  ;;  %v14515_v1 = vor.u32 %v10948_v58, %v10274_v45  ;;  %v10965_v58 = vld [vmem:[%s15728_s15 + $0x1f8] sm:$0xf0] }
 0x986   :  { %6986 = vmatpush.bf16.msra.mxu3 %v6615_v40  ;;  %v14520_v39 = vor.u32 %v10960_v8, %v10312_v13  ;;  %v10140_v62 = vld [vmem:[%s15728_s15 + $0x60] sm:$0xf] }
 0x987   :  { %15814 = vst [vmem:[#allocation30_spill] sm:$0xff] %v14515_v1 }
 0x988   :  { %15815 = vst [vmem:[#allocation31_spill] sm:$0xff] %v14520_v39 }
 0x989   :  { %v6045_v12 = vpop.f32.mrf.mxu2 }
 0x98a   :  { %v6134_v30 = vpop.f32.mrf.mxu3 }
 0x98b   :  { %v14513_v53 = vadd.f32 %v6134_v30, %v6045_v12  ;;  %v6275_v41 = vpop.f32.mrf.mxu0 }
 0x98c   :  { %v14518_v11 = vadd.f32 %v6275_v41, %v14431_v63  ;;  %v6196_v19 = vpop.f32.mrf.mxu1 }
 0x98d   :  { %v6197_v26 = vadd.f32 %v6196_v19, %v14242_v2 }
 0x98e   :  { %10403 = vmatmul.msk.bf16.gmra.mxu2 %vm360_vm0, %v14511_v60 }
 0x98f   :  { %6636 = vmatmul.bf16.gmra.mxu3 %v13802_v3  ;;  %6314 = vmatmul.bf16.gmra.mxu0 %v14515_v1  ;;  %v10916_v3 = vld [vmem:[%s15728_s15 + $0x70] sm:$0xf0] }
 0x990   :  { %6235 = vmatmul.bf16.gmra.mxu1 %v14520_v39  ;;  %v14552_v12 = vor.u32 %v10916_v3, %v10140_v62 }
 0x991   :  { %v6048_v42 = vpop.f32.mrf.mxu2 }
 0x992   :  { %v6137_v27 = vpop.f32.mrf.mxu3 }
 0x993   :  { %v14528_v32 = vadd.f32 %v6137_v27, %v6048_v42  ;;  %v6277_v63 = vpop.f32.mrf.mxu0 }
 0x994   :  { %v14531_v24 = vadd.f32 %v6277_v63, %v14440_v15  ;;  %v6198_v40 = vpop.f32.mrf.mxu1  ;;  %v10294_v15 = vld [vmem:[%s15728_s15 + $0x1ac] sm:$0xf0] }
 0x995   :  { %v6199_v2 = vadd.f32 %v6198_v40, %v14278_v4  ;;  %v10332_v4 = vld [vmem:[%s15728_s15 + $0x1e8] sm:$0xf]  ;;  %v14556_v30 = vor.u32 %v10953_v48, %v10294_v15 }
 0x996   :  { %v14560_v42 = vor.u32 %v10965_v58, %v10332_v4  ;;  %v10970_v58 = vld [vmem:[%s15728_s15 + $0x220] sm:$0xf0] }
 0x997   :  { %15816 = vst [vmem:[#allocation32_spill] sm:$0xff] %v14556_v30 }
 0x998   :  { %15817 = vst [vmem:[#allocation33_spill] sm:$0xff] %v14560_v42 }
 0x999   :  { %v6050_v33 = vpop.f32.mrf.mxu2 }
 0x99a   :  { %v6139_v45 = vpop.f32.mrf.mxu3 }
 0x99b   :  { %v14554_v13 = vadd.f32 %v6139_v45, %v6050_v33  ;;  %v6280_v8 = vpop.f32.mrf.mxu0  ;;  %v10958_v33 = vld [vmem:[%s15728_s15 + $0x1c4] sm:$0xf] }
 0x99c   :  { %v14558_v41 = vadd.f32 %v6280_v8, %v6192_v57  ;;  %v6201_v19 = vpop.f32.mrf.mxu1 }
 0x99d   :  { %v6202_v27 = vadd.f32 %v6201_v19, %v14294_v52  ;;  %v10160_v52 = vld [vmem:[%s15728_s15 + $0x88] sm:$0xf] }
 0x99e   :  { %10404 = vmatmul.msk.bf16.gmra.mxu2 %vm360_vm0, %v14552_v12 }
 0x99f   :  { %6641 = vmatmul.bf16.gmra.mxu3 %v13840_v61  ;;  %6319 = vmatmul.bf16.gmra.mxu0 %v14556_v30  ;;  %v10921_v61 = vld [vmem:[%s15728_s15 + $0x98] sm:$0xf0] }
 0x9a0   :  { %6240 = vmatmul.bf16.gmra.mxu1 %v14560_v42  ;;  %v14591_v8 = vor.u32 %v10921_v61, %v10160_v52 }
 0x9a1   :  { %v6053_v63 = vpop.f32.mrf.mxu2 }
 0x9a2   :  { %v6142_v40 = vpop.f32.mrf.mxu3  ;;  %15818 = vst [vmem:[#allocation34_spill] sm:$0xff] %v14591_v8 }
 0x9a3   :  { %v14568_v62 = vadd.f32 %v6142_v40, %v6053_v63  ;;  %v6282_v57 = vpop.f32.mrf.mxu0 }
 0x9a4   :  { %v14570_v3 = vadd.f32 %v6282_v57, %v6194_v28  ;;  %v6203_v48 = vpop.f32.mrf.mxu1  ;;  %v10314_v28 = vld [vmem:[%s15728_s15 + $0x1d4] sm:$0xf0] }
 0x9a5   :  { %v6204_v15 = vadd.f32 %v6203_v48, %v14327_v50  ;;  %v10352_v50 = vld [vmem:[%s15728_s15 + $0x210] sm:$0xf]  ;;  %v14595_v40 = vor.u32 %v10958_v33, %v10314_v28 }
 0x9a6   :  { %v14599_v30 = vor.u32 %v10970_v58, %v10352_v50  ;;  %v10963_v58 = vld [vmem:[%s15728_s15 + $0x1ec] sm:$0xf] }
 0x9a7   :  { %15819 = vst [vmem:[#allocation35_spill] sm:$0xff] %v14595_v40 }
 0x9a8   :  { %15820 = vst [vmem:[#allocation36_spill] sm:$0xff] %v14599_v30 }
 0x9a9   :  { %v6055_v4 = vpop.f32.mrf.mxu2 }
 0x9aa   :  { %v6144_v45 = vpop.f32.mrf.mxu3 }
 0x9ab   :  { %v14593_v19 = vadd.f32 %v6144_v45, %v6055_v4  ;;  %v6285_v63 = vpop.f32.mrf.mxu0 }
 0x9ac   :  { %v14597_v57 = vadd.f32 %v6285_v63, %v6197_v26  ;;  %v6206_v48 = vpop.f32.mrf.mxu1  ;;  %v10975_v63 = vld [vmem:[%s15728_s15 + $0x248] sm:$0xf0] }
 0x9ad   :  { %v6207_v1 = vadd.f32 %v6206_v48, %v14341_v6  ;;  %v10180_v6 = vld [vmem:[%s15728_s15 + $0xb0] sm:$0xf] }
 0x9ae   :  { %10405 = vmatmul.msk.bf16.gmra.mxu2 %vm360_vm0, %v14591_v8 }
 0x9af   :  { %6646 = vmatmul.bf16.gmra.mxu3 %v13860_v10  ;;  %6324 = vmatmul.bf16.gmra.mxu0 %v14595_v40  ;;  %v10926_v10 = vld [vmem:[%s15728_s15 + $0xc0] sm:$0xf0] }
 0x9b0   :  { %6245 = vmatmul.bf16.gmra.mxu1 %v14599_v30 }
 0x9b1   :  { %v6058_v52 = vpop.f32.mrf.mxu2 }
 0x9b2   :  { %v6147_v61 = vpop.f32.mrf.mxu3 }
 0x9b3   :  { %v14607_v33 = vadd.f32 %v6147_v61, %v6058_v52  ;;  %v6287_v26 = vpop.f32.mrf.mxu0  ;;  %v14630_v52 = vor.u32 %v10926_v10, %v10180_v6 }
 0x9b4   :  { %v14609_v28 = vadd.f32 %v6287_v26, %v6199_v2  ;;  %v6208_v4 = vpop.f32.mrf.mxu1  ;;  %v10334_v2 = vld [vmem:[%s15728_s15 + $0x1fc] sm:$0xf0] }
 0x9b5   :  { %v6209_v50 = vadd.f32 %v6208_v4, %v14375_v34  ;;  %v10372_v34 = vld [vmem:[%s15728_s15 + $0x238] sm:$0xf]  ;;  %15821 = vst [vmem:[#allocation37_spill] sm:$0xff] %v14630_v52  ;;  %v14634_v4 = vor.u32 %v10963_v58, %v10334_v2 }
 0x9b6   :  { %v14638_v46 = vor.u32 %v10975_v63, %v10372_v34 }
 0x9b7   :  { %15822 = vst [vmem:[#allocation38_spill] sm:$0xff] %v14634_v4 }
 0x9b8   :  { %15823 = vst [vmem:[#allocation39_spill] sm:$0xff] %v14638_v46 }
 0x9b9   :  { %v6060_v45 = vpop.f32.mrf.mxu2 }
 0x9ba   :  { %v6149_v48 = vpop.f32.mrf.mxu3 }
 0x9bb   :  { %v14632_v61 = vadd.f32 %v6149_v48, %v6060_v45  ;;  %v6290_v26 = vpop.f32.mrf.mxu0  ;;  %v10980_v48 = vld [vmem:[%s15728_s15 + $0x270] sm:$0xf0] }
 0x9bc   :  { %v14636_v40 = vadd.f32 %v6290_v26, %v6202_v27 }
 0x9bd   :  { %v6211_v30 = vpop.f32.mrf.mxu1 }
 0x9be   :  { %10406 = vmatmul.msk.bf16.gmra.mxu2 %vm360_vm0, %v14630_v52  ;;  %v6212_v42 = vadd.f32 %v6211_v30, %v14390_v35  ;;  %v10200_v35 = vld [vmem:[%s15728_s15 + $0xd8] sm:$0xf]  ;;  %v10968_v30 = vld [vmem:[%s15728_s15 + $0x214] sm:$0xf] }
 0x9bf   :  { %6651 = vmatmul.bf16.gmra.mxu3 %v13887_v20  ;;  %6329 = vmatmul.bf16.gmra.mxu0 %v14634_v4  ;;  %v10931_v20 = vld [vmem:[%s15728_s15 + $0xe8] sm:$0xf0] }
 0x9c0   :  { %6250 = vmatmul.bf16.gmra.mxu1 %v14638_v46 }
 0x9c1   :  { %v6063_v6 = vpop.f32.mrf.mxu2 }
 0x9c2   :  { %v6152_v10 = vpop.f32.mrf.mxu3 }
 0x9c3   :  { %v14646_v58 = vadd.f32 %v6152_v10, %v6063_v6  ;;  %v6292_v27 = vpop.f32.mrf.mxu0  ;;  %v14669_v6 = vor.u32 %v10931_v20, %v10200_v35 }
 0x9c4   :  { %v14648_v2 = vadd.f32 %v6292_v27, %v6204_v15  ;;  %v10354_v15 = vld [vmem:[%s15728_s15 + $0x224] sm:$0xf0] }
 0x9c5   :  { %v6213_v45 = vpop.f32.mrf.mxu1  ;;  %15824 = vst [vmem:[#allocation40_spill] sm:$0xff] %v14669_v6 }
 0x9c6   :  { %v6214_v34 = vadd.f32 %v6213_v45, %v14424_v22  ;;  %v10392_v22 = vld [vmem:[%s15728_s15 + $0x260] sm:$0xf]  ;;  %v14673_v45 = vor.u32 %v10968_v30, %v10354_v15 }
 0x9c7   :  { %v14677_v46 = vor.u32 %v10980_v48, %v10392_v22 }
 0x9c8   :  { %15825 = vst [vmem:[#allocation41_spill] sm:$0xff] %v14673_v45 }
 0x9c9   :  { %v6065_v63 = vpop.f32.mrf.mxu2  ;;  %15826 = vst [vmem:[#allocation42_spill] sm:$0xff] %v14677_v46 }
 0x9ca   :  { %v6154_v26 = vpop.f32.mrf.mxu3 }
 0x9cb   :  { %v14671_v10 = vadd.f32 %v6154_v26, %v6065_v63  ;;  %v6295_v27 = vpop.f32.mrf.mxu0 }
 0x9cc   :  { %v14675_v4 = vadd.f32 %v6295_v27, %v6207_v1 }
 0x9cd   :  { %v6216_v52 = vpop.f32.mrf.mxu1 }
 0x9ce   :  { %10407 = vmatmul.msk.bf16.gmra.mxu2 %vm360_vm0, %v14669_v6  ;;  %v6217_v39 = vadd.f32 %v6216_v52, %v14437_v14  ;;  %v10220_v14 = vld [vmem:[%s15728_s15 + $0x100] sm:$0xf]  ;;  %v10973_v52 = vld [vmem:[%s15728_s15 + $0x23c] sm:$0xf] }
 0x9cf   :  { %6656 = vmatmul.bf16.gmra.mxu3 %v13947_v38  ;;  %6334 = vmatmul.bf16.gmra.mxu0 %v14673_v45  ;;  %v10936_v38 = vld [vmem:[%s15728_s15 + $0x110] sm:$0xf0] }
 0x9d0   :  { %6255 = vmatmul.bf16.gmra.mxu1 %v14677_v46  ;;  %v14702_v27 = vor.u32 %v10936_v38, %v10220_v14 }
 0x9d1   :  { %v6068_v35 = vpop.f32.mrf.mxu2 }
 0x9d2   :  { %v6157_v20 = vpop.f32.mrf.mxu3  ;;  %15827 = vst [vmem:[#allocation43_spill] sm:$0xff] %v14702_v27 }
 0x9d3   :  { %v14685_v30 = vadd.f32 %v6157_v20, %v6068_v35  ;;  %v6297_v1 = vpop.f32.mrf.mxu0 }
 0x9d4   :  { %v14687_v15 = vadd.f32 %v6297_v1, %v6209_v50  ;;  %v10374_v50 = vld [vmem:[%s15728_s15 + $0x24c] sm:$0xf0] }
 0x9d5   :  { %v6218_v63 = vpop.f32.mrf.mxu1  ;;  %v14706_v20 = vor.u32 %v10973_v52, %v10374_v50 }
 0x9d6   :  { %v6219_v22 = vadd.f32 %v6218_v63, %v14470_v9 }
 0x9d7   :  { %15828 = vst [vmem:[#allocation44_spill] sm:$0xff] %v14706_v20 }
 0x9d9   :  { %v6070_v48 = vpop.f32.mrf.mxu2 }
 0x9da   :  { %v6159_v26 = vpop.f32.mrf.mxu3 }
 0x9db   :  { %v14704_v9 = vadd.f32 %v6159_v26, %v6070_v48  ;;  %v6300_v35 = vpop.f32.mrf.mxu0 }
 0x9dc   :  { %v14708_v1 = vadd.f32 %v6300_v35, %v6212_v42 }
 0x9dd   :  { %v6221_v63 = vpop.f32.mrf.mxu1 }
 0x9de   :  { %10408 = vmatmul.msk.bf16.gmra.mxu2 %vm360_vm0, %v14702_v27  ;;  %v6222_v45 = vadd.f32 %v6221_v63, %v14487_v49  ;;  %v10240_v49 = vld [vmem:[%s15728_s15 + $0x128] sm:$0xf] }
 0x9df   :  { %6661 = vmatmul.bf16.gmra.mxu3 %v14002_v56  ;;  %6339 = vmatmul.bf16.gmra.mxu0 %v14706_v20  ;;  %v10941_v56 = vld [vmem:[%s15728_s15 + $0x138] sm:$0xf0] }
 0x9e0   :  { %6720 = vmatmul.bf16.vlgmr.msrb.gmra.mxu1 %v13769_v17  ;;  %v10978_v17 = vld [vmem:[%s15728_s15 + $0x264] sm:$0xf] }
 0x9e1   :  { %v6073_v14 = vpop.f32.mrf.mxu2 }
 0x9e2   :  { %v6162_v38 = vpop.f32.mrf.mxu3 }
 0x9e3   :  { %v14716_v48 = vadd.f32 %v6162_v38, %v6073_v14  ;;  %v6302_v52 = vpop.f32.mrf.mxu0  ;;  %v14733_v14 = vor.u32 %v10941_v56, %v10240_v49 }
 0x9e4   :  { %v14718_v50 = vadd.f32 %v6302_v52, %v6214_v34  ;;  %v10394_v34 = vld [vmem:[%s15728_s15 + $0x274] sm:$0xf0] }
 0x9e5   :  { %v6223_v42 = vpop.f32.mrf.mxu1  ;;  %15829 = vst [vmem:[#allocation45_spill] sm:$0xff] %v14733_v14  ;;  %v14737_v52 = vor.u32 %v10978_v17, %v10394_v34 }
 0x9e6   :  { %v6224_v26 = vadd.f32 %v6223_v42, %v14513_v53 }
 0x9e7   :  { %15830 = vst [vmem:[#allocation46_spill] sm:$0xff] %v14737_v52 }
 0x9e9   :  { %v6075_v35 = vpop.f32.mrf.mxu2 }
 0x9ea   :  { %v6164_v63 = vpop.f32.mrf.mxu3 }
 0x9eb   :  { %v14735_v53 = vadd.f32 %v6164_v63, %v6075_v35  ;;  %v6305_v38 = vpop.f32.mrf.mxu0 }
 0x9ec   :  { %v14739_v42 = vadd.f32 %v6305_v38, %v6217_v39 }
 0x9ed   :  { %v6226_v20 = vpop.f32.mrf.mxu1 }
 0x9ee   :  { %10409 = vmatmul.msk.bf16.gmra.mxu2 %vm360_vm0, %v14733_v14  ;;  %v6227_v46 = vadd.f32 %v6226_v20, %v14528_v32  ;;  %v10260_v32 = vld [vmem:[%s15728_s15 + $0x150] sm:$0xf] }
 0x9ef   :  { %6666 = vmatmul.bf16.gmra.mxu3 %v14041_v51  ;;  %6344 = vmatmul.bf16.gmra.mxu0 %v14737_v52  ;;  %v10946_v51 = vld [vmem:[%s15728_s15 + $0x160] sm:$0xf0] }
 0x9f0   :  { %6725 = vmatmul.bf16.gmra.mxu1 %v13807_v18  ;;  %v14758_v38 = vor.u32 %v10946_v51, %v10260_v32 }
 0x9f1   :  { %v6078_v49 = vpop.f32.mrf.mxu2 }
 0x9f2   :  { %v6167_v56 = vpop.f32.mrf.mxu3  ;;  %15831 = vst [vmem:[#allocation47_spill] sm:$0xff] %v14758_v38 }
 0x9f3   :  { %v14747_v35 = vadd.f32 %v6167_v56, %v6078_v49  ;;  %v6307_v17 = vpop.f32.mrf.mxu0 }
 0x9f4   :  { %v14749_v34 = vadd.f32 %v6307_v17, %v6219_v22 }
 0x9f5   :  { %v6228_v39 = vpop.f32.mrf.mxu1 }
 0x9f6   :  { %v6229_v63 = vadd.f32 %v6228_v39, %v14554_v13  ;;  %v14774_v39 = vld [vmem:[%s15729_s17] ss:$0 sm:$0xff] }
 0x9f9   :  { %v6080_v20 = vpop.f32.mrf.mxu2 }
 0x9fa   :  { %v6169_v18 = vpop.f32.mrf.mxu3 }
 0x9fb   :  { %v14760_v49 = vadd.f32 %v6169_v18, %v6080_v20 }
 0x9fc   :  { %v6310_v56 = vpop.f32.mrf.mxu0 }
 0x9fd   :  { %v14762_v22 = vadd.f32 %v6310_v56, %v6222_v45  ;;  %v6231_v17 = vpop.f32.mrf.mxu1 }
 0x9fe   :  { %10410 = vmatmul.msk.bf16.gmra.mxu2 %vm360_vm0, %v14758_v38  ;;  %v14767_v13 = vadd.f32 %v6231_v17, %v14568_v62  ;;  %v10280_v17 = vld [vmem:[%s15728_s15 + $0x178] sm:$0xf] }
 0x9ff   :  { %6671 = vmatmul.bf16.gmra.mxu3 %v14087_v37  ;;  %6809 = vmatmul.bf16.vlgmr.msrb.gmra.mxu0 %v14008_v29 }
 0xa00   :  { %6730 = vmatmul.bf16.gmra.mxu1 %v13842_v23  ;;  %v10951_v23 = vld [vmem:[%s15728_s15 + $0x188] sm:$0xf0] }
 0xa01   :  { %v6359_v45 = vpop.f32.mrf.mxu2 }
 0xa02   :  { %v6360_v32 = vadd.f32 %v6359_v45, %v14475_v5  ;;  %v14778_v51 = vpop.f32.mrf.mxu3 }
 0xa04   :  { %v7072_v20 = vadd.f32 %v14774_v39, %v6360_v32  ;;  %v6312_v62 = vpop.f32.mrf.mxu0 }
 0xa05   :  { %v14781_v18 = vadd.f32 %v6312_v62, %v6224_v26  ;;  %v6233_v37 = vpop.f32.mrf.mxu1  ;;  %v14795_v26 = vor.u32 %v10951_v23, %v10280_v17 }
 0xa06   :  { %v10434_v56 = vmul.f32 -1.442695, %v7072_v20  ;;  %v14784_v29 = vadd.f32 %v6233_v37, %v14593_v19 }
 0xa07   :  { %15832 = vst [vmem:[#allocation48_spill] sm:$0xff] %v14795_v26 }
 0xa08   :  { %10992 = vpow2.f32 %v10434_v56 }
 0xa09   :  { %v6361_v5 = vpop.f32.mrf.mxu2 }
 0xa0a   :  { %v6362_v45 = vadd.f32 %v6361_v5, %v14490_v44  ;;  %v14793_v32 = vpop.f32.mrf.mxu3 }
 0xa0c   :  { %v7073_v20 = vadd.f32 %v14774_v39, %v6362_v45  ;;  %v6315_v19 = vpop.f32.mrf.mxu0 }
 0xa0d   :  { %v14798_v62 = vadd.f32 %v6315_v19, %v6227_v46  ;;  %v6236_v37 = vpop.f32.mrf.mxu1 }
 0xa0e   :  { %v10993_v52 = vpop.eup %10992  ;;  %v10435_v38 = vmul.f32 -1.442695, %v7073_v20  ;;  %10411 = vmatmul.msk.bf16.gmra.mxu2 %vm360_vm0, %v14795_v26  ;;  %v14803_v56 = vadd.f32 %v6236_v37, %v14607_v33 }
 0xa0f   :  { %v7328_v14 = vadd.f32 1.0, %v10993_v52  ;;  %6676 = vmatmul.bf16.gmra.mxu3 %v14140_v55  ;;  %6814 = vmatmul.bf16.gmra.mxu0 %v14045_v16 }
 0xa10   :  { %10994 = vpow2.f32 %v10435_v38  ;;  %6735 = vmatmul.bf16.gmra.mxu1 %v13862_v25  ;;  %v10300_v25 = vld [vmem:[%s15728_s15 + $0x1a0] sm:$0xf] }
 0xa11   :  { %10996 = vrcp.f32 %v7328_v14  ;;  %v6364_v46 = vpop.f32.mrf.mxu2  ;;  %vm7397_vm3 = vweird.f32 %v7328_v14 }
 0xa12   :  { %v6365_v44 = vadd.f32 %v6364_v46, %v14518_v11  ;;  %v14809_v17 = vpop.f32.mrf.mxu3  ;;  %v10956_v11 = vld [vmem:[%s15728_s15 + $0x1b0] sm:$0xf0] }
 0xa14   :  { %v7074_v23 = vadd.f32 %v14774_v39, %v6365_v44  ;;  %v6317_v5 = vpop.f32.mrf.mxu0  ;;  %v14829_v44 = vor.u32 %v10956_v11, %v10300_v25 }
 0xa15   :  { %v14812_v45 = vadd.f32 %v6317_v5, %v6229_v63  ;;  %v6238_v33 = vpop.f32.mrf.mxu1 }
 0xa16   :  { %v10995_v52 = vpop.eup %10994  ;;  %v10436_v20 = vmul.f32 -1.442695, %v7074_v23  ;;  %v14815_v55 = vadd.f32 %v6238_v33, %v14632_v61  ;;  %v7403_v23 = vand.u32 2147483648, %v7328_v14  ;;  %v7401_v33 = vand.u32 2147483647, %v7328_v14 }
 0xa17   :  { %v10997_v16 = vpop.eup %10996  ;;  %v14817_v38 = vadd.f32 1.0, %v10995_v52 }
 0xa18   :  { %v7393_v19 = vmul.f32 %v10997_v16, %v7328_v14  ;;  %10998 = vpow2.f32 %v10436_v20  ;;  %vm7398_vm2 = vweird.f32 %v10997_v16  ;;  %v7404_v11 = vor.u32 1.1754944e-38, %v7403_v23 }
 0xa19   :  { %11000 = vrcp.f32 %v14817_v38  ;;  %v6366_v63 = vpop.f32.mrf.mxu2  ;;  %vm7399_vm4 = vmor %vm7397_vm3, %vm7398_vm2  ;;  %vm7402_vm5 = vcmp.eq.f32.partialorder %v7401_v33, 8.507059e+37  ;;  %vm7412_vm7 = vweird.f32 %v14817_v38 }
 0xa1a   :  { %v7394_v37 = vsub.f32 1.0, %v7393_v19  ;;  %v6367_v61 = vadd.f32 %v6366_v63, %v14531_v24  ;;  %v14827_v46 = vpop.f32.mrf.mxu3 }
 0xa1c   :  { %v7395_v5 = vmul.f32 %v10997_v16, %v7394_v37  ;;  %v7075_v52 = vadd.f32 %v14774_v39, %v6367_v61  ;;  %v6320_v26 = vpop.f32.mrf.mxu0 }
 0xa1d   :  { %v14833_v27 = vadd.f32 %v6320_v26, %v14767_v13  ;;  %v6241_v20 = vpop.f32.mrf.mxu1 }
 0xa1e   :  { %v10999_v6 = vpop.eup %10998  ;;  %v7396_v8 = vadd.f32 %v10997_v16, %v7395_v5  ;;  %v10437_v19 = vmul.f32 -1.442695, %v7075_v52  ;;  %10412 = vmatmul.msk.bf16.gmra.mxu2 %vm360_vm0, %v14829_v44  ;;  %v14838_v24 = vadd.f32 %v6241_v20, %v14646_v58 }
 0xa1f   :  { %v11001_v25 = vpop.eup %11000  ;;  %v14840_v63 = vadd.f32 1.0, %v10999_v6  ;;  %6681 = vmatmul.bf16.gmra.mxu3 %v14187_v54  ;;  %6819 = vmatmul.bf16.gmra.mxu0 %v14095_v47  ;;  %v7418_v47 = vand.u32 2147483648, %v14817_v38 }
 0xa20   :  { %v7400_v13 = vsel %vm7399_vm4, %v10997_v16, %v7396_v8  ;;  %v7408_v14 = vmul.f32 %v11001_v25, %v14817_v38  ;;  %11002 = vpow2.f32 %v10437_v19  ;;  %6740 = vmatmul.bf16.gmra.mxu1 %v13893_v21  ;;  %vm7413_vm6 = vweird.f32 %v11001_v25 }
 0xa21   :  { %v7405_v26 = vsel %vm7402_vm5, %v7404_v11, %v7400_v13  ;;  %11004 = vrcp.f32 %v14840_v63  ;;  %v6369_v58 = vpop.f32.mrf.mxu2  ;;  %v7416_v16 = vand.u32 2147483647, %v14817_v38  ;;  %vm7414_vm8 = vmor %vm7412_vm7, %vm7413_vm6  ;;  %v7419_v11 = vor.u32 1.1754944e-38, %v7418_v47 }
 0xa22   :  { %8352 = vst [vmem:[%s15730_s18] sm:$0xff] %v7405_v26  ;;  %v7409_v6 = vsub.f32 1.0, %v7408_v14  ;;  %v6370_v54 = vadd.f32 %v6369_v58, %v14558_v41  ;;  %v14851_v37 = vpop.f32.mrf.mxu3  ;;  %v10320_v14 = vld [vmem:[%s15728_s15 + $0x1c8] sm:$0xf]  ;;  %vm7427_vm11 = vweird.f32 %v14840_v63 }
 0xa23   :  { %vm7417_vm9 = vcmp.eq.f32.partialorder %v7416_v16, 8.507059e+37 }
 0xa24   :  { %v7410_v8 = vmul.f32 %v11001_v25, %v7409_v6  ;;  %v7076_v21 = vadd.f32 %v14774_v39, %v6370_v54  ;;  %v6322_v61 = vpop.f32.mrf.mxu0 }
 0xa25   :  { %v14857_v23 = vadd.f32 %v6322_v61, %v14784_v29  ;;  %v6243_v5 = vpop.f32.mrf.mxu1  ;;  %v10961_v29 = vld [vmem:[%s15728_s15 + $0x1d8] sm:$0xf0] }
 0xa26   :  { %v11003_v33 = vpop.eup %11002  ;;  %v7411_v52 = vadd.f32 %v11001_v25, %v7410_v8  ;;  %v10438_v41 = vmul.f32 -1.442695, %v7076_v21  ;;  %v14861_v20 = vadd.f32 %v6243_v5, %v14671_v10  ;;  %v14879_v8 = vor.u32 %v10961_v29, %v10320_v14 }
 0xa27   :  { %v11005_v19 = vpop.eup %11004  ;;  %v14863_v13 = vadd.f32 1.0, %v11003_v33  ;;  %v7431_v21 = vand.u32 2147483647, %v14840_v63 }
 0xa28   :  { %v7415_v26 = vsel %vm7414_vm8, %v11001_v25, %v7411_v52  ;;  %v7423_v38 = vmul.f32 %v11005_v19, %v14840_v63  ;;  %11006 = vpow2.f32 %v10438_v41  ;;  %v7433_v25 = vand.u32 2147483648, %v14840_v63 }
 0xa29   :  { %v7420_v10 = vsel %vm7417_vm9, %v7419_v11, %v7415_v26  ;;  %11008 = vrcp.f32 %v14863_v13  ;;  %v6371_v58 = vpop.f32.mrf.mxu2  ;;  %vm7428_vm10 = vweird.f32 %v11005_v19  ;;  %vm7432_vm13 = vcmp.eq.f32.partialorder %v7431_v21, 8.507059e+37 }
 0xa2a   :  { %8353 = vst [vmem:[%s15730_s18 + $0x8] sm:$0xff] %v7420_v10  ;;  %v7424_v6 = vsub.f32 1.0, %v7423_v38  ;;  %v6372_v54 = vadd.f32 %v6371_v58, %v14570_v3  ;;  %v14877_v47 = vpop.f32.mrf.mxu3  ;;  %vm7429_vm12 = vmor %vm7427_vm11, %vm7428_vm10  ;;  %v7434_v26 = vor.u32 1.1754944e-38, %v7433_v25  ;;  %vm7442_vm15 = vweird.f32 %v14863_v13 }
 0xa2c   :  { %v7425_v16 = vmul.f32 %v11005_v19, %v7424_v6  ;;  %v7077_v61 = vadd.f32 %v14774_v39, %v6372_v54  ;;  %v6325_v5 = vpop.f32.mrf.mxu0  ;;  %v7446_v54 = vand.u32 2147483647, %v14863_v13 }
 0xa2d   :  { %v14885_v33 = vadd.f32 %v6325_v5, %v14803_v56  ;;  %v6246_v52 = vpop.f32.mrf.mxu1 }
 0xa2e   :  { %v11007_v41 = vpop.eup %11006  ;;  %v7426_v11 = vadd.f32 %v11005_v19, %v7425_v16  ;;  %v10439_v3 = vmul.f32 -1.442695, %v7077_v61  ;;  %10413 = vmatmul.msk.bf16.gmra.mxu2 %vm360_vm0, %v14879_v8  ;;  %v14891_v14 = vadd.f32 %v6246_v52, %v14685_v30  ;;  %vm7447_vm2 = vcmp.eq.f32.partialorder %v7446_v54, 8.507059e+37 }
 0xa2f   :  { %v11009_v29 = vpop.eup %11008  ;;  %v14893_v38 = vadd.f32 1.0, %v11007_v41  ;;  %6686 = vmatmul.bf16.gmra.mxu3 %v14228_v59  ;;  %6824 = vmatmul.bf16.gmra.mxu0 %v14150_v36  ;;  %v7448_v36 = vand.u32 2147483648, %v14863_v13 }
 0xa30   :  { %v7430_v56 = vsel %vm7429_vm12, %v11005_v19, %v7426_v11  ;;  %v7438_v63 = vmul.f32 %v11009_v29, %v14863_v13  ;;  %11010 = vpow2.f32 %v10439_v3  ;;  %6745 = vmatmul.bf16.gmra.mxu1 %v13949_v7  ;;  %vm7443_vm14 = vweird.f32 %v11009_v29 }
 0xa31   :  { %v7435_v10 = vsel %vm7432_vm13, %v7434_v26, %v7430_v56  ;;  %11012 = vrcp.f32 %v14893_v38  ;;  %v6374_v30 = vpop.f32.mrf.mxu2  ;;  %vm7444_vm1 = vmor %vm7442_vm15, %vm7443_vm14  ;;  %v7449_v11 = vor.u32 1.1754944e-38, %v7448_v36  ;;  %v10340_v26 = vld [vmem:[%s15728_s15 + $0x1f0] sm:$0xf]  ;;  %vm7457_vm4 = vweird.f32 %v14893_v38 }
 0xa32   :  { %8354 = vst [vmem:[%s15730_s18 + $0x10] sm:$0xff] %v7435_v10  ;;  %v7439_v58 = vsub.f32 1.0, %v7438_v63  ;;  %v6375_v59 = vadd.f32 %v6374_v30, %v14597_v57  ;;  %v14904_v6 = vpop.f32.mrf.mxu3 }
 0xa34   :  { %v7440_v19 = vmul.f32 %v11009_v29, %v7439_v58  ;;  %v7078_v7 = vadd.f32 %v14774_v39, %v6375_v59  ;;  %v6327_v25 = vpop.f32.mrf.mxu0 }
 0xa35   :  { %v14910_v16 = vadd.f32 %v6327_v25, %v14815_v55  ;;  %v6248_v21 = vpop.f32.mrf.mxu1  ;;  %v10966_v55 = vld [vmem:[%s15728_s15 + $0x200] sm:$0xf0] }
 0xa36   :  { %v11011_v61 = vpop.eup %11010  ;;  %v7441_v5 = vadd.f32 %v11009_v29, %v7440_v19  ;;  %v10440_v57 = vmul.f32 -1.442695, %v7078_v7  ;;  %v14914_v52 = vadd.f32 %v6248_v21, %v14704_v9  ;;  %v14932_v59 = vor.u32 %v10966_v55, %v10340_v26 }
 0xa37   :  { %v11013_v41 = vpop.eup %11012  ;;  %v14916_v3 = vadd.f32 1.0, %v11011_v61  ;;  %v7461_v19 = vand.u32 2147483647, %v14893_v38 }
 0xa38   :  { %v7445_v56 = vsel %vm7444_vm1, %v11009_v29, %v7441_v5  ;;  %v7453_v13 = vmul.f32 %v11013_v41, %v14893_v38  ;;  %11014 = vpow2.f32 %v10440_v57  ;;  %v7463_v29 = vand.u32 2147483648, %v14893_v38 }
 0xa39   :  { %v7450_v9 = vsel %vm7447_vm2, %v7449_v11, %v7445_v56  ;;  %11016 = vrcp.f32 %v14916_v3  ;;  %v6376_v63 = vpop.f32.mrf.mxu2  ;;  %vm7458_vm3 = vweird.f32 %v11013_v41  ;;  %vm7462_vm6 = vcmp.eq.f32.partialorder %v7461_v19, 8.507059e+37 }
 0xa3a   :  { %8355 = vst [vmem:[%s15730_s18 + $0x18] sm:$0xff] %v7450_v9  ;;  %v7454_v10 = vsub.f32 1.0, %v7453_v13  ;;  %v6377_v30 = vadd.f32 %v6376_v63, %v14609_v28  ;;  %v14930_v58 = vpop.f32.mrf.mxu3  ;;  %vm7459_vm5 = vmor %vm7457_vm4, %vm7458_vm3  ;;  %v7464_v26 = vor.u32 1.1754944e-38, %v7463_v29  ;;  %v15834_v13 = vld [vmem:[#allocation2_spill] sm:$0xff]  ;;  %v7476_v29 = vand.u32 2147483647, %v14916_v3 }
 0xa3b   :  { %vm7472_vm8 = vweird.f32 %v14916_v3 }
 0xa3c   :  { %v7455_v36 = vmul.f32 %v11013_v41, %v7454_v10  ;;  %v7079_v54 = vadd.f32 %v14774_v39, %v6377_v30  ;;  %v6330_v7 = vpop.f32.mrf.mxu0  ;;  %vm7477_vm10 = vcmp.eq.f32.partialorder %v7476_v29, 8.507059e+37 }
 0xa3d   :  { %v14938_v25 = vadd.f32 %v6330_v7, %v14838_v24  ;;  %v6251_v21 = vpop.f32.mrf.mxu1  ;;  %v15833_v24 = vld [vmem:[#allocation10_spill] sm:$0xff] }
 0xa3e   :  { %v11015_v61 = vpop.eup %11014  ;;  %v7456_v5 = vadd.f32 %v11013_v41, %v7455_v36  ;;  %v10441_v28 = vmul.f32 -1.442695, %v7079_v54  ;;  %10414 = vmatmul.msk.bf16.gmra.mxu2 %vm360_vm0, %v14932_v59  ;;  %v14944_v57 = vadd.f32 %v6251_v21, %v14716_v48 }
 0xa3f   :  { %v11017_v11 = vpop.eup %11016  ;;  %v14946_v55 = vadd.f32 1.0, %v11015_v61  ;;  %6691 = vmatmul.bf16.gmra.mxu3 %v14270_v31  ;;  %6829 = vmatmul.bf16.gmra.mxu0 %v15833_v24 }
 0xa40   :  { %v7460_v56 = vsel %vm7459_vm5, %v11013_v41, %v7456_v5  ;;  %v7468_v38 = vmul.f32 %v11017_v11, %v14916_v3  ;;  %11018 = vpow2.f32 %v10441_v28  ;;  %6750 = vmatmul.bf16.gmra.mxu1 %v15834_v13  ;;  %v7478_v41 = vand.u32 2147483648, %v14916_v3 }
 0xa41   :  { %v7465_v9 = vsel %vm7462_vm6, %v7464_v26, %v7460_v56  ;;  %11020 = vrcp.f32 %v14946_v55  ;;  %v6379_v48 = vpop.f32.mrf.mxu2  ;;  %vm7473_vm7 = vweird.f32 %v11017_v11  ;;  %v10360_v56 = vld [vmem:[%s15728_s15 + $0x218] sm:$0xf]  ;;  %vm7487_vm12 = vweird.f32 %v14946_v55 }
 0xa42   :  { %8356 = vst [vmem:[%s15730_s18 + $0x20] sm:$0xff] %v7465_v9  ;;  %v7469_v63 = vsub.f32 1.0, %v7468_v38  ;;  %v6380_v31 = vadd.f32 %v6379_v48, %v14636_v40  ;;  %v14957_v10 = vpop.f32.mrf.mxu3  ;;  %vm7474_vm9 = vmor %vm7472_vm8, %vm7473_vm7  ;;  %v7479_v26 = vor.u32 1.1754944e-38, %v7478_v41 }
 0xa44   :  { %v7470_v30 = vmul.f32 %v11017_v11, %v7469_v63  ;;  %v7080_v36 = vadd.f32 %v14774_v39, %v6380_v31  ;;  %v6332_v19 = vpop.f32.mrf.mxu0 }
 0xa45   :  { %v14963_v54 = vadd.f32 %v6332_v19, %v14861_v20  ;;  %v6253_v7 = vpop.f32.mrf.mxu1  ;;  %v10971_v20 = vld [vmem:[%s15728_s15 + $0x228] sm:$0xf0] }
 0xa46   :  { %v11019_v21 = vpop.eup %11018  ;;  %v7471_v61 = vadd.f32 %v11017_v11, %v7470_v30  ;;  %v10442_v40 = vmul.f32 -1.442695, %v7080_v36  ;;  %v14967_v5 = vadd.f32 %v6253_v7, %v14735_v53  ;;  %v14985_v31 = vor.u32 %v10971_v20, %v10360_v56 }
 0xa47   :  { %v11021_v28 = vpop.eup %11020  ;;  %v14969_v24 = vadd.f32 1.0, %v11019_v21  ;;  %v7491_v30 = vand.u32 2147483647, %v14946_v55 }
 0xa48   :  { %v7475_v38 = vsel %vm7474_vm9, %v11017_v11, %v7471_v61  ;;  %v7483_v3 = vmul.f32 %v11021_v28, %v14946_v55  ;;  %11022 = vpow2.f32 %v10442_v40  ;;  %v7493_v11 = vand.u32 2147483648, %v14946_v55 }
 0xa49   :  { %v7480_v53 = vsel %vm7477_vm10, %v7479_v26, %v7475_v38  ;;  %11024 = vrcp.f32 %v14969_v24  ;;  %v6381_v13 = vpop.f32.mrf.mxu2  ;;  %vm7488_vm11 = vweird.f32 %v11021_v28  ;;  %v15835_v38 = vld [vmem:[#allocation17_spill] sm:$0xff]  ;;  %vm7492_vm14 = vcmp.eq.f32.partialorder %v7491_v30, 8.507059e+37 }
 0xa4a   :  { %8357 = vst [vmem:[%s15730_s18 + $0x28] sm:$0xff] %v7480_v53  ;;  %v7484_v9 = vsub.f32 1.0, %v7483_v3  ;;  %v6382_v48 = vadd.f32 %v6381_v13, %v14648_v2  ;;  %v14983_v63 = vpop.f32.mrf.mxu3  ;;  %vm7489_vm13 = vmor %vm7487_vm12, %vm7488_vm11  ;;  %v7494_v56 = vor.u32 1.1754944e-38, %v7493_v11  ;;  %v15837_v53 = vld [vmem:[#allocation3_spill] sm:$0xff]  ;;  %v7506_v30 = vand.u32 2147483647, %v14969_v24 }
 0xa4b   :  { %vm7502_vm1 = vweird.f32 %v14969_v24 }
 0xa4c   :  { %v7485_v41 = vmul.f32 %v11021_v28, %v7484_v9  ;;  %v7081_v29 = vadd.f32 %v14774_v39, %v6382_v48  ;;  %v6335_v36 = vpop.f32.mrf.mxu0  ;;  %vm7507_vm3 = vcmp.eq.f32.partialorder %v7506_v30, 8.507059e+37 }
 0xa4d   :  { %v14991_v19 = vadd.f32 %v6335_v36, %v14891_v14  ;;  %v6256_v7 = vpop.f32.mrf.mxu1  ;;  %v15836_v14 = vld [vmem:[#allocation13_spill] sm:$0xff] }
 0xa4e   :  { %v11023_v21 = vpop.eup %11022  ;;  %v7486_v61 = vadd.f32 %v11021_v28, %v7485_v41  ;;  %v10443_v2 = vmul.f32 -1.442695, %v7081_v29  ;;  %10415 = vmatmul.msk.bf16.gmra.mxu2 %vm360_vm0, %v14985_v31  ;;  %v14997_v40 = vadd.f32 %v6256_v7, %v14747_v35 }
 0xa4f   :  { %v11025_v26 = vpop.eup %11024  ;;  %v14999_v20 = vadd.f32 1.0, %v11023_v21  ;;  %6696 = vmatmul.bf16.gmra.mxu3 %v15835_v38  ;;  %6834 = vmatmul.bf16.gmra.mxu0 %v15836_v14 }
 0xa50   :  { %v7490_v3 = vsel %vm7489_vm13, %v11021_v28, %v7486_v61  ;;  %v7498_v55 = vmul.f32 %v11025_v26, %v14969_v24  ;;  %11026 = vpow2.f32 %v10443_v2  ;;  %6755 = vmatmul.bf16.gmra.mxu1 %v15837_v53  ;;  %v7508_v28 = vand.u32 2147483648, %v14969_v24 }
 0xa51   :  { %v7495_v13 = vsel %vm7492_vm14, %v7494_v56, %v7490_v3  ;;  %11028 = vrcp.f32 %v14999_v20  ;;  %v6384_v35 = vpop.f32.mrf.mxu2  ;;  %vm7503_vm15 = vweird.f32 %v11025_v26  ;;  %v7521_v30 = vand.u32 2147483647, %v14999_v20 }
 0xa52   :  { %8358 = vst [vmem:[%s15730_s18 + $0x30] sm:$0xff] %v7495_v13  ;;  %v7499_v9 = vsub.f32 1.0, %v7498_v55  ;;  %v6385_v48 = vadd.f32 %v6384_v35, %v14675_v4  ;;  %v15010_v11 = vpop.f32.mrf.mxu3  ;;  %vm7504_vm2 = vmor %vm7502_vm1, %vm7503_vm15  ;;  %v7509_v14 = vor.u32 1.1754944e-38, %v7508_v28  ;;  %v10380_v55 = vld [vmem:[%s15728_s15 + $0x240] sm:$0xf]  ;;  %vm7517_vm5 = vweird.f32 %v14999_v20 }
 0xa53   :  { %vm7522_vm7 = vcmp.eq.f32.partialorder %v7521_v30, 8.507059e+37 }
 0xa54   :  { %v7500_v41 = vmul.f32 %v11025_v26, %v7499_v9  ;;  %v7082_v29 = vadd.f32 %v14774_v39, %v6385_v48  ;;  %v6337_v36 = vpop.f32.mrf.mxu0 }
 0xa55   :  { %v15016_v7 = vadd.f32 %v6337_v36, %v14914_v52  ;;  %v6258_v21 = vpop.f32.mrf.mxu1  ;;  %v10976_v52 = vld [vmem:[%s15728_s15 + $0x250] sm:$0xf0] }
 0xa56   :  { %v11027_v61 = vpop.eup %11026  ;;  %v7501_v2 = vadd.f32 %v11025_v26, %v7500_v41  ;;  %v10444_v4 = vmul.f32 -1.442695, %v7082_v29  ;;  %v15020_v56 = vadd.f32 %v6258_v21, %v14760_v49  ;;  %v15038_v28 = vor.u32 %v10976_v52, %v10380_v55  ;;  %v15838_v52 = vld [vmem:[#allocation21_spill] sm:$0xff] }
 0xa57   :  { %v11029_v38 = vpop.eup %11028  ;;  %v15022_v3 = vadd.f32 1.0, %v11027_v61 }
 0xa58   :  { %v7505_v53 = vsel %vm7504_vm2, %v11025_v26, %v7501_v2  ;;  %v7513_v24 = vmul.f32 %v11029_v38, %v14999_v20  ;;  %11030 = vpow2.f32 %v10444_v4  ;;  %v7523_v26 = vand.u32 2147483648, %v14999_v20 }
 0xa59   :  { %v7510_v49 = vsel %vm7507_vm3, %v7509_v14, %v7505_v53  ;;  %11032 = vrcp.f32 %v15022_v3  ;;  %v6386_v13 = vpop.f32.mrf.mxu2  ;;  %vm7518_vm4 = vweird.f32 %v11029_v38  ;;  %v15839_v53 = vld [vmem:[#allocation16_spill] sm:$0xff]  ;;  %v7536_v30 = vand.u32 2147483647, %v15022_v3 }
 0xa5a   :  { %8359 = vst [vmem:[%s15730_s18 + $0x38] sm:$0xff] %v7510_v49  ;;  %v7514_v35 = vsub.f32 1.0, %v7513_v24  ;;  %v6387_v9 = vadd.f32 %v6386_v13, %v14687_v15  ;;  %v15036_v48 = vpop.f32.mrf.mxu3  ;;  %vm7519_vm6 = vmor %vm7517_vm5, %vm7518_vm4  ;;  %v7524_v14 = vor.u32 1.1754944e-38, %v7523_v26  ;;  %v15840_v49 = vld [vmem:[#allocation5_spill] sm:$0xff]  ;;  %vm7532_vm9 = vweird.f32 %v15022_v3 }
 0xa5b   :  { %vm7537_vm11 = vcmp.eq.f32.partialorder %v7536_v30, 8.507059e+37 }
 0xa5c   :  { %v7515_v41 = vmul.f32 %v11029_v38, %v7514_v35  ;;  %v7083_v29 = vadd.f32 %v14774_v39, %v6387_v9  ;;  %v6340_v36 = vpop.f32.mrf.mxu0 }
 0xa5d   :  { %v15044_v21 = vadd.f32 %v6340_v36, %v14944_v57 }
 0xa5e   :  { %v11031_v61 = vpop.eup %11030  ;;  %v7516_v2 = vadd.f32 %v11029_v38, %v7515_v41  ;;  %v10445_v15 = vmul.f32 -1.442695, %v7083_v29  ;;  %10416 = vmatmul.msk.bf16.gmra.mxu2 %vm360_vm0, %v15038_v28 }
 0xa5f   :  { %v11033_v4 = vpop.eup %11032  ;;  %v15049_v55 = vadd.f32 1.0, %v11031_v61  ;;  %6701 = vmatmul.bf16.gmra.mxu3 %v15838_v52  ;;  %6839 = vmatmul.bf16.gmra.mxu0 %v15839_v53 }
 0xa60   :  { %v7520_v24 = vsel %vm7519_vm6, %v11029_v38, %v7516_v2  ;;  %v7528_v57 = vmul.f32 %v11033_v4, %v15022_v3  ;;  %11034 = vpow2.f32 %v10445_v15  ;;  %6760 = vmatmul.bf16.gmra.mxu1 %v15840_v49  ;;  %v7538_v38 = vand.u32 2147483648, %v15022_v3 }
 0xa61   :  { %v7525_v20 = vsel %vm7522_vm7, %v7524_v14, %v7520_v24  ;;  %11036 = vrcp.f32 %v15049_v55  ;;  %v6389_v13 = vpop.f32.mrf.mxu2  ;;  %vm7533_vm8 = vweird.f32 %v11033_v4  ;;  %v10400_v24 = vld [vmem:[%s15728_s15 + $0x268] sm:$0xf]  ;;  %vm7547_vm13 = vweird.f32 %v15049_v55 }
 0xa62   :  { %8360 = vst [vmem:[%s15730_s18 + $0x40] sm:$0xff] %v7525_v20  ;;  %v7529_v35 = vsub.f32 1.0, %v7528_v57  ;;  %v6390_v9 = vadd.f32 %v6389_v13, %v14708_v1  ;;  %v15060_v26 = vpop.f32.mrf.mxu3  ;;  %vm7534_vm10 = vmor %vm7532_vm9, %vm7533_vm8  ;;  %v7539_v52 = vor.u32 1.1754944e-38, %v7538_v38  ;;  %v10981_v57 = vld [vmem:[%s15728_s15 + $0x278] sm:$0xf0] }
 0xa63   :  { %v15085_v38 = vor.u32 %v10981_v57, %v10400_v24 }
 0xa64   :  { %v7530_v41 = vmul.f32 %v11033_v4, %v7529_v35  ;;  %v7084_v29 = vadd.f32 %v14774_v39, %v6390_v9  ;;  %v6342_v36 = vpop.f32.mrf.mxu0 }
 0xa65   :  { %v15066_v61 = vadd.f32 %v6342_v36, %v14967_v5 }
 0xa66   :  { %v11035_v2 = vpop.eup %11034  ;;  %v7531_v15 = vadd.f32 %v11033_v4, %v7530_v41  ;;  %v10446_v14 = vmul.f32 -1.442695, %v7084_v29  ;;  %v7553_v41 = vand.u32 2147483648, %v15049_v55  ;;  %v7551_v29 = vand.u32 2147483647, %v15049_v55 }
 0xa67   :  { %v11037_v1 = vpop.eup %11036  ;;  %v15069_v53 = vadd.f32 1.0, %v11035_v2 }
 0xa68   :  { %v7535_v5 = vsel %vm7534_vm10, %v11033_v4, %v7531_v15  ;;  %v7543_v49 = vmul.f32 %v11037_v1, %v15049_v55  ;;  %11038 = vpow2.f32 %v10446_v14  ;;  %v6721_v4 = vpop.f32.mrf.mxu1  ;;  %vm7548_vm12 = vweird.f32 %v11037_v1 }
 0xa69   :  { %v7540_v3 = vsel %vm7537_vm11, %v7539_v52, %v7535_v5  ;;  %11040 = vrcp.f32 %v15069_v53  ;;  %v6391_v20 = vpop.f32.mrf.mxu2  ;;  %vm7549_vm14 = vmor %vm7547_vm13, %vm7548_vm12  ;;  %v7554_v57 = vor.u32 1.1754944e-38, %v7553_v41  ;;  %vm7552_vm15 = vcmp.eq.f32.partialorder %v7551_v29, 8.507059e+37 }
 0xa6a   :  { %8361 = vst [vmem:[%s15730_s18 + $0x48] sm:$0xff] %v7540_v3  ;;  %v7544_v13 = vsub.f32 1.0, %v7543_v49  ;;  %v6392_v35 = vadd.f32 %v6391_v20, %v14718_v50  ;;  %v15083_v9 = vpop.f32.mrf.mxu3  ;;  %v15841_v49 = vld [vmem:[#allocation25_spill] sm:$0xff]  ;;  %v15842_v3 = vld [vmem:[#allocation20_spill] sm:$0xff]  ;;  %vm7562_vm2 = vweird.f32 %v15069_v53 }
 0xa6c   :  { %v7545_v30 = vmul.f32 %v11037_v1, %v7544_v13  ;;  %v7085_v36 = vadd.f32 %v14774_v39, %v6392_v35  ;;  %v6345_v2 = vpop.f32.mrf.mxu0  ;;  %v15843_v13 = vld [vmem:[#allocation7_spill] sm:$0xff] }
 0xa6d   :  { %v15091_v15 = vadd.f32 %v6345_v2, %v14997_v40  ;;  %v7566_v2 = vand.u32 2147483647, %v15069_v53 }
 0xa6e   :  { %v11039_v14 = vpop.eup %11038  ;;  %v7546_v52 = vadd.f32 %v11037_v1, %v7545_v30  ;;  %v10447_v50 = vmul.f32 -1.442695, %v7085_v36  ;;  %10417 = vmatmul.msk.bf16.gmra.mxu2 %vm360_vm0, %v15085_v38 }
 0xa6f   :  { %v11041_v24 = vpop.eup %11040  ;;  %v15096_v5 = vadd.f32 1.0, %v11039_v14  ;;  %6706 = vmatmul.bf16.gmra.mxu3 %v15841_v49  ;;  %6844 = vmatmul.bf16.gmra.mxu0 %v15842_v3  ;;  %vm7567_vm4 = vcmp.eq.f32.partialorder %v7566_v2, 8.507059e+37 }
 0xa70   :  { %v7550_v20 = vsel %vm7549_vm14, %v11037_v1, %v7546_v52  ;;  %v7558_v40 = vmul.f32 %v11041_v24, %v15069_v53  ;;  %11042 = vpow2.f32 %v10447_v50  ;;  %6765 = vmatmul.bf16.gmra.mxu1 %v15843_v13  ;;  %v7568_v1 = vand.u32 2147483648, %v15069_v53  ;;  %v6723_v50 = vpop.f32.mrf.mxu1 }
 0xa71   :  { %v7555_v55 = vsel %vm7552_vm15, %v7554_v57, %v7550_v20  ;;  %11044 = vrcp.f32 %v15096_v5  ;;  %v6394_v35 = vpop.f32.mrf.mxu2  ;;  %vm7563_vm1 = vweird.f32 %v11041_v24  ;;  %vm7577_vm6 = vweird.f32 %v15096_v5 }
 0xa72   :  { %8362 = vst [vmem:[%s15730_s18 + $0x50] sm:$0xff] %v7555_v55  ;;  %v7559_v41 = vsub.f32 1.0, %v7558_v40  ;;  %v6395_v30 = vadd.f32 %v6394_v35, %v14739_v42  ;;  %v15107_v36 = vpop.f32.mrf.mxu3  ;;  %vm7564_vm3 = vmor %vm7562_vm2, %vm7563_vm1  ;;  %v7569_v40 = vor.u32 1.1754944e-38, %v7568_v1  ;;  %v7583_v1 = vand.u32 2147483648, %v15096_v5 }
 0xa74   :  { %v7560_v29 = vmul.f32 %v11041_v24, %v7559_v41  ;;  %v7086_v14 = vadd.f32 %v14774_v39, %v6395_v30  ;;  %v6347_v52 = vpop.f32.mrf.mxu0 }
 0xa75   :  { %v15113_v57 = vadd.f32 %v6347_v52, %v15020_v56 }
 0xa76   :  { %v11043_v49 = vpop.eup %11042  ;;  %v7561_v3 = vadd.f32 %v11041_v24, %v7560_v29  ;;  %v10448_v42 = vmul.f32 -1.442695, %v7086_v14  ;;  %v7581_v14 = vand.u32 2147483647, %v15096_v5 }
 0xa77   :  { %v11045_v20 = vpop.eup %11044  ;;  %v7341_v13 = vadd.f32 1.0, %v11043_v49 }
 0xa78   :  { %v7565_v55 = vsel %vm7564_vm3, %v11041_v24, %v7561_v3  ;;  %v7573_v35 = vmul.f32 %v11045_v20, %v15096_v5  ;;  %11046 = vpow2.f32 %v10448_v42  ;;  %v6722_v24 = vadd.f32 %v6721_v4, %v14778_v51 }
 0xa79   :  { %v7570_v41 = vsel %vm7567_vm4, %v7569_v40, %v7565_v55  ;;  %11048 = vrcp.f32 %v7341_v13  ;;  %v6396_v30 = vpop.f32.mrf.mxu2  ;;  %vm7578_vm5 = vweird.f32 %v11045_v20  ;;  %v15844_v55 = vld [vmem:[#allocation4_spill] sm:$0xff]  ;;  %v7584_v51 = vor.u32 1.1754944e-38, %v7583_v1 }
 0xa7a   :  { %8363 = vst [vmem:[%s15730_s18 + $0x58] sm:$0xff] %v7570_v41  ;;  %v7574_v56 = vsub.f32 1.0, %v7573_v35  ;;  %v6397_v53 = vadd.f32 %v6396_v30, %v14749_v34  ;;  %v15121_v29 = vpop.f32.mrf.mxu3  ;;  %v6726_v35 = vpop.f32.mrf.mxu1  ;;  %vm7579_vm7 = vmor %vm7577_vm6, %vm7578_vm5  ;;  %v15845_v30 = vld [vmem:[#allocation24_spill] sm:$0xff]  ;;  %vm7582_vm8 = vcmp.eq.f32.partialorder %v7581_v14, 8.507059e+37  ;;  %vm7592_vm10 = vweird.f32 %v7341_v13 }
 0xa7c   :  { %v7575_v2 = vmul.f32 %v11045_v20, %v7574_v56  ;;  %v7087_v52 = vadd.f32 %v14774_v39, %v6397_v53  ;;  %v6810_v49 = vpop.f32.mrf.mxu0 }
 0xa7d   :  { %v15127_v3 = vadd.f32 %v6810_v49, %v6722_v24  ;;  %v15846_v24 = vld [vmem:[#allocation9_spill] sm:$0xff]  ;;  %v7598_v49 = vand.u32 2147483648, %v7341_v13 }
 0xa7e   :  { %v11047_v42 = vpop.eup %11046  ;;  %v7576_v40 = vadd.f32 %v11045_v20, %v7575_v2  ;;  %v10449_v34 = vmul.f32 -1.442695, %v7087_v52  ;;  %6898 = vmatmul.bf16.vlgmr.msrb.gmra.mxu2 %v15844_v55 }
 0xa7f   :  { %v11049_v41 = vpop.eup %11048  ;;  %v15131_v4 = vadd.f32 1.0, %v11047_v42  ;;  %10418 = vmatmul.msk.bf16.vlgmr.msra.gmra.mxu3 %vm360_vm0, %v14466_v0  ;;  %6849 = vmatmul.bf16.gmra.mxu0 %v15845_v30  ;;  %v7596_v42 = vand.u32 2147483647, %v7341_v13 }
 0xa80   :  { %v7580_v56 = vsel %vm7579_vm7, %v11045_v20, %v7576_v40  ;;  %v7588_v53 = vmul.f32 %v11049_v41, %v7341_v13  ;;  %11050 = vpow2.f32 %v10449_v34  ;;  %6770 = vmatmul.bf16.gmra.mxu1 %v15846_v24  ;;  %v6724_v20 = vadd.f32 %v6723_v50, %v14793_v32 }
 0xa81   :  { %v7585_v5 = vsel %vm7582_vm8, %v7584_v51, %v7580_v56  ;;  %11052 = vrcp.f32 %v15131_v4  ;;  %v6399_v2 = vpop.f32.mrf.mxu2  ;;  %vm7593_vm9 = vweird.f32 %v11049_v41  ;;  %vm7597_vm12 = vcmp.eq.f32.partialorder %v7596_v42, 8.507059e+37 }
 0xa82   :  { %8364 = vst [vmem:[%s15730_s18 + $0x60] sm:$0xff] %v7585_v5  ;;  %v7589_v1 = vsub.f32 1.0, %v7588_v53  ;;  %v6400_v52 = vadd.f32 %v6399_v2, %v14762_v22  ;;  %v15142_v0 = vpop.f32.mrf.mxu3  ;;  %vm7594_vm11 = vmor %vm7592_vm10, %vm7593_vm9  ;;  %v7599_v22 = vor.u32 1.1754944e-38, %v7598_v49  ;;  %v6728_v50 = vpop.f32.mrf.mxu1  ;;  %v7611_v42 = vand.u32 2147483647, %v15131_v4 }
 0xa83   :  { %vm7607_vm14 = vweird.f32 %v15131_v4 }
 0xa84   :  { %v7590_v14 = vmul.f32 %v11049_v41, %v7589_v1  ;;  %v7088_v40 = vadd.f32 %v14774_v39, %v6400_v52  ;;  %v6812_v34 = vpop.f32.mrf.mxu0  ;;  %vm7612_vm1 = vcmp.eq.f32.partialorder %v7611_v42, 8.507059e+37 }
 0xa85   :  { %v15146_v55 = vadd.f32 %v6812_v34, %v6724_v20  ;;  %v6727_v20 = vadd.f32 %v6726_v35, %v14809_v17  ;;  %v15848_v35 = vld [vmem:[#allocation28_spill] sm:$0xff] }
 0xa86   :  { %v11051_v51 = vpop.eup %11050  ;;  %v7591_v30 = vadd.f32 %v11049_v41, %v7590_v14  ;;  %v10450_v56 = vmul.f32 -1.442695, %v7088_v40 }
 0xa87   :  { %v11053_v53 = vpop.eup %11052  ;;  %v15148_v24 = vadd.f32 1.0, %v11051_v51 }
 0xa88   :  { %v7595_v5 = vsel %vm7594_vm11, %v11049_v41, %v7591_v30  ;;  %v7603_v32 = vmul.f32 %v11053_v53, %v15131_v4  ;;  %11054 = vpow2.f32 %v10450_v56  ;;  %v7613_v41 = vand.u32 2147483648, %v15131_v4 }
 0xa89   :  { %v7600_v2 = vsel %vm7597_vm12, %v7599_v22, %v7595_v5  ;;  %11056 = vrcp.f32 %v15148_v24  ;;  %v6401_v1 = vpop.f32.mrf.mxu2  ;;  %vm7608_vm13 = vweird.f32 %v11053_v53  ;;  %v15847_v22 = vld [vmem:[#allocation6_spill] sm:$0xff]  ;;  %vm7622_vm3 = vweird.f32 %v15148_v24 }
 0xa8a   :  { %8365 = vst [vmem:[%s15730_s18 + $0x68] sm:$0xff] %v7600_v2  ;;  %v7604_v13 = vsub.f32 1.0, %v7603_v32  ;;  %v6402_v52 = vadd.f32 %v6401_v1, %v14781_v18  ;;  %v15156_v49 = vpop.f32.mrf.mxu3  ;;  %vm7609_vm15 = vmor %vm7607_vm14, %vm7608_vm13  ;;  %v7614_v32 = vor.u32 1.1754944e-38, %v7613_v41  ;;  %v15849_v1 = vld [vmem:[#allocation12_spill] sm:$0xff] }
 0xa8c   :  { %v7605_v14 = vmul.f32 %v11053_v53, %v7604_v13  ;;  %v7089_v40 = vadd.f32 %v14774_v39, %v6402_v52  ;;  %v6815_v34 = vpop.f32.mrf.mxu0 }
 0xa8d   :  { %v15162_v51 = vadd.f32 %v6815_v34, %v6727_v20  ;;  %v7628_v20 = vand.u32 2147483648, %v15148_v24  ;;  %v15186_v34 = vld [vmem:[%s15729_s17] ss:$0 sm:$0xff] }
 0xa8e   :  { %v11055_v30 = vpop.eup %11054  ;;  %v7606_v56 = vadd.f32 %v11053_v53, %v7605_v14  ;;  %v10451_v18 = vmul.f32 -1.442695, %v7089_v40  ;;  %6903 = vmatmul.bf16.gmra.mxu2 %v15847_v22  ;;  %v6729_v14 = vadd.f32 %v6728_v50, %v14827_v46  ;;  %v7626_v40 = vand.u32 2147483647, %v15148_v24 }
 0xa8f   :  { %v11057_v5 = vpop.eup %11056  ;;  %v15166_v17 = vadd.f32 1.0, %v11055_v30  ;;  %10419 = vmatmul.msk.bf16.gmra.mxu3 %vm360_vm0, %v14511_v60  ;;  %6854 = vmatmul.bf16.gmra.mxu0 %v15848_v35  ;;  %v7629_v50 = vor.u32 1.1754944e-38, %v7628_v20 }
 0xa90   :  { %v7610_v39 = vsel %vm7609_vm15, %v11053_v53, %v7606_v56  ;;  %v7618_v2 = vmul.f32 %v11057_v5, %v15148_v24  ;;  %11058 = vpow2.f32 %v10451_v18  ;;  %6775 = vmatmul.bf16.gmra.mxu1 %v15849_v1  ;;  %v6731_v53 = vpop.f32.mrf.mxu1  ;;  %vm7623_vm2 = vweird.f32 %v11057_v5 }
 0xa91   :  { %v7615_v4 = vsel %vm7612_vm1, %v7614_v32, %v7610_v39  ;;  %11060 = vrcp.f32 %v15166_v17  ;;  %v6404_v13 = vpop.f32.mrf.mxu2  ;;  %vm7624_vm4 = vmor %vm7622_vm3, %vm7623_vm2  ;;  %vm7627_vm5 = vcmp.eq.f32.partialorder %v7626_v40, 8.507059e+37  ;;  %vm7637_vm7 = vweird.f32 %v15166_v17 }
 0xa92   :  { %8366 = vst [vmem:[%s15730_s18 + $0x70] sm:$0xff] %v7615_v4  ;;  %v7619_v52 = vsub.f32 1.0, %v7618_v2  ;;  %v6405_v60 = vadd.f32 %v6404_v13, %v14798_v62  ;;  %v15178_v41 = vpop.f32.mrf.mxu3 }
 0xa94   :  { %v7620_v42 = vmul.f32 %v11057_v5, %v7619_v52  ;;  %v7090_v30 = vadd.f32 %v15186_v34, %v6405_v60  ;;  %v6817_v56 = vpop.f32.mrf.mxu0  ;;  %v7643_v60 = vand.u32 2147483648, %v15166_v17 }
 0xa95   :  { %v15189_v62 = vadd.f32 %v6817_v56, %v6729_v14  ;;  %v7641_v14 = vand.u32 2147483647, %v15166_v17 }
 0xa96   :  { %v11059_v18 = vpop.eup %11058  ;;  %v7621_v22 = vadd.f32 %v11057_v5, %v7620_v42  ;;  %v10452_v32 = vmul.f32 -1.442695, %v7090_v30 }
 0xa97   :  { %v11061_v46 = vpop.eup %11060  ;;  %v15192_v35 = vadd.f32 1.0, %v11059_v18  ;;  %vm7642_vm9 = vcmp.eq.f32.partialorder %v7641_v14, 8.507059e+37 }
 0xa98   :  { %v7625_v39 = vsel %vm7624_vm4, %v11057_v5, %v7621_v22  ;;  %v7633_v2 = vmul.f32 %v11061_v46, %v15166_v17  ;;  %11062 = vpow2.f32 %v10452_v32  ;;  %v6732_v5 = vadd.f32 %v6731_v53, %v14851_v37  ;;  %v6733_v30 = vpop.f32.mrf.mxu1  ;;  %v15850_v32 = vld [vmem:[#allocation8_spill] sm:$0xff] }
 0xa99   :  { %v7630_v1 = vsel %vm7627_vm5, %v7629_v50, %v7625_v39  ;;  %11064 = vrcp.f32 %v15192_v35  ;;  %v6406_v4 = vpop.f32.mrf.mxu2  ;;  %vm7638_vm6 = vweird.f32 %v11061_v46  ;;  %v7644_v37 = vor.u32 1.1754944e-38, %v7643_v60 }
 0xa9a   :  { %8367 = vst [vmem:[%s15730_s18 + $0x78] sm:$0xff] %v7630_v1  ;;  %v7634_v24 = vsub.f32 1.0, %v7633_v2  ;;  %v6407_v13 = vadd.f32 %v6406_v4, %v14812_v45  ;;  %v15200_v52 = vpop.f32.mrf.mxu3  ;;  %vm7639_vm8 = vmor %vm7637_vm7, %vm7638_vm6  ;;  %v15851_v1 = vld [vmem:[#allocation15_spill] sm:$0xff]  ;;  %vm7652_vm11 = vweird.f32 %v15192_v35 }
 0xa9c   :  { %v7635_v20 = vmul.f32 %v11061_v46, %v7634_v24  ;;  %v7091_v42 = vadd.f32 %v15186_v34, %v6407_v13  ;;  %v6820_v40 = vpop.f32.mrf.mxu0 }
 0xa9d   :  { %v15206_v56 = vadd.f32 %v6820_v40, %v6732_v5  ;;  %v7656_v5 = vand.u32 2147483647, %v15192_v35 }
 0xa9e   :  { %v11063_v18 = vpop.eup %11062  ;;  %v7636_v22 = vadd.f32 %v11061_v46, %v7635_v20  ;;  %v10453_v45 = vmul.f32 -1.442695, %v7091_v42  ;;  %6908 = vmatmul.bf16.gmra.mxu2 %v15850_v32 }
 0xa9f   :  { %v11065_v50 = vpop.eup %11064  ;;  %v15210_v53 = vadd.f32 1.0, %v11063_v18  ;;  %10420 = vmatmul.msk.bf16.gmra.mxu3 %vm360_vm0, %v14552_v12  ;;  %6859 = vmatmul.bf16.gmra.mxu0 %v14477_v43  ;;  %v7658_v43 = vand.u32 2147483648, %v15192_v35  ;;  %vm7657_vm13 = vcmp.eq.f32.partialorder %v7656_v5, 8.507059e+37 }
 0xaa0   :  { %v7640_v39 = vsel %vm7639_vm8, %v11061_v46, %v7636_v22  ;;  %v7648_v2 = vmul.f32 %v11065_v50, %v15192_v35  ;;  %11066 = vpow2.f32 %v10453_v45  ;;  %6780 = vmatmul.bf16.gmra.mxu1 %v15851_v1  ;;  %v6734_v46 = vadd.f32 %v6733_v30, %v14877_v47  ;;  %v6736_v22 = vpop.f32.mrf.mxu1 }
 0xaa1   :  { %v7645_v17 = vsel %vm7642_vm9, %v7644_v37, %v7640_v39  ;;  %11068 = vrcp.f32 %v15210_v53  ;;  %v6409_v4 = vpop.f32.mrf.mxu2  ;;  %vm7653_vm10 = vweird.f32 %v11065_v50  ;;  %v7659_v32 = vor.u32 1.1754944e-38, %v7658_v43 }
 0xaa2   :  { %8368 = vst [vmem:[%s15730_s18 + $0x80] sm:$0xff] %v7645_v17  ;;  %v7649_v24 = vsub.f32 1.0, %v7648_v2  ;;  %v6410_v12 = vadd.f32 %v6409_v4, %v14833_v27  ;;  %v15222_v13 = vpop.f32.mrf.mxu3  ;;  %vm7654_vm12 = vmor %vm7652_vm11, %vm7653_vm10  ;;  %v7673_v4 = vand.u32 2147483648, %v15210_v53  ;;  %vm7667_vm15 = vweird.f32 %v15210_v53 }
 0xaa4   :  { %v7650_v60 = vmul.f32 %v11065_v50, %v7649_v24  ;;  %v7092_v20 = vadd.f32 %v15186_v34, %v6410_v12  ;;  %v6822_v14 = vpop.f32.mrf.mxu0  ;;  %v7671_v12 = vand.u32 2147483647, %v15210_v53 }
 0xaa5   :  { %v15228_v42 = vadd.f32 %v6822_v14, %v6734_v46  ;;  %v15852_v14 = vld [vmem:[#allocation11_spill] sm:$0xff] }
 0xaa6   :  { %v11067_v40 = vpop.eup %11066  ;;  %v7651_v18 = vadd.f32 %v11065_v50, %v7650_v60  ;;  %v10454_v27 = vmul.f32 -1.442695, %v7092_v20  ;;  %vm7672_vm2 = vcmp.eq.f32.partialorder %v7671_v12, 8.507059e+37 }
 0xaa7   :  { %v11069_v45 = vpop.eup %11068  ;;  %v7347_v37 = vadd.f32 1.0, %v11067_v40 }
 0xaa8   :  { %v7655_v47 = vsel %vm7654_vm12, %v11065_v50, %v7651_v18  ;;  %v7663_v30 = vmul.f32 %v11069_v45, %v15210_v53  ;;  %11070 = vpow2.f32 %v10454_v27  ;;  %v6737_v50 = vadd.f32 %v6736_v22, %v14904_v6  ;;  %v15853_v27 = vld [vmem:[#allocation34_spill] sm:$0xff]  ;;  %v15854_v22 = vld [vmem:[#allocation31_spill] sm:$0xff] }
 0xaa9   :  { %v7660_v39 = vsel %vm7657_vm13, %v7659_v32, %v7655_v47  ;;  %11072 = vrcp.f32 %v7347_v37  ;;  %v6411_v2 = vpop.f32.mrf.mxu2  ;;  %vm7668_vm14 = vweird.f32 %v11069_v45  ;;  %v7674_v18 = vor.u32 1.1754944e-38, %v7673_v4 }
 0xaaa   :  { %8369 = vst [vmem:[%s15730_s18 + $0x88] sm:$0xff] %v7660_v39  ;;  %v7664_v1 = vsub.f32 1.0, %v7663_v30  ;;  %v6412_v35 = vadd.f32 %v6411_v2, %v14857_v23  ;;  %v15236_v17 = vpop.f32.mrf.mxu3  ;;  %vm7669_vm1 = vmor %vm7667_vm15, %vm7668_vm14  ;;  %v6738_v30 = vpop.f32.mrf.mxu1  ;;  %v15855_v39 = vld [vmem:[#allocation19_spill] sm:$0xff]  ;;  %v7686_v12 = vand.u32 2147483647, %v7347_v37  ;;  %vm7682_vm4 = vweird.f32 %v7347_v37 }
 0xaac   :  { %v7665_v24 = vmul.f32 %v11069_v45, %v7664_v1  ;;  %v7093_v43 = vadd.f32 %v15186_v34, %v6412_v35  ;;  %v6825_v46 = vpop.f32.mrf.mxu0  ;;  %vm7687_vm6 = vcmp.eq.f32.partialorder %v7686_v12, 8.507059e+37 }
 0xaad   :  { %v15242_v60 = vadd.f32 %v6825_v46, %v6737_v50  ;;  %v7688_v50 = vand.u32 2147483648, %v7347_v37 }
 0xaae   :  { %v11071_v5 = vpop.eup %11070  ;;  %v7666_v20 = vadd.f32 %v11069_v45, %v7665_v24  ;;  %v10455_v23 = vmul.f32 -1.442695, %v7093_v43  ;;  %6913 = vmatmul.bf16.gmra.mxu2 %v15852_v14 }
 0xaaf   :  { %v11073_v40 = vpop.eup %11072  ;;  %v7348_v6 = vadd.f32 1.0, %v11071_v5  ;;  %10421 = vmatmul.msk.bf16.gmra.mxu3 %vm360_vm0, %v15853_v27  ;;  %6864 = vmatmul.bf16.gmra.mxu0 %v15854_v22 }
 0xab0   :  { %v7670_v32 = vsel %vm7669_vm1, %v11069_v45, %v7666_v20  ;;  %v7678_v47 = vmul.f32 %v11073_v40, %v7347_v37  ;;  %11074 = vpow2.f32 %v10455_v23  ;;  %6785 = vmatmul.bf16.gmra.mxu1 %v15855_v39  ;;  %v6739_v45 = vadd.f32 %v6738_v30, %v14930_v58 }
 0xab1   :  { %v7675_v53 = vsel %vm7672_vm2, %v7674_v18, %v7670_v32  ;;  %11076 = vrcp.f32 %v7348_v6  ;;  %v6414_v2 = vpop.f32.mrf.mxu2  ;;  %vm7683_vm3 = vweird.f32 %v11073_v40  ;;  %vm7697_vm8 = vweird.f32 %v7348_v6 }
 0xab2   :  { %8370 = vst [vmem:[%s15730_s18 + $0x90] sm:$0xff] %v7675_v53  ;;  %v7679_v1 = vsub.f32 1.0, %v7678_v47  ;;  %v6415_v35 = vadd.f32 %v6414_v2, %v14885_v33  ;;  %v15254_v4 = vpop.f32.mrf.mxu3  ;;  %vm7684_vm5 = vmor %vm7682_vm4, %vm7683_vm3  ;;  %v7689_v33 = vor.u32 1.1754944e-38, %v7688_v50  ;;  %v7703_v53 = vand.u32 2147483648, %v7348_v6 }
 0xab4   :  { %v7680_v24 = vmul.f32 %v11073_v40, %v7679_v1  ;;  %v7094_v43 = vadd.f32 %v15186_v34, %v6415_v35  ;;  %v6827_v46 = vpop.f32.mrf.mxu0  ;;  %v7701_v1 = vand.u32 2147483647, %v7348_v6 }
 0xab5   :  { %v15258_v5 = vadd.f32 %v6827_v46, %v6739_v45 }
 0xab6   :  { %v11075_v20 = vpop.eup %11074  ;;  %v7681_v23 = vadd.f32 %v11073_v40, %v7680_v24  ;;  %v10456_v14 = vmul.f32 -1.442695, %v7094_v43  ;;  %v15856_v24 = vld [vmem:[#allocation14_spill] sm:$0xff]  ;;  %v7704_v43 = vor.u32 1.1754944e-38, %v7703_v53  ;;  %vm7702_vm10 = vcmp.eq.f32.partialorder %v7701_v1, 8.507059e+37 }
 0xab7   :  { %v11077_v18 = vpop.eup %11076  ;;  %v7349_v27 = vadd.f32 1.0, %v11075_v20  ;;  %v15857_v20 = vld [vmem:[#allocation37_spill] sm:$0xff] }
 0xab8   :  { %v7685_v22 = vsel %vm7684_vm5, %v11073_v40, %v7681_v23  ;;  %v7693_v32 = vmul.f32 %v11077_v18, %v7348_v6  ;;  %11078 = vpow2.f32 %v10456_v14  ;;  %vm7698_vm7 = vweird.f32 %v11077_v18 }
 0xab9   :  { %v7690_v58 = vsel %vm7687_vm6, %v7689_v33, %v7685_v22  ;;  %11080 = vrcp.f32 %v7349_v27  ;;  %v6416_v47 = vpop.f32.mrf.mxu2  ;;  %vm7699_vm9 = vmor %vm7697_vm8, %vm7698_vm7  ;;  %v15859_v33 = vld [vmem:[#allocation23_spill] sm:$0xff]  ;;  %vm7712_vm12 = vweird.f32 %v7349_v27 }
 0xaba   :  { %8371 = vst [vmem:[%s15730_s18 + $0x98] sm:$0xff] %v7690_v58  ;;  %v7694_v30 = vsub.f32 1.0, %v7693_v32  ;;  %v6417_v39 = vadd.f32 %v6416_v47, %v14910_v16  ;;  %v15264_v37 = vpop.f32.mrf.mxu3  ;;  %v15858_v16 = vld [vmem:[#allocation33_spill] sm:$0xff] }
 0xabc   :  { %v7695_v2 = vmul.f32 %v11077_v18, %v7694_v30  ;;  %v7095_v40 = vadd.f32 %v15186_v34, %v6417_v39  ;;  %v7718_v30 = vand.u32 2147483648, %v7349_v27 }
 0xabe   :  { %v11079_v35 = vpop.eup %11078  ;;  %v7696_v50 = vadd.f32 %v11077_v18, %v7695_v2  ;;  %v10457_v45 = vmul.f32 -1.442695, %v7095_v40  ;;  %6918 = vmatmul.bf16.gmra.mxu2 %v15856_v24 }
 0xabf   :  { %v11081_v12 = vpop.eup %11080  ;;  %v7350_v46 = vadd.f32 1.0, %v11079_v35  ;;  %10422 = vmatmul.msk.bf16.gmra.mxu3 %vm360_vm0, %v15857_v20  ;;  %6869 = vmatmul.bf16.gmra.mxu0 %v15858_v16 }
 0xac0   :  { %v7700_v23 = vsel %vm7699_vm9, %v11077_v18, %v7696_v50  ;;  %v7708_v14 = vmul.f32 %v11081_v12, %v7349_v27  ;;  %11082 = vpow2.f32 %v10457_v45  ;;  %6790 = vmatmul.bf16.gmra.mxu1 %v15859_v33  ;;  %vm7713_vm11 = vweird.f32 %v11081_v12 }
 0xac1   :  { %v7705_v22 = vsel %vm7702_vm10, %v7704_v43, %v7700_v23  ;;  %11084 = vrcp.f32 %v7350_v46  ;;  %v6419_v6 = vpop.f32.mrf.mxu2  ;;  %v7716_v18 = vand.u32 2147483647, %v7349_v27  ;;  %vm7714_vm13 = vmor %vm7712_vm12, %vm7713_vm11  ;;  %v7719_v50 = vor.u32 1.1754944e-38, %v7718_v30  ;;  %v15860_v30 = vld [vmem:[#allocation18_spill] sm:$0xff] }
 0xac2   :  { %8372 = vst [vmem:[%s15730_s18 + $0xa0] sm:$0xff] %v7705_v22  ;;  %v7709_v32 = vsub.f32 1.0, %v7708_v14  ;;  %v6420_v58 = vadd.f32 %v6419_v6, %v14938_v25  ;;  %v15276_v47 = vpop.f32.mrf.mxu3  ;;  %v7733_v14 = vand.u32 2147483648, %v7350_v46  ;;  %v7731_v22 = vand.u32 2147483647, %v7350_v46 }
 0xac3   :  { %vm7717_vm14 = vcmp.eq.f32.partialorder %v7716_v18, 8.507059e+37  ;;  %vm7727_vm1 = vweird.f32 %v7350_v46 }
 0xac4   :  { %v7710_v39 = vmul.f32 %v11081_v12, %v7709_v32  ;;  %v7096_v53 = vadd.f32 %v15186_v34, %v6420_v58  ;;  %v7734_v18 = vor.u32 1.1754944e-38, %v7733_v14  ;;  %vm7732_vm3 = vcmp.eq.f32.partialorder %v7731_v22, 8.507059e+37 }
 0xac6   :  { %v11083_v2 = vpop.eup %11082  ;;  %v7711_v1 = vadd.f32 %v11081_v12, %v7710_v39  ;;  %v10458_v40 = vmul.f32 -1.442695, %v7096_v53 }
 0xac7   :  { %v11085_v35 = vpop.eup %11084  ;;  %v7351_v45 = vadd.f32 1.0, %v11083_v2  ;;  %v15861_v2 = vld [vmem:[#allocation40_spill] sm:$0xff] }
 0xac8   :  { %v7715_v24 = vsel %vm7714_vm13, %v11081_v12, %v7711_v1  ;;  %v7723_v43 = vmul.f32 %v11085_v35, %v7350_v46  ;;  %11086 = vpow2.f32 %v10458_v40  ;;  %vm7728_vm15 = vweird.f32 %v11085_v35 }
 0xac9   :  { %v7720_v25 = vsel %vm7717_vm14, %v7719_v50, %v7715_v24  ;;  %11088 = vrcp.f32 %v7351_v45  ;;  %v6421_v20 = vpop.f32.mrf.mxu2  ;;  %vm7729_vm2 = vmor %vm7727_vm1, %vm7728_vm15  ;;  %v15863_v50 = vld [vmem:[#allocation27_spill] sm:$0xff]  ;;  %vm7742_vm5 = vweird.f32 %v7351_v45 }
 0xaca   :  { %8373 = vst [vmem:[%s15730_s18 + $0xa8] sm:$0xff] %v7720_v25  ;;  %v7724_v16 = vsub.f32 1.0, %v7723_v43  ;;  %v6422_v23 = vadd.f32 %v6421_v20, %v14963_v54  ;;  %v15283_v27 = vpop.f32.mrf.mxu3  ;;  %v15862_v54 = vld [vmem:[#allocation36_spill] sm:$0xff] }
 0xacc   :  { %v7725_v33 = vmul.f32 %v11085_v35, %v7724_v16  ;;  %v7097_v12 = vadd.f32 %v15186_v34, %v6422_v23  ;;  %v7748_v16 = vand.u32 2147483648, %v7351_v45 }
 0xace   :  { %v11087_v6 = vpop.eup %11086  ;;  %v7726_v32 = vadd.f32 %v11085_v35, %v7725_v33  ;;  %v10459_v58 = vmul.f32 -1.442695, %v7097_v12  ;;  %6923 = vmatmul.bf16.gmra.mxu2 %v15860_v30 }
 0xacf   :  { %v11089_v39 = vpop.eup %11088  ;;  %v7352_v53 = vadd.f32 1.0, %v11087_v6  ;;  %10423 = vmatmul.msk.bf16.gmra.mxu3 %vm360_vm0, %v15861_v2  ;;  %6874 = vmatmul.bf16.gmra.mxu0 %v15862_v54 }
 0xad0   :  { %v7730_v1 = vsel %vm7729_vm2, %v11085_v35, %v7726_v32  ;;  %v7738_v40 = vmul.f32 %v11089_v39, %v7351_v45  ;;  %11090 = vpow2.f32 %v10459_v58  ;;  %6795 = vmatmul.bf16.gmra.mxu1 %v15863_v50  ;;  %vm7743_vm4 = vweird.f32 %v11089_v39 }
 0xad1   :  { %v7735_v24 = vsel %vm7732_vm3, %v7734_v18, %v7730_v1  ;;  %11092 = vrcp.f32 %v7352_v53  ;;  %v6424_v46 = vpop.f32.mrf.mxu2  ;;  %v7746_v35 = vand.u32 2147483647, %v7351_v45  ;;  %vm7744_vm6 = vmor %vm7742_vm5, %vm7743_vm4  ;;  %v7749_v32 = vor.u32 1.1754944e-38, %v7748_v16  ;;  %v15864_v16 = vld [vmem:[#allocation22_spill] sm:$0xff] }
 0xad2   :  { %8374 = vst [vmem:[%s15730_s18 + $0xb0] sm:$0xff] %v7735_v24  ;;  %v7739_v43 = vsub.f32 1.0, %v7738_v40  ;;  %v6425_v25 = vadd.f32 %v6424_v46, %v14991_v19  ;;  %v15295_v20 = vpop.f32.mrf.mxu3  ;;  %v7763_v40 = vand.u32 2147483648, %v7352_v53  ;;  %v7761_v24 = vand.u32 2147483647, %v7352_v53 }
 0xad3   :  { %vm7747_vm7 = vcmp.eq.f32.partialorder %v7746_v35, 8.507059e+37  ;;  %vm7757_vm9 = vweird.f32 %v7352_v53 }
 0xad4   :  { %v7740_v23 = vmul.f32 %v11089_v39, %v7739_v43  ;;  %v7098_v14 = vadd.f32 %v15186_v34, %v6425_v25  ;;  %v7764_v35 = vor.u32 1.1754944e-38, %v7763_v40  ;;  %vm7762_vm11 = vcmp.eq.f32.partialorder %v7761_v24, 8.507059e+37 }
 0xad6   :  { %v11091_v33 = vpop.eup %11090  ;;  %v7741_v22 = vadd.f32 %v11089_v39, %v7740_v23  ;;  %v10460_v12 = vmul.f32 -1.442695, %v7098_v14 }
 0xad7   :  { %v11093_v6 = vpop.eup %11092  ;;  %v7353_v58 = vadd.f32 1.0, %v11091_v33  ;;  %v15865_v33 = vld [vmem:[#allocation43_spill] sm:$0xff] }
 0xad8   :  { %v7745_v30 = vsel %vm7744_vm6, %v11089_v39, %v7741_v22  ;;  %v7753_v18 = vmul.f32 %v11093_v6, %v7352_v53  ;;  %11094 = vpow2.f32 %v10460_v12  ;;  %vm7758_vm8 = vweird.f32 %v11093_v6 }
 0xad9   :  { %v7750_v19 = vsel %vm7747_vm7, %v7749_v32, %v7745_v30  ;;  %11096 = vrcp.f32 %v7353_v58  ;;  %v6426_v2 = vpop.f32.mrf.mxu2  ;;  %vm7759_vm10 = vmor %vm7757_vm9, %vm7758_vm8  ;;  %vm7772_vm13 = vweird.f32 %v7353_v58 }
 0xada   :  { %8375 = vst [vmem:[%s15730_s18 + $0xb8] sm:$0xff] %v7750_v19  ;;  %v7754_v54 = vsub.f32 1.0, %v7753_v18  ;;  %v6427_v1 = vadd.f32 %v6426_v2, %v15016_v7  ;;  %v15302_v45 = vpop.f32.mrf.mxu3  ;;  %v15866_v7 = vld [vmem:[#allocation39_spill] sm:$0xff]  ;;  %v7778_v2 = vand.u32 2147483648, %v7353_v58 }
 0xadc   :  { %v7755_v50 = vmul.f32 %v11093_v6, %v7754_v54  ;;  %v7099_v39 = vadd.f32 %v15186_v34, %v6427_v1  ;;  %v7776_v1 = vand.u32 2147483647, %v7353_v58 }
 0xade   :  { %v11095_v46 = vpop.eup %11094  ;;  %v7756_v43 = vadd.f32 %v11093_v6, %v7755_v50  ;;  %v10461_v25 = vmul.f32 -1.442695, %v7099_v39  ;;  %6928 = vmatmul.bf16.gmra.mxu2 %v15864_v16  ;;  %vm7777_vm15 = vcmp.eq.f32.partialorder %v7776_v1, 8.507059e+37 }
 0xadf   :  { %v11097_v23 = vpop.eup %11096  ;;  %v7354_v14 = vadd.f32 1.0, %v11095_v46  ;;  %10424 = vmatmul.msk.bf16.gmra.mxu3 %vm360_vm0, %v15865_v33  ;;  %6879 = vmatmul.bf16.gmra.mxu0 %v15866_v7  ;;  %v7779_v46 = vor.u32 1.1754944e-38, %v7778_v2  ;;  %v15867_v2 = vld [vmem:[#allocation26_spill] sm:$0xff] }
 0xae0   :  { %v7760_v22 = vsel %vm7759_vm10, %v11093_v6, %v7756_v43  ;;  %v7768_v12 = vmul.f32 %v11097_v23, %v7353_v58  ;;  %11098 = vpow2.f32 %v10461_v25  ;;  %vm7773_vm12 = vweird.f32 %v11097_v23 }
 0xae1   :  { %v7765_v32 = vsel %vm7762_vm11, %v7764_v35, %v7760_v22  ;;  %11100 = vrcp.f32 %v7354_v14  ;;  %v6429_v30 = vpop.f32.mrf.mxu2  ;;  %vm7774_vm14 = vmor %vm7772_vm13, %vm7773_vm12  ;;  %v7793_v22 = vand.u32 2147483648, %v7354_v14  ;;  %vm7787_vm2 = vweird.f32 %v7354_v14 }
 0xae2   :  { %8376 = vst [vmem:[%s15730_s18 + $0xc0] sm:$0xff] %v7765_v32  ;;  %v7769_v53 = vsub.f32 1.0, %v7768_v12  ;;  %v6430_v18 = vadd.f32 %v6429_v30, %v15044_v21  ;;  %v15313_v19 = vpop.f32.mrf.mxu3  ;;  %v7791_v32 = vand.u32 2147483647, %v7354_v14 }
 0xae3   :  { %v7794_v1 = vor.u32 1.1754944e-38, %v7793_v22 }
 0xae4   :  { %v7770_v54 = vmul.f32 %v11097_v23, %v7769_v53  ;;  %v7100_v6 = vadd.f32 %v15186_v34, %v6430_v18  ;;  %vm7792_vm4 = vcmp.eq.f32.partialorder %v7791_v32, 8.507059e+37 }
 0xae6   :  { %v11099_v40 = vpop.eup %11098  ;;  %v7771_v50 = vadd.f32 %v11097_v23, %v7770_v54  ;;  %v10462_v24 = vmul.f32 -1.442695, %v7100_v6 }
 0xae7   :  { %v11101_v39 = vpop.eup %11100  ;;  %v7355_v43 = vadd.f32 1.0, %v11099_v40  ;;  %v15868_v40 = vld [vmem:[#allocation45_spill] sm:$0xff] }
 0xae8   :  { %v7775_v25 = vsel %vm7774_vm14, %v11097_v23, %v7771_v50  ;;  %v7783_v16 = vmul.f32 %v11101_v39, %v7354_v14  ;;  %11102 = vpow2.f32 %v10462_v24  ;;  %vm7788_vm1 = vweird.f32 %v11101_v39 }
 0xae9   :  { %v7780_v21 = vsel %vm7777_vm15, %v7779_v46, %v7775_v25  ;;  %11104 = vrcp.f32 %v7355_v43  ;;  %v6431_v35 = vpop.f32.mrf.mxu2  ;;  %vm7789_vm3 = vmor %vm7787_vm2, %vm7788_vm1  ;;  %vm7802_vm6 = vweird.f32 %v7355_v43 }
 0xaea   :  { %8377 = vst [vmem:[%s15730_s18 + $0xc8] sm:$0xff] %v7780_v21  ;;  %v7784_v33 = vsub.f32 1.0, %v7783_v16  ;;  %v6432_v7 = vadd.f32 %v6431_v35, %v15066_v61  ;;  %v15320_v58 = vpop.f32.mrf.mxu3  ;;  %v15869_v61 = vld [vmem:[#allocation42_spill] sm:$0xff]  ;;  %v7808_v35 = vand.u32 2147483648, %v7355_v43 }
 0xaec   :  { %v7785_v12 = vmul.f32 %v11101_v39, %v7784_v33  ;;  %v7101_v23 = vadd.f32 %v15186_v34, %v6432_v7  ;;  %v7806_v7 = vand.u32 2147483647, %v7355_v43 }
 0xaee   :  { %v11103_v30 = vpop.eup %11102  ;;  %v7786_v53 = vadd.f32 %v11101_v39, %v7785_v12  ;;  %v10463_v18 = vmul.f32 -1.442695, %v7101_v23  ;;  %6933 = vmatmul.bf16.gmra.mxu2 %v15867_v2  ;;  %vm7807_vm8 = vcmp.eq.f32.partialorder %v7806_v7, 8.507059e+37 }
 0xaef   :  { %v11105_v54 = vpop.eup %11104  ;;  %v7356_v6 = vadd.f32 1.0, %v11103_v30  ;;  %10425 = vmatmul.msk.bf16.gmra.mxu3 %vm360_vm0, %v15868_v40  ;;  %6884 = vmatmul.bf16.gmra.mxu0 %v15869_v61  ;;  %v7809_v30 = vor.u32 1.1754944e-38, %v7808_v35  ;;  %v15870_v35 = vld [vmem:[#allocation29_spill] sm:$0xff] }
 0xaf0   :  { %v7790_v50 = vsel %vm7789_vm3, %v11101_v39, %v7786_v53  ;;  %v7798_v24 = vmul.f32 %v11105_v54, %v7355_v43  ;;  %11106 = vpow2.f32 %v10463_v18  ;;  %vm7803_vm5 = vweird.f32 %v11105_v54 }
 0xaf1   :  { %v7795_v46 = vsel %vm7792_vm4, %v7794_v1, %v7790_v50  ;;  %11108 = vrcp.f32 %v7356_v6  ;;  %v6434_v25 = vpop.f32.mrf.mxu2  ;;  %vm7804_vm7 = vmor %vm7802_vm6, %vm7803_vm5  ;;  %v7823_v50 = vand.u32 2147483648, %v7356_v6  ;;  %vm7817_vm10 = vweird.f32 %v7356_v6 }
 0xaf2   :  { %8378 = vst [vmem:[%s15730_s18 + $0xd0] sm:$0xff] %v7795_v46  ;;  %v7799_v14 = vsub.f32 1.0, %v7798_v24  ;;  %v6435_v16 = vadd.f32 %v6434_v25, %v15091_v15  ;;  %v15331_v21 = vpop.f32.mrf.mxu3  ;;  %v7821_v46 = vand.u32 2147483647, %v7356_v6 }
 0xaf3   :  { %v7824_v7 = vor.u32 1.1754944e-38, %v7823_v50 }
 0xaf4   :  { %v7800_v33 = vmul.f32 %v11105_v54, %v7799_v14  ;;  %v7102_v39 = vadd.f32 %v15186_v34, %v6435_v16  ;;  %vm7822_vm12 = vcmp.eq.f32.partialorder %v7821_v46, 8.507059e+37 }
 0xaf6   :  { %v11107_v22 = vpop.eup %11106  ;;  %v7801_v12 = vadd.f32 %v11105_v54, %v7800_v33  ;;  %v10464_v32 = vmul.f32 -1.442695, %v7102_v39 }
 0xaf7   :  { %v11109_v23 = vpop.eup %11108  ;;  %v7357_v53 = vadd.f32 1.0, %v11107_v22  ;;  %v15871_v22 = vld [vmem:[#allocation47_spill] sm:$0xff] }
 0xaf8   :  { %v7805_v18 = vsel %vm7804_vm7, %v11105_v54, %v7801_v12  ;;  %v7813_v2 = vmul.f32 %v11109_v23, %v7356_v6  ;;  %11110 = vpow2.f32 %v10464_v32  ;;  %vm7818_vm9 = vweird.f32 %v11109_v23 }
 0xaf9   :  { %v7810_v15 = vsel %vm7807_vm8, %v7809_v30, %v7805_v18  ;;  %11112 = vrcp.f32 %v7357_v53  ;;  %v6436_v1 = vpop.f32.mrf.mxu2  ;;  %vm7819_vm11 = vmor %vm7817_vm10, %vm7818_vm9  ;;  %vm7832_vm14 = vweird.f32 %v7357_v53 }
 0xafa   :  { %8379 = vst [vmem:[%s15730_s18 + $0xd8] sm:$0xff] %v7810_v15  ;;  %v7814_v40 = vsub.f32 1.0, %v7813_v2  ;;  %v6437_v61 = vadd.f32 %v6436_v1, %v15113_v57  ;;  %v15338_v43 = vpop.f32.mrf.mxu3  ;;  %v7838_v15 = vand.u32 2147483648, %v7357_v53 }
 0xafc   :  { %v7815_v24 = vmul.f32 %v11109_v23, %v7814_v40  ;;  %v7103_v54 = vadd.f32 %v15186_v34, %v6437_v61  ;;  %v7836_v40 = vand.u32 2147483647, %v7357_v53 }
 0xafe   :  { %v11111_v25 = vpop.eup %11110  ;;  %v7816_v14 = vadd.f32 %v11109_v23, %v7815_v24  ;;  %v10465_v16 = vmul.f32 -1.442695, %v7103_v54  ;;  %6938 = vmatmul.bf16.gmra.mxu2 %v15870_v35  ;;  %v7839_v54 = vor.u32 1.1754944e-38, %v7838_v15  ;;  %vm7837_vm1 = vcmp.eq.f32.partialorder %v7836_v40, 8.507059e+37  ;;  %v15872_v15 = vld [vmem:[#allocation30_spill] sm:$0xff] }
 0xaff   :  { %v11113_v33 = vpop.eup %11112  ;;  %v7358_v39 = vadd.f32 1.0, %v11111_v25  ;;  %10426 = vmatmul.msk.bf16.gmra.mxu3 %vm360_vm0, %v15871_v22 }
 0xb00   :  { %v7820_v57 = vsel %vm7819_vm11, %v11109_v23, %v7816_v14  ;;  %v7828_v12 = vmul.f32 %v11113_v33, %v7357_v53  ;;  %11114 = vpow2.f32 %v10465_v16  ;;  %vm7833_vm13 = vweird.f32 %v11113_v33 }
 0xb01   :  { %v7825_v32 = vsel %vm7822_vm12, %v7824_v7, %v7820_v57  ;;  %11116 = vrcp.f32 %v7358_v39  ;;  %v6899_v30 = vpop.f32.mrf.mxu2  ;;  %vm7834_vm15 = vmor %vm7832_vm14, %vm7833_vm13  ;;  %vm7847_vm3 = vweird.f32 %v7358_v39 }
 0xb02   :  { %8380 = vst [vmem:[%s15730_s18 + $0xe0] sm:$0xff] %v7825_v32  ;;  %v7829_v6 = vsub.f32 1.0, %v7828_v12  ;;  %v6900_v18 = vadd.f32 %v6899_v30, %v15127_v3  ;;  %v6988_v2 = vpop.f32.mrf.mxu3  ;;  %v7853_v12 = vand.u32 2147483648, %v7358_v39  ;;  %v7851_v30 = vand.u32 2147483647, %v7358_v39 }
 0xb04   :  { %v7830_v1 = vmul.f32 %v11113_v33, %v7829_v6  ;;  %v6989_v61 = vadd.f32 %v6988_v2, %v6900_v18  ;;  %v7854_v40 = vor.u32 1.1754944e-38, %v7853_v12  ;;  %vm7852_vm5 = vcmp.eq.f32.partialorder %v7851_v30, 8.507059e+37 }
 0xb06   :  { %v11115_v23 = vpop.eup %11114  ;;  %v7831_v50 = vadd.f32 %v11113_v33, %v7830_v1  ;;  %v7104_v24 = vadd.f32 %v15186_v34, %v6989_v61  ;;  %v15357_v61 = vpop.f32.mrf.mxu0 }
 0xb07   :  { %v11117_v46 = vpop.eup %11116  ;;  %v7359_v25 = vadd.f32 1.0, %v11115_v23 }
 0xb08   :  { %v7835_v14 = vsel %vm7834_vm15, %v11113_v33, %v7831_v50  ;;  %v7843_v16 = vmul.f32 %v11117_v46, %v7358_v39  ;;  %v10466_v35 = vmul.f32 -1.442695, %v7104_v24  ;;  %vm7848_vm2 = vweird.f32 %v11117_v46  ;;  %v15353_v33 = vpop.f32.mrf.mxu1 }
 0xb09   :  { %v7840_v3 = vsel %vm7837_vm1, %v7839_v54, %v7835_v14  ;;  %11118 = vrcp.f32 %v7359_v25  ;;  %v6901_v7 = vpop.f32.mrf.mxu2  ;;  %vm7849_vm4 = vmor %vm7847_vm3, %vm7848_vm2  ;;  %vm7862_vm7 = vweird.f32 %v7359_v25 }
 0xb0a   :  { %8381 = vst [vmem:[%s15730_s18 + $0xe8] sm:$0xff] %v7840_v3  ;;  %v7844_v22 = vsub.f32 1.0, %v7843_v16  ;;  %11120 = vpow2.f32 %v10466_v35  ;;  %v6902_v53 = vadd.f32 %v6901_v7, %v15146_v55  ;;  %v6990_v57 = vpop.f32.mrf.mxu3  ;;  %v15873_v55 = vld [vmem:[#allocation48_spill] sm:$0xff] }
 0xb0c   :  { %v7845_v32 = vmul.f32 %v11117_v46, %v7844_v22  ;;  %v6991_v6 = vadd.f32 %v6990_v57, %v6902_v53  ;;  %v7868_v22 = vand.u32 2147483648, %v7359_v25 }
 0xb0e   :  { %v7846_v18 = vadd.f32 %v11117_v46, %v7845_v32  ;;  %v7105_v2 = vadd.f32 %v15186_v34, %v6991_v6  ;;  %6943 = vmatmul.bf16.gmra.mxu2 %v15872_v15  ;;  %v7869_v6 = vor.u32 1.1754944e-38, %v7868_v22  ;;  %v15874_v22 = vld [vmem:[#allocation32_spill] sm:$0xff] }
 0xb0f   :  { %v11119_v1 = vpop.eup %11118  ;;  %10427 = vmatmul.msk.bf16.gmra.mxu3 %vm360_vm0, %v15873_v55  ;;  %v15368_v55 = vpop.f32.mrf.mxu0 }
 0xb10   :  { %v11121_v23 = vpop.eup %11120  ;;  %v7850_v50 = vsel %vm7849_vm4, %v11117_v46, %v7846_v18  ;;  %v7858_v24 = vmul.f32 %v11119_v1, %v7359_v25  ;;  %v10467_v54 = vmul.f32 -1.442695, %v7105_v2  ;;  %vm7863_vm6 = vweird.f32 %v11119_v1  ;;  %v15365_v32 = vpop.f32.mrf.mxu1 }
 0xb11   :  { %v7855_v14 = vsel %vm7852_vm5, %v7854_v40, %v7850_v50  ;;  %v7360_v16 = vadd.f32 1.0, %v11121_v23  ;;  %v6904_v39 = vpop.f32.mrf.mxu2  ;;  %v7866_v46 = vand.u32 2147483647, %v7359_v25  ;;  %vm7864_vm8 = vmor %vm7862_vm7, %vm7863_vm6 }
 0xb12   :  { %8382 = vst [vmem:[%s15730_s18 + $0xf0] sm:$0xff] %v7855_v14  ;;  %v7859_v35 = vsub.f32 1.0, %v7858_v24  ;;  %11122 = vpow2.f32 %v10467_v54  ;;  %v6905_v3 = vadd.f32 %v6904_v39, %v15162_v51  ;;  %v6993_v7 = vpop.f32.mrf.mxu3 }
 0xb13   :  { %11124 = vrcp.f32 %v7360_v16  ;;  %vm7867_vm9 = vcmp.eq.f32.partialorder %v7866_v46, 8.507059e+37  ;;  %v7883_v39 = vand.u32 2147483648, %v7360_v16  ;;  %vm7877_vm11 = vweird.f32 %v7360_v16 }
 0xb14   :  { %v7860_v53 = vmul.f32 %v11119_v1, %v7859_v35  ;;  %v6994_v57 = vadd.f32 %v6993_v7, %v6905_v3  ;;  %v7881_v3 = vand.u32 2147483647, %v7360_v16 }
 0xb16   :  { %v7861_v12 = vadd.f32 %v11119_v1, %v7860_v53  ;;  %v7106_v30 = vadd.f32 %v15186_v34, %v6994_v57  ;;  %vm7882_vm13 = vcmp.eq.f32.partialorder %v7881_v3, 8.507059e+37 }
 0xb18   :  { %v11123_v18 = vpop.eup %11122  ;;  %v7865_v2 = vsel %vm7864_vm8, %v11119_v1, %v7861_v12  ;;  %v10468_v15 = vmul.f32 -1.442695, %v7106_v30  ;;  %v15378_v57 = vpop.f32.mrf.mxu1  ;;  %v7884_v30 = vor.u32 1.1754944e-38, %v7883_v39 }
 0xb19   :  { %v11125_v51 = vpop.eup %11124  ;;  %v7870_v40 = vsel %vm7867_vm9, %v7869_v6, %v7865_v2  ;;  %v7361_v23 = vadd.f32 1.0, %v11123_v18  ;;  %v6906_v50 = vpop.f32.mrf.mxu2 }
 0xb1a   :  { %8383 = vst [vmem:[%s15730_s18 + $0xf8] sm:$0xff] %v7870_v40  ;;  %v7873_v25 = vmul.f32 %v11125_v51, %v7360_v16  ;;  %11126 = vpow2.f32 %v10468_v15  ;;  %v6907_v24 = vadd.f32 %v6906_v50, %v15189_v62  ;;  %v6995_v54 = vpop.f32.mrf.mxu3  ;;  %vm7878_vm10 = vweird.f32 %v11125_v51 }
 0xb1b   :  { %11128 = vrcp.f32 %v7361_v23  ;;  %vm7879_vm12 = vmor %vm7877_vm11, %vm7878_vm10  ;;  %vm7892_vm15 = vweird.f32 %v7361_v23 }
 0xb1c   :  { %v7874_v14 = vsub.f32 1.0, %v7873_v25  ;;  %v6996_v1 = vadd.f32 %v6995_v54, %v6907_v24  ;;  %v15380_v25 = vpop.f32.mrf.mxu0  ;;  %v7898_v24 = vand.u32 2147483648, %v7361_v23 }
 0xb1e   :  { %v7875_v35 = vmul.f32 %v11125_v51, %v7874_v14  ;;  %v7107_v7 = vadd.f32 %v15186_v34, %v6996_v1  ;;  %6948 = vmatmul.bf16.gmra.mxu2 %v15874_v22  ;;  %v7896_v14 = vand.u32 2147483647, %v7361_v23 }
 0xb1f   :  { %10428 = vmatmul.msk.bf16.gmra.mxu3 %vm360_vm0, %v14829_v44 }
 0xb20   :  { %v11127_v53 = vpop.eup %11126  ;;  %v7876_v46 = vadd.f32 %v11125_v51, %v7875_v35  ;;  %v10469_v62 = vmul.f32 -1.442695, %v7107_v7  ;;  %v7899_v7 = vor.u32 1.1754944e-38, %v7898_v24  ;;  %vm7897_vm2 = vcmp.eq.f32.partialorder %v7896_v14, 8.507059e+37 }
 0xb21   :  { %v11129_v12 = vpop.eup %11128  ;;  %v7362_v6 = vadd.f32 1.0, %v11127_v53  ;;  %v6909_v18 = vpop.f32.mrf.mxu2 }
 0xb22   :  { %v7880_v2 = vsel %vm7879_vm12, %v11125_v51, %v7876_v46  ;;  %v7888_v15 = vmul.f32 %v11129_v12, %v7361_v23  ;;  %11130 = vpow2.f32 %v10469_v62  ;;  %v6998_v40 = vpop.f32.mrf.mxu3  ;;  %v6910_v16 = vadd.f32 %v6909_v18, %v15206_v56  ;;  %v15387_v62 = vpop.f32.mrf.mxu1 }
 0xb23   :  { %v7885_v50 = vsel %vm7882_vm13, %v7884_v30, %v7880_v2  ;;  %11132 = vrcp.f32 %v7362_v6  ;;  %vm7893_vm14 = vweird.f32 %v11129_v12  ;;  %vm7907_vm4 = vweird.f32 %v7362_v6 }
 0xb24   :  { %8384 = vst [vmem:[%s15730_s18 + $0x100] sm:$0xff] %v7885_v50  ;;  %v7889_v44 = vsub.f32 1.0, %v7888_v15  ;;  %v6999_v51 = vadd.f32 %v6998_v40, %v6910_v16  ;;  %vm7894_vm1 = vmor %vm7892_vm15, %vm7893_vm14  ;;  %v15393_v15 = vpop.f32.mrf.mxu0  ;;  %v7913_v40 = vand.u32 2147483648, %v7362_v6  ;;  %v7911_v50 = vand.u32 2147483647, %v7362_v6  ;;  %v15875_v16 = vld [vmem:[#allocation35_spill] sm:$0xff] }
 0xb26   :  { %v7890_v54 = vmul.f32 %v11129_v12, %v7889_v44  ;;  %v7108_v35 = vadd.f32 %v15186_v34, %v6999_v51  ;;  %v7914_v51 = vor.u32 1.1754944e-38, %v7913_v40  ;;  %vm7912_vm6 = vcmp.eq.f32.partialorder %v7911_v50, 8.507059e+37 }
 0xb28   :  { %v11131_v1 = vpop.eup %11130  ;;  %v7891_v39 = vadd.f32 %v11129_v12, %v7890_v54  ;;  %v10470_v30 = vmul.f32 -1.442695, %v7108_v35  ;;  %v15401_v54 = vld [vmem:[%s15729_s17] ss:$0 sm:$0xff] }
 0xb29   :  { %v11133_v3 = vpop.eup %11132  ;;  %v7363_v22 = vadd.f32 1.0, %v11131_v1  ;;  %v6911_v53 = vpop.f32.mrf.mxu2 }
 0xb2a   :  { %v7895_v46 = vsel %vm7894_vm1, %v11129_v12, %v7891_v39  ;;  %v7903_v56 = vmul.f32 %v11133_v3, %v7362_v6  ;;  %v7000_v18 = vpop.f32.mrf.mxu3  ;;  %v6912_v34 = vadd.f32 %v6911_v53, %v15228_v42  ;;  %vm7908_vm3 = vweird.f32 %v11133_v3 }
 0xb2b   :  { %v7900_v2 = vsel %vm7897_vm2, %v7899_v7, %v7895_v46  ;;  %11134 = vrcp.f32 %v7363_v22  ;;  %vm7909_vm5 = vmor %vm7907_vm4, %vm7908_vm3  ;;  %vm7922_vm8 = vweird.f32 %v7363_v22 }
 0xb2c   :  { %8385 = vst [vmem:[%s15730_s18 + $0x108] sm:$0xff] %v7900_v2  ;;  %v7904_v23 = vsub.f32 1.0, %v7903_v56  ;;  %11136 = vpow2.f32 %v10470_v30  ;;  %v7001_v44 = vadd.f32 %v7000_v18, %v6912_v34  ;;  %v15408_v30 = vpop.f32.mrf.mxu1  ;;  %v7928_v2 = vand.u32 2147483648, %v7363_v22  ;;  %v15410_v40 = vpop.f32.mrf.mxu0 }
 0xb2e   :  { %v7905_v12 = vmul.f32 %v11133_v3, %v7904_v23  ;;  %6953 = vmatmul.bf16.gmra.mxu2 %v15875_v16  ;;  %v7109_v42 = vadd.f32 %v15401_v54, %v7001_v44  ;;  %v7929_v50 = vor.u32 1.1754944e-38, %v7928_v2 }
 0xb2f   :  { %10429 = vmatmul.msk.bf16.gmra.mxu3 %vm360_vm0, %v14879_v8 }
 0xb30   :  { %v7906_v24 = vadd.f32 %v11133_v3, %v7905_v12  ;;  %v10471_v53 = vmul.f32 -1.442695, %v7109_v42 }
 0xb31   :  { %v11135_v14 = vpop.eup %11134  ;;  %v6914_v1 = vpop.f32.mrf.mxu2 }
 0xb32   :  { %v11137_v39 = vpop.eup %11136  ;;  %v7910_v35 = vsel %vm7909_vm5, %v11133_v3, %v7906_v24  ;;  %v7918_v7 = vmul.f32 %v11135_v14, %v7363_v22  ;;  %v7003_v46 = vpop.f32.mrf.mxu3  ;;  %v6915_v6 = vadd.f32 %v6914_v1, %v15242_v60  ;;  %11138 = vpow2.f32 %v10471_v53 }
 0xb33   :  { %v7915_v8 = vsel %vm7912_vm6, %v7914_v51, %v7910_v35  ;;  %v7364_v56 = vadd.f32 1.0, %v11137_v39  ;;  %vm7923_vm7 = vweird.f32 %v11135_v14  ;;  %v7926_v3 = vand.u32 2147483647, %v7363_v22 }
 0xb34   :  { %8386 = vst [vmem:[%s15730_s18 + $0x110] sm:$0xff] %v7915_v8  ;;  %v7919_v18 = vsub.f32 1.0, %v7918_v7  ;;  %v7004_v34 = vadd.f32 %v7003_v46, %v6915_v6  ;;  %vm7924_vm9 = vmor %vm7922_vm8, %vm7923_vm7  ;;  %v6742_v46 = vadd.f32 %v15353_v33, %v14957_v10  ;;  %v15876_v6 = vld [vmem:[#allocation38_spill] sm:$0xff] }
 0xb35   :  { %11140 = vrcp.f32 %v7364_v56  ;;  %vm7927_vm10 = vcmp.eq.f32.partialorder %v7926_v3, 8.507059e+37  ;;  %v7943_v2 = vand.u32 2147483648, %v7364_v56  ;;  %v7941_v3 = vand.u32 2147483647, %v7364_v56 }
 0xb36   :  { %v7920_v23 = vmul.f32 %v11135_v14, %v7919_v18  ;;  %v7110_v60 = vadd.f32 %v15401_v54, %v7004_v34  ;;  %v6831_v18 = vadd.f32 %v15357_v61, %v6742_v46  ;;  %vm7937_vm12 = vweird.f32 %v7364_v56 }
 0xb37   :  { %v7944_v61 = vor.u32 1.1754944e-38, %v7943_v2  ;;  %vm7942_vm14 = vcmp.eq.f32.partialorder %v7941_v3, 8.507059e+37 }
 0xb38   :  { %v7921_v12 = vadd.f32 %v11135_v14, %v7920_v23  ;;  %v11139_v16 = vpop.eup %11138  ;;  %v10472_v42 = vmul.f32 -1.442695, %v7110_v60 }
 0xb39   :  { %v6916_v44 = vpop.f32.mrf.mxu2  ;;  %v7365_v7 = vadd.f32 1.0, %v11139_v16 }
 0xb3a   :  { %v7925_v24 = vsel %vm7924_vm9, %v11135_v14, %v7921_v12  ;;  %v6917_v51 = vadd.f32 %v6916_v44, %v15258_v5  ;;  %v7005_v1 = vpop.f32.mrf.mxu3  ;;  %11142 = vpow2.f32 %v10472_v42  ;;  %v15419_v14 = vpop.f32.mrf.mxu1 }
 0xb3b   :  { %v11141_v39 = vpop.eup %11140  ;;  %v7930_v35 = vsel %vm7927_vm10, %v7929_v50, %v7925_v24  ;;  %11144 = vrcp.f32 %v7365_v7  ;;  %v15426_v12 = vpop.f32.mrf.mxu0  ;;  %v7958_v46 = vand.u32 2147483648, %v7365_v7  ;;  %vm7952_vm1 = vweird.f32 %v7365_v7 }
 0xb3c   :  { %8387 = vst [vmem:[%s15730_s18 + $0x118] sm:$0xff] %v7930_v35  ;;  %v7933_v22 = vmul.f32 %v11141_v39, %v7364_v56  ;;  %v7006_v53 = vadd.f32 %v7005_v1, %v6917_v51  ;;  %vm7938_vm11 = vweird.f32 %v11141_v39  ;;  %v6744_v1 = vadd.f32 %v15365_v32, %v14983_v63 }
 0xb3d   :  { %vm7939_vm13 = vmor %vm7937_vm12, %vm7938_vm11 }
 0xb3e   :  { %v7934_v8 = vsub.f32 1.0, %v7933_v22  ;;  %v7111_v5 = vadd.f32 %v15401_v54, %v7006_v53  ;;  %6958 = vmatmul.bf16.gmra.mxu2 %v15876_v6  ;;  %v6833_v53 = vadd.f32 %v15368_v55, %v6744_v1  ;;  %v7956_v6 = vand.u32 2147483647, %v7365_v7 }
 0xb3f   :  { %10430 = vmatmul.msk.bf16.gmra.mxu3 %vm360_vm0, %v14932_v59  ;;  %v7959_v55 = vor.u32 1.1754944e-38, %v7958_v46 }
 0xb40   :  { %v7935_v23 = vmul.f32 %v11141_v39, %v7934_v8  ;;  %v10473_v34 = vmul.f32 -1.442695, %v7111_v5  ;;  %v11143_v33 = vpop.eup %11142  ;;  %vm7957_vm3 = vcmp.eq.f32.partialorder %v7956_v6, 8.507059e+37 }
 0xb41   :  { %v6919_v10 = vpop.f32.mrf.mxu2  ;;  %v11145_v16 = vpop.eup %11144  ;;  %v15428_v24 = vadd.f32 1.0, %v11143_v33 }
 0xb42   :  { %v7936_v60 = vadd.f32 %v11141_v39, %v7935_v23  ;;  %11146 = vpow2.f32 %v10473_v34  ;;  %v6920_v50 = vadd.f32 %v6919_v10, %v6831_v18  ;;  %v7008_v44 = vpop.f32.mrf.mxu3  ;;  %v7948_v59 = vmul.f32 %v11145_v16, %v7365_v7  ;;  %v15438_v8 = vpop.f32.mrf.mxu1 }
 0xb43   :  { %11148 = vrcp.f32 %v15428_v24  ;;  %vm7953_vm15 = vweird.f32 %v11145_v16  ;;  %v15442_v10 = vpop.f32.mrf.mxu0  ;;  %vm7967_vm5 = vweird.f32 %v15428_v24 }
 0xb44   :  { %v7940_v42 = vsel %vm7939_vm13, %v11141_v39, %v7936_v60  ;;  %v7009_v51 = vadd.f32 %v7008_v44, %v6920_v50  ;;  %v7949_v56 = vsub.f32 1.0, %v7948_v59  ;;  %vm7954_vm2 = vmor %vm7952_vm1, %vm7953_vm15  ;;  %v6747_v59 = vadd.f32 %v15378_v57, %v15010_v11 }
 0xb45   :  { %v7945_v35 = vsel %vm7942_vm14, %v7944_v61, %v7940_v42  ;;  %v15877_v42 = vld [vmem:[#allocation41_spill] sm:$0xff] }
 0xb46   :  { %8388 = vst [vmem:[%s15730_s18 + $0x120] sm:$0xff] %v7945_v35  ;;  %v7112_v22 = vadd.f32 %v15401_v54, %v7009_v51  ;;  %v7950_v5 = vmul.f32 %v11145_v16, %v7949_v56  ;;  %v7973_v51 = vand.u32 2147483648, %v15428_v24  ;;  %v7971_v35 = vand.u32 2147483647, %v15428_v24 }
 0xb48   :  { %v11147_v39 = vpop.eup %11146  ;;  %v10474_v63 = vmul.f32 -1.442695, %v7112_v22  ;;  %v7951_v2 = vadd.f32 %v11145_v16, %v7950_v5  ;;  %v7974_v6 = vor.u32 1.1754944e-38, %v7973_v51  ;;  %vm7972_vm7 = vcmp.eq.f32.partialorder %v7971_v35, 8.507059e+37 }
 0xb49   :  { %v15440_v32 = vadd.f32 1.0, %v11147_v39  ;;  %v6921_v18 = vpop.f32.mrf.mxu2  ;;  %v11149_v34 = vpop.eup %11148 }
 0xb4a   :  { %11150 = vpow2.f32 %v10474_v63  ;;  %v6922_v23 = vadd.f32 %v6921_v18, %v6833_v53  ;;  %v7010_v3 = vpop.f32.mrf.mxu3  ;;  %v7955_v33 = vsel %vm7954_vm2, %v11145_v16, %v7951_v2  ;;  %v7963_v60 = vmul.f32 %v11149_v34, %v15428_v24  ;;  %v15460_v5 = vpop.f32.mrf.mxu1 }
 0xb4b   :  { %11152 = vrcp.f32 %v15440_v32  ;;  %v7960_v44 = vsel %vm7957_vm3, %v7959_v55, %v7955_v33  ;;  %vm7968_vm4 = vweird.f32 %v11149_v34  ;;  %v6836_v53 = vadd.f32 %v15380_v25, %v6747_v59  ;;  %v15465_v2 = vpop.f32.mrf.mxu0 }
 0xb4c   :  { %v7011_v50 = vadd.f32 %v7010_v3, %v6922_v23  ;;  %8389 = vst [vmem:[%s15730_s18 + $0x128] sm:$0xff] %v7960_v44  ;;  %v7964_v7 = vsub.f32 1.0, %v7963_v60  ;;  %vm7969_vm6 = vmor %vm7967_vm5, %vm7968_vm4  ;;  %v7988_v3 = vand.u32 2147483648, %v15440_v32  ;;  %v7986_v55 = vand.u32 2147483647, %v15440_v32 }
 0xb4d   :  { %vm7982_vm9 = vweird.f32 %v15440_v32 }
 0xb4e   :  { %v7113_v61 = vadd.f32 %v15401_v54, %v7011_v50  ;;  %6963 = vmatmul.bf16.gmra.mxu2 %v15877_v42  ;;  %v7965_v1 = vmul.f32 %v11149_v34, %v7964_v7  ;;  %v7989_v42 = vor.u32 1.1754944e-38, %v7988_v3  ;;  %vm7987_vm11 = vcmp.eq.f32.partialorder %v7986_v55, 8.507059e+37 }
 0xb4f   :  { %10431 = vmatmul.msk.bf16.gmra.mxu3 %vm360_vm0, %v14985_v31 }
 0xb50   :  { %v11151_v16 = vpop.eup %11150  ;;  %v10475_v56 = vmul.f32 -1.442695, %v7113_v61  ;;  %v7966_v11 = vadd.f32 %v11149_v34, %v7965_v1 }
 0xb51   :  { %v11153_v22 = vpop.eup %11152  ;;  %v15458_v46 = vadd.f32 1.0, %v11151_v16  ;;  %v6924_v39 = vpop.f32.mrf.mxu2 }
 0xb52   :  { %v7978_v57 = vmul.f32 %v11153_v22, %v15440_v32  ;;  %11154 = vpow2.f32 %v10475_v56  ;;  %v7013_v31 = vpop.f32.mrf.mxu3  ;;  %v7970_v63 = vsel %vm7969_vm6, %v11149_v34, %v7966_v11  ;;  %v6925_v25 = vadd.f32 %v6924_v39, %v6836_v53 }
 0xb53   :  { %11156 = vrcp.f32 %v15458_v46  ;;  %v7975_v23 = vsel %vm7972_vm7, %v7974_v6, %v7970_v63  ;;  %vm7983_vm8 = vweird.f32 %v11153_v22  ;;  %v6749_v34 = vadd.f32 %v15387_v62, %v15036_v48  ;;  %v15478_v62 = vpop.f32.mrf.mxu1  ;;  %v15488_v6 = vpop.f32.mrf.mxu0 }
 0xb54   :  { %v7979_v18 = vsub.f32 1.0, %v7978_v57  ;;  %8390 = vst [vmem:[%s15730_s18 + $0x130] sm:$0xff] %v7975_v23  ;;  %v7014_v33 = vadd.f32 %v7013_v31, %v6925_v25  ;;  %vm7984_vm10 = vmor %vm7982_vm9, %vm7983_vm8  ;;  %v8003_v53 = vand.u32 2147483648, %v15458_v46  ;;  %v15878_v57 = vld [vmem:[#allocation44_spill] sm:$0xff]  ;;  %v6752_v31 = vadd.f32 %v15408_v30, %v15060_v26 }
 0xb55   :  { %v6838_v61 = vadd.f32 %v15393_v15, %v6749_v34  ;;  %vm7997_vm13 = vweird.f32 %v15458_v46 }
 0xb56   :  { %v7980_v24 = vmul.f32 %v11153_v22, %v7979_v18  ;;  %v7114_v44 = vadd.f32 %v15401_v54, %v7014_v33  ;;  %v6841_v23 = vadd.f32 %v15410_v40, %v6752_v31  ;;  %v8004_v3 = vor.u32 1.1754944e-38, %v8003_v53 }
 0xb57   :  { %v6754_v40 = vadd.f32 %v15419_v14, %v15083_v9  ;;  %v6757_v31 = vadd.f32 %v15438_v8, %v15107_v36 }
 0xb58   :  { %v11155_v60 = vpop.eup %11154  ;;  %v7981_v50 = vadd.f32 %v11153_v22, %v7980_v24  ;;  %v10476_v35 = vmul.f32 -1.442695, %v7114_v44 }
 0xb59   :  { %v11157_v7 = vpop.eup %11156  ;;  %v7369_v59 = vadd.f32 1.0, %v11155_v60  ;;  %v6926_v51 = vpop.f32.mrf.mxu2 }
 0xb5a   :  { %v7985_v16 = vsel %vm7984_vm10, %v11153_v22, %v7981_v50  ;;  %v7993_v1 = vmul.f32 %v11157_v7, %v15458_v46  ;;  %v7015_v56 = vpop.f32.mrf.mxu3  ;;  %v6927_v15 = vadd.f32 %v6926_v51, %v6838_v61  ;;  %vm7998_vm12 = vweird.f32 %v11157_v7 }
 0xb5b   :  { %v7990_v48 = vsel %vm7987_vm11, %v7989_v42, %v7985_v16  ;;  %11158 = vrcp.f32 %v7369_v59  ;;  %v8001_v22 = vand.u32 2147483647, %v15458_v46  ;;  %vm7999_vm14 = vmor %vm7997_vm13, %vm7998_vm12  ;;  %v8018_v44 = vand.u32 2147483648, %v7369_v59  ;;  %v15500_v61 = vpop.f32.mrf.mxu1 }
 0xb5c   :  { %8391 = vst [vmem:[%s15730_s18 + $0x138] sm:$0xff] %v7990_v48  ;;  %v7994_v32 = vsub.f32 1.0, %v7993_v1  ;;  %11160 = vpow2.f32 %v10476_v35  ;;  %v7016_v11 = vadd.f32 %v7015_v56, %v6927_v15  ;;  %v8016_v42 = vand.u32 2147483647, %v7369_v59  ;;  %v15504_v56 = vpop.f32.mrf.mxu0 }
 0xb5d   :  { %vm8002_vm15 = vcmp.eq.f32.partialorder %v8001_v22, 8.507059e+37  ;;  %v6843_v16 = vadd.f32 %v15426_v12, %v6754_v40  ;;  %vm8012_vm2 = vweird.f32 %v7369_v59  ;;  %v8019_v48 = vor.u32 1.1754944e-38, %v8018_v44 }
 0xb5e   :  { %v7995_v39 = vmul.f32 %v11157_v7, %v7994_v32  ;;  %6968 = vmatmul.bf16.gmra.mxu2 %v15878_v57  ;;  %v7115_v18 = vadd.f32 %v15401_v54, %v7016_v11  ;;  %vm8017_vm4 = vcmp.eq.f32.partialorder %v8016_v42, 8.507059e+37  ;;  %v6759_v42 = vadd.f32 %v15460_v5, %v15121_v29 }
 0xb5f   :  { %10432 = vmatmul.msk.bf16.gmra.mxu3 %vm360_vm0, %v15038_v28 }
 0xb60   :  { %v7996_v63 = vadd.f32 %v11157_v7, %v7995_v39  ;;  %v10477_v30 = vmul.f32 -1.442695, %v7115_v18 }
 0xb61   :  { %v11159_v25 = vpop.eup %11158  ;;  %v6929_v24 = vpop.f32.mrf.mxu2 }
 0xb62   :  { %v11161_v55 = vpop.eup %11160  ;;  %v8000_v33 = vsel %vm7999_vm14, %v11157_v7, %v7996_v63  ;;  %v8008_v26 = vmul.f32 %v11159_v25, %v7369_v59  ;;  %v7018_v34 = vpop.f32.mrf.mxu3  ;;  %v6930_v28 = vadd.f32 %v6929_v24, %v6841_v23  ;;  %11162 = vpow2.f32 %v10477_v30 }
 0xb63   :  { %v8005_v60 = vsel %vm8002_vm15, %v8004_v3, %v8000_v33  ;;  %v7370_v50 = vadd.f32 1.0, %v11161_v55  ;;  %vm8013_vm1 = vweird.f32 %v11159_v25  ;;  %v6846_v23 = vadd.f32 %v15442_v10, %v6757_v31  ;;  %v15516_v24 = vpop.f32.mrf.mxu1 }
 0xb64   :  { %8392 = vst [vmem:[%s15730_s18 + $0x140] sm:$0xff] %v8005_v60  ;;  %v8009_v46 = vsub.f32 1.0, %v8008_v26  ;;  %v7019_v51 = vadd.f32 %v7018_v34, %v6930_v28  ;;  %vm8014_vm3 = vmor %vm8012_vm2, %vm8013_vm1 }
 0xb65   :  { %11164 = vrcp.f32 %v7370_v50  ;;  %v8033_v3 = vand.u32 2147483648, %v7370_v50  ;;  %v8031_v33 = vand.u32 2147483647, %v7370_v50  ;;  %vm8027_vm6 = vweird.f32 %v7370_v50 }
 0xb66   :  { %v8010_v7 = vmul.f32 %v11159_v25, %v8009_v46  ;;  %v7116_v35 = vadd.f32 %v15401_v54, %v7019_v51  ;;  %v15518_v46 = vpop.f32.mrf.mxu0 }
 0xb67   :  { %v8034_v10 = vor.u32 1.1754944e-38, %v8033_v3 }
 0xb68   :  { %v8011_v1 = vadd.f32 %v11159_v25, %v8010_v7  ;;  %v11163_v9 = vpop.eup %11162  ;;  %v10478_v15 = vmul.f32 -1.442695, %v7116_v35 }
 0xb69   :  { %v6931_v32 = vpop.f32.mrf.mxu2  ;;  %v7371_v57 = vadd.f32 1.0, %v11163_v9 }
 0xb6a   :  { %v8015_v14 = vsel %vm8014_vm3, %v11159_v25, %v8011_v1  ;;  %v6932_v53 = vadd.f32 %v6931_v32, %v6843_v16  ;;  %v7020_v39 = vpop.f32.mrf.mxu3  ;;  %11166 = vpow2.f32 %v10478_v15  ;;  %v15879_v25 = vld [vmem:[#allocation46_spill] sm:$0xff]  ;;  %v6848_v1 = vadd.f32 %v15465_v2, %v6759_v42 }
 0xb6b   :  { %v11165_v22 = vpop.eup %11164  ;;  %v8020_v11 = vsel %vm8017_vm4, %v8019_v48, %v8015_v14  ;;  %11168 = vrcp.f32 %v7371_v57  ;;  %v8048_v35 = vand.u32 2147483648, %v7371_v57  ;;  %v8046_v9 = vand.u32 2147483647, %v7371_v57  ;;  %v15529_v5 = vpop.f32.mrf.mxu1 }
 0xb6c   :  { %8393 = vst [vmem:[%s15730_s18 + $0x148] sm:$0xff] %v8020_v11  ;;  %v8023_v12 = vmul.f32 %v11165_v22, %v7370_v50  ;;  %v7021_v59 = vadd.f32 %v7020_v39, %v6932_v53  ;;  %vm8028_vm5 = vweird.f32 %v11165_v22  ;;  %vm8042_vm9 = vweird.f32 %v7371_v57 }
 0xb6d   :  { %vm8029_vm7 = vmor %vm8027_vm6, %vm8028_vm5  ;;  %vm8047_vm11 = vcmp.eq.f32.partialorder %v8046_v9, 8.507059e+37 }
 0xb6e   :  { %v8024_v63 = vsub.f32 1.0, %v8023_v12  ;;  %v7117_v18 = vadd.f32 %v15401_v54, %v7021_v59  ;;  %6973 = vmatmul.bf16.gmra.mxu2 %v15879_v25  ;;  %v8049_v12 = vor.u32 1.1754944e-38, %v8048_v35 }
 0xb6f   :  { %10433 = vmatmul.msk.bf16.gmra.mxu3 %vm360_vm0, %v15085_v38  ;;  %vm8032_vm0 = vcmp.eq.f32.partialorder %v8031_v33, 8.507059e+37 }
 0xb70   :  { %v8025_v55 = vmul.f32 %v11165_v22, %v8024_v63  ;;  %v10479_v26 = vmul.f32 -1.442695, %v7117_v18  ;;  %v11167_v36 = vpop.eup %11166  ;;  %v15532_v63 = vpop.f32.mrf.mxu0 }
 0xb71   :  { %v6934_v30 = vpop.f32.mrf.mxu2  ;;  %v11169_v28 = vpop.eup %11168  ;;  %v7372_v40 = vadd.f32 1.0, %v11167_v36 }
 0xb72   :  { %v8026_v8 = vadd.f32 %v11165_v22, %v8025_v55  ;;  %11170 = vpow2.f32 %v10479_v26  ;;  %v6935_v34 = vadd.f32 %v6934_v30, %v6846_v23  ;;  %v7023_v60 = vpop.f32.mrf.mxu3  ;;  %v8038_v44 = vmul.f32 %v11169_v28, %v7371_v57 }
 0xb73   :  { %11172 = vrcp.f32 %v7372_v40  ;;  %vm8043_vm8 = vweird.f32 %v11169_v28  ;;  %v6762_v23 = vadd.f32 %v15478_v62, %v15142_v0  ;;  %v8063_v3 = vand.u32 2147483648, %v7372_v40  ;;  %v15545_v62 = vpop.f32.mrf.mxu1 }
 0xb74   :  { %v8030_v38 = vsel %vm8029_vm7, %v11165_v22, %v8026_v8  ;;  %v7024_v7 = vadd.f32 %v7023_v60, %v6935_v34  ;;  %v8039_v50 = vsub.f32 1.0, %v8038_v44  ;;  %vm8044_vm10 = vmor %vm8042_vm9, %vm8043_vm8  ;;  %v8061_v26 = vand.u32 2147483647, %v7372_v40 }
 0xb75   :  { %v8035_v51 = vsel %vm8032_vm0, %v8034_v10, %v8030_v38  ;;  %v6851_v8 = vadd.f32 %v15488_v6, %v6762_v23  ;;  %vm8057_vm13 = vweird.f32 %v7372_v40  ;;  %v8064_v0 = vor.u32 1.1754944e-38, %v8063_v3 }
 0xb76   :  { %8394 = vst [vmem:[%s15730_s18 + $0x150] sm:$0xff] %v8035_v51  ;;  %v7118_v16 = vadd.f32 %v15401_v54, %v7024_v7  ;;  %v8040_v32 = vmul.f32 %v11169_v28, %v8039_v50  ;;  %vm8062_vm15 = vcmp.eq.f32.partialorder %v8061_v26, 8.507059e+37  ;;  %v6767_v23 = vadd.f32 %v15516_v24, %v15178_v41 }
 0xb78   :  { %v11171_v48 = vpop.eup %11170  ;;  %v10480_v14 = vmul.f32 -1.442695, %v7118_v16  ;;  %v8041_v53 = vadd.f32 %v11169_v28, %v8040_v32  ;;  %v15554_v35 = vpop.f32.mrf.mxu0  ;;  %v6856_v26 = vadd.f32 %v15518_v46, %v6767_v23  ;;  %v6769_v46 = vadd.f32 %v15529_v5, %v15200_v52 }
 0xb79   :  { %v15527_v15 = vadd.f32 1.0, %v11171_v48  ;;  %v6936_v29 = vpop.f32.mrf.mxu2  ;;  %v11173_v11 = vpop.eup %11172 }
 0xb7a   :  { %11174 = vpow2.f32 %v10480_v14  ;;  %v6937_v39 = vadd.f32 %v6936_v29, %v6848_v1  ;;  %v7025_v22 = vpop.f32.mrf.mxu3  ;;  %v8045_v2 = vsel %vm8044_vm10, %v11169_v28, %v8041_v53  ;;  %v8053_v59 = vmul.f32 %v11173_v11, %v7372_v40 }
 0xb7b   :  { %11176 = vrcp.f32 %v15527_v15  ;;  %v8050_v18 = vsel %vm8047_vm11, %v8049_v12, %v8045_v2  ;;  %vm8058_vm12 = vweird.f32 %v11173_v11  ;;  %v8078_v51 = vand.u32 2147483648, %v15527_v15 }
 0xb7c   :  { %v7026_v31 = vadd.f32 %v7025_v22, %v6937_v39  ;;  %8395 = vst [vmem:[%s15730_s18 + $0x158] sm:$0xff] %v8050_v18  ;;  %v8054_v57 = vsub.f32 1.0, %v8053_v59  ;;  %vm8059_vm14 = vmor %vm8057_vm13, %vm8058_vm12  ;;  %v8076_v50 = vand.u32 2147483647, %v15527_v15  ;;  %v6764_v1 = vadd.f32 %v15500_v61, %v15156_v49 }
 0xb7d   :  { %vm8072_vm2 = vweird.f32 %v15527_v15  ;;  %v8079_v53 = vor.u32 1.1754944e-38, %v8078_v51 }
 0xb7e   :  { %v7119_v25 = vadd.f32 %v15401_v54, %v7026_v31  ;;  %v8055_v33 = vmul.f32 %v11173_v11, %v8054_v57  ;;  %v6853_v29 = vadd.f32 %v15504_v56, %v6764_v1  ;;  %vm8077_vm4 = vcmp.eq.f32.partialorder %v8076_v50, 8.507059e+37  ;;  %v15564_v31 = vpop.f32.mrf.mxu1 }
 0xb80   :  { %v11175_v55 = vpop.eup %11174  ;;  %v10481_v30 = vmul.f32 -1.442695, %v7119_v25  ;;  %v8056_v28 = vadd.f32 %v11173_v11, %v8055_v33 }
 0xb81   :  { %v11177_v36 = vpop.eup %11176  ;;  %v15541_v34 = vadd.f32 1.0, %v11175_v55  ;;  %v6939_v60 = vpop.f32.mrf.mxu2 }
 0xb82   :  { %v8068_v10 = vmul.f32 %v11177_v36, %v15527_v15  ;;  %11178 = vpow2.f32 %v10481_v30  ;;  %v7028_v38 = vpop.f32.mrf.mxu3  ;;  %v8060_v44 = vsel %vm8059_vm14, %v11173_v11, %v8056_v28  ;;  %v6940_v42 = vadd.f32 %v6939_v60, %v6851_v8  ;;  %v15572_v30 = vpop.f32.mrf.mxu0 }
 0xb83   :  { %11180 = vrcp.f32 %v15541_v34  ;;  %v8065_v6 = vsel %vm8062_vm15, %v8064_v0, %v8060_v44  ;;  %vm8073_vm1 = vweird.f32 %v11177_v36  ;;  %v8093_v56 = vand.u32 2147483648, %v15541_v34 }
 0xb84   :  { %v8069_v7 = vsub.f32 1.0, %v8068_v10  ;;  %8396 = vst [vmem:[%s15730_s18 + $0x160] sm:$0xff] %v8065_v6  ;;  %v7029_v16 = vadd.f32 %v7028_v38, %v6940_v42  ;;  %vm8074_vm3 = vmor %vm8072_vm2, %vm8073_vm1  ;;  %v8091_v57 = vand.u32 2147483647, %v15541_v34  ;;  %vm8087_vm6 = vweird.f32 %v15541_v34 }
 0xb86   :  { %v8070_v40 = vmul.f32 %v11177_v36, %v8069_v7  ;;  %v7120_v9 = vadd.f32 %v15401_v54, %v7029_v16  ;;  %vm8092_vm0 = vcmp.eq.f32.partialorder %v8091_v57, 8.507059e+37  ;;  %v15580_v50 = vpop.f32.mrf.mxu1 }
 0xb88   :  { %v11179_v48 = vpop.eup %11178  ;;  %v8071_v32 = vadd.f32 %v11177_v36, %v8070_v40  ;;  %v10482_v49 = vmul.f32 -1.442695, %v7120_v9  ;;  %v6858_v40 = vadd.f32 %v15532_v63, %v6769_v46 }
 0xb89   :  { %v11181_v14 = vpop.eup %11180  ;;  %v7375_v39 = vadd.f32 1.0, %v11179_v48  ;;  %v6941_v22 = vpop.f32.mrf.mxu2 }
 0xb8a   :  { %v8075_v11 = vsel %vm8074_vm3, %v11177_v36, %v8071_v32  ;;  %v8083_v12 = vmul.f32 %v11181_v14, %v15541_v34  ;;  %v7030_v61 = vpop.f32.mrf.mxu3  ;;  %v6942_v59 = vadd.f32 %v6941_v22, %v6853_v29  ;;  %vm8088_vm5 = vweird.f32 %v11181_v14  ;;  %v15583_v22 = vpop.f32.mrf.mxu0 }
 0xb8b   :  { %v8080_v2 = vsel %vm8077_vm4, %v8079_v53, %v8075_v11  ;;  %11182 = vrcp.f32 %v7375_v39  ;;  %vm8089_vm7 = vmor %vm8087_vm6, %vm8088_vm5  ;;  %v8094_v36 = vor.u32 1.1754944e-38, %v8093_v56  ;;  %v8108_v7 = vand.u32 2147483648, %v7375_v39 }
 0xb8c   :  { %8397 = vst [vmem:[%s15730_s18 + $0x168] sm:$0xff] %v8080_v2  ;;  %v8084_v15 = vsub.f32 1.0, %v8083_v12  ;;  %11184 = vpow2.f32 %v10482_v49  ;;  %v7031_v25 = vadd.f32 %v7030_v61, %v6942_v59  ;;  %v8106_v6 = vand.u32 2147483647, %v7375_v39 }
 0xb8d   :  { %vm8102_vm9 = vweird.f32 %v7375_v39  ;;  %v8109_v48 = vor.u32 1.1754944e-38, %v8108_v7  ;;  %v6772_v49 = vadd.f32 %v15545_v62, %v15222_v13 }
 0xb8e   :  { %v8085_v18 = vmul.f32 %v11181_v14, %v8084_v15  ;;  %v7121_v55 = vadd.f32 %v15401_v54, %v7031_v25  ;;  %vm8107_vm11 = vcmp.eq.f32.partialorder %v8106_v6, 8.507059e+37 }
 0xb8f   :  { %v6861_v15 = vadd.f32 %v15554_v35, %v6772_v49 }
 0xb90   :  { %v8086_v3 = vadd.f32 %v11181_v14, %v8085_v18  ;;  %v10483_v38 = vmul.f32 -1.442695, %v7121_v55 }
 0xb91   :  { %v11183_v33 = vpop.eup %11182  ;;  %v6944_v8 = vpop.f32.mrf.mxu2 }
 0xb92   :  { %v11185_v60 = vpop.eup %11184  ;;  %v8090_v28 = vsel %vm8089_vm7, %v11181_v14, %v8086_v3  ;;  %v8098_v10 = vmul.f32 %v11183_v33, %v7375_v39  ;;  %v7033_v0 = vpop.f32.mrf.mxu3  ;;  %v6945_v44 = vadd.f32 %v6944_v8, %v6856_v26  ;;  %11186 = vpow2.f32 %v10483_v38 }
 0xb93   :  { %v8095_v41 = vsel %vm8092_vm0, %v8094_v36, %v8090_v28  ;;  %v7376_v24 = vadd.f32 1.0, %v11185_v60  ;;  %vm8103_vm8 = vweird.f32 %v11183_v33  ;;  %v15592_v3 = vpop.f32.mrf.mxu1  ;;  %v6774_v28 = vadd.f32 %v15564_v31, %v15236_v17 }
 0xb94   :  { %8398 = vst [vmem:[%s15730_s18 + $0x170] sm:$0xff] %v8095_v41  ;;  %v8099_v34 = vsub.f32 1.0, %v8098_v10  ;;  %v7034_v51 = vadd.f32 %v7033_v0, %v6945_v44  ;;  %vm8104_vm10 = vmor %vm8102_vm9, %vm8103_vm8  ;;  %v15596_v10 = vpop.f32.mrf.mxu0 }
 0xb95   :  { %11188 = vrcp.f32 %v7376_v24  ;;  %v8123_v59 = vand.u32 2147483648, %v7376_v24  ;;  %v8121_v18 = vand.u32 2147483647, %v7376_v24  ;;  %vm8117_vm13 = vweird.f32 %v7376_v24 }
 0xb96   :  { %v8100_v42 = vmul.f32 %v11183_v33, %v8099_v34  ;;  %v7122_v1 = vadd.f32 %v15401_v54, %v7034_v51 }
 0xb97   :  { %v8124_v26 = vor.u32 1.1754944e-38, %v8123_v59  ;;  %vm8122_vm15 = vcmp.eq.f32.partialorder %v8121_v18, 8.507059e+37 }
 0xb98   :  { %v8101_v16 = vadd.f32 %v11183_v33, %v8100_v42  ;;  %v11187_v9 = vpop.eup %11186  ;;  %v10484_v52 = vmul.f32 -1.442695, %v7122_v1 }
 0xb99   :  { %v6946_v32 = vpop.f32.mrf.mxu2  ;;  %v7377_v63 = vadd.f32 1.0, %v11187_v9 }
 0xb9a   :  { %v8105_v14 = vsel %vm8104_vm10, %v11183_v33, %v8101_v16  ;;  %v6947_v5 = vadd.f32 %v6946_v32, %v6858_v40  ;;  %v7035_v29 = vpop.f32.mrf.mxu3  ;;  %11190 = vpow2.f32 %v10484_v52 }
 0xb9b   :  { %v11189_v53 = vpop.eup %11188  ;;  %v8110_v11 = vsel %vm8107_vm11, %v8109_v48, %v8105_v14  ;;  %11192 = vrcp.f32 %v7377_v63  ;;  %v8138_v44 = vand.u32 2147483648, %v7377_v63  ;;  %v8136_v7 = vand.u32 2147483647, %v7377_v63 }
 0xb9c   :  { %8399 = vst [vmem:[%s15730_s18 + $0x178] sm:$0xff] %v8110_v11  ;;  %v8113_v39 = vmul.f32 %v11189_v53, %v7376_v24  ;;  %v7036_v12 = vadd.f32 %v7035_v29, %v6947_v5  ;;  %vm8118_vm12 = vweird.f32 %v11189_v53  ;;  %v6863_v24 = vadd.f32 %v15572_v30, %v6774_v28  ;;  %v15606_v30 = vpop.f32.mrf.mxu1 }
 0xb9d   :  { %vm8119_vm14 = vmor %vm8117_vm13, %vm8118_vm12  ;;  %vm8132_vm2 = vweird.f32 %v7377_v63  ;;  %v8139_v1 = vor.u32 1.1754944e-38, %v8138_v44  ;;  %vm8137_vm4 = vcmp.eq.f32.partialorder %v8136_v7, 8.507059e+37  ;;  %v6777_v29 = vadd.f32 %v15580_v50, %v15254_v4 }
 0xb9e   :  { %v8114_v61 = vsub.f32 1.0, %v8113_v39  ;;  %v7123_v2 = vadd.f32 %v15401_v54, %v7036_v12 }
 0xba0   :  { %v8115_v56 = vmul.f32 %v11189_v53, %v8114_v61  ;;  %v10485_v57 = vmul.f32 -1.442695, %v7123_v2  ;;  %v11191_v23 = vpop.eup %11190  ;;  %v6866_v2 = vadd.f32 %v15583_v22, %v6777_v29 }
 0xba1   :  { %v6949_v25 = vpop.f32.mrf.mxu2  ;;  %v11193_v62 = vpop.eup %11192  ;;  %v7378_v36 = vadd.f32 1.0, %v11191_v23 }
 0xba2   :  { %v8116_v55 = vadd.f32 %v11189_v53, %v8115_v56  ;;  %11194 = vpow2.f32 %v10485_v57  ;;  %v6950_v33 = vadd.f32 %v6949_v25, %v6861_v15  ;;  %v7038_v13 = vpop.f32.mrf.mxu3  ;;  %v8128_v35 = vmul.f32 %v11193_v62, %v7377_v63 }
 0xba3   :  { %11196 = vrcp.f32 %v7378_v36  ;;  %vm8133_vm1 = vweird.f32 %v11193_v62  ;;  %v8153_v11 = vand.u32 2147483648, %v7378_v36  ;;  %v8151_v12 = vand.u32 2147483647, %v7378_v36 }
 0xba4   :  { %v8120_v8 = vsel %vm8119_vm14, %v11189_v53, %v8116_v55  ;;  %v7039_v60 = vadd.f32 %v7038_v13, %v6950_v33  ;;  %v8129_v0 = vsub.f32 1.0, %v8128_v35  ;;  %vm8134_vm3 = vmor %vm8132_vm2, %vm8133_vm1  ;;  %v15614_v53 = vpop.f32.mrf.mxu0  ;;  %vm8147_vm6 = vweird.f32 %v7378_v36  ;;  %v6783_v33 = vpop.f32.mrf.mxu1 }
 0xba5   :  { %v8125_v38 = vsel %vm8122_vm15, %v8124_v26, %v8120_v8  ;;  %v8154_v50 = vor.u32 1.1754944e-38, %v8153_v11  ;;  %vm8152_vm0 = vcmp.eq.f32.partialorder %v8151_v12, 8.507059e+37 }
 0xba6   :  { %8400 = vst [vmem:[%s15730_s18 + $0x180] sm:$0xff] %v8125_v38  ;;  %v7124_v41 = vadd.f32 %v15401_v54, %v7039_v60  ;;  %v8130_v46 = vmul.f32 %v11193_v62, %v8129_v0 }
 0xba8   :  { %v11195_v34 = vpop.eup %11194  ;;  %v10486_v42 = vmul.f32 -1.442695, %v7124_v41  ;;  %v8131_v6 = vadd.f32 %v11193_v62, %v8130_v46 }
 0xba9   :  { %v15603_v17 = vadd.f32 1.0, %v11195_v34  ;;  %v6951_v31 = vpop.f32.mrf.mxu2  ;;  %v11197_v16 = vpop.eup %11196 }
 0xbaa   :  { %11198 = vpow2.f32 %v10486_v42  ;;  %v6952_v51 = vadd.f32 %v6951_v31, %v6863_v24  ;;  %v7040_v40 = vpop.f32.mrf.mxu3  ;;  %v8135_v48 = vsel %vm8134_vm3, %v11193_v62, %v8131_v6  ;;  %v8143_v32 = vmul.f32 %v11197_v16, %v7378_v36 }
 0xbab   :  { %11200 = vrcp.f32 %v15603_v17  ;;  %v8140_v14 = vsel %vm8137_vm4, %v8139_v1, %v8135_v48  ;;  %vm8148_vm5 = vweird.f32 %v11197_v16  ;;  %v8168_v22 = vand.u32 2147483648, %v15603_v17  ;;  %v15643_v1 = vld [vmem:[%s15729_s17] ss:$0 sm:$0xff] }
 0xbac   :  { %v7041_v9 = vadd.f32 %v7040_v40, %v6952_v51  ;;  %8401 = vst [vmem:[%s15730_s18 + $0x188] sm:$0xff] %v8140_v14  ;;  %v8144_v52 = vsub.f32 1.0, %v8143_v32  ;;  %vm8149_vm7 = vmor %vm8147_vm6, %vm8148_vm5  ;;  %v8166_v62 = vand.u32 2147483647, %v15603_v17  ;;  %v6779_v36 = vadd.f32 %v15592_v3, %v15264_v37  ;;  %v6872_v0 = vpop.f32.mrf.mxu0  ;;  %v6786_v40 = vpop.f32.mrf.mxu1 }
 0xbad   :  { %vm8162_vm9 = vweird.f32 %v15603_v17  ;;  %v8169_v41 = vor.u32 1.1754944e-38, %v8168_v22  ;;  %v6782_v51 = vadd.f32 %v15606_v30, %v15276_v47 }
 0xbae   :  { %v7125_v5 = vadd.f32 %v15401_v54, %v7041_v9  ;;  %v8145_v39 = vmul.f32 %v11197_v16, %v8144_v52  ;;  %v6868_v38 = vadd.f32 %v15596_v10, %v6779_v36  ;;  %vm8167_vm11 = vcmp.eq.f32.partialorder %v8166_v62, 8.507059e+37 }
 0xbaf   :  { %v6871_v9 = vadd.f32 %v15614_v53, %v6782_v51  ;;  %v6784_v53 = vadd.f32 %v6783_v33, %v15283_v27 }
 0xbb0   :  { %v11199_v63 = vpop.eup %11198  ;;  %v10487_v49 = vmul.f32 -1.442695, %v7125_v5  ;;  %v8146_v56 = vadd.f32 %v11197_v16, %v8145_v39 }
 0xbb1   :  { %v11201_v61 = vpop.eup %11200  ;;  %v15617_v15 = vadd.f32 1.0, %v11199_v63  ;;  %v6954_v59 = vpop.f32.mrf.mxu2 }
 0xbb2   :  { %v8158_v18 = vmul.f32 %v11201_v61, %v15603_v17  ;;  %11202 = vpow2.f32 %v10487_v49  ;;  %v7043_v4 = vpop.f32.mrf.mxu3  ;;  %v8150_v57 = vsel %vm8149_vm7, %v11197_v16, %v8146_v56  ;;  %v6955_v23 = vadd.f32 %v6954_v59, %v6866_v2 }
 0xbb3   :  { %11204 = vrcp.f32 %v15617_v15  ;;  %v8155_v55 = vsel %vm8152_vm0, %v8154_v50, %v8150_v57  ;;  %vm8163_vm8 = vweird.f32 %v11201_v61  ;;  %v8183_v42 = vand.u32 2147483648, %v15617_v15 }
 0xbb4   :  { %v8159_v25 = vsub.f32 1.0, %v8158_v18  ;;  %8402 = vst [vmem:[%s15730_s18 + $0x190] sm:$0xff] %v8155_v55  ;;  %v7044_v26 = vadd.f32 %v7043_v4, %v6955_v23  ;;  %vm8164_vm10 = vmor %vm8162_vm9, %vm8163_vm8  ;;  %v8181_v31 = vand.u32 2147483647, %v15617_v15  ;;  %vm8177_vm13 = vweird.f32 %v15617_v15  ;;  %v6875_v63 = vpop.f32.mrf.mxu0  ;;  %v6788_v55 = vpop.f32.mrf.mxu1 }
 0xbb5   :  { %v8184_v14 = vor.u32 1.1754944e-38, %v8183_v42  ;;  %v6873_v18 = vadd.f32 %v6872_v0, %v6784_v53 }
 0xbb6   :  { %v8160_v13 = vmul.f32 %v11201_v61, %v8159_v25  ;;  %v7126_v60 = vadd.f32 %v15401_v54, %v7044_v26  ;;  %vm8182_vm15 = vcmp.eq.f32.partialorder %v8181_v31, 8.507059e+37 }
 0xbb8   :  { %v11203_v8 = vpop.eup %11202  ;;  %v8161_v35 = vadd.f32 %v11201_v61, %v8160_v13  ;;  %v10488_v7 = vmul.f32 -1.442695, %v7126_v60  ;;  %v6787_v60 = vadd.f32 %v6786_v40, %v15295_v20 }
 0xbb9   :  { %v11205_v28 = vpop.eup %11204  ;;  %v7381_v24 = vadd.f32 1.0, %v11203_v8  ;;  %v6956_v44 = vpop.f32.mrf.mxu2 }
 0xbba   :  { %v8165_v34 = vsel %vm8164_vm10, %v11201_v61, %v8161_v35  ;;  %v8173_v46 = vmul.f32 %v11205_v28, %v15617_v15  ;;  %v7045_v37 = vpop.f32.mrf.mxu3  ;;  %v6957_v10 = vadd.f32 %v6956_v44, %v6868_v38  ;;  %vm8178_vm12 = vweird.f32 %v11205_v28 }
 0xbbb   :  { %v8170_v3 = vsel %vm8167_vm11, %v8169_v41, %v8165_v34  ;;  %11206 = vrcp.f32 %v7381_v24  ;;  %vm8179_vm14 = vmor %vm8177_vm13, %vm8178_vm12  ;;  %v8198_v2 = vand.u32 2147483648, %v7381_v24  ;;  %v8196_v59 = vand.u32 2147483647, %v7381_v24 }
 0xbbc   :  { %8403 = vst [vmem:[%s15730_s18 + $0x198] sm:$0xff] %v8170_v3  ;;  %v8174_v54 = vsub.f32 1.0, %v8173_v46  ;;  %11208 = vpow2.f32 %v10488_v7  ;;  %v7046_v6 = vadd.f32 %v7045_v37, %v6957_v10  ;;  %vm8192_vm2 = vweird.f32 %v7381_v24  ;;  %v6791_v31 = vpop.f32.mrf.mxu1 }
 0xbbd   :  { %v8199_v57 = vor.u32 1.1754944e-38, %v8198_v2  ;;  %vm8197_vm4 = vcmp.eq.f32.partialorder %v8196_v59, 8.507059e+37  ;;  %v6876_v41 = vadd.f32 %v6875_v63, %v6787_v60 }
 0xbbe   :  { %v8175_v17 = vmul.f32 %v11205_v28, %v8174_v54  ;;  %v7127_v48 = vadd.f32 %v15643_v1, %v7046_v6 }
 0xbc0   :  { %v8176_v16 = vadd.f32 %v11205_v28, %v8175_v17  ;;  %v10489_v30 = vmul.f32 -1.442695, %v7127_v48 }
 0xbc1   :  { %v11207_v32 = vpop.eup %11206  ;;  %v6959_v52 = vpop.f32.mrf.mxu2 }
 0xbc2   :  { %v11209_v5 = vpop.eup %11208  ;;  %v8180_v29 = vsel %vm8179_vm14, %v11205_v28, %v8176_v16  ;;  %v8188_v47 = vmul.f32 %v11207_v32, %v7381_v24  ;;  %v7048_v11 = vpop.f32.mrf.mxu3  ;;  %v6960_v49 = vadd.f32 %v6959_v52, %v6871_v9  ;;  %11210 = vpow2.f32 %v10489_v30 }
 0xbc3   :  { %v8185_v39 = vsel %vm8182_vm15, %v8184_v14, %v8180_v29  ;;  %v7382_v12 = vadd.f32 1.0, %v11209_v5  ;;  %vm8193_vm1 = vweird.f32 %v11207_v32  ;;  %v6877_v28 = vpop.f32.mrf.mxu0  ;;  %v6789_v16 = vadd.f32 %v6788_v55, %v15302_v45 }
 0xbc4   :  { %8404 = vst [vmem:[%s15730_s18 + $0x1a0] sm:$0xff] %v8185_v39  ;;  %v8189_v61 = vsub.f32 1.0, %v8188_v47  ;;  %v7049_v56 = vadd.f32 %v7048_v11, %v6960_v49  ;;  %vm8194_vm3 = vmor %vm8192_vm2, %vm8193_vm1 }
 0xbc5   :  { %11212 = vrcp.f32 %v7382_v12  ;;  %v8213_v24 = vand.u32 2147483648, %v7382_v12  ;;  %v8211_v34 = vand.u32 2147483647, %v7382_v12  ;;  %vm8207_vm6 = vweird.f32 %v7382_v12 }
 0xbc6   :  { %v8190_v15 = vmul.f32 %v11207_v32, %v8189_v61  ;;  %v7128_v50 = vadd.f32 %v15643_v1, %v7049_v56  ;;  %v6878_v14 = vadd.f32 %v6877_v28, %v6789_v16 }
 0xbc7   :  { %v8214_v20 = vor.u32 1.1754944e-38, %v8213_v24  ;;  %vm8212_vm0 = vcmp.eq.f32.partialorder %v8211_v34, 8.507059e+37 }
 0xbc8   :  { %v8191_v4 = vadd.f32 %v11207_v32, %v8190_v15  ;;  %v11211_v23 = vpop.eup %11210  ;;  %v10490_v13 = vmul.f32 -1.442695, %v7128_v50 }
 0xbc9   :  { %v6961_v25 = vpop.f32.mrf.mxu2  ;;  %v7383_v36 = vadd.f32 1.0, %v11211_v23 }
 0xbca   :  { %v8195_v22 = vsel %vm8194_vm3, %v11207_v32, %v8191_v4  ;;  %v6962_v27 = vadd.f32 %v6961_v25, %v6873_v18  ;;  %v7050_v33 = vpop.f32.mrf.mxu3  ;;  %11214 = vpow2.f32 %v10490_v13  ;;  %v6793_v18 = vpop.f32.mrf.mxu1 }
 0xbcb   :  { %v11213_v62 = vpop.eup %11212  ;;  %v8200_v26 = vsel %vm8197_vm4, %v8199_v57, %v8195_v22  ;;  %11216 = vrcp.f32 %v7383_v36  ;;  %v6880_v52 = vpop.f32.mrf.mxu0  ;;  %v8228_v5 = vand.u32 2147483648, %v7383_v36  ;;  %v8226_v30 = vand.u32 2147483647, %v7383_v36 }
 0xbcc   :  { %8405 = vst [vmem:[%s15730_s18 + $0x1a8] sm:$0xff] %v8200_v26  ;;  %v8203_v8 = vmul.f32 %v11213_v62, %v7382_v12  ;;  %v7051_v35 = vadd.f32 %v7050_v33, %v6962_v27  ;;  %vm8208_vm5 = vweird.f32 %v11213_v62  ;;  %vm8222_vm9 = vweird.f32 %v7383_v36 }
 0xbcd   :  { %vm8209_vm7 = vmor %vm8207_vm6, %vm8208_vm5  ;;  %v8229_v53 = vor.u32 1.1754944e-38, %v8228_v5  ;;  %vm8227_vm11 = vcmp.eq.f32.partialorder %v8226_v30, 8.507059e+37  ;;  %v6792_v57 = vadd.f32 %v6791_v31, %v15313_v19 }
 0xbce   :  { %v8204_v38 = vsub.f32 1.0, %v8203_v8  ;;  %v7129_v0 = vadd.f32 %v15643_v1, %v7051_v35 }
 0xbcf   :  { %v6881_v33 = vadd.f32 %v6880_v52, %v6792_v57 }
 0xbd0   :  { %v8205_v44 = vmul.f32 %v11213_v62, %v8204_v38  ;;  %v10491_v46 = vmul.f32 -1.442695, %v7129_v0  ;;  %v11215_v37 = vpop.eup %11214 }
 0xbd1   :  { %v6964_v7 = vpop.f32.mrf.mxu2  ;;  %v11217_v42 = vpop.eup %11216  ;;  %v7384_v17 = vadd.f32 1.0, %v11215_v37 }
 0xbd2   :  { %v8206_v3 = vadd.f32 %v11213_v62, %v8205_v44  ;;  %11218 = vpow2.f32 %v10491_v46  ;;  %v6965_v54 = vadd.f32 %v6964_v7, %v6876_v41  ;;  %v7053_v10 = vpop.f32.mrf.mxu3  ;;  %v8218_v51 = vmul.f32 %v11217_v42, %v7383_v36 }
 0xbd3   :  { %11220 = vrcp.f32 %v7384_v17  ;;  %vm8223_vm8 = vweird.f32 %v11217_v42  ;;  %v8243_v25 = vand.u32 2147483648, %v7384_v17  ;;  %v8241_v22 = vand.u32 2147483647, %v7384_v17 }
 0xbd4   :  { %v8210_v6 = vsel %vm8209_vm7, %v11213_v62, %v8206_v3  ;;  %v7054_v40 = vadd.f32 %v7053_v10, %v6965_v54  ;;  %v8219_v32 = vsub.f32 1.0, %v8218_v51  ;;  %vm8224_vm10 = vmor %vm8222_vm9, %vm8223_vm8  ;;  %v6882_v62 = vpop.f32.mrf.mxu0  ;;  %vm8237_vm13 = vweird.f32 %v7384_v17  ;;  %v6796_v3 = vpop.f32.mrf.mxu1 }
 0xbd5   :  { %v8215_v48 = vsel %vm8212_vm0, %v8214_v20, %v8210_v6  ;;  %v8244_v19 = vor.u32 1.1754944e-38, %v8243_v25  ;;  %vm8242_vm15 = vcmp.eq.f32.partialorder %v8241_v22, 8.507059e+37  ;;  %v6794_v7 = vadd.f32 %v6793_v18, %v15320_v58 }
 0xbd6   :  { %8406 = vst [vmem:[%s15730_s18 + $0x1b0] sm:$0xff] %v8215_v48  ;;  %v7130_v9 = vadd.f32 %v15643_v1, %v7054_v40  ;;  %v8220_v47 = vmul.f32 %v11217_v42, %v8219_v32  ;;  %v6797_v30 = vadd.f32 %v6796_v3, %v15331_v21 }
 0xbd7   :  { %v6883_v20 = vadd.f32 %v6882_v62, %v6794_v7 }
 0xbd8   :  { %v11219_v29 = vpop.eup %11218  ;;  %v10492_v11 = vmul.f32 -1.442695, %v7130_v9  ;;  %v8221_v39 = vadd.f32 %v11217_v42, %v8220_v47 }
 0xbd9   :  { %v15662_v63 = vadd.f32 1.0, %v11219_v29  ;;  %v6966_v45 = vpop.f32.mrf.mxu2  ;;  %v11221_v61 = vpop.eup %11220 }
 0xbda   :  { %11222 = vpow2.f32 %v10492_v11  ;;  %v6967_v12 = vadd.f32 %v6966_v45, %v6878_v14  ;;  %v7055_v49 = vpop.f32.mrf.mxu3  ;;  %v8225_v2 = vsel %vm8224_vm10, %v11217_v42, %v8221_v39  ;;  %v8233_v15 = vmul.f32 %v11221_v61, %v7384_v17 }
 0xbdb   :  { %11224 = vrcp.f32 %v15662_v63  ;;  %v8230_v56 = vsel %vm8227_vm11, %v8229_v53, %v8225_v2  ;;  %vm8238_vm12 = vweird.f32 %v11221_v61  ;;  %v8258_v24 = vand.u32 2147483648, %v15662_v63 }
 0xbdc   :  { %v7056_v59 = vadd.f32 %v7055_v49, %v6967_v12  ;;  %8407 = vst [vmem:[%s15730_s18 + $0x1b8] sm:$0xff] %v8230_v56  ;;  %v8234_v4 = vsub.f32 1.0, %v8233_v15  ;;  %vm8239_vm14 = vmor %vm8237_vm13, %vm8238_vm12  ;;  %v8256_v34 = vand.u32 2147483647, %v15662_v63  ;;  %vm8252_vm2 = vweird.f32 %v15662_v63  ;;  %v6885_v58 = vpop.f32.mrf.mxu0  ;;  %v6798_v53 = vpop.f32.mrf.mxu1 }
 0xbdd   :  { %v8259_v17 = vor.u32 1.1754944e-38, %v8258_v24  ;;  %v6886_v39 = vadd.f32 %v6885_v58, %v6797_v30  ;;  %v6799_v57 = vadd.f32 %v6798_v53, %v15338_v43 }
 0xbde   :  { %v7131_v50 = vadd.f32 %v15643_v1, %v7056_v59  ;;  %v8235_v55 = vmul.f32 %v11221_v61, %v8234_v4  ;;  %vm8257_vm4 = vcmp.eq.f32.partialorder %v8256_v34, 8.507059e+37 }
 0xbe0   :  { %v11223_v23 = vpop.eup %11222  ;;  %v10493_v13 = vmul.f32 -1.442695, %v7131_v50  ;;  %v8236_v8 = vadd.f32 %v11221_v61, %v8235_v55 }
 0xbe1   :  { %v11225_v27 = vpop.eup %11224  ;;  %v15670_v26 = vadd.f32 1.0, %v11223_v23  ;;  %v6969_v36 = vpop.f32.mrf.mxu2 }
 0xbe2   :  { %v8248_v35 = vmul.f32 %v11225_v27, %v15662_v63  ;;  %11226 = vpow2.f32 %v10493_v13  ;;  %v7058_v60 = vpop.f32.mrf.mxu3  ;;  %v8240_v28 = vsel %vm8239_vm14, %v11221_v61, %v8236_v8  ;;  %v6970_v0 = vadd.f32 %v6969_v36, %v6881_v33 }
 0xbe3   :  { %11228 = vrcp.f32 %v15670_v26  ;;  %v8245_v41 = vsel %vm8242_vm15, %v8244_v19, %v8240_v28  ;;  %vm8253_vm1 = vweird.f32 %v11225_v27  ;;  %v8273_v52 = vand.u32 2147483648, %v15670_v26 }
 0xbe4   :  { %v8249_v38 = vsub.f32 1.0, %v8248_v35  ;;  %8408 = vst [vmem:[%s15730_s18 + $0x1c0] sm:$0xff] %v8245_v41  ;;  %v7059_v46 = vadd.f32 %v7058_v60, %v6970_v0  ;;  %vm8254_vm3 = vmor %vm8252_vm2, %vm8253_vm1  ;;  %v8271_v29 = vand.u32 2147483647, %v15670_v26  ;;  %vm8267_vm6 = vweird.f32 %v15670_v26  ;;  %v6887_v25 = vpop.f32.mrf.mxu0 }
 0xbe5   :  { %v8274_v12 = vor.u32 1.1754944e-38, %v8273_v52 }
 0xbe6   :  { %v8250_v44 = vmul.f32 %v11225_v27, %v8249_v38  ;;  %v7132_v10 = vadd.f32 %v15643_v1, %v7059_v46  ;;  %vm8272_vm0 = vcmp.eq.f32.partialorder %v8271_v29, 8.507059e+37 }
 0xbe8   :  { %v11227_v37 = vpop.eup %11226  ;;  %v8251_v54 = vadd.f32 %v11225_v27, %v8250_v44  ;;  %v10494_v16 = vmul.f32 -1.442695, %v7132_v10 }
 0xbe9   :  { %v11229_v42 = vpop.eup %11228  ;;  %v7387_v31 = vadd.f32 1.0, %v11227_v37  ;;  %v6971_v6 = vpop.f32.mrf.mxu2 }
 0xbea   :  { %v8255_v51 = vsel %vm8254_vm3, %v11225_v27, %v8251_v54  ;;  %v8263_v40 = vmul.f32 %v11229_v42, %v15670_v26  ;;  %v7060_v48 = vpop.f32.mrf.mxu3  ;;  %v6972_v14 = vadd.f32 %v6971_v6, %v6883_v20  ;;  %vm8268_vm5 = vweird.f32 %v11229_v42 }
 0xbeb   :  { %v8260_v32 = vsel %vm8257_vm4, %v8259_v17, %v8255_v51  ;;  %11230 = vrcp.f32 %v7387_v31  ;;  %vm8269_vm7 = vmor %vm8267_vm6, %vm8268_vm5  ;;  %v8288_v23 = vand.u32 2147483648, %v7387_v31  ;;  %v8286_v22 = vand.u32 2147483647, %v7387_v31 }
 0xbec   :  { %8409 = vst [vmem:[%s15730_s18 + $0x1c8] sm:$0xff] %v8260_v32  ;;  %v8264_v9 = vsub.f32 1.0, %v8263_v40  ;;  %11232 = vpow2.f32 %v10494_v16  ;;  %v7061_v47 = vadd.f32 %v7060_v48, %v6972_v14  ;;  %v6888_v27 = vadd.f32 %v6887_v25, %v6799_v57 }
 0xbed   :  { %vm8282_vm9 = vweird.f32 %v7387_v31  ;;  %v8289_v26 = vor.u32 1.1754944e-38, %v8288_v23  ;;  %vm8287_vm11 = vcmp.eq.f32.partialorder %v8286_v22, 8.507059e+37 }
 0xbee   :  { %v8265_v5 = vmul.f32 %v11229_v42, %v8264_v9  ;;  %v7133_v63 = vadd.f32 %v15643_v1, %v7061_v47 }
 0xbf0   :  { %v8266_v11 = vadd.f32 %v11229_v42, %v8265_v5  ;;  %v10495_v59 = vmul.f32 -1.442695, %v7133_v63 }
 0xbf1   :  { %v11231_v45 = vpop.eup %11230  ;;  %v6974_v49 = vpop.f32.mrf.mxu2 }
 0xbf2   :  { %v11233_v61 = vpop.eup %11232  ;;  %v8270_v2 = vsel %vm8269_vm7, %v11229_v42, %v8266_v11  ;;  %v8278_v15 = vmul.f32 %v11231_v45, %v7387_v31  ;;  %v7063_v56 = vpop.f32.mrf.mxu3  ;;  %v6975_v21 = vadd.f32 %v6974_v49, %v6886_v39  ;;  %11234 = vpow2.f32 %v10495_v59 }
 0xbf3   :  { %v8275_v18 = vsel %vm8272_vm0, %v8274_v12, %v8270_v2  ;;  %v7388_v4 = vadd.f32 1.0, %v11233_v61  ;;  %vm8283_vm8 = vweird.f32 %v11231_v45 }
 0xbf4   :  { %8410 = vst [vmem:[%s15730_s18 + $0x1d0] sm:$0xff] %v8275_v18  ;;  %v8279_v50 = vsub.f32 1.0, %v8278_v15  ;;  %v7064_v13 = vadd.f32 %v7063_v56, %v6975_v21  ;;  %vm8284_vm10 = vmor %vm8282_vm9, %vm8283_vm8 }
 0xbf5   :  { %11236 = vrcp.f32 %v7388_v4  ;;  %v8303_v46 = vand.u32 2147483648, %v7388_v4  ;;  %v8301_v37 = vand.u32 2147483647, %v7388_v4  ;;  %vm8297_vm13 = vweird.f32 %v7388_v4 }
 0xbf6   :  { %v8280_v55 = vmul.f32 %v11231_v45, %v8279_v50  ;;  %v7134_v62 = vadd.f32 %v15643_v1, %v7064_v13 }
 0xbf7   :  { %v8304_v20 = vor.u32 1.1754944e-38, %v8303_v46  ;;  %vm8302_vm15 = vcmp.eq.f32.partialorder %v8301_v37, 8.507059e+37 }
 0xbf8   :  { %v8281_v33 = vadd.f32 %v11231_v45, %v8280_v55  ;;  %v11235_v8 = vpop.eup %11234  ;;  %v10496_v60 = vmul.f32 -1.442695, %v7134_v62 }
 0xbf9   :  { %v6976_v36 = vpop.f32.mrf.mxu2  ;;  %v7389_v38 = vadd.f32 1.0, %v11235_v8 }
 0xbfa   :  { %v8285_v35 = vsel %vm8284_vm10, %v11231_v45, %v8281_v33  ;;  %v6977_v43 = vadd.f32 %v6976_v36, %v6888_v27  ;;  %v7065_v0 = vpop.f32.mrf.mxu3  ;;  %11238 = vpow2.f32 %v10496_v60 }
 0xbfb   :  { %v11237_v19 = vpop.eup %11236  ;;  %v8290_v28 = vsel %vm8287_vm11, %v8289_v26, %v8285_v35  ;;  %11240 = vrcp.f32 %v7389_v38  ;;  %v8318_v40 = vand.u32 2147483648, %v7389_v38  ;;  %v8316_v58 = vand.u32 2147483647, %v7389_v38 }
 0xbfc   :  { %8411 = vst [vmem:[%s15730_s18 + $0x1d8] sm:$0xff] %v8290_v28  ;;  %v8293_v41 = vmul.f32 %v11237_v19, %v7388_v4  ;;  %v7066_v24 = vadd.f32 %v7065_v0, %v6977_v43  ;;  %vm8298_vm12 = vweird.f32 %v11237_v19  ;;  %vm8312_vm2 = vweird.f32 %v7389_v38 }
 0xbfd   :  { %vm8299_vm14 = vmor %vm8297_vm13, %vm8298_vm12  ;;  %v8319_v52 = vor.u32 1.1754944e-38, %v8318_v40  ;;  %vm8317_vm4 = vcmp.eq.f32.partialorder %v8316_v58, 8.507059e+37 }
 0xbfe   :  { %v8294_v44 = vsub.f32 1.0, %v8293_v41  ;;  %v7135_v34 = vadd.f32 %v15643_v1, %v7066_v24 }
 0xc00   :  { %v8295_v7 = vmul.f32 %v11237_v19, %v8294_v44  ;;  %v10497_v3 = vmul.f32 -1.442695, %v7135_v34  ;;  %v11239_v54 = vpop.eup %11238 }
 0xc01   :  { %v11241_v42 = vpop.eup %11240  ;;  %v7390_v17 = vadd.f32 1.0, %v11239_v54 }
 0xc02   :  { %v8296_v10 = vadd.f32 %v11237_v19, %v8295_v7  ;;  %11242 = vpow2.f32 %v10497_v3  ;;  %v8308_v6 = vmul.f32 %v11241_v42, %v7389_v38  ;;  %vm8313_vm1 = vweird.f32 %v11241_v42 }
 0xc03   :  { %11244 = vrcp.f32 %v7390_v17  ;;  %vm8314_vm3 = vmor %vm8312_vm2, %vm8313_vm1  ;;  %v8333_v11 = vand.u32 2147483648, %v7390_v17  ;;  %v8331_v45 = vand.u32 2147483647, %v7390_v17  ;;  %vm8327_vm6 = vweird.f32 %v7390_v17 }
 0xc04   :  { %v8300_v31 = vsel %vm8299_vm14, %v11237_v19, %v8296_v10  ;;  %v8309_v1 = vsub.f32 1.0, %v8308_v6 }
 0xc05   :  { %v8305_v51 = vsel %vm8302_vm15, %v8304_v20, %v8300_v31  ;;  %v8334_v61 = vor.u32 1.1754944e-38, %v8333_v11  ;;  %vm8332_vm0 = vcmp.eq.f32.partialorder %v8331_v45, 8.507059e+37 }
 0xc06   :  { %8412 = vst [vmem:[%s15730_s18 + $0x1e0] sm:$0xff] %v8305_v51  ;;  %v8310_v48 = vmul.f32 %v11241_v42, %v8309_v1 }
 0xc08   :  { %v11243_v16 = vpop.eup %11242  ;;  %v8311_v9 = vadd.f32 %v11241_v42, %v8310_v48 }
 0xc09   :  { %v7391_v32 = vadd.f32 1.0, %v11243_v16  ;;  %v11245_v14 = vpop.eup %11244 }
 0xc0a   :  { %v8315_v5 = vsel %vm8314_vm3, %v11241_v42, %v8311_v9  ;;  %v8323_v29 = vmul.f32 %v11245_v14, %v7390_v17  ;;  %vm8328_vm5 = vweird.f32 %v11245_v14 }
 0xc0b   :  { %11246 = vrcp.f32 %v7391_v32  ;;  %v8320_v47 = vsel %vm8317_vm4, %v8319_v52, %v8315_v5  ;;  %vm8329_vm7 = vmor %vm8327_vm6, %vm8328_vm5  ;;  %v8348_v59 = vand.u32 2147483648, %v7391_v32  ;;  %v8346_v18 = vand.u32 2147483647, %v7391_v32 }
 0xc0c   :  { %8413 = vst [vmem:[%s15730_s18 + $0x1e8] sm:$0xff] %v8320_v47  ;;  %v8324_v30 = vsub.f32 1.0, %v8323_v29  ;;  %vm8342_vm9 = vweird.f32 %v7391_v32 }
 0xc0d   :  { %v8349_v21 = vor.u32 1.1754944e-38, %v8348_v59  ;;  %vm8347_vm11 = vcmp.eq.f32.partialorder %v8346_v18, 8.507059e+37 }
 0xc0e   :  { %v8325_v63 = vmul.f32 %v11245_v14, %v8324_v30 }
 0xc10   :  { %v8326_v12 = vadd.f32 %v11245_v14, %v8325_v63 }
 0xc11   :  { %v11247_v39 = vpop.eup %11246 }
 0xc12   :  { %v8338_v49 = vmul.f32 %v11247_v39, %v7391_v32  ;;  %v8330_v53 = vsel %vm8329_vm7, %v11245_v14, %v8326_v12  ;;  %vm8343_vm8 = vweird.f32 %v11247_v39 }
 0xc13   :  { %v8335_v15 = vsel %vm8332_vm0, %v8334_v61, %v8330_v53  ;;  %vm8344_vm10 = vmor %vm8342_vm9, %vm8343_vm8 }
 0xc14   :  { %v8339_v2 = vsub.f32 1.0, %v8338_v49  ;;  %8414 = vst [vmem:[%s15730_s18 + $0x1f0] sm:$0xff] %v8335_v15 }
 0xc16   :  { %v8340_v56 = vmul.f32 %v11247_v39, %v8339_v2 }
 0xc18   :  { %v8341_v4 = vadd.f32 %v11247_v39, %v8340_v56 }
 0xc1a   :  { %v8345_v50 = vsel %vm8344_vm10, %v11247_v39, %v8341_v4 }
 0xc1b   :  { %v8350_v57 = vsel %vm8347_vm11, %v8349_v21, %v8345_v50 }
 0xc1c   :  { %8415 = vst [vmem:[%s15730_s18 + $0x1f8] sm:$0xff] %v8350_v57 }

</bundles_post_ra>
